<compile_context>
chip_gen: v7x
topology: tpu7x:2x2x1
jax: 0.10.0
libtpu: 0.0.40
codegen_flags: <defaults>
</compile_context>

<pallas_src>
import functools

import jax
import jax.numpy as jnp
import numpy as np
from jax.experimental import pallas as pl
from jax.experimental.pallas import tpu as pltpu

# ----------------------------------------------------------------------------
# Config (small synthetic sizes)
# ----------------------------------------------------------------------------
CFG = dict(
    num_channels=1,        # image channels C
    hidden=32,             # hidden_channels
    out_hidden=32,         # out_hidden_channels
    R=4,                   # color_range
    n_layers=2,            # number of hidden gated blocks
    E=16,                  # embedding_dim
)


def _round_up(n, m):
    return ((n + m - 1) // m) * m


# ----------------------------------------------------------------------------
# Static mask / tap helpers (pure Python / numpy, run at prep & trace time)
# ----------------------------------------------------------------------------
def make_mask_np(kh, kw, horizontal, first_layer):
    m = np.zeros((kh, kw), np.float32)
    kc_h, kc_w = kh // 2, kw // 2
    if horizontal:
        m[:kc_h, :] = 1.0
        m[kc_h, :kc_w] = 1.0
        if not first_layer:
            m[kc_h, kc_w] = 1.0
    else:  # vertical stack
        m[:kc_h, :] = 1.0
        if not first_layer:
            m[kc_h, :] = 1.0
    return m


def _active_taps(kh, kw, horizontal, first_layer):
    """Active (dy, dx, ky, kx) taps of the masked kernel."""
    m = make_mask_np(kh, kw, horizontal, first_layer)
    taps = []
    for ky in range(kh):
        for kx in range(kw):
            if m[ky, kx] > 0:
                taps.append((ky - kh // 2, kx - kw // 2, ky, kx))
    return taps


# ----------------------------------------------------------------------------
# ONE fused kernel: first 7x7 gated block + n hidden 3x3 gated blocks + head
# ----------------------------------------------------------------------------
def _pixelcnn_kernel(slab1v_ref, slab1h_ref, cond_ref, emb_ref, gumbel_ref,
                     w1v_ref, w1h_ref, wv_hid_ref, wh_hid_ref,
                     wlink_ref, wout_ref, bias_ref, maskv_ref, maskh_ref,
                     wf1_ref, bf1_ref, wf2_ref, bf2_ref,
                     out_ref, vpad_s, hpad_s,
                     *, B, HW, W, C, R, Cimg, n_hidden, taps_v, taps_h,
                     voff, hoff):
    f32, bf16 = jnp.float32, jnp.bfloat16
    M = B * HW

    def bcast_rows(vec):                       # (B, K) -> (M, K) per-image
        K = vec.shape[-1]
        return jnp.concatenate(
            [jnp.broadcast_to(vec[b:b + 1, :], (HW, K)) for b in range(B)],
            axis=0)

    def gate(pre):                             # (M, 2C) -> (M, C)
        return jnp.tanh(pre[:, :C]) * jax.nn.sigmoid(pre[:, C:])

    def mm(a, w):                              # bf16 MXU dot, f32 accumulate
        return jnp.dot(a.astype(bf16), w, preferred_element_type=f32)

    # ---------- first layer: masked 7x7 convs as one dot over the tap slab ---
    b0 = bias_ref[0]                                          # (4, 2C)
    cb = bcast_rows(cond_ref[0])                              # (M, 2C)
    v_pre = mm(slab1v_ref[...], w1v_ref[...]) + b0[0:1, :]
    h_pre = mm(slab1h_ref[...], w1h_ref[...]) + b0[1:2, :]
    vh = mm(v_pre, wlink_ref[0]) + b0[2:3, :]
    v = gate(v_pre + cb)
    h_gate = gate(h_pre + vh + cb)
    h = mm(h_gate, wout_ref[0]) + b0[3:4, :C]        # no residual, skip unused

    # stash v / h into row-padded VMEM scratch for the hidden 3x3 convs
    vpad_s[...] = jnp.zeros_like(vpad_s)
    hpad_s[...] = jnp.zeros_like(hpad_s)
    vpad_s[voff:voff + M, :] = v
    hpad_s[hoff:hoff + M, :] = h

    skip = jnp.zeros((M, C), f32)

    # ---------- hidden gated blocks ------------------------------------------
    for l in range(n_hidden):
        last = (l == n_hidden - 1)
        bl = bias_ref[l + 1]                                  # (4, 2C)
        cb = bcast_rows(cond_ref[l + 1])                      # (M, 2C)

        # vertical stack: K-concatenated tap slab -> single fat MXU dot
        slab_v = jnp.concatenate(
            [(vpad_s[voff + dy * W + dx: voff + dy * W + dx + M, :]
              * maskv_ref[ti]).astype(bf16)
             for ti, (dy, dx) in enumerate(taps_v)], axis=-1)
        v_pre = jnp.dot(slab_v, wv_hid_ref[l],
                        preferred_element_type=f32) + bl[0:1, :]

        # horizontal stack
        slab_h = jnp.concatenate(
            [(hpad_s[hoff + dy * W + dx: hoff + dy * W + dx + M, :]
              * maskh_ref[ti]).astype(bf16)
             for ti, (dy, dx) in enumerate(taps_h)], axis=-1)
        h_pre = jnp.dot(slab_h, wh_hid_ref[l],
                        preferred_element_type=f32) + bl[1:2, :]

        # v -> h 1x1 link, consumed while v_pre is still in registers
        vh = mm(v_pre, wlink_ref[l + 1]) + bl[2:3, :]
        h_gate = gate(h_pre + vh + cb)
        skip = skip + h_gate

        if not last:   # the last block's v_gated / h_out are never consumed
            v = gate(v_pre + cb)
            h = (mm(h_gate, wout_ref[l + 1]) + bl[3:4, :C]
                 + hpad_s[hoff:hoff + M, :])                  # residual
            vpad_s[voff:voff + M, :] = v
            hpad_s[hoff:hoff + M, :] = h

    # ---------- output head: relu -> fl1 -> relu -> fl2 -> gumbel-softmax ----
    x = jnp.maximum(skip + bcast_rows(emb_ref[...]), 0.0)
    x = jnp.maximum(mm(x, wf1_ref[...]) + bf1_ref[...], 0.0)
    z = mm(x, wf2_ref[...]) + bf2_ref[...] + gumbel_ref[...]     # (M, Cimg*R)

    cols = []
    for c in range(Cimg):
        zc = z[:, c * R:(c + 1) * R]
        zc = zc - jnp.max(zc, axis=-1, keepdims=True)
        e = jnp.exp(zc)
        p = e / jnp.sum(e, axis=-1, keepdims=True)       # exact reciprocal
        vals = jax.lax.broadcasted_iota(jnp.int32, zc.shape, 1).astype(f32)
        ex = jnp.sum(p * vals, axis=-1, keepdims=True)
        cols.append(2.0 * ex / (R - 1.0) - 1.0)
    out_ref[...] = cols[0] if Cimg == 1 else jnp.concatenate(cols, axis=-1)


# ----------------------------------------------------------------------------
# One-time parameter preparation (merged-half, tap-packed, transposed weights)
# ----------------------------------------------------------------------------
def prepare_params(params, B, H, W):
    C = CFG["hidden"]
    Cimg = CFG["num_channels"]
    OH = CFG["out_hidden"]
    R = CFG["R"]
    HW = H * W
    M = B * HW

    taps_v1 = _active_taps(7, 7, horizontal=False, first_layer=True)
    taps_h1 = _active_taps(1, 7, horizontal=True, first_layer=True)
    taps_vh = _active_taps(3, 3, horizontal=False, first_layer=False)
    taps_hh = _active_taps(1, 3, horizontal=True, first_layer=False)

    def pack_conv(wfull, taps, kpad):
        # torch (2C, cin, kh, kw) -> (kpad, 2C); K blocks are tap-major
        blocks = [jnp.transpose(wfull[:, :, ky, kx]) for (_, _, ky, kx) in taps]
        wp = jnp.concatenate(blocks, axis=0)
        pad = kpad - wp.shape[0]
        if pad:
            wp = jnp.concatenate(
                [wp, jnp.zeros((pad, wp.shape[1]), wp.dtype)], axis=0)
        return wp.astype(jnp.bfloat16)

    def border_masks(taps):
        mm_ = np.zeros((len(taps), M, 1), np.float32)
        hh = np.arange(H)[:, None]
        ww = np.arange(W)[None, :]
        for i, (dy, dx, _, _) in enumerate(taps):
            ok = ((hh + dy >= 0) & (hh + dy < H) &
                  (ww + dx >= 0) & (ww + dx < W)).astype(np.float32)
            mm_[i, :, 0] = np.tile(ok.reshape(-1), B)
        return jnp.asarray(mm_)

    def bias_pack(p):
        row3 = jnp.concatenate([p["bhh"], jnp.zeros((C,), jnp.float32)])
        return jnp.stack([p["bv"], p["bh"], p["bvh"], row3]).astype(jnp.float32)

    kv1 = _round_up(len(taps_v1) * Cimg, 8)
    kh1 = _round_up(len(taps_h1) * Cimg, 8)

    first = params["first"]
    hidden = list(params["hidden"])
    layers = [first] + hidden

    return dict(
        w1v=pack_conv(first["Wv"], taps_v1, kv1),
        w1h=pack_conv(first["Wh"], taps_h1, kh1),
        wv_hid=jnp.stack([pack_conv(p["Wv"], taps_vh, len(taps_vh) * C)
                          for p in hidden]),
        wh_hid=jnp.stack([pack_conv(p["Wh"], taps_hh, len(taps_hh) * C)
                          for p in hidden]),
        wlink=jnp.stack([jnp.transpose(p["Wvh"].reshape(2 * C, 2 * C))
                         for p in layers]).astype(jnp.bfloat16),
        wout=jnp.stack([jnp.transpose(p["Whh"].reshape(C, C))
                        for p in layers]).astype(jnp.bfloat16),
        bias=jnp.stack([bias_pack(p) for p in layers]),
        maskv=border_masks(taps_vh),
        maskh=border_masks(taps_hh),
        Wc=jnp.stack([p["Wc"] for p in layers]),              # (L, E, 2C)
        bc=jnp.stack([p["bc"] for p in layers]),              # (L, 2C)
        Wp=params["Wp"], bp=params["bp"],
        wf1=jnp.transpose(params["Wf1"].reshape(OH, C)).astype(jnp.bfloat16),
        bf1=params["bf1"].reshape(1, OH).astype(jnp.float32),
        wf2=jnp.transpose(params["Wf2"].reshape(Cimg * R, OH)).astype(jnp.bfloat16),
        bf2=params["bf2"].reshape(1, Cimg * R).astype(jnp.float32))


# ----------------------------------------------------------------------------
# Full PixelCNN forward: ONE pallas_call
# ----------------------------------------------------------------------------
def pixelcnn_forward(prep, images_nchw, labels, t, noise_key):
    C = CFG["hidden"]
    Cimg = CFG["num_channels"]
    R = CFG["R"]
    n_hidden = CFG["n_layers"]
    B, _, H, W = images_nchw.shape
    HW = H * W
    M = B * HW

    taps_v1 = tuple((dy, dx) for (dy, dx, _, _) in
                    _active_taps(7, 7, horizontal=False, first_layer=True))
    taps_h1 = tuple((dy, dx) for (dy, dx, _, _) in
                    _active_taps(1, 7, horizontal=True, first_layer=True))
    taps_vh = tuple((dy, dx) for (dy, dx, _, _) in
                    _active_taps(3, 3, horizontal=False, first_layer=False))
    taps_hh = tuple((dy, dx) for (dy, dx, _, _) in
                    _active_taps(1, 3, horizontal=True, first_layer=False))

    # ---- first-layer im2col tap slabs (2-D halo pad: border zeros built in) -
    img = jnp.transpose(images_nchw, (0, 2, 3, 1)).astype(jnp.float32)
    pv = 3
    xp = jnp.pad(img, ((0, 0), (pv, pv), (pv, pv), (0, 0)))

    def tap_slab(taps, kpad):
        cols = [xp[:, pv + dy:pv + dy + H, pv + dx:pv + dx + W, :]
                .reshape(M, Cimg) for (dy, dx) in taps]
        slab = jnp.concatenate(cols, axis=-1)
        return jnp.pad(slab, ((0, 0), (0, kpad - slab.shape[1])))

    slab_v1 = tap_slab(taps_v1, _round_up(len(taps_v1) * Cimg, 8))
    slab_h1 = tap_slab(taps_h1, _round_up(len(taps_h1) * Cimg, 8))

    # ---- tiny conditioning / embedding projections (plain XLA, per-batch) ---
    cond = (labels + t).astype(jnp.float32)                       # (B, E)
    cvec = jnp.einsum('be,lef->lbf', cond, prep["Wc"]) + prep["bc"][:, None, :]
    emb = jax.nn.gelu(cond, approximate=False) @ prep["Wp"] + prep["bp"]
    gnoise = jax.random.gumbel(noise_key, (M, Cimg * R), jnp.float32)

    # ---- halo geometry for the hidden 3x3 convs ------------------------------
    def halo(taps):
        offs = [dy * W + dx for (dy, dx) in taps]
        off = _round_up(max(0, -min(offs)), 8)
        rows = _round_up(off + M + max(0, max(offs)), 8)
        return off, rows

    voff, vrows = halo(taps_vh)
    hoff, hrows = halo(taps_hh)

    kern = functools.partial(
        _pixelcnn_kernel, B=B, HW=HW, W=W, C=C, R=R, Cimg=Cimg,
        n_hidden=n_hidden, taps_v=taps_vh, taps_h=taps_hh,
        voff=voff, hoff=hoff)

    out = pl.pallas_call(
        kern,
        out_shape=jax.ShapeDtypeStruct((M, Cimg), jnp.float32),
        scratch_shapes=[pltpu.VMEM((vrows, C), jnp.float32),
                        pltpu.VMEM((hrows, C), jnp.float32)],
    )(slab_v1, slab_h1, cvec, emb, gnoise,
      prep["w1v"], prep["w1h"], prep["wv_hid"], prep["wh_hid"],
      prep["wlink"], prep["wout"], prep["bias"],
      prep["maskv"], prep["maskh"],
      prep["wf1"], prep["bf1"], prep["wf2"], prep["bf2"])

    out = out.reshape(B, H, W, Cimg)
    return jnp.transpose(out, (0, 3, 1, 2))                       # NCHW


# ----------------------------------------------------------------------------
# Deterministic parameter init (PyTorch weight layout)
# ----------------------------------------------------------------------------
def init_params(key):
    keys = iter(jax.random.split(key, 64))

    def w(shape, scale=0.1):
        return scale * jax.random.normal(next(keys), shape, jnp.float32)

    def gated_layer(cin, cout, kh, kw):
        return dict(
            Wv=w((2 * cout, cin, kh, kw)), bv=w((2 * cout,), 0.01),
            Wh=w((2 * cout, cin, 1, kw)), bh=w((2 * cout,), 0.01),
            Wvh=w((2 * cout, 2 * cout, 1, 1)), bvh=w((2 * cout,), 0.01),
            Wc=w((CFG["E"], 2 * cout)), bc=w((2 * cout,), 0.01),
            Whh=w((cout, cout, 1, 1)), bhh=w((cout,), 0.01))

    return dict(
        first=gated_layer(CFG["num_channels"], CFG["hidden"], 7, 7),
        hidden=[gated_layer(CFG["hidden"], CFG["hidden"], 3, 3)
                for _ in range(CFG["n_layers"])],
        Wp=w((CFG["E"], CFG["hidden"])), bp=w((CFG["hidden"],), 0.01),
        Wf1=w((CFG["out_hidden"], CFG["hidden"], 1, 1)),
        bf1=w((CFG["out_hidden"],), 0.01),
        Wf2=w((CFG["num_channels"] * CFG["R"], CFG["out_hidden"], 1, 1)),
        bf2=w((CFG["num_channels"] * CFG["R"],), 0.01))


if __name__ == "__main__":
    key = jax.random.PRNGKey(0)
    k_param, k_img, k_lab, k_t, k_noise = jax.random.split(key, 5)

    params = init_params(k_param)
    B, Himg, Wimg = 2, 8, 8
    prep = prepare_params(params, B, Himg, Wimg)

    images = jax.random.normal(k_img, (B, CFG["num_channels"], Himg, Wimg),
                               jnp.float32)
    labels = jax.random.normal(k_lab, (B, CFG["E"]), jnp.float32)
    t = jax.random.normal(k_t, (B, CFG["E"]), jnp.float32)

    fwd = jax.jit(pixelcnn_forward)
    out = jax.block_until_ready(fwd(prep, images, labels, t, k_noise))

    assert out.shape == (B, CFG["num_channels"], Himg, Wimg), out.shape
    assert bool(jnp.all(jnp.isfinite(out)))
    assert bool(jnp.all(out >= -1.0 - 1e-3)) and bool(jnp.all(out <= 1.0 + 1e-3))
    print("KERNEL_OK")
</pallas_src>

<mosaic_0001>
module attributes {stable_mosaic.version = 11 : i64} {
  func.func @_pixelcnn_kernel(%arg0: memref<128x24xf32, #tpu.memory_space<vmem>>, %arg1: memref<128x8xf32, #tpu.memory_space<vmem>>, %arg2: memref<3x2x64xf32, #tpu.memory_space<vmem>>, %arg3: memref<2x32xf32, #tpu.memory_space<vmem>>, %arg4: memref<128x4xf32, #tpu.memory_space<vmem>>, %arg5: memref<24x64xbf16, #tpu.memory_space<vmem>>, %arg6: memref<8x64xbf16, #tpu.memory_space<vmem>>, %arg7: memref<2x192x64xbf16, #tpu.memory_space<vmem>>, %arg8: memref<2x64x64xbf16, #tpu.memory_space<vmem>>, %arg9: memref<3x64x64xbf16, #tpu.memory_space<vmem>>, %arg10: memref<3x32x32xbf16, #tpu.memory_space<vmem>>, %arg11: memref<3x4x64xf32, #tpu.memory_space<vmem>>, %arg12: memref<6x128x1xf32, #tpu.memory_space<vmem>>, %arg13: memref<2x128x1xf32, #tpu.memory_space<vmem>>, %arg14: memref<32x32xbf16, #tpu.memory_space<vmem>>, %arg15: memref<1x32xf32, #tpu.memory_space<vmem>>, %arg16: memref<32x4xbf16, #tpu.memory_space<vmem>>, %arg17: memref<1x4xf32, #tpu.memory_space<vmem>>, %arg18: memref<128x1xf32, #tpu.memory_space<vmem>>, %arg19: memref<152x32xf32, #tpu.memory_space<vmem>>, %arg20: memref<136x32xf32, #tpu.memory_space<vmem>>) attributes {dimension_semantics = [], scalar_prefetch = 0 : i64, scratch_operands = 2 : i64, tpu.core_type = #tpu.core_type<tc>} {
    %c0 = arith.constant 0 : index
    %c0_0 = arith.constant 0 : index
    %c0_1 = arith.constant 0 : index
    %0 = vector.load %arg11[%c0, %c0_0, %c0_1] : memref<3x4x64xf32, #tpu.memory_space<vmem>>, vector<1x4x64xf32>
    %1 = vector.shape_cast %0 : vector<1x4x64xf32> to vector<4x64xf32>
    %c0_2 = arith.constant 0 : index
    %c0_3 = arith.constant 0 : index
    %c0_4 = arith.constant 0 : index
    %2 = vector.load %arg2[%c0_2, %c0_3, %c0_4] : memref<3x2x64xf32, #tpu.memory_space<vmem>>, vector<1x2x64xf32>
    %3 = vector.shape_cast %2 : vector<1x2x64xf32> to vector<2x64xf32>
    %4 = vector.extract_strided_slice %3 {offsets = [0, 0], sizes = [1, 64], strides = [1, 1]} : vector<2x64xf32> to vector<1x64xf32>
    %5 = vector.shape_cast %4 : vector<1x64xf32> to vector<1x64xf32>
    %6 = vector.broadcast %5 : vector<1x64xf32> to vector<64x64xf32>
    %7 = vector.extract_strided_slice %3 {offsets = [1, 0], sizes = [1, 64], strides = [1, 1]} : vector<2x64xf32> to vector<1x64xf32>
    %8 = vector.shape_cast %7 : vector<1x64xf32> to vector<1x64xf32>
    %9 = vector.broadcast %8 : vector<1x64xf32> to vector<64x64xf32>
    %10 = tpu.concatenate %6, %9 in 0 : vector<64x64xf32>, vector<64x64xf32> -> vector<128x64xf32>
    %c0_5 = arith.constant 0 : index
    %c0_6 = arith.constant 0 : index
    %11 = vector.load %arg0[%c0_5, %c0_6] : memref<128x24xf32, #tpu.memory_space<vmem>>, vector<128x24xf32>
    %c0_7 = arith.constant 0 : index
    %c0_8 = arith.constant 0 : index
    %12 = vector.load %arg5[%c0_7, %c0_8] : memref<24x64xbf16, #tpu.memory_space<vmem>>, vector<24x64xbf16>
    %13 = arith.truncf %11 : vector<128x24xf32> to vector<128x24xbf16>
    %cst = arith.constant dense<0.000000e+00> : vector<128x64xf32>
    %14 = tpu.matmul %13, %12, %cst {dimension_numbers = #tpu.dot_dimension_numbers<[1], [0], [0], [1], [0, 0, 1, 1], [], []>} : vector<128x24xbf16>, vector<24x64xbf16>, vector<128x64xf32> -> vector<128x64xf32>
    %15 = vector.extract_strided_slice %1 {offsets = [0, 0], sizes = [1, 64], strides = [1, 1]} : vector<4x64xf32> to vector<1x64xf32>
    %16 = vector.broadcast %15 : vector<1x64xf32> to vector<128x64xf32>
    %17 = arith.addf %14, %16 : vector<128x64xf32>
    %c0_9 = arith.constant 0 : index
    %c0_10 = arith.constant 0 : index
    %18 = vector.load %arg1[%c0_9, %c0_10] : memref<128x8xf32, #tpu.memory_space<vmem>>, vector<128x8xf32>
    %c0_11 = arith.constant 0 : index
    %c0_12 = arith.constant 0 : index
    %19 = vector.load %arg6[%c0_11, %c0_12] : memref<8x64xbf16, #tpu.memory_space<vmem>>, vector<8x64xbf16>
    %20 = arith.truncf %18 : vector<128x8xf32> to vector<128x8xbf16>
    %cst_13 = arith.constant dense<0.000000e+00> : vector<128x64xf32>
    %21 = tpu.matmul %20, %19, %cst_13 {dimension_numbers = #tpu.dot_dimension_numbers<[1], [0], [0], [1], [0, 0, 1, 1], [], []>} : vector<128x8xbf16>, vector<8x64xbf16>, vector<128x64xf32> -> vector<128x64xf32>
    %22 = vector.extract_strided_slice %1 {offsets = [1, 0], sizes = [1, 64], strides = [1, 1]} : vector<4x64xf32> to vector<1x64xf32>
    %23 = vector.broadcast %22 : vector<1x64xf32> to vector<128x64xf32>
    %24 = arith.addf %21, %23 : vector<128x64xf32>
    %c0_14 = arith.constant 0 : index
    %c0_15 = arith.constant 0 : index
    %c0_16 = arith.constant 0 : index
    %25 = vector.load %arg9[%c0_14, %c0_15, %c0_16] : memref<3x64x64xbf16, #tpu.memory_space<vmem>>, vector<1x64x64xbf16>
    %26 = vector.shape_cast %25 : vector<1x64x64xbf16> to vector<64x64xbf16>
    %27 = arith.truncf %17 : vector<128x64xf32> to vector<128x64xbf16>
    %cst_17 = arith.constant dense<0.000000e+00> : vector<128x64xf32>
    %28 = tpu.matmul %27, %26, %cst_17 {dimension_numbers = #tpu.dot_dimension_numbers<[1], [0], [0], [1], [0, 0, 1, 1], [], []>} : vector<128x64xbf16>, vector<64x64xbf16>, vector<128x64xf32> -> vector<128x64xf32>
    %29 = vector.extract_strided_slice %1 {offsets = [2, 0], sizes = [1, 64], strides = [1, 1]} : vector<4x64xf32> to vector<1x64xf32>
    %30 = vector.broadcast %29 : vector<1x64xf32> to vector<128x64xf32>
    %31 = arith.addf %28, %30 : vector<128x64xf32>
    %32 = arith.addf %17, %10 : vector<128x64xf32>
    %33 = vector.extract_strided_slice %32 {offsets = [0, 0], sizes = [128, 32], strides = [1, 1]} : vector<128x64xf32> to vector<128x32xf32>
    %34 = math.tanh %33 : vector<128x32xf32>
    %35 = vector.extract_strided_slice %32 {offsets = [0, 32], sizes = [128, 32], strides = [1, 1]} : vector<128x64xf32> to vector<128x32xf32>
    %36 = arith.negf %35 : vector<128x32xf32>
    %37 = math.exp %36 : vector<128x32xf32>
    %cst_18 = arith.constant 1.000000e+00 : f32
    %38 = vector.broadcast %cst_18 : f32 to vector<128x32xf32>
    %39 = arith.addf %38, %37 : vector<128x32xf32>
    %40 = arith.divf %38, %39 : vector<128x32xf32>
    %41 = arith.mulf %34, %40 : vector<128x32xf32>
    %42 = arith.addf %24, %31 : vector<128x64xf32>
    %43 = arith.addf %42, %10 : vector<128x64xf32>
    %44 = vector.extract_strided_slice %43 {offsets = [0, 0], sizes = [128, 32], strides = [1, 1]} : vector<128x64xf32> to vector<128x32xf32>
    %45 = math.tanh %44 : vector<128x32xf32>
    %46 = vector.extract_strided_slice %43 {offsets = [0, 32], sizes = [128, 32], strides = [1, 1]} : vector<128x64xf32> to vector<128x32xf32>
    %47 = arith.negf %46 : vector<128x32xf32>
    %48 = math.exp %47 : vector<128x32xf32>
    %cst_19 = arith.constant 1.000000e+00 : f32
    %49 = vector.broadcast %cst_19 : f32 to vector<128x32xf32>
    %50 = arith.addf %49, %48 : vector<128x32xf32>
    %51 = arith.divf %49, %50 : vector<128x32xf32>
    %52 = arith.mulf %45, %51 : vector<128x32xf32>
    %c0_20 = arith.constant 0 : index
    %c0_21 = arith.constant 0 : index
    %c0_22 = arith.constant 0 : index
    %53 = vector.load %arg10[%c0_20, %c0_21, %c0_22] : memref<3x32x32xbf16, #tpu.memory_space<vmem>>, vector<1x32x32xbf16>
    %54 = vector.shape_cast %53 : vector<1x32x32xbf16> to vector<32x32xbf16>
    %55 = arith.truncf %52 : vector<128x32xf32> to vector<128x32xbf16>
    %cst_23 = arith.constant dense<0.000000e+00> : vector<128x32xf32>
    %56 = tpu.matmul %55, %54, %cst_23 {dimension_numbers = #tpu.dot_dimension_numbers<[1], [0], [0], [1], [0, 0, 1, 1], [], []>} : vector<128x32xbf16>, vector<32x32xbf16>, vector<128x32xf32> -> vector<128x32xf32>
    %57 = vector.extract_strided_slice %1 {offsets = [3, 0], sizes = [1, 32], strides = [1, 1]} : vector<4x64xf32> to vector<1x32xf32>
    %58 = vector.broadcast %57 : vector<1x32xf32> to vector<128x32xf32>
    %59 = arith.addf %56, %58 : vector<128x32xf32>
    %cst_24 = arith.constant 0.000000e+00 : f32
    %60 = vector.broadcast %cst_24 : f32 to vector<152x32xf32>
    %c0_25 = arith.constant 0 : index
    %c0_26 = arith.constant 0 : index
    %61 = vector.load %arg19[%c0_25, %c0_26] : memref<152x32xf32, #tpu.memory_space<vmem>>, vector<152x32xf32>
    tpu.vector_store %arg19[%c0_25, %c0_26], %60 {strides = array<i32>} : memref<152x32xf32, #tpu.memory_space<vmem>>, vector<152x32xf32>,
    %cst_27 = arith.constant 0.000000e+00 : f32
    %62 = vector.broadcast %cst_27 : f32 to vector<136x32xf32>
    %c0_28 = arith.constant 0 : index
    %c0_29 = arith.constant 0 : index
    %63 = vector.load %arg20[%c0_28, %c0_29] : memref<136x32xf32, #tpu.memory_space<vmem>>, vector<136x32xf32>
    tpu.vector_store %arg20[%c0_28, %c0_29], %62 {strides = array<i32>} : memref<136x32xf32, #tpu.memory_space<vmem>>, vector<136x32xf32>,
    %c16 = arith.constant 16 : index
    %c0_30 = arith.constant 0 : index
    %64 = vector.load %arg19[%c16, %c0_30] : memref<152x32xf32, #tpu.memory_space<vmem>>, vector<128x32xf32>
    tpu.vector_store %arg19[%c16, %c0_30], %41 {strides = array<i32>} : memref<152x32xf32, #tpu.memory_space<vmem>>, vector<128x32xf32>,
    %c8 = arith.constant 8 : index
    %c0_31 = arith.constant 0 : index
    %65 = vector.load %arg20[%c8, %c0_31] : memref<136x32xf32, #tpu.memory_space<vmem>>, vector<128x32xf32>
    tpu.vector_store %arg20[%c8, %c0_31], %59 {strides = array<i32>} : memref<136x32xf32, #tpu.memory_space<vmem>>, vector<128x32xf32>,
    %cst_32 = arith.constant 0.000000e+00 : f32
    %66 = vector.broadcast %cst_32 : f32 to vector<128x32xf32>
    %c1 = arith.constant 1 : index
    %c0_33 = arith.constant 0 : index
    %c0_34 = arith.constant 0 : index
    %67 = vector.load %arg11[%c1, %c0_33, %c0_34] : memref<3x4x64xf32, #tpu.memory_space<vmem>>, vector<1x4x64xf32>
    %68 = vector.shape_cast %67 : vector<1x4x64xf32> to vector<4x64xf32>
    %c1_35 = arith.constant 1 : index
    %c0_36 = arith.constant 0 : index
    %c0_37 = arith.constant 0 : index
    %69 = vector.load %arg2[%c1_35, %c0_36, %c0_37] : memref<3x2x64xf32, #tpu.memory_space<vmem>>, vector<1x2x64xf32>
    %70 = vector.shape_cast %69 : vector<1x2x64xf32> to vector<2x64xf32>
    %71 = vector.extract_strided_slice %70 {offsets = [0, 0], sizes = [1, 64], strides = [1, 1]} : vector<2x64xf32> to vector<1x64xf32>
    %72 = vector.shape_cast %71 : vector<1x64xf32> to vector<1x64xf32>
    %73 = vector.broadcast %72 : vector<1x64xf32> to vector<64x64xf32>
    %74 = vector.extract_strided_slice %70 {offsets = [1, 0], sizes = [1, 64], strides = [1, 1]} : vector<2x64xf32> to vector<1x64xf32>
    %75 = vector.shape_cast %74 : vector<1x64xf32> to vector<1x64xf32>
    %76 = vector.broadcast %75 : vector<1x64xf32> to vector<64x64xf32>
    %77 = tpu.concatenate %73, %76 in 0 : vector<64x64xf32>, vector<64x64xf32> -> vector<128x64xf32>
    %c7 = arith.constant 7 : index
    %c0_38 = arith.constant 0 : index
    %78 = vector.load %arg19[%c7, %c0_38] : memref<152x32xf32, #tpu.memory_space<vmem>>, vector<128x32xf32>
    %c0_39 = arith.constant 0 : index
    %c0_40 = arith.constant 0 : index
    %c0_41 = arith.constant 0 : index
    %79 = vector.load %arg12[%c0_39, %c0_40, %c0_41] : memref<6x128x1xf32, #tpu.memory_space<vmem>>, vector<1x128x1xf32>
    %80 = vector.shape_cast %79 : vector<1x128x1xf32> to vector<128x1xf32>
    %81 = vector.broadcast %80 : vector<128x1xf32> to vector<128x32xf32>
    %82 = arith.mulf %78, %81 : vector<128x32xf32>
    %83 = arith.truncf %82 : vector<128x32xf32> to vector<128x32xbf16>
    %c8_42 = arith.constant 8 : index
    %c0_43 = arith.constant 0 : index
    %84 = vector.load %arg19[%c8_42, %c0_43] : memref<152x32xf32, #tpu.memory_space<vmem>>, vector<128x32xf32>
    %c1_44 = arith.constant 1 : index
    %c0_45 = arith.constant 0 : index
    %c0_46 = arith.constant 0 : index
    %85 = vector.load %arg12[%c1_44, %c0_45, %c0_46] : memref<6x128x1xf32, #tpu.memory_space<vmem>>, vector<1x128x1xf32>
    %86 = vector.shape_cast %85 : vector<1x128x1xf32> to vector<128x1xf32>
    %87 = vector.broadcast %86 : vector<128x1xf32> to vector<128x32xf32>
    %88 = arith.mulf %84, %87 : vector<128x32xf32>
    %89 = arith.truncf %88 : vector<128x32xf32> to vector<128x32xbf16>
    %c9 = arith.constant 9 : index
    %c0_47 = arith.constant 0 : index
    %90 = vector.load %arg19[%c9, %c0_47] : memref<152x32xf32, #tpu.memory_space<vmem>>, vector<128x32xf32>
    %c2 = arith.constant 2 : index
    %c0_48 = arith.constant 0 : index
    %c0_49 = arith.constant 0 : index
    %91 = vector.load %arg12[%c2, %c0_48, %c0_49] : memref<6x128x1xf32, #tpu.memory_space<vmem>>, vector<1x128x1xf32>
    %92 = vector.shape_cast %91 : vector<1x128x1xf32> to vector<128x1xf32>
    %93 = vector.broadcast %92 : vector<128x1xf32> to vector<128x32xf32>
    %94 = arith.mulf %90, %93 : vector<128x32xf32>
    %95 = arith.truncf %94 : vector<128x32xf32> to vector<128x32xbf16>
    %c15 = arith.constant 15 : index
    %c0_50 = arith.constant 0 : index
    %96 = vector.load %arg19[%c15, %c0_50] : memref<152x32xf32, #tpu.memory_space<vmem>>, vector<128x32xf32>
    %c3 = arith.constant 3 : index
    %c0_51 = arith.constant 0 : index
    %c0_52 = arith.constant 0 : index
    %97 = vector.load %arg12[%c3, %c0_51, %c0_52] : memref<6x128x1xf32, #tpu.memory_space<vmem>>, vector<1x128x1xf32>
    %98 = vector.shape_cast %97 : vector<1x128x1xf32> to vector<128x1xf32>
    %99 = vector.broadcast %98 : vector<128x1xf32> to vector<128x32xf32>
    %100 = arith.mulf %96, %99 : vector<128x32xf32>
    %101 = arith.truncf %100 : vector<128x32xf32> to vector<128x32xbf16>
    %c16_53 = arith.constant 16 : index
    %c0_54 = arith.constant 0 : index
    %102 = vector.load %arg19[%c16_53, %c0_54] : memref<152x32xf32, #tpu.memory_space<vmem>>, vector<128x32xf32>
    %c4 = arith.constant 4 : index
    %c0_55 = arith.constant 0 : index
    %c0_56 = arith.constant 0 : index
    %103 = vector.load %arg12[%c4, %c0_55, %c0_56] : memref<6x128x1xf32, #tpu.memory_space<vmem>>, vector<1x128x1xf32>
    %104 = vector.shape_cast %103 : vector<1x128x1xf32> to vector<128x1xf32>
    %105 = vector.broadcast %104 : vector<128x1xf32> to vector<128x32xf32>
    %106 = arith.mulf %102, %105 : vector<128x32xf32>
    %107 = arith.truncf %106 : vector<128x32xf32> to vector<128x32xbf16>
    %c17 = arith.constant 17 : index
    %c0_57 = arith.constant 0 : index
    %108 = vector.load %arg19[%c17, %c0_57] : memref<152x32xf32, #tpu.memory_space<vmem>>, vector<128x32xf32>
    %c5 = arith.constant 5 : index
    %c0_58 = arith.constant 0 : index
    %c0_59 = arith.constant 0 : index
    %109 = vector.load %arg12[%c5, %c0_58, %c0_59] : memref<6x128x1xf32, #tpu.memory_space<vmem>>, vector<1x128x1xf32>
    %110 = vector.shape_cast %109 : vector<1x128x1xf32> to vector<128x1xf32>
    %111 = vector.broadcast %110 : vector<128x1xf32> to vector<128x32xf32>
    %112 = arith.mulf %108, %111 : vector<128x32xf32>
    %113 = arith.truncf %112 : vector<128x32xf32> to vector<128x32xbf16>
    %114 = tpu.concatenate %83, %89, %95, %101, %107, %113 in 1 : vector<128x32xbf16>, vector<128x32xbf16>, vector<128x32xbf16>, vector<128x32xbf16>, vector<128x32xbf16>, vector<128x32xbf16> -> vector<128x192xbf16>
    %c0_60 = arith.constant 0 : index
    %c0_61 = arith.constant 0 : index
    %c0_62 = arith.constant 0 : index
    %115 = vector.load %arg7[%c0_60, %c0_61, %c0_62] : memref<2x192x64xbf16, #tpu.memory_space<vmem>>, vector<1x192x64xbf16>
    %116 = vector.shape_cast %115 : vector<1x192x64xbf16> to vector<192x64xbf16>
    %cst_63 = arith.constant dense<0.000000e+00> : vector<128x64xf32>
    %117 = tpu.matmul %114, %116, %cst_63 {dimension_numbers = #tpu.dot_dimension_numbers<[1], [0], [0], [1], [0, 0, 1, 1], [], []>} : vector<128x192xbf16>, vector<192x64xbf16>, vector<128x64xf32> -> vector<128x64xf32>
    %118 = vector.extract_strided_slice %68 {offsets = [0, 0], sizes = [1, 64], strides = [1, 1]} : vector<4x64xf32> to vector<1x64xf32>
    %119 = vector.broadcast %118 : vector<1x64xf32> to vector<128x64xf32>
    %120 = arith.addf %117, %119 : vector<128x64xf32>
    %c7_64 = arith.constant 7 : index
    %c0_65 = arith.constant 0 : index
    %121 = vector.load %arg20[%c7_64, %c0_65] : memref<136x32xf32, #tpu.memory_space<vmem>>, vector<128x32xf32>
    %c0_66 = arith.constant 0 : index
    %c0_67 = arith.constant 0 : index
    %c0_68 = arith.constant 0 : index
    %122 = vector.load %arg13[%c0_66, %c0_67, %c0_68] : memref<2x128x1xf32, #tpu.memory_space<vmem>>, vector<1x128x1xf32>
    %123 = vector.shape_cast %122 : vector<1x128x1xf32> to vector<128x1xf32>
    %124 = vector.broadcast %123 : vector<128x1xf32> to vector<128x32xf32>
    %125 = arith.mulf %121, %124 : vector<128x32xf32>
    %126 = arith.truncf %125 : vector<128x32xf32> to vector<128x32xbf16>
    %c8_69 = arith.constant 8 : index
    %c0_70 = arith.constant 0 : index
    %127 = vector.load %arg20[%c8_69, %c0_70] : memref<136x32xf32, #tpu.memory_space<vmem>>, vector<128x32xf32>
    %c1_71 = arith.constant 1 : index
    %c0_72 = arith.constant 0 : index
    %c0_73 = arith.constant 0 : index
    %128 = vector.load %arg13[%c1_71, %c0_72, %c0_73] : memref<2x128x1xf32, #tpu.memory_space<vmem>>, vector<1x128x1xf32>
    %129 = vector.shape_cast %128 : vector<1x128x1xf32> to vector<128x1xf32>
    %130 = vector.broadcast %129 : vector<128x1xf32> to vector<128x32xf32>
    %131 = arith.mulf %127, %130 : vector<128x32xf32>
    %132 = arith.truncf %131 : vector<128x32xf32> to vector<128x32xbf16>
    %133 = tpu.concatenate %126, %132 in 1 : vector<128x32xbf16>, vector<128x32xbf16> -> vector<128x64xbf16>
    %c0_74 = arith.constant 0 : index
    %c0_75 = arith.constant 0 : index
    %c0_76 = arith.constant 0 : index
    %134 = vector.load %arg8[%c0_74, %c0_75, %c0_76] : memref<2x64x64xbf16, #tpu.memory_space<vmem>>, vector<1x64x64xbf16>
    %135 = vector.shape_cast %134 : vector<1x64x64xbf16> to vector<64x64xbf16>
    %cst_77 = arith.constant dense<0.000000e+00> : vector<128x64xf32>
    %136 = tpu.matmul %133, %135, %cst_77 {dimension_numbers = #tpu.dot_dimension_numbers<[1], [0], [0], [1], [0, 0, 1, 1], [], []>} : vector<128x64xbf16>, vector<64x64xbf16>, vector<128x64xf32> -> vector<128x64xf32>
    %137 = vector.extract_strided_slice %68 {offsets = [1, 0], sizes = [1, 64], strides = [1, 1]} : vector<4x64xf32> to vector<1x64xf32>
    %138 = vector.broadcast %137 : vector<1x64xf32> to vector<128x64xf32>
    %139 = arith.addf %136, %138 : vector<128x64xf32>
    %c1_78 = arith.constant 1 : index
    %c0_79 = arith.constant 0 : index
    %c0_80 = arith.constant 0 : index
    %140 = vector.load %arg9[%c1_78, %c0_79, %c0_80] : memref<3x64x64xbf16, #tpu.memory_space<vmem>>, vector<1x64x64xbf16>
    %141 = vector.shape_cast %140 : vector<1x64x64xbf16> to vector<64x64xbf16>
    %142 = arith.truncf %120 : vector<128x64xf32> to vector<128x64xbf16>
    %cst_81 = arith.constant dense<0.000000e+00> : vector<128x64xf32>
    %143 = tpu.matmul %142, %141, %cst_81 {dimension_numbers = #tpu.dot_dimension_numbers<[1], [0], [0], [1], [0, 0, 1, 1], [], []>} : vector<128x64xbf16>, vector<64x64xbf16>, vector<128x64xf32> -> vector<128x64xf32>
    %144 = vector.extract_strided_slice %68 {offsets = [2, 0], sizes = [1, 64], strides = [1, 1]} : vector<4x64xf32> to vector<1x64xf32>
    %145 = vector.broadcast %144 : vector<1x64xf32> to vector<128x64xf32>
    %146 = arith.addf %143, %145 : vector<128x64xf32>
    %147 = arith.addf %139, %146 : vector<128x64xf32>
    %148 = arith.addf %147, %77 : vector<128x64xf32>
    %149 = vector.extract_strided_slice %148 {offsets = [0, 0], sizes = [128, 32], strides = [1, 1]} : vector<128x64xf32> to vector<128x32xf32>
    %150 = math.tanh %149 : vector<128x32xf32>
    %151 = vector.extract_strided_slice %148 {offsets = [0, 32], sizes = [128, 32], strides = [1, 1]} : vector<128x64xf32> to vector<128x32xf32>
    %152 = arith.negf %151 : vector<128x32xf32>
    %153 = math.exp %152 : vector<128x32xf32>
    %cst_82 = arith.constant 1.000000e+00 : f32
    %154 = vector.broadcast %cst_82 : f32 to vector<128x32xf32>
    %155 = arith.addf %154, %153 : vector<128x32xf32>
    %156 = arith.divf %154, %155 : vector<128x32xf32>
    %157 = arith.mulf %150, %156 : vector<128x32xf32>
    %158 = arith.addf %66, %157 : vector<128x32xf32>
    %159 = arith.addf %120, %77 : vector<128x64xf32>
    %160 = vector.extract_strided_slice %159 {offsets = [0, 0], sizes = [128, 32], strides = [1, 1]} : vector<128x64xf32> to vector<128x32xf32>
    %161 = math.tanh %160 : vector<128x32xf32>
    %162 = vector.extract_strided_slice %159 {offsets = [0, 32], sizes = [128, 32], strides = [1, 1]} : vector<128x64xf32> to vector<128x32xf32>
    %163 = arith.negf %162 : vector<128x32xf32>
    %164 = math.exp %163 : vector<128x32xf32>
    %cst_83 = arith.constant 1.000000e+00 : f32
    %165 = vector.broadcast %cst_83 : f32 to vector<128x32xf32>
    %166 = arith.addf %165, %164 : vector<128x32xf32>
    %167 = arith.divf %165, %166 : vector<128x32xf32>
    %168 = arith.mulf %161, %167 : vector<128x32xf32>
    %c1_84 = arith.constant 1 : index
    %c0_85 = arith.constant 0 : index
    %c0_86 = arith.constant 0 : index
    %169 = vector.load %arg10[%c1_84, %c0_85, %c0_86] : memref<3x32x32xbf16, #tpu.memory_space<vmem>>, vector<1x32x32xbf16>
    %170 = vector.shape_cast %169 : vector<1x32x32xbf16> to vector<32x32xbf16>
    %171 = arith.truncf %157 : vector<128x32xf32> to vector<128x32xbf16>
    %cst_87 = arith.constant dense<0.000000e+00> : vector<128x32xf32>
    %172 = tpu.matmul %171, %170, %cst_87 {dimension_numbers = #tpu.dot_dimension_numbers<[1], [0], [0], [1], [0, 0, 1, 1], [], []>} : vector<128x32xbf16>, vector<32x32xbf16>, vector<128x32xf32> -> vector<128x32xf32>
    %173 = vector.extract_strided_slice %68 {offsets = [3, 0], sizes = [1, 32], strides = [1, 1]} : vector<4x64xf32> to vector<1x32xf32>
    %174 = vector.broadcast %173 : vector<1x32xf32> to vector<128x32xf32>
    %175 = arith.addf %172, %174 : vector<128x32xf32>
    %c8_88 = arith.constant 8 : index
    %c0_89 = arith.constant 0 : index
    %176 = vector.load %arg20[%c8_88, %c0_89] : memref<136x32xf32, #tpu.memory_space<vmem>>, vector<128x32xf32>
    %177 = arith.addf %175, %176 : vector<128x32xf32>
    %c16_90 = arith.constant 16 : index
    %c0_91 = arith.constant 0 : index
    %178 = vector.load %arg19[%c16_90, %c0_91] : memref<152x32xf32, #tpu.memory_space<vmem>>, vector<128x32xf32>
    tpu.vector_store %arg19[%c16_90, %c0_91], %168 {strides = array<i32>} : memref<152x32xf32, #tpu.memory_space<vmem>>, vector<128x32xf32>,
    %c8_92 = arith.constant 8 : index
    %c0_93 = arith.constant 0 : index
    %179 = vector.load %arg20[%c8_92, %c0_93] : memref<136x32xf32, #tpu.memory_space<vmem>>, vector<128x32xf32>
    tpu.vector_store %arg20[%c8_92, %c0_93], %177 {strides = array<i32>} : memref<136x32xf32, #tpu.memory_space<vmem>>, vector<128x32xf32>,
    %c2_94 = arith.constant 2 : index
    %c0_95 = arith.constant 0 : index
    %c0_96 = arith.constant 0 : index
    %180 = vector.load %arg11[%c2_94, %c0_95, %c0_96] : memref<3x4x64xf32, #tpu.memory_space<vmem>>, vector<1x4x64xf32>
    %181 = vector.shape_cast %180 : vector<1x4x64xf32> to vector<4x64xf32>
    %c2_97 = arith.constant 2 : index
    %c0_98 = arith.constant 0 : index
    %c0_99 = arith.constant 0 : index
    %182 = vector.load %arg2[%c2_97, %c0_98, %c0_99] : memref<3x2x64xf32, #tpu.memory_space<vmem>>, vector<1x2x64xf32>
    %183 = vector.shape_cast %182 : vector<1x2x64xf32> to vector<2x64xf32>
    %184 = vector.extract_strided_slice %183 {offsets = [0, 0], sizes = [1, 64], strides = [1, 1]} : vector<2x64xf32> to vector<1x64xf32>
    %185 = vector.shape_cast %184 : vector<1x64xf32> to vector<1x64xf32>
    %186 = vector.broadcast %185 : vector<1x64xf32> to vector<64x64xf32>
    %187 = vector.extract_strided_slice %183 {offsets = [1, 0], sizes = [1, 64], strides = [1, 1]} : vector<2x64xf32> to vector<1x64xf32>
    %188 = vector.shape_cast %187 : vector<1x64xf32> to vector<1x64xf32>
    %189 = vector.broadcast %188 : vector<1x64xf32> to vector<64x64xf32>
    %190 = tpu.concatenate %186, %189 in 0 : vector<64x64xf32>, vector<64x64xf32> -> vector<128x64xf32>
    %c7_100 = arith.constant 7 : index
    %c0_101 = arith.constant 0 : index
    %191 = vector.load %arg19[%c7_100, %c0_101] : memref<152x32xf32, #tpu.memory_space<vmem>>, vector<128x32xf32>
    %c0_102 = arith.constant 0 : index
    %c0_103 = arith.constant 0 : index
    %c0_104 = arith.constant 0 : index
    %192 = vector.load %arg12[%c0_102, %c0_103, %c0_104] : memref<6x128x1xf32, #tpu.memory_space<vmem>>, vector<1x128x1xf32>
    %193 = vector.shape_cast %192 : vector<1x128x1xf32> to vector<128x1xf32>
    %194 = vector.broadcast %193 : vector<128x1xf32> to vector<128x32xf32>
    %195 = arith.mulf %191, %194 : vector<128x32xf32>
    %196 = arith.truncf %195 : vector<128x32xf32> to vector<128x32xbf16>
    %c8_105 = arith.constant 8 : index
    %c0_106 = arith.constant 0 : index
    %197 = vector.load %arg19[%c8_105, %c0_106] : memref<152x32xf32, #tpu.memory_space<vmem>>, vector<128x32xf32>
    %c1_107 = arith.constant 1 : index
    %c0_108 = arith.constant 0 : index
    %c0_109 = arith.constant 0 : index
    %198 = vector.load %arg12[%c1_107, %c0_108, %c0_109] : memref<6x128x1xf32, #tpu.memory_space<vmem>>, vector<1x128x1xf32>
    %199 = vector.shape_cast %198 : vector<1x128x1xf32> to vector<128x1xf32>
    %200 = vector.broadcast %199 : vector<128x1xf32> to vector<128x32xf32>
    %201 = arith.mulf %197, %200 : vector<128x32xf32>
    %202 = arith.truncf %201 : vector<128x32xf32> to vector<128x32xbf16>
    %c9_110 = arith.constant 9 : index
    %c0_111 = arith.constant 0 : index
    %203 = vector.load %arg19[%c9_110, %c0_111] : memref<152x32xf32, #tpu.memory_space<vmem>>, vector<128x32xf32>
    %c2_112 = arith.constant 2 : index
    %c0_113 = arith.constant 0 : index
    %c0_114 = arith.constant 0 : index
    %204 = vector.load %arg12[%c2_112, %c0_113, %c0_114] : memref<6x128x1xf32, #tpu.memory_space<vmem>>, vector<1x128x1xf32>
    %205 = vector.shape_cast %204 : vector<1x128x1xf32> to vector<128x1xf32>
    %206 = vector.broadcast %205 : vector<128x1xf32> to vector<128x32xf32>
    %207 = arith.mulf %203, %206 : vector<128x32xf32>
    %208 = arith.truncf %207 : vector<128x32xf32> to vector<128x32xbf16>
    %c15_115 = arith.constant 15 : index
    %c0_116 = arith.constant 0 : index
    %209 = vector.load %arg19[%c15_115, %c0_116] : memref<152x32xf32, #tpu.memory_space<vmem>>, vector<128x32xf32>
    %c3_117 = arith.constant 3 : index
    %c0_118 = arith.constant 0 : index
    %c0_119 = arith.constant 0 : index
    %210 = vector.load %arg12[%c3_117, %c0_118, %c0_119] : memref<6x128x1xf32, #tpu.memory_space<vmem>>, vector<1x128x1xf32>
    %211 = vector.shape_cast %210 : vector<1x128x1xf32> to vector<128x1xf32>
    %212 = vector.broadcast %211 : vector<128x1xf32> to vector<128x32xf32>
    %213 = arith.mulf %209, %212 : vector<128x32xf32>
    %214 = arith.truncf %213 : vector<128x32xf32> to vector<128x32xbf16>
    %c16_120 = arith.constant 16 : index
    %c0_121 = arith.constant 0 : index
    %215 = vector.load %arg19[%c16_120, %c0_121] : memref<152x32xf32, #tpu.memory_space<vmem>>, vector<128x32xf32>
    %c4_122 = arith.constant 4 : index
    %c0_123 = arith.constant 0 : index
    %c0_124 = arith.constant 0 : index
    %216 = vector.load %arg12[%c4_122, %c0_123, %c0_124] : memref<6x128x1xf32, #tpu.memory_space<vmem>>, vector<1x128x1xf32>
    %217 = vector.shape_cast %216 : vector<1x128x1xf32> to vector<128x1xf32>
    %218 = vector.broadcast %217 : vector<128x1xf32> to vector<128x32xf32>
    %219 = arith.mulf %215, %218 : vector<128x32xf32>
    %220 = arith.truncf %219 : vector<128x32xf32> to vector<128x32xbf16>
    %c17_125 = arith.constant 17 : index
    %c0_126 = arith.constant 0 : index
    %221 = vector.load %arg19[%c17_125, %c0_126] : memref<152x32xf32, #tpu.memory_space<vmem>>, vector<128x32xf32>
    %c5_127 = arith.constant 5 : index
    %c0_128 = arith.constant 0 : index
    %c0_129 = arith.constant 0 : index
    %222 = vector.load %arg12[%c5_127, %c0_128, %c0_129] : memref<6x128x1xf32, #tpu.memory_space<vmem>>, vector<1x128x1xf32>
    %223 = vector.shape_cast %222 : vector<1x128x1xf32> to vector<128x1xf32>
    %224 = vector.broadcast %223 : vector<128x1xf32> to vector<128x32xf32>
    %225 = arith.mulf %221, %224 : vector<128x32xf32>
    %226 = arith.truncf %225 : vector<128x32xf32> to vector<128x32xbf16>
    %227 = tpu.concatenate %196, %202, %208, %214, %220, %226 in 1 : vector<128x32xbf16>, vector<128x32xbf16>, vector<128x32xbf16>, vector<128x32xbf16>, vector<128x32xbf16>, vector<128x32xbf16> -> vector<128x192xbf16>
    %c1_130 = arith.constant 1 : index
    %c0_131 = arith.constant 0 : index
    %c0_132 = arith.constant 0 : index
    %228 = vector.load %arg7[%c1_130, %c0_131, %c0_132] : memref<2x192x64xbf16, #tpu.memory_space<vmem>>, vector<1x192x64xbf16>
    %229 = vector.shape_cast %228 : vector<1x192x64xbf16> to vector<192x64xbf16>
    %cst_133 = arith.constant dense<0.000000e+00> : vector<128x64xf32>
    %230 = tpu.matmul %227, %229, %cst_133 {dimension_numbers = #tpu.dot_dimension_numbers<[1], [0], [0], [1], [0, 0, 1, 1], [], []>} : vector<128x192xbf16>, vector<192x64xbf16>, vector<128x64xf32> -> vector<128x64xf32>
    %231 = vector.extract_strided_slice %181 {offsets = [0, 0], sizes = [1, 64], strides = [1, 1]} : vector<4x64xf32> to vector<1x64xf32>
    %232 = vector.broadcast %231 : vector<1x64xf32> to vector<128x64xf32>
    %233 = arith.addf %230, %232 : vector<128x64xf32>
    %c7_134 = arith.constant 7 : index
    %c0_135 = arith.constant 0 : index
    %234 = vector.load %arg20[%c7_134, %c0_135] : memref<136x32xf32, #tpu.memory_space<vmem>>, vector<128x32xf32>
    %c0_136 = arith.constant 0 : index
    %c0_137 = arith.constant 0 : index
    %c0_138 = arith.constant 0 : index
    %235 = vector.load %arg13[%c0_136, %c0_137, %c0_138] : memref<2x128x1xf32, #tpu.memory_space<vmem>>, vector<1x128x1xf32>
    %236 = vector.shape_cast %235 : vector<1x128x1xf32> to vector<128x1xf32>
    %237 = vector.broadcast %236 : vector<128x1xf32> to vector<128x32xf32>
    %238 = arith.mulf %234, %237 : vector<128x32xf32>
    %239 = arith.truncf %238 : vector<128x32xf32> to vector<128x32xbf16>
    %c8_139 = arith.constant 8 : index
    %c0_140 = arith.constant 0 : index
    %240 = vector.load %arg20[%c8_139, %c0_140] : memref<136x32xf32, #tpu.memory_space<vmem>>, vector<128x32xf32>
    %c1_141 = arith.constant 1 : index
    %c0_142 = arith.constant 0 : index
    %c0_143 = arith.constant 0 : index
    %241 = vector.load %arg13[%c1_141, %c0_142, %c0_143] : memref<2x128x1xf32, #tpu.memory_space<vmem>>, vector<1x128x1xf32>
    %242 = vector.shape_cast %241 : vector<1x128x1xf32> to vector<128x1xf32>
    %243 = vector.broadcast %242 : vector<128x1xf32> to vector<128x32xf32>
    %244 = arith.mulf %240, %243 : vector<128x32xf32>
    %245 = arith.truncf %244 : vector<128x32xf32> to vector<128x32xbf16>
    %246 = tpu.concatenate %239, %245 in 1 : vector<128x32xbf16>, vector<128x32xbf16> -> vector<128x64xbf16>
    %c1_144 = arith.constant 1 : index
    %c0_145 = arith.constant 0 : index
    %c0_146 = arith.constant 0 : index
    %247 = vector.load %arg8[%c1_144, %c0_145, %c0_146] : memref<2x64x64xbf16, #tpu.memory_space<vmem>>, vector<1x64x64xbf16>
    %248 = vector.shape_cast %247 : vector<1x64x64xbf16> to vector<64x64xbf16>
    %cst_147 = arith.constant dense<0.000000e+00> : vector<128x64xf32>
    %249 = tpu.matmul %246, %248, %cst_147 {dimension_numbers = #tpu.dot_dimension_numbers<[1], [0], [0], [1], [0, 0, 1, 1], [], []>} : vector<128x64xbf16>, vector<64x64xbf16>, vector<128x64xf32> -> vector<128x64xf32>
    %250 = vector.extract_strided_slice %181 {offsets = [1, 0], sizes = [1, 64], strides = [1, 1]} : vector<4x64xf32> to vector<1x64xf32>
    %251 = vector.broadcast %250 : vector<1x64xf32> to vector<128x64xf32>
    %252 = arith.addf %249, %251 : vector<128x64xf32>
    %c2_148 = arith.constant 2 : index
    %c0_149 = arith.constant 0 : index
    %c0_150 = arith.constant 0 : index
    %253 = vector.load %arg9[%c2_148, %c0_149, %c0_150] : memref<3x64x64xbf16, #tpu.memory_space<vmem>>, vector<1x64x64xbf16>
    %254 = vector.shape_cast %253 : vector<1x64x64xbf16> to vector<64x64xbf16>
    %255 = arith.truncf %233 : vector<128x64xf32> to vector<128x64xbf16>
    %cst_151 = arith.constant dense<0.000000e+00> : vector<128x64xf32>
    %256 = tpu.matmul %255, %254, %cst_151 {dimension_numbers = #tpu.dot_dimension_numbers<[1], [0], [0], [1], [0, 0, 1, 1], [], []>} : vector<128x64xbf16>, vector<64x64xbf16>, vector<128x64xf32> -> vector<128x64xf32>
    %257 = vector.extract_strided_slice %181 {offsets = [2, 0], sizes = [1, 64], strides = [1, 1]} : vector<4x64xf32> to vector<1x64xf32>
    %258 = vector.broadcast %257 : vector<1x64xf32> to vector<128x64xf32>
    %259 = arith.addf %256, %258 : vector<128x64xf32>
    %260 = arith.addf %252, %259 : vector<128x64xf32>
    %261 = arith.addf %260, %190 : vector<128x64xf32>
    %262 = vector.extract_strided_slice %261 {offsets = [0, 0], sizes = [128, 32], strides = [1, 1]} : vector<128x64xf32> to vector<128x32xf32>
    %263 = math.tanh %262 : vector<128x32xf32>
    %264 = vector.extract_strided_slice %261 {offsets = [0, 32], sizes = [128, 32], strides = [1, 1]} : vector<128x64xf32> to vector<128x32xf32>
    %265 = arith.negf %264 : vector<128x32xf32>
    %266 = math.exp %265 : vector<128x32xf32>
    %cst_152 = arith.constant 1.000000e+00 : f32
    %267 = vector.broadcast %cst_152 : f32 to vector<128x32xf32>
    %268 = arith.addf %267, %266 : vector<128x32xf32>
    %269 = arith.divf %267, %268 : vector<128x32xf32>
    %270 = arith.mulf %263, %269 : vector<128x32xf32>
    %271 = arith.addf %158, %270 : vector<128x32xf32>
    %c0_153 = arith.constant 0 : index
    %c0_154 = arith.constant 0 : index
    %272 = vector.load %arg3[%c0_153, %c0_154] : memref<2x32xf32, #tpu.memory_space<vmem>>, vector<2x32xf32>
    %273 = vector.extract_strided_slice %272 {offsets = [0, 0], sizes = [1, 32], strides = [1, 1]} : vector<2x32xf32> to vector<1x32xf32>
    %274 = vector.shape_cast %273 : vector<1x32xf32> to vector<1x32xf32>
    %275 = vector.broadcast %274 : vector<1x32xf32> to vector<64x32xf32>
    %276 = vector.extract_strided_slice %272 {offsets = [1, 0], sizes = [1, 32], strides = [1, 1]} : vector<2x32xf32> to vector<1x32xf32>
    %277 = vector.shape_cast %276 : vector<1x32xf32> to vector<1x32xf32>
    %278 = vector.broadcast %277 : vector<1x32xf32> to vector<64x32xf32>
    %279 = tpu.concatenate %275, %278 in 0 : vector<64x32xf32>, vector<64x32xf32> -> vector<128x32xf32>
    %280 = arith.addf %271, %279 : vector<128x32xf32>
    %cst_155 = arith.constant 0.000000e+00 : f32
    %281 = vector.broadcast %cst_155 : f32 to vector<128x32xf32>
    %282 = arith.maximumf %280, %281 : vector<128x32xf32>
    %c0_156 = arith.constant 0 : index
    %c0_157 = arith.constant 0 : index
    %283 = vector.load %arg14[%c0_156, %c0_157] : memref<32x32xbf16, #tpu.memory_space<vmem>>, vector<32x32xbf16>
    %284 = arith.truncf %282 : vector<128x32xf32> to vector<128x32xbf16>
    %cst_158 = arith.constant dense<0.000000e+00> : vector<128x32xf32>
    %285 = tpu.matmul %284, %283, %cst_158 {dimension_numbers = #tpu.dot_dimension_numbers<[1], [0], [0], [1], [0, 0, 1, 1], [], []>} : vector<128x32xbf16>, vector<32x32xbf16>, vector<128x32xf32> -> vector<128x32xf32>
    %c0_159 = arith.constant 0 : index
    %c0_160 = arith.constant 0 : index
    %286 = vector.load %arg15[%c0_159, %c0_160] : memref<1x32xf32, #tpu.memory_space<vmem>>, vector<1x32xf32>
    %287 = vector.broadcast %286 : vector<1x32xf32> to vector<128x32xf32>
    %288 = arith.addf %285, %287 : vector<128x32xf32>
    %cst_161 = arith.constant 0.000000e+00 : f32
    %289 = vector.broadcast %cst_161 : f32 to vector<128x32xf32>
    %290 = arith.maximumf %288, %289 : vector<128x32xf32>
    %c0_162 = arith.constant 0 : index
    %c0_163 = arith.constant 0 : index
    %291 = vector.load %arg16[%c0_162, %c0_163] : memref<32x4xbf16, #tpu.memory_space<vmem>>, vector<32x4xbf16>
    %292 = arith.truncf %290 : vector<128x32xf32> to vector<128x32xbf16>
    %cst_164 = arith.constant dense<0.000000e+00> : vector<128x4xf32>
    %293 = tpu.matmul %292, %291, %cst_164 {dimension_numbers = #tpu.dot_dimension_numbers<[1], [0], [0], [1], [0, 0, 1, 1], [], []>} : vector<128x32xbf16>, vector<32x4xbf16>, vector<128x4xf32> -> vector<128x4xf32>
    %c0_165 = arith.constant 0 : index
    %c0_166 = arith.constant 0 : index
    %294 = vector.load %arg17[%c0_165, %c0_166] : memref<1x4xf32, #tpu.memory_space<vmem>>, vector<1x4xf32>
    %295 = vector.broadcast %294 : vector<1x4xf32> to vector<128x4xf32>
    %296 = arith.addf %293, %295 : vector<128x4xf32>
    %c0_167 = arith.constant 0 : index
    %c0_168 = arith.constant 0 : index
    %297 = vector.load %arg4[%c0_167, %c0_168] : memref<128x4xf32, #tpu.memory_space<vmem>>, vector<128x4xf32>
    %298 = arith.addf %296, %297 : vector<128x4xf32>
    %cst_169 = arith.constant dense<0xFF800000> : vector<128xf32>
    %299 = vector.multi_reduction <maximumf>, %298, %cst_169 [1] : vector<128x4xf32> to vector<128xf32>
    %300 = vector.shape_cast %299 : vector<128xf32> to vector<128x1xf32>
    %301 = vector.broadcast %300 : vector<128x1xf32> to vector<128x4xf32>
    %302 = arith.subf %298, %301 : vector<128x4xf32>
    %303 = math.exp %302 : vector<128x4xf32>
    %cst_170 = arith.constant dense<0.000000e+00> : vector<128xf32>
    %304 = vector.multi_reduction <add>, %303, %cst_170 [1] : vector<128x4xf32> to vector<128xf32>
    %305 = vector.shape_cast %304 : vector<128xf32> to vector<128x1xf32>
    %306 = vector.broadcast %305 : vector<128x1xf32> to vector<128x4xf32>
    %307 = arith.divf %303, %306 : vector<128x4xf32>
    %308 = tpu.iota {dimensions = array<i32: 1>} : vector<128x4xi32>
    %309 = arith.sitofp %308 : vector<128x4xi32> to vector<128x4xf32>
    %310 = arith.mulf %307, %309 : vector<128x4xf32>
    %cst_171 = arith.constant dense<0.000000e+00> : vector<128xf32>
    %311 = vector.multi_reduction <add>, %310, %cst_171 [1] : vector<128x4xf32> to vector<128xf32>
    %312 = vector.shape_cast %311 : vector<128xf32> to vector<128x1xf32>
    %cst_172 = arith.constant 2.000000e+00 : f32
    %313 = vector.broadcast %cst_172 : f32 to vector<128x1xf32>
    %314 = arith.mulf %313, %312 : vector<128x1xf32>
    %cst_173 = arith.constant 3.000000e+00 : f32
    %315 = vector.broadcast %cst_173 : f32 to vector<128x1xf32>
    %316 = arith.divf %314, %315 : vector<128x1xf32>
    %cst_174 = arith.constant 1.000000e+00 : f32
    %317 = vector.broadcast %cst_174 : f32 to vector<128x1xf32>
    %318 = arith.subf %316, %317 : vector<128x1xf32>
    %c0_175 = arith.constant 0 : index
    %c0_176 = arith.constant 0 : index
    %319 = vector.load %arg18[%c0_175, %c0_176] : memref<128x1xf32, #tpu.memory_space<vmem>>, vector<128x1xf32>
    tpu.vector_store %arg18[%c0_175, %c0_176], %318 {strides = array<i32>} : memref<128x1xf32, #tpu.memory_space<vmem>>, vector<128x1xf32>,
    return
  }
}

</mosaic_0001>

<bundles_post_ra>
// kernel: pixelcnn_forward.1
= control target key start
LH: loop header
LB: loop body
LE: loop exit
PB: predicated region body
PF: predicated region fallthrough
CT: control target
= control target key end

     0   :  { %v11626_v1 = vmov 0   ;;  %vm135_vm0 = vcmask 1043456   ;;  %vm110_vm1 = vcmask 195584   ;;  %vm1016_vm2 = vcmask 261120   ;;  %s8167_s19 = smov 96   ;;  %s8169_s21 = smov 64   ;;  %s11603_s5 = inlined_call_operand.vmem [shape: bf16[24,64], index: 5, kind: input, shape index: {}]   ;;  %s11604_s0 = inlined_call_operand.vmem [shape: f32[128,24], index: 0, kind: input, shape index: {}]   ;;  %s11605_s12 = inlined_call_operand.vmem [shape: f32[6,128,1], index: 12, kind: input, shape index: {}]   ;;  %s11606_s6 = inlined_call_operand.vmem [shape: bf16[8,64], index: 6, kind: input, shape index: {}]   ;;  %s11607_s1 = inlined_call_operand.vmem [shape: f32[128,8], index: 1, kind: input, shape index: {}]   ;;  %s11608_s9 = inlined_call_operand.vmem [shape: bf16[3,64,64], index: 9, kind: input, shape index: {}]   ;;  %s11609_s11 = inlined_call_operand.vmem [shape: f32[3,4,64], index: 11, kind: input, shape index: {}]   ;;  %s11610_s2 = inlined_call_operand.vmem [shape: f32[3,2,64], index: 2, kind: input, shape index: {}]   ;;  %s11611_s10 = inlined_call_operand.vmem [shape: bf16[3,32,32], index: 10, kind: input, shape index: {}]   ;;  %s11612_s7 = inlined_call_operand.vmem [shape: bf16[2,192,64], index: 7, kind: input, shape index: {}]   ;;  %s11613_s13 = inlined_call_operand.vmem [shape: f32[2,128,1], index: 13, kind: input, shape index: {}]   ;;  %s11614_s8 = inlined_call_operand.vmem [shape: bf16[2,64,64], index: 8, kind: input, shape index: {}]   ;;  %s11615_s14 = inlined_call_operand.vmem [shape: bf16[32,32], index: 14, kind: input, shape index: {}]   ;;  %s11616_s16 = inlined_call_operand.vmem [shape: bf16[32,4], index: 16, kind: input, shape index: {}]   ;;  %s11617_s3 = inlined_call_operand.vmem [shape: f32[2,32], index: 3, kind: input, shape index: {}]   ;;  %s11618_s15 = inlined_call_operand.vmem [shape: f32[1,32], index: 15, kind: input, shape index: {}]   ;;  %s11619_s17 = inlined_call_operand.vmem [shape: f32[1,4], index: 17, kind: input, shape index: {}]   ;;  %s11620_s4 = inlined_call_operand.vmem [shape: f32[128,4], index: 4, kind: input, shape index: {}]   ;;  %s11621_s18 = inlined_call_operand.vmem [shape: f32[128,1], index: 18, kind: output, shape index: {}]  }
   0x1   :  { %11646 = sst [smem:[#allocation47_spill]] %s11603_s5  ;;  %7545 = vset.pattern.permute.xlu1 %v11626_v1  ;;  %7546 = vset.pattern.permute.xlu0 %v11626_v1  ;;  %v8166_v17 = vmov 0.0   ;;  %v252_v48 = vld [vmem:[%s11606_s6] sm:$0xf]  ;;  %v237_v56 = vld [vmem:[%s11607_s1 + $0x8] sm:$0xff]  ;;  %vm265_vm3 = vcmask 64512  }
   0x2   :  { %11647 = sst [smem:[#allocation48_spill]] %s11604_s0  ;;  %s11649_s29 = sld [smem:[#allocation47_spill]]  ;;  %1139 = vst.msk [vmem:[#allocation2 + $0x8] sm:$0xff] %vm1016_vm2, %v8166_v17  ;;  %1138 = vst.msk [vmem:[#allocation2] sm:$0xff] %vm1016_vm2, %v8166_v17  ;;  %v291_v50 = vsel %vm135_vm0, %v252_v48, 0  ;;  %v236_v55 = vld [vmem:[%s11607_s1] sm:$0xff] }
   0x3   :  { %11648 = sst [smem:[#allocation49_spill]] %s11605_s12  ;;  %s11650_s20 = sld [smem:[#allocation48_spill]]  ;;  %1140 = vst.msk [vmem:[#allocation2 + $0x10] sm:$0xff] %vm1016_vm2, %v8166_v17  ;;  %1141 = vst.msk [vmem:[#allocation2 + $0x18] sm:$0xff] %vm1016_vm2, %v8166_v17  ;;  %v253_v57 = vpack.c.bf16 %v237_v56, %v236_v55  ;;  %v7549_v58 = vld [vmem:[%s11608_s9] sm:$0xff]   ;;  %v238_v61 = vld [vmem:[%s11607_s1 + $0x10] sm:$0xff] }
   0x4   :  { %s11651_s26 = sld [smem:[#allocation49_spill]]  ;;  %1142 = vst.msk [vmem:[#allocation2 + $0x20] sm:$0xff] %vm1016_vm2, %v8166_v17  ;;  %1143 = vst.msk [vmem:[#allocation2 + $0x28] sm:$0xff] %vm1016_vm2, %v8166_v17  ;;  %v239_v62 = vld [vmem:[%s11607_s1 + $0x18] sm:$0xff]  ;;  %vm434_vm4 = vcmask 523264   ;;  %s8168_s0 = smov 32  }
   0x5   :  { %1144 = vst.msk [vmem:[#allocation2 + $0x30] sm:$0xff] %vm1016_vm2, %v8166_v17  ;;  %1145 = vst.msk [vmem:[#allocation2 + $0x38] sm:$0xff] %vm1016_vm2, %v8166_v17  ;;  %v254_v63 = vpack.c.bf16 %v239_v62, %v238_v61  ;;  %vm2175_vm5 = vcmask 785408   ;;  %vm6214_vm6 = vcmask 31744   ;;  %vm6507_vm7 = vcmask 7168  }
   0x6   :  { %1146 = vst.msk [vmem:[#allocation2 + $0x40] sm:$0xff] %vm1016_vm2, %v8166_v17  ;;  %1147 = vst.msk [vmem:[#allocation2 + $0x48] sm:$0xff] %vm1016_vm2, %v8166_v17 }
   0x7   :  { %1148 = vst.msk [vmem:[#allocation2 + $0x50] sm:$0xff] %vm1016_vm2, %v8166_v17  ;;  %1149 = vst.msk [vmem:[#allocation2 + $0x58] sm:$0xff] %vm1016_vm2, %v8166_v17 }
   0x8   :  { %v7547_v0 = vld [vmem:[%s11649_s29] sm:$0xff]   ;;  %v7548_v2 = vld [vmem:[%s11649_s29 + $0x8] ss:$0 sps:$4 sm:$0xff]   ;;  %1150 = vst.msk [vmem:[#allocation2 + $0x60] sm:$0xff] %vm1016_vm2, %v8166_v17  ;;  %1151 = vst.msk [vmem:[#allocation2 + $0x68] sm:$0xff] %vm1016_vm2, %v8166_v17 }
   0x9   :  { %v70_v3 = vld [vmem:[%s11650_s20] sm:$0xff]  ;;  %7151 = vmatprep.subr.bf16.mxu0 %v7547_v0  ;;  %7389 = vmatprep.subr.bf16.mxu1 %v7547_v0  ;;  %v71_v4 = vld [vmem:[%s11650_s20 + $0x8] sm:$0xff]  ;;  %v72_v9 = vld [vmem:[%s11650_s20 + $0x10] sm:$0xff]  ;;  %v137_v12 = vsel %vm135_vm0, %v7548_v2, 0  ;;  %1152 = vst.msk [vmem:[#allocation2 + $0x70] sm:$0xff] %vm1016_vm2, %v8166_v17 }
   0xa   :  { %v82_v5 = vld [vmem:[%s11650_s20 + $0x60] sm:$0xff]  ;;  %v83_v6 = vld [vmem:[%s11650_s20 + $0x68] sm:$0xff]  ;;  %7152 = vmatpush3.bf16.msra.mxu0 %v7547_v0  ;;  %7391 = vmatpush3.bf16.msra.mxu1 %v7547_v0  ;;  %v89_v7 = vpack.c.bf16 %v71_v4, %v70_v3  ;;  %v73_v10 = vld [vmem:[%s11650_s20 + $0x18] sm:$0xff]  ;;  %1153 = vst.msk [vmem:[#allocation2 + $0x78] sm:$0xff] %vm1016_vm2, %v8166_v17 }
   0xb   :  { %v95_v8 = vpack.c.bf16 %v83_v6, %v82_v5  ;;  %v84_v11 = vld [vmem:[%s11650_s20 + $0x70] sm:$0xff]  ;;  %7537 = vmatprep.subr.msk.bf16.mxu0 %vm135_vm0, %v7548_v2  ;;  %7538 = vmatprep.subr.msk.bf16.mxu1 %vm135_vm0, %v7548_v2  ;;  %v85_v13 = vld [vmem:[%s11650_s20 + $0x78] sm:$0xff]  ;;  %v74_v14 = vld [vmem:[%s11650_s20 + $0x20] sm:$0xff]  ;;  %1154 = vst.msk [vmem:[#allocation2 + $0x80] sm:$0xff] %vm1016_vm2, %v8166_v17  ;;  %v90_v18 = vpack.c.bf16 %v73_v10, %v72_v9 }
   0xc   :  { %v75_v15 = vld [vmem:[%s11650_s20 + $0x28] sm:$0xff]  ;;  %7155 = vmatprep.mubr.msk.bf16.mxu0 %vm110_vm1, %v89_v7  ;;  %v6602_v16 = vld [vmem:[%s11651_s26 + $0x80] sm:$0xff]  ;;  %1155 = vst.msk [vmem:[#allocation2 + $0x88] sm:$0xff] %vm1016_vm2, %v8166_v17  ;;  %1156 = vst.msk [vmem:[#allocation2 + $0x90] sm:$0xff] %vm1016_vm2, %v8166_v17  ;;  %v96_v19 = vpack.c.bf16 %v85_v13, %v84_v11 }
   0xd   :  { %7167 = vmatprep.mubr.msk.bf16.mxu1 %vm110_vm1, %v95_v8  ;;  %1157 = vst.msk [vmem:[#allocation3] sm:$0xff] %vm1016_vm2, %v8166_v17  ;;  %1158 = vst.msk [vmem:[#allocation3 + $0x8] sm:$0xff] %vm1016_vm2, %v8166_v17  ;;  %1389 = vperm.xlu1 %7545, %v6602_v16   ;;  %v91_v20 = vpack.c.bf16 %v75_v15, %v74_v14  ;;  %v6618_v21 = vld [vmem:[%s11651_s26 + $0x100] sm:$0xff]  ;;  %v76_v22 = vld [vmem:[%s11650_s20 + $0x30] sm:$0xff] }
   0xe   :  { %1159 = vst.msk [vmem:[#allocation3 + $0x10] sm:$0xff] %vm1016_vm2, %v8166_v17  ;;  %1160 = vst.msk [vmem:[#allocation3 + $0x18] sm:$0xff] %vm1016_vm2, %v8166_v17  ;;  %7154 = vmatpush3.bf16.msra.mxu0 %v137_v12  ;;  %7392 = vmatpush3.bf16.msra.mxu1 %v137_v12  ;;  %v77_v23 = vld [vmem:[%s11650_s20 + $0x38] sm:$0xff]  ;;  %v78_v24 = vld [vmem:[%s11650_s20 + $0x40] sm:$0xff] }
   0xf   :  { %1161 = vst.msk [vmem:[#allocation3 + $0x20] sm:$0xff] %vm1016_vm2, %v8166_v17  ;;  %1162 = vst.msk [vmem:[#allocation3 + $0x28] sm:$0xff] %vm1016_vm2, %v8166_v17  ;;  %v79_v25 = vld [vmem:[%s11650_s20 + $0x48] sm:$0xff]  ;;  %v92_v28 = vpack.c.bf16 %v77_v23, %v76_v22  ;;  %v6666_v30 = vld [vmem:[%s11651_s26 + $0x280] sm:$0xff]  ;;  %7539 = vmatprep.subr.msk.bf16.mxu1 %vm135_vm0, %v252_v48 }
  0x10   :  { %1163 = vst.msk [vmem:[#allocation3 + $0x30] sm:$0xff] %vm1016_vm2, %v8166_v17  ;;  %1164 = vst.msk [vmem:[#allocation3 + $0x38] sm:$0xff] %vm1016_vm2, %v8166_v17  ;;  %v6619_v26 = vld [vmem:[%s11651_s26 + $0x108] sm:$0xff]  ;;  %v93_v29 = vpack.c.bf16 %v79_v25, %v78_v24  ;;  %v80_v32 = vld [vmem:[%s11650_s20 + $0x50] sm:$0xff] }
  0x11   :  { %1165 = vst.msk [vmem:[#allocation3 + $0x40] sm:$0xff] %vm1016_vm2, %v8166_v17  ;;  %1166 = vst.msk [vmem:[#allocation3 + $0x48] sm:$0xff] %vm1016_vm2, %v8166_v17  ;;  %7156 = vmatmul.mubr.msk.bf16.vlgmr.msra.gmra.mrb[0].mxu0 %vm110_vm1, %v90_v18  ;;  %7168 = vmatmul.mubr.msk.bf16.vlgmr.msra.gmra.mrb[0].mxu1 %vm110_vm1, %v96_v19  ;;  %v6603_v27 = vld [vmem:[%s11651_s26 + $0x88] sm:$0xff]  ;;  %v81_v33 = vld [vmem:[%s11650_s20 + $0x58] sm:$0xff] }
  0x12   :  { %1167 = vst.msk [vmem:[#allocation3 + $0x50] sm:$0xff] %vm1016_vm2, %v8166_v17  ;;  %1168 = vst.msk [vmem:[#allocation3 + $0x58] sm:$0xff] %vm1016_vm2, %v8166_v17  ;;  %7159 = vmatprep.mubr.msk.bf16.mxu0 %vm110_vm1, %v91_v20  ;;  %1526 = vperm.xlu1 %7545, %v6618_v21   ;;  %v6667_v31 = vld [vmem:[%s11651_s26 + $0x288] sm:$0xff]  ;;  %v6634_v34 = vld [vmem:[%s11651_s26 + $0x180] sm:$0xff]  ;;  %v94_v36 = vpack.c.bf16 %v81_v33, %v80_v32 }
  0x13   :  { %1169 = vst.msk [vmem:[#allocation3 + $0x60] sm:$0xff] %vm1016_vm2, %v8166_v17  ;;  %1170 = vst.msk [vmem:[#allocation3 + $0x68] sm:$0xff] %vm1016_vm2, %v8166_v17  ;;  %1394 = vperm.xlu0 %7546, %v6603_v27   ;;  %v6635_v35 = vld [vmem:[%s11651_s26 + $0x188] sm:$0xff]  ;;  %v6604_v37 = vld [vmem:[%s11651_s26 + $0x90] sm:$0xff]  ;;  %7172 = vmatpush3.bf16.msra.mxu1 %v291_v50 }
  0x14   :  { %1171 = vst.msk [vmem:[#allocation3 + $0x70] sm:$0xff] %vm1016_vm2, %v8166_v17  ;;  %1172 = vst.msk [vmem:[#allocation3 + $0x78] sm:$0xff] %vm1016_vm2, %v8166_v17  ;;  %v6605_v38 = vld [vmem:[%s11651_s26 + $0x98] sm:$0xff]  ;;  %v6620_v39 = vld [vmem:[%s11651_s26 + $0x110] sm:$0xff]  ;;  %7173 = vmatprep.mubr.msk.bf16.mxu1 %vm265_vm3, %v253_v57  ;;  %7189 = vmatprep.subr.bf16.mxu1 %v7549_v58 }
  0x15   :  { %1173 = vst.msk [vmem:[#allocation3 + $0x80] sm:$0xff] %vm1016_vm2, %v8166_v17  ;;  %v6621_v40 = vld [vmem:[%s11651_s26 + $0x118] sm:$0xff]  ;;  %v6668_v41 = vld [vmem:[%s11651_s26 + $0x290] sm:$0xff]  ;;  %v6606_v45 = vld [vmem:[%s11651_s26 + $0xa0] sm:$0xff] }
  0x16   :  { %1531 = vperm.xlu1 %7545, %v6619_v26   ;;  %v6669_v42 = vld [vmem:[%s11651_s26 + $0x298] sm:$0xff]  ;;  %v6636_v43 = vld [vmem:[%s11651_s26 + $0x190] sm:$0xff]  ;;  %v6607_v46 = vld [vmem:[%s11651_s26 + $0xa8] sm:$0xff] }
  0x17   :  { %1937 = vperm.xlu0 %7546, %v6666_v30   ;;  %v6637_v44 = vld [vmem:[%s11651_s26 + $0x198] sm:$0xff]  ;;  %v6622_v47 = vld [vmem:[%s11651_s26 + $0x120] sm:$0xff]  ;;  %v6623_v49 = vld [vmem:[%s11651_s26 + $0x128] sm:$0xff] }
  0x18   :  { %v6670_v51 = vld [vmem:[%s11651_s26 + $0x2a0] sm:$0xff]  ;;  %v6671_v52 = vld [vmem:[%s11651_s26 + $0x2a8] sm:$0xff]  ;;  %v6609_v59 = vld [vmem:[%s11651_s26 + $0xb8] sm:$0xff] }
  0x19   :  { %7160 = vmatmul.mubr.msk.bf16.gmra.mrb[4].mxu0 %vm110_vm1, %v92_v28  ;;  %v6639_v53 = vld [vmem:[%s11651_s26 + $0x1a8] sm:$0xff]  ;;  %v6638_v54 = vld [vmem:[%s11651_s26 + $0x1a0] sm:$0xff]  ;;  %v6608_v60 = vld [vmem:[%s11651_s26 + $0xb0] sm:$0xff]  ;;  %7174 = vmatmul.mubr.msk.bf16.vlgmr.msra.gmra.mrb[4].mxu1 %vm265_vm3, %v254_v63 }
  0x1a   :  { %7163 = vmatprep.mubr.msk.bf16.mxu0 %vm110_vm1, %v93_v29  ;;  %1942 = vperm.xlu1 %7545, %v6667_v31   ;;  %v6625_v0 = vld [vmem:[%s11651_s26 + $0x138] sm:$0xff]  ;;  %v6624_v2 = vld [vmem:[%s11651_s26 + $0x130] sm:$0xff]  ;;  %v240_v3 = vld [vmem:[%s11607_s1 + $0x20] sm:$0xff] }
  0x1b   :  { %1663 = vperm.xlu0 %7546, %v6634_v34   ;;  %7190 = vmatpush3.bf16.msra.mxu1 %v7549_v58  ;;  %v241_v4 = vld [vmem:[%s11607_s1 + $0x28] sm:$0xff]  ;;  %v242_v7 = vld [vmem:[%s11607_s1 + $0x30] sm:$0xff]  ;;  %v243_v8 = vld [vmem:[%s11607_s1 + $0x38] sm:$0xff] }
  0x1c   :  { %v255_v5 = vpack.c.bf16 %v241_v4, %v240_v3  ;;  %v7550_v6 = vld [vmem:[%s11608_s9 + $0x8] sm:$0xff]   ;;  %v6672_v9 = vld [vmem:[%s11651_s26 + $0x2b0] sm:$0xff]  ;;  %v256_v10 = vpack.c.bf16 %v243_v8, %v242_v7  ;;  %v6673_v11 = vld [vmem:[%s11651_s26 + $0x2b8] sm:$0xff] }
  0x1d   :  { %7191 = vmatprep.subr.bf16.mxu1 %v7550_v6  ;;  %v244_v12 = vld [vmem:[%s11607_s1 + $0x40] sm:$0xff]  ;;  %v245_v13 = vld [vmem:[%s11607_s1 + $0x48] sm:$0xff]  ;;  %v6640_v14 = vld [vmem:[%s11651_s26 + $0x1b0] sm:$0xff] }
  0x1e   :  { %1668 = vperm.xlu1 %7545, %v6635_v35   ;;  %7177 = vmatprep.mubr.msk.bf16.mxu1 %vm265_vm3, %v255_v5  ;;  %v257_v15 = vpack.c.bf16 %v245_v13, %v244_v12  ;;  %v7551_v16 = vld [vmem:[%s11608_s9 + $0x10] sm:$0xff]   ;;  %v6641_v17 = vld [vmem:[%s11651_s26 + $0x1b8] sm:$0xff]  ;;  %v6610_v20 = vld [vmem:[%s11651_s26 + $0xc0] sm:$0xff] }
  0x1f   :  { %1399 = vperm.xlu0 %7546, %v6604_v37   ;;  %7192 = vmatpush3.bf16.msra.mxu1 %v7550_v6  ;;  %v246_v18 = vld [vmem:[%s11607_s1 + $0x50] sm:$0xff]  ;;  %v247_v19 = vld [vmem:[%s11607_s1 + $0x58] sm:$0xff]  ;;  %v6611_v22 = vld [vmem:[%s11651_s26 + $0xc8] sm:$0xff] }
  0x20   :  { %7193 = vmatprep.subr.bf16.mxu1 %v7551_v16  ;;  %v258_v21 = vpack.c.bf16 %v247_v19, %v246_v18  ;;  %v6626_v23 = vld [vmem:[%s11651_s26 + $0x140] sm:$0xff]  ;;  %v6627_v24 = vld [vmem:[%s11651_s26 + $0x148] sm:$0xff]  ;;  %v6612_v29 = vld [vmem:[%s11651_s26 + $0xd0] sm:$0xff] }
  0x21   :  { %7164 = vmatmul.mubr.msk.bf16.gmra.mrb[8].mxu0 %vm110_vm1, %v94_v36  ;;  %7178 = vmatmul.mubr.msk.bf16.gmra.mrb[8].mxu1 %vm265_vm3, %v256_v10  ;;  %v6674_v25 = vld [vmem:[%s11651_s26 + $0x2c0] sm:$0xff]  ;;  %v6675_v26 = vld [vmem:[%s11651_s26 + $0x2c8] sm:$0xff]  ;;  %v6613_v30 = vld [vmem:[%s11651_s26 + $0xd8] sm:$0xff] }
  0x22   :  { %1404 = vperm.xlu1 %7545, %v6605_v38   ;;  %7181 = vmatprep.mubr.msk.bf16.mxu1 %vm265_vm3, %v257_v15  ;;  %v6642_v27 = vld [vmem:[%s11651_s26 + $0x1c0] sm:$0xff]  ;;  %v6643_v28 = vld [vmem:[%s11651_s26 + $0x1c8] sm:$0xff]  ;;  %v6628_v31 = vld [vmem:[%s11651_s26 + $0x150] sm:$0xff] }
  0x23   :  { %1536 = vperm.xlu0 %7546, %v6620_v39   ;;  %7194 = vmatpush3.bf16.msra.mxu1 %v7551_v16  ;;  %v248_v32 = vld [vmem:[%s11607_s1 + $0x60] sm:$0xff]  ;;  %v249_v33 = vld [vmem:[%s11607_s1 + $0x68] sm:$0xff]  ;;  %v6629_v34 = vld [vmem:[%s11651_s26 + $0x158] sm:$0xff] }
  0x24   :  { %v259_v35 = vpack.c.bf16 %v249_v33, %v248_v32  ;;  %v250_v36 = vld [vmem:[%s11607_s1 + $0x70] sm:$0xff]  ;;  %v251_v37 = vld [vmem:[%s11607_s1 + $0x78] sm:$0xff]  ;;  %v6678_v48 = vld [vmem:[%s11651_s26 + $0x2e0] sm:$0xff] }
  0x25   :  { %v6676_v38 = vld [vmem:[%s11651_s26 + $0x2d0] sm:$0xff]  ;;  %v260_v39 = vpack.c.bf16 %v251_v37, %v250_v36  ;;  %v6646_v50 = vld [vmem:[%s11651_s26 + $0x1e0] sm:$0xff]  ;;  %v6681_v56 = vld [vmem:[%s11651_s26 + $0x2f8] sm:$0xff] }
  0x26   :  { %1541 = vperm.xlu1 %7545, %v6621_v40   ;;  %v6677_v40 = vld [vmem:[%s11651_s26 + $0x2d8] sm:$0xff]  ;;  %v6632_v55 = vld [vmem:[%s11651_s26 + $0x170] sm:$0xff]  ;;  %v1235_v58 = vld [vmem:[%s11651_s26 + $0x8] sm:$0xff] }
  0x27   :  { %1947 = vperm.xlu0 %7546, %v6668_v41   ;;  %v7552_v41 = vld [vmem:[%s11608_s9 + $0x18] sm:$0xff]   ;;  %v6680_v57 = vld [vmem:[%s11651_s26 + $0x2f0] sm:$0xff]  ;;  %v6651_v62 = vld [vmem:[%s11651_s26 + $0x208] sm:$0xff] }
  0x28   :  { %7195 = vmatprep.subr.bf16.mxu1 %v7552_v41  ;;  %v6648_v61 = vld [vmem:[%s11651_s26 + $0x1f0] sm:$0xff]  ;;  %v6650_v63 = vld [vmem:[%s11651_s26 + $0x200] sm:$0xff]  ;;  %v6653_v4 = vld [vmem:[%s11651_s26 + $0x218] sm:$0xff] }
  0x29   :  { %7182 = vmatmul.mubr.msk.bf16.gmra.mrb[12].mxu1 %vm265_vm3, %v258_v21  ;;  %v6652_v5 = vld [vmem:[%s11651_s26 + $0x210] sm:$0xff]  ;;  %v61_v33 = vld [vmem:[%s11610_s2] sm:$0x3] }
  0x2a   :  { %1952 = vperm.xlu1 %7545, %v6669_v42   ;;  %7185 = vmatprep.mubr.msk.bf16.mxu1 %vm265_vm3, %v259_v35  ;;  %v6644_v42 = vld [vmem:[%s11651_s26 + $0x1d0] sm:$0xff] }
  0x2b   :  { %1673 = vperm.xlu0 %7546, %v6636_v43   ;;  %v6645_v43 = vld [vmem:[%s11651_s26 + $0x1d8] sm:$0xff]  ;;  %7196 = vmatpush3.bf16.msra.mxu1 %v7552_v41 }
  0x2c   :  { %2340 = vmatprep.subr.bf16.mxu1 %v11626_v1 }
  0x2e   :  { %1678 = vperm.xlu1 %7545, %v6637_v44   ;;  %v6614_v44 = vld [vmem:[%s11651_s26 + $0xe0] sm:$0xff] }
  0x2f   :  { %1409 = vperm.xlu0 %7546, %v6606_v45   ;;  %v6615_v45 = vld [vmem:[%s11651_s26 + $0xe8] sm:$0xff] }
  0x31   :  { %7186 = vmatmul.mubr.msk.bf16.gmra.mrb[16].mxu1 %vm265_vm3, %v260_v39 }
  0x32   :  { %1414 = vperm.xlu1 %7545, %v6607_v46   ;;  %v6630_v46 = vld [vmem:[%s11651_s26 + $0x160] sm:$0xff] }
  0x33   :  { %1546 = vperm.xlu0 %7546, %v6622_v47   ;;  %v6631_v47 = vld [vmem:[%s11651_s26 + $0x168] sm:$0xff] }
  0x36   :  { %1551 = vperm.xlu1 %7545, %v6623_v49   ;;  %v6679_v49 = vld [vmem:[%s11651_s26 + $0x2e8] sm:$0xff] }
  0x37   :  { %1957 = vperm.xlu0 %7546, %v6670_v51   ;;  %v6647_v51 = vld [vmem:[%s11651_s26 + $0x1e8] sm:$0xff] }
  0x3a   :  { %1962 = vperm.xlu1 %7545, %v6671_v52   ;;  %v6617_v52 = vld [vmem:[%s11651_s26 + $0xf8] sm:$0xff] }
  0x3b   :  { %1683 = vperm.xlu0 %7546, %v6638_v54   ;;  %v6633_v54 = vld [vmem:[%s11651_s26 + $0x178] sm:$0xff] }
  0x3e   :  { %1688 = vperm.xlu1 %7545, %v6639_v53   ;;  %v6616_v53 = vld [vmem:[%s11651_s26 + $0xf0] sm:$0xff] }
  0x3f   :  { %1419 = vperm.xlu0 %7546, %v6608_v60   ;;  %v6649_v60 = vld [vmem:[%s11651_s26 + $0x1f8] sm:$0xff] }
  0x42   :  { %1424 = vperm.xlu1 %7545, %v6609_v59   ;;  %v1234_v59 = vld [vmem:[%s11651_s26] sm:$0xff] }
  0x43   :  { %1556 = vperm.xlu0 %7546, %v6624_v2   ;;  %v1236_v2 = vld [vmem:[%s11651_s26 + $0x10] sm:$0xff] }
  0x46   :  { %1561 = vperm.xlu1 %7545, %v6625_v0   ;;  %v1237_v0 = vld [vmem:[%s11651_s26 + $0x18] sm:$0xff] }
  0x47   :  { %1967 = vperm.xlu0 %7546, %v6672_v9  }
  0x4a   :  { %1972 = vperm.xlu1 %7545, %v6673_v11  }
  0x4b   :  { %1693 = vperm.xlu0 %7546, %v6640_v14  }
  0x4e   :  { %1698 = vperm.xlu1 %7545, %v6641_v17  }
  0x4f   :  { %1429 = vperm.xlu0 %7546, %v6610_v20  }
  0x52   :  { %1434 = vperm.xlu1 %7545, %v6611_v22  }
  0x53   :  { %1566 = vperm.xlu0 %7546, %v6626_v23  }
  0x56   :  { %1571 = vperm.xlu1 %7545, %v6627_v24   ;;  %v11625_v24 = vlaneseq }
  0x57   :  { %1977 = vperm.xlu0 %7546, %v6674_v25  }
  0x5a   :  { %1982 = vperm.xlu1 %7545, %v6675_v26  }
  0x5b   :  { %1703 = vperm.xlu0 %7546, %v6642_v27   ;;  %v8701_v27 = vshrl.u32 %v11625_v24, 7 }
  0x5d   :  { %11652 = vst [vmem:[#allocation4_spill] sm:$0xff] %v8701_v27  ;;  %v8716_v32 = vsub.s32 1, %v8701_v27 }
  0x5e   :  { %1708 = vperm.xlu1 %7545, %v6643_v28  }
  0x5f   :  { %1439 = vperm.xlu0 %7546, %v6612_v29   ;;  %v8706_v29 = vsub.s32 0, %v8701_v27  ;;  %11654 = vst [vmem:[#allocation6_spill] sm:$0xff] %v8716_v32  ;;  %v8731_v37 = vrot.slane %v61_v33, %v8716_v32 }
  0x61   :  { %11653 = vst [vmem:[#allocation5_spill] sm:$0xff] %v8706_v29  ;;  %v8728_v36 = vrot.slane %v61_v33, %v8706_v29 }
  0x62   :  { %1444 = vperm.xlu1 %7545, %v6613_v30  }
  0x63   :  { %1576 = vperm.xlu0 %7546, %v6628_v31   ;;  %v8713_v31 = vld [vmem:[%s11609_s11] sm:$0xf] }
  0x66   :  { %1581 = vperm.xlu1 %7545, %v6629_v34   ;;  %v8723_v34 = vrot.slane %v8713_v31, %v8706_v29 }
  0x67   :  { %1987 = vperm.xlu0 %7546, %v6676_v38  }
  0x6a   :  { %1992 = vperm.xlu1 %7545, %v6677_v40  }
  0x6b   :  { %1713 = vperm.xlu0 %7546, %v6644_v42  }
  0x6e   :  { %1718 = vperm.xlu1 %7545, %v6645_v43  }
  0x6f   :  { %1449 = vperm.xlu0 %7546, %v6614_v44  }
  0x72   :  { %1454 = vperm.xlu1 %7545, %v6615_v45  }
  0x73   :  { %1586 = vperm.xlu0 %7546, %v6630_v46  }
  0x76   :  { %1591 = vperm.xlu1 %7545, %v6631_v47  }
  0x77   :  { %1997 = vperm.xlu0 %7546, %v6678_v48  }
  0x7a   :  { %2002 = vperm.xlu1 %7545, %v6679_v49  }
  0x7b   :  { %1723 = vperm.xlu0 %7546, %v6646_v50  }
  0x7e   :  { %1728 = vperm.xlu1 %7545, %v6647_v51  }
  0x7f   :  { %1464 = vperm.xlu0 %7546, %v6617_v52  }
  0x82   :  { %1459 = vperm.xlu1 %7545, %v6616_v53  }
  0x83   :  { %1601 = vperm.xlu0 %7546, %v6633_v54  }
  0x86   :  { %1596 = vperm.xlu1 %7545, %v6632_v55  }
  0x87   :  { %2012 = vperm.xlu0 %7546, %v6681_v56  }
  0x8a   :  { %2007 = vperm.xlu1 %7545, %v6680_v57  }
  0x8b   :  { %1257 = vperm.xlu0 %7546, %v1235_v58  }
  0x8c   :  { %v8652_v3 = vpop.permute.xlu1 %1389 }
  0x8e   :  { %1252 = vperm.xlu1 %7545, %v1234_v59  }
  0x8f   :  { %1738 = vperm.xlu0 %7546, %v6649_v60  }
  0x91   :  { %v8660_v6 = vpop.permute.xlu1 %1526 }
  0x92   :  { %1733 = vperm.xlu1 %7545, %v6648_v61   ;;  %v8662_v7 = vpop.permute.xlu0 %1394 }
  0x93   :  { %1805 = vperm.xlu0 %7546, %v6651_v62  }
  0x95   :  { %v8664_v8 = vpop.permute.xlu1 %1531 }
  0x96   :  { %1800 = vperm.xlu1 %7545, %v6650_v63   ;;  %v8666_v9 = vpop.permute.xlu0 %1937 }
  0x97   :  { %1267 = vperm.xlu0 %7546, %v1237_v0  }
  0x99   :  { %v8668_v10 = vpop.permute.xlu1 %1942 }
  0x9a   :  { %1262 = vperm.xlu1 %7545, %v1236_v2   ;;  %v8670_v11 = vpop.permute.xlu0 %1663 }
  0x9b   :  { %1815 = vperm.xlu0 %7546, %v6653_v4  }
  0x9d   :  { %v8672_v12 = vpop.permute.xlu1 %1668 }
  0x9e   :  { %1810 = vperm.xlu1 %7545, %v6652_v5   ;;  %v8674_v13 = vpop.permute.xlu0 %1399 }
  0xa1   :  { %v8676_v14 = vpop.permute.xlu1 %1404 }
  0xa2   :  { %v8678_v15 = vpop.permute.xlu0 %1536 }
  0xa5   :  { %v8680_v16 = vpop.permute.xlu1 %1541 }
  0xa6   :  { %v8682_v17 = vpop.permute.xlu0 %1947 }
  0xa9   :  { %v8684_v18 = vpop.permute.xlu1 %1952 }
  0xaa   :  { %v8686_v19 = vpop.permute.xlu0 %1673 }
  0xad   :  { %v8688_v20 = vpop.permute.xlu1 %1678 }
  0xae   :  { %v8690_v21 = vpop.permute.xlu0 %1409 }
  0xb1   :  { %v8692_v22 = vpop.permute.xlu1 %1414 }
  0xb2   :  { %v8694_v23 = vpop.permute.xlu0 %1546 }
  0xb5   :  { %v8696_v25 = vpop.permute.xlu1 %1551 }
  0xb6   :  { %v8698_v26 = vpop.permute.xlu0 %1957 }
  0xb9   :  { %v8703_v28 = vpop.permute.xlu1 %1962 }
  0xba   :  { %v8708_v30 = vpop.permute.xlu0 %1683 }
  0xbd   :  { %v8725_v35 = vpop.permute.xlu1 %1688 }
  0xbe   :  { %v8733_v38 = vpop.permute.xlu0 %1419 }
  0xbf   :  { %11655 = vst [vmem:[#allocation7_spill] sm:$0xff] %v8733_v38 }
  0xc1   :  { %v8748_v53 = vpop.permute.xlu1 %1424 }
  0xc2   :  { %11656 = vst [vmem:[#allocation8_spill] sm:$0xff] %v8748_v53  ;;  %v8774_v5 = vpop.permute.xlu0 %1556 }
  0xe4   :  { %v7157_v39 = vpop.f32.mrb[0].mxu0  ;;  %v7169_v40 = vpop.f32.mrb[0].mxu1 }
  0xe5   :  { %v182_v41 = vadd.f32 %v7157_v39, %v8723_v34  ;;  %v8737_v42 = vadd.f32 %v7169_v40, %v8723_v34  ;;  %v173_v43 = vpop.f32.mrb[1].mxu0  ;;  %v221_v44 = vpop.f32.mrb[1].mxu1 }
  0xe6   :  { %v174_v45 = vadd.f32 %v173_v43, %v8723_v34  ;;  %v7158_v46 = vpop.f32.mrb[2].mxu0  ;;  %v7170_v47 = vpop.f32.mrb[2].mxu1  ;;  %v8755_v56 = vadd.f32 %v221_v44, %v8723_v34 }
  0xe7   :  { %v8741_v48 = vadd.f32 %v182_v41, %v8728_v36  ;;  %v8745_v49 = vadd.f32 %v8737_v42, %v8731_v37  ;;  %v185_v50 = vadd.f32 %v7158_v46, %v8723_v34  ;;  %v176_v51 = vpop.f32.mrb[3].mxu0  ;;  %v224_v52 = vpop.f32.mrb[3].mxu1  ;;  %v8760_v60 = vadd.f32 %v7170_v47, %v8723_v34 }
  0xe8   :  { %v8751_v54 = vadd.f32 %v174_v45, %v8728_v36  ;;  %v177_v55 = vadd.f32 %v176_v51, %v8723_v34  ;;  %v8767_v0 = vadd.f32 %v224_v52, %v8723_v34  ;;  %v8779_v39 = vadd.f32 %v8755_v56, %v8731_v37 }
  0xe9   :  { %v6560_v57 = vmul.f32 -1.442695, %v8741_v48  ;;  %v6572_v58 = vmul.f32 -1.442695, %v8745_v49  ;;  %v399_v59 = vpack.c.bf16 %v185_v50, %v182_v41  ;;  %v8764_v62 = vadd.f32 %v185_v50, %v8728_v36 }
  0xea   :  { %v6558_v61 = vmul.f32 -1.442695, %v8751_v54  ;;  %v398_v63 = vpack.c.bf16 %v177_v55, %v174_v45  ;;  %v8770_v2 = vadd.f32 %v177_v55, %v8728_v36  ;;  %v404_v41 = vpack.c.bf16 %v8767_v0, %v8755_v56  ;;  %v8786_v45 = vpop.permute.xlu1 %1561 }
  0xeb   :  { %7601 = vpow2.f32 %v6560_v57  ;;  %v6561_v33 = vmul.f32 -1.442695, %v8764_v62  ;;  %11657 = vst [vmem:[#allocation9_spill] sm:$0xff] %v8786_v45  ;;  %v6570_v56 = vmul.f32 -1.442695, %v8779_v39 }
  0xec   :  { %7603 = vpow2.f32 %v6572_v58  ;;  %v7161_v40 = vpop.f32.mrb[4].mxu0  ;;  %7197 = vmatprep.mubr.msk.bf16.mxu1 %vm434_vm4, %v398_v63  ;;  %v6559_v50 = vmul.f32 -1.442695, %v8770_v2 }
  0xed   :  { %v198_v43 = vadd.f32 %v7161_v40, %v8723_v34  ;;  %v189_v44 = vpop.f32.mrb[5].mxu0  ;;  %7198 = vmatmul.mubr.msk.bf16.vlgmr.msra.gmra.mrb[4].mxu1 %vm434_vm4, %v399_v59  ;;  %7605 = vpow2.f32 %v6558_v61  ;;  %v8796_v59 = vpop.permute.xlu0 %1967  ;;  %v8800_v61 = vadd.f32 %v8760_v60, %v8731_v37 }
  0xee   :  { %v190_v46 = vadd.f32 %v189_v44, %v8723_v34  ;;  %v7162_v47 = vpop.f32.mrb[6].mxu0  ;;  %7607 = vpow2.f32 %v6561_v33  ;;  %11658 = vst [vmem:[#allocation10_spill] sm:$0xff] %v8796_v59  ;;  %v8803_v44 = vpop.permute.xlu1 %1972 }
  0xef   :  { %v8791_v51 = vadd.f32 %v198_v43, %v8728_v36  ;;  %v201_v52 = vadd.f32 %v7162_v47, %v8723_v34  ;;  %v192_v55 = vpop.f32.mrb[7].mxu0  ;;  %7609 = vpow2.f32 %v6559_v50  ;;  %11659 = vst [vmem:[#allocation11_spill] sm:$0xff] %v8803_v44  ;;  %v6573_v4 = vmul.f32 -1.442695, %v8800_v61 }
  0xf0   :  { %v193_v57 = vadd.f32 %v192_v55, %v8723_v34  ;;  %7611 = vpow2.f32 %v6570_v56  ;;  %v8810_v50 = vadd.f32 %v190_v46, %v8728_v36 }
  0xf1   :  { %v401_v58 = vpack.c.bf16 %v201_v52, %v198_v43  ;;  %v6564_v40 = vmul.f32 -1.442695, %v8791_v51  ;;  %v8814_v53 = vpop.permute.xlu0 %1693 }
  0xf2   :  { %v400_v63 = vpack.c.bf16 %v193_v57, %v190_v46  ;;  %v8817_v46 = vpop.permute.xlu1 %1698 }
  0xf3   :  { %7613 = vpow2.f32 %v6564_v40 }
  0xf4   :  { %v7165_v47 = vpop.f32.mrb[8].mxu0  ;;  %7201 = vmatprep.mubr.msk.bf16.mxu1 %vm434_vm4, %v400_v63 }
  0xf5   :  { %v7602_v33 = vpop.eup %7601  ;;  %v214_v55 = vadd.f32 %v7165_v47, %v8723_v34  ;;  %v205_v43 = vpop.f32.mrb[9].mxu0  ;;  %7202 = vmatmul.mubr.msk.bf16.gmra.mrb[8].mxu1 %vm434_vm4, %v401_v58 }
  0xf6   :  { %v7604_v24 = vpop.eup %7603  ;;  %v638_v1 = vadd.f32 1.0, %v7602_v33  ;;  %v206_v29 = vadd.f32 %v205_v43, %v8723_v34  ;;  %v7166_v59 = vpop.f32.mrb[10].mxu0  ;;  %v6562_v43 = vmul.f32 -1.442695, %v8810_v50 }
  0xf7   :  { %v650_v56 = vadd.f32 1.0, %v7604_v24  ;;  %v217_v63 = vadd.f32 %v7166_v59, %v8723_v34  ;;  %v208_v44 = vpop.f32.mrb[11].mxu0  ;;  %v7606_v47 = vpop.eup %7605 }
  0xf8   :  { %7615 = vrcp.f32 %v638_v1  ;;  %v209_v58 = vadd.f32 %v208_v44, %v8723_v34  ;;  %v636_v33 = vadd.f32 1.0, %v7606_v47  ;;  %v7608_v45 = vpop.eup %7607  ;;  %v8822_v1 = vpop.permute.xlu0 %1429  ;;  %v8825_v44 = vadd.f32 %v201_v52, %v8728_v36 }
  0xf9   :  { %7617 = vrcp.f32 %v650_v56  ;;  %v403_v38 = vpack.c.bf16 %v217_v63, %v214_v55  ;;  %v639_v40 = vadd.f32 1.0, %v7608_v45  ;;  %v7610_v59 = vpop.eup %7609  ;;  %11660 = vst [vmem:[#allocation12_spill] sm:$0xff] %v8822_v1  ;;  %v8828_v56 = vpop.permute.xlu1 %1434  ;;  %v8832_v45 = vadd.f32 %v8767_v0, %v8731_v37 }
  0xfa   :  { %7619 = vpow2.f32 %v6573_v4  ;;  %v402_v24 = vpack.c.bf16 %v209_v58, %v206_v29  ;;  %v7612_v34 = vpop.eup %7611  ;;  %11661 = vst [vmem:[#allocation13_spill] sm:$0xff] %v8828_v56 }
  0xfb   :  { %7621 = vrcp.f32 %v636_v33  ;;  %v648_v4 = vadd.f32 1.0, %v7612_v34  ;;  %v637_v33 = vadd.f32 1.0, %v7610_v59  ;;  %v6571_v34 = vmul.f32 -1.442695, %v8832_v45 }
  0xfc   :  { %7205 = vmatprep.mubr.msk.bf16.mxu1 %vm434_vm4, %v402_v24  ;;  %7623 = vrcp.f32 %v639_v40  ;;  %v6565_v24 = vmul.f32 -1.442695, %v8825_v44  ;;  %v8839_v40 = vadd.f32 %v193_v57, %v8728_v36  ;;  %v11663_v57 = vpack.c.bf16 %v8760_v60, %v8737_v42 }
  0xfd   :  { %7206 = vmatmul.mubr.msk.bf16.gmra.mrb[12].mxu1 %vm434_vm4, %v403_v38  ;;  %7625 = vpow2.f32 %v6562_v43  ;;  %v7614_v47 = vpop.eup %7613  ;;  %v8836_v43 = vadd.f32 %v214_v55, %v8731_v37  ;;  %v8847_v55 = vadd.f32 %v206_v29, %v8731_v37  ;;  %v8858_v29 = vadd.f32 %v217_v63, %v8731_v37 }
  0xfe   :  { %7209 = vmatprep.mubr.msk.bf16.mxu1 %vm434_vm4, %v404_v41  ;;  %7627 = vrcp.f32 %v648_v4  ;;  %v8842_v41 = vpop.permute.xlu0 %1566  ;;  %v642_v59 = vadd.f32 1.0, %v7614_v47 }
  0xff   :  { %11662 = vst [vmem:[#allocation14_spill] sm:$0xff] %v8842_v41  ;;  %7629 = vrcp.f32 %v637_v33  ;;  %v6568_v56 = vmul.f32 -1.442695, %v8836_v43  ;;  %v6563_v33 = vmul.f32 -1.442695, %v8839_v40 }
 0x100   :  { %7631 = vpow2.f32 %v6565_v24  ;;  %v6566_v60 = vmul.f32 -1.442695, %v8847_v55  ;;  %v6569_v63 = vmul.f32 -1.442695, %v8858_v29 }
 0x102   :  { %v7616_v38 = vpop.eup %7615  ;;  %v8863_v24 = vpop.permute.xlu0 %1977 }
 0x103   :  { %v7618_v52 = vpop.eup %7617  ;;  %704 = vrot.lane.b32.xlu0 %v7616_v38, %s8167_s19  ;;  %v8853_v38 = vpop.permute.xlu1 %1571  ;;  %11664 = vst [vmem:[#allocation15_spill] sm:$0xff] %v8863_v24 }
 0x104   :  { %v7620_v0 = vpop.eup %7619  ;;  %728 = vrot.lane.b32.xlu1 %v7618_v52, %s8167_s19 }
 0x105   :  { %v651_v4 = vadd.f32 1.0, %v7620_v0  ;;  %7210 = vmatmul.mubr.msk.bf16.gmra.mrb[16].mxu1 %vm434_vm4, %v11663_v57  ;;  %v7622_v1 = vpop.eup %7621  ;;  %v8866_v0 = vadd.f32 %v209_v58, %v8731_v37 }
 0x106   :  { %v7624_v41 = vpop.eup %7623 }
 0x107   :  { %7633 = vrcp.f32 %v651_v4  ;;  %v7626_v47 = vpop.eup %7625  ;;  %706 = vrot.lane.b32.xlu0 %v7624_v41, %s8167_s19  ;;  %v6567_v41 = vmul.f32 -1.442695, %v8866_v0 }
 0x108   :  { %7635 = vpow2.f32 %v6571_v34  ;;  %700 = vrot.lane.b32.xlu1 %v7622_v1, %s8167_s19  ;;  %v640_v42 = vadd.f32 1.0, %v7626_v47  ;;  %v7628_v52 = vpop.eup %7627  ;;  %v8868_v34 = vpop.permute.xlu1 %1982 }
 0x109   :  { %7637 = vrcp.f32 %v642_v59  ;;  %11665 = vst [vmem:[#allocation16_spill] sm:$0xff] %v8868_v34  ;;  %v7630_v1 = vpop.eup %7629  ;;  %v8873_v59 = vpop.permute.xlu0 %1703 }
 0x10a   :  { %7639 = vpow2.f32 %v6568_v56  ;;  %11666 = vst [vmem:[#allocation17_spill] sm:$0xff] %v8873_v59  ;;  %v7632_v4 = vpop.eup %7631 }
 0x10b   :  { %7641 = vpow2.f32 %v6563_v33 }
 0x10c   :  { %7643 = vrcp.f32 %v640_v42  ;;  %724 = vrot.lane.b32.xlu1 %v7628_v52, %s8167_s19  ;;  %v8876_v57 = vpop.permute.xlu1 %1708  ;;  %v643_v52 = vadd.f32 1.0, %v7632_v4 }
 0x10d   :  { %7645 = vpow2.f32 %v6566_v60  ;;  %11667 = vst [vmem:[#allocation18_spill] sm:$0xff] %v8876_v57  ;;  %v8880_v24 = vpop.permute.xlu0 %1439 }
 0x10e   :  { %7647 = vpow2.f32 %v6569_v63  ;;  %11668 = vst [vmem:[#allocation19_spill] sm:$0xff] %v8880_v24 }
 0x10f   :  { %7649 = vpow2.f32 %v6567_v41 }
 0x110   :  { %702 = vrot.lane.b32.xlu1 %v7630_v1, %s8167_s19  ;;  %v8882_v59 = vpop.permute.xlu1 %1444 }
 0x111   :  { %v7634_v56 = vpop.eup %7633  ;;  %11669 = vst [vmem:[#allocation20_spill] sm:$0xff] %v8882_v59 }
 0x112   :  { %v7636_v58 = vpop.eup %7635  ;;  %730 = vrot.lane.b32.xlu0 %v7634_v56, %s8167_s19 }
 0x113   :  { %v7638_v33 = vpop.eup %7637  ;;  %v649_v47 = vadd.f32 1.0, %v7636_v58 }
 0x114   :  { %v7640_v42 = vpop.eup %7639  ;;  %712 = vrot.lane.b32.xlu1 %v7638_v33, %s8167_s19  ;;  %v8885_v33 = vpop.permute.xlu0 %1576 }
 0x115   :  { %v7642_v60 = vpop.eup %7641  ;;  %7651 = vrcp.f32 %v649_v47  ;;  %v646_v34 = vadd.f32 1.0, %v7640_v42  ;;  %v8887_v47 = vpop.permute.xlu1 %1581 }
 0x116   :  { %v7644_v63 = vpop.eup %7643  ;;  %v641_v56 = vadd.f32 1.0, %v7642_v60 }
 0x117   :  { %v7646_v1 = vpop.eup %7645  ;;  %7653 = vrcp.f32 %v646_v34 }
 0x118   :  { %v644_v57 = vadd.f32 1.0, %v7646_v1  ;;  %708 = vrot.lane.b32.xlu1 %v7644_v63, %s8167_s19  ;;  %7655 = vrcp.f32 %v643_v52  ;;  %v7648_v41 = vpop.eup %7647  ;;  %v8890_v1 = vpop.permute.xlu0 %1987 }
 0x119   :  { %v647_v58 = vadd.f32 1.0, %v7648_v41  ;;  %v7650_v4 = vpop.eup %7649  ;;  %11670 = vst [vmem:[#allocation21_spill] sm:$0xff] %v8890_v1  ;;  %v8893_v52 = vpop.permute.xlu1 %1992 }
 0x11a   :  { %7657 = vrcp.f32 %v644_v57  ;;  %v645_v24 = vadd.f32 1.0, %v7650_v4  ;;  %11671 = vst [vmem:[#allocation22_spill] sm:$0xff] %v8893_v52 }
 0x11b   :  { %7659 = vrcp.f32 %v641_v56 }
 0x11c   :  { %7661 = vrcp.f32 %v647_v58  ;;  %v8897_v56 = vpop.permute.xlu0 %1713 }
 0x11d   :  { %7663 = vrcp.f32 %v645_v24  ;;  %v8900_v58 = vpop.permute.xlu1 %1718 }
 0x11e   :  { %7665 = vtanh.f32 %v8741_v48 }
 0x11f   :  { %v7652_v42 = vpop.eup %7651  ;;  %7667 = vtanh.f32 %v8745_v49 }
 0x120   :  { %726 = vrot.lane.b32.xlu0 %v7652_v42, %s8167_s19  ;;  %v8903_v42 = vpop.permute.xlu0 %1449  ;;  %7669 = vtanh.f32 %v8751_v54 }
 0x121   :  { %v7654_v34 = vpop.eup %7653  ;;  %11672 = vst [vmem:[#allocation23_spill] sm:$0xff] %v8903_v42  ;;  %v8905_v24 = vpop.permute.xlu1 %1454  ;;  %7671 = vtanh.f32 %v8764_v62 }
 0x122   :  { %720 = vrot.lane.b32.xlu1 %v7654_v34, %s8167_s19  ;;  %v7656_v60 = vpop.eup %7655  ;;  %11673 = vst [vmem:[#allocation24_spill] sm:$0xff] %v8905_v24  ;;  %7673 = vtanh.f32 %v8779_v39 }
 0x123   :  { %7675 = vtanh.f32 %v8770_v2 }
 0x124   :  { %v7658_v57 = vpop.eup %7657  ;;  %714 = vrot.lane.b32.xlu0 %v7656_v60, %s8167_s19  ;;  %v8908_v34 = vpop.permute.xlu0 %1586  ;;  %7677 = vtanh.f32 %v8800_v61 }
 0x125   :  { %v7660_v63 = vpop.eup %7659  ;;  %11674 = vst [vmem:[#allocation25_spill] sm:$0xff] %v8908_v34  ;;  %v8910_v60 = vpop.permute.xlu1 %1591  ;;  %7679 = vtanh.f32 %v8791_v51 }
 0x126   :  { %716 = vrot.lane.b32.xlu1 %v7658_v57, %s8167_s19  ;;  %v7662_v41 = vpop.eup %7661  ;;  %11675 = vst [vmem:[#allocation26_spill] sm:$0xff] %v8910_v60  ;;  %7681 = vtanh.f32 %v8810_v50 }
 0x127   :  { %v7664_v4 = vpop.eup %7663  ;;  %7683 = vtanh.f32 %v8832_v45 }
 0x128   :  { %710 = vrot.lane.b32.xlu0 %v7660_v63, %s8167_s19  ;;  %v8912_v57 = vpop.permute.xlu0 %1997  ;;  %7685 = vtanh.f32 %v8836_v43 }
 0x129   :  { %11676 = vst [vmem:[#allocation27_spill] sm:$0xff] %v8912_v57  ;;  %v8914_v52 = vpop.permute.xlu1 %2002  ;;  %7687 = vtanh.f32 %v8825_v44 }
 0x12a   :  { %11677 = vst [vmem:[#allocation28_spill] sm:$0xff] %v8914_v52  ;;  %7689 = vtanh.f32 %v8847_v55 }
 0x12b   :  { %7691 = vtanh.f32 %v8839_v40 }
 0x12c   :  { %722 = vrot.lane.b32.xlu0 %v7662_v41, %s8167_s19  ;;  %v8916_v63 = vpop.permute.xlu0 %1723  ;;  %7693 = vtanh.f32 %v8858_v29 }
 0x12d   :  { %11678 = vst [vmem:[#allocation29_spill] sm:$0xff] %v8916_v63  ;;  %v8918_v1 = vpop.permute.xlu1 %1728  ;;  %7695 = vtanh.f32 %v8866_v0  ;;  %v8994_v0 = vsub.s32 2, %v8701_v27 }
 0x12e   :  { %11679 = vst [vmem:[#allocation30_spill] sm:$0xff] %v8918_v1 }
 0x12f   :  { %11695 = vst [vmem:[#allocation46_spill] sm:$0xff] %v8994_v0 }
 0x130   :  { %718 = vrot.lane.b32.xlu0 %v7664_v4, %s8167_s19  ;;  %v8920_v41 = vpop.permute.xlu0 %1464 }
 0x131   :  { %11680 = vst [vmem:[#allocation31_spill] sm:$0xff] %v8920_v41  ;;  %v8922_v59 = vpop.permute.xlu1 %1459 }
 0x132   :  { %11681 = vst [vmem:[#allocation32_spill] sm:$0xff] %v8922_v59 }
 0x134   :  { %v8924_v42 = vpop.permute.xlu0 %1601 }
 0x135   :  { %11682 = vst [vmem:[#allocation33_spill] sm:$0xff] %v8924_v42  ;;  %v8926_v24 = vpop.permute.xlu1 %1596 }
 0x138   :  { %v8928_v4 = vpop.permute.xlu0 %2012 }
 0x139   :  { %11683 = vst [vmem:[#allocation34_spill] sm:$0xff] %v8928_v4  ;;  %v8930_v34 = vpop.permute.xlu1 %2007 }
 0x13a   :  { %11684 = vst [vmem:[#allocation35_spill] sm:$0xff] %v8930_v34 }
 0x13c   :  { %v8932_v60 = vpop.permute.xlu0 %1257 }
 0x13d   :  { %11685 = vst [vmem:[#allocation36_spill] sm:$0xff] %v8932_v60  ;;  %v8934_v57 = vpop.permute.xlu1 %1252 }
 0x13e   :  { %11686 = vst [vmem:[#allocation37_spill] sm:$0xff] %v8934_v57 }
 0x140   :  { %v8936_v52 = vpop.permute.xlu0 %1738 }
 0x141   :  { %11687 = vst [vmem:[#allocation38_spill] sm:$0xff] %v8936_v52  ;;  %v8938_v63 = vpop.permute.xlu1 %1733 }
 0x142   :  { %11688 = vst [vmem:[#allocation39_spill] sm:$0xff] %v8938_v63 }
 0x144   :  { %v8940_v1 = vpop.permute.xlu0 %1805 }
 0x145   :  { %11689 = vst [vmem:[#allocation40_spill] sm:$0xff] %v8940_v1  ;;  %v8942_v41 = vpop.permute.xlu1 %1800  ;;  %v7666_v1 = vpop.eup %7665 }
 0x146   :  { %11690 = vst [vmem:[#allocation41_spill] sm:$0xff] %v8942_v41  ;;  %v7668_v34 = vpop.eup %7667 }
 0x147   :  { %v7670_v49 = vpop.eup %7669 }
 0x148   :  { %v8944_v59 = vpop.permute.xlu0 %1267  ;;  %v7672_v54 = vpop.eup %7671 }
 0x149   :  { %11691 = vst [vmem:[#allocation42_spill] sm:$0xff] %v8944_v59  ;;  %v8948_v4 = vpop.permute.xlu1 %1262 }
 0x14a   :  { %11692 = vst [vmem:[#allocation43_spill] sm:$0xff] %v8948_v4 }
 0x14c   :  { %v8951_v60 = vpop.permute.xlu0 %1815 }
 0x14d   :  { %11693 = vst [vmem:[#allocation44_spill] sm:$0xff] %v8951_v60  ;;  %v8954_v57 = vpop.permute.xlu1 %1810 }
 0x14e   :  { %11694 = vst [vmem:[#allocation45_spill] sm:$0xff] %v8954_v57 }
 0x175   :  { %v705_v41 = vpop.permute.xlu0 %704 }
 0x176   :  { %v729_v59 = vpop.permute.xlu1 %728  ;;  %v750_v52 = vmul.f32 %v7666_v1, %v705_v41 }
 0x177   :  { %v762_v48 = vmul.f32 %v7668_v34, %v729_v59  ;;  %v7674_v59 = vpop.eup %7673  ;;  %v1354_v34 = vld [vmem:[#allocation2 + $0x8] sm:$0xff] }
 0x178   :  { %1176 = vst.msk [vmem:[#allocation2 + $0x20] sm:$0xff] %vm1016_vm2, %v750_v52  ;;  %v7676_v52 = vpop.eup %7675  ;;  %v1467_v51 = vmul.f32 %v8652_v3, %v1354_v34 }
 0x179   :  { %1188 = vst.msk [vmem:[#allocation2 + $0x80] sm:$0xff] %vm1016_vm2, %v762_v48  ;;  %v707_v62 = vpop.permute.xlu0 %706  ;;  %v7678_v48 = vpop.eup %7677 }
 0x17a   :  { %v701_v57 = vpop.permute.xlu1 %700  ;;  %v751_v60 = vmul.f32 %v7672_v54, %v707_v62  ;;  %v7680_v62 = vpop.eup %7679 }
 0x17b   :  { %v748_v39 = vmul.f32 %v7670_v49, %v701_v57 }
 0x17c   :  { %1177 = vst.msk [vmem:[#allocation2 + $0x28] sm:$0xff] %vm1016_vm2, %v751_v60 }
 0x17d   :  { %1174 = vst.msk [vmem:[#allocation2 + $0x10] sm:$0xff] %vm1016_vm2, %v748_v39 }
 0x17e   :  { %v725_v2 = vpop.permute.xlu1 %724 }
 0x17f   :  { %v760_v1 = vmul.f32 %v7674_v59, %v725_v2  ;;  %v7682_v2 = vpop.eup %7681 }
 0x180   :  { %v7684_v43 = vpop.eup %7683 }
 0x181   :  { %1186 = vst.msk [vmem:[#allocation2 + $0x70] sm:$0xff] %vm1016_vm2, %v760_v1 }
 0x182   :  { %v703_v61 = vpop.permute.xlu1 %702 }
 0x183   :  { %v749_v41 = vmul.f32 %v7676_v52, %v703_v61 }
 0x184   :  { %v731_v54 = vpop.permute.xlu0 %730  ;;  %v1355_v57 = vld [vmem:[#allocation2 + $0x10] sm:$0xff] }
 0x185   :  { %v763_v49 = vmul.f32 %v7678_v48, %v731_v54  ;;  %1175 = vst.msk [vmem:[#allocation2 + $0x18] sm:$0xff] %vm1016_vm2, %v749_v41  ;;  %v1468_v60 = vmul.f32 %v8662_v7, %v1355_v57  ;;  %v1491_v1 = vld [vmem:[#allocation2 + $0x9] sm:$0xff]  ;;  %v7686_v48 = vpop.eup %7685 }
 0x186   :  { %v713_v39 = vpop.permute.xlu1 %712  ;;  %v1604_v34 = vmul.f32 %v8660_v6, %v1491_v1  ;;  %v7688_v57 = vpop.eup %7687 }
 0x187   :  { %1189 = vst.msk [vmem:[#allocation2 + $0x88] sm:$0xff] %vm1016_vm2, %v763_v49  ;;  %v754_v50 = vmul.f32 %v7680_v62, %v713_v39  ;;  %v1483_v59 = vpack.c.bf16 %v1468_v60, %v1467_v51  ;;  %v7690_v55 = vpop.eup %7689 }
 0x188   :  { %v7692_v60 = vpop.eup %7691 }
 0x189   :  { %1180 = vst.msk [vmem:[#allocation2 + $0x40] sm:$0xff] %vm1016_vm2, %v754_v50  ;;  %2047 = vrot.lane.b32.xlu1 %v1483_v59, %s8168_s0  ;;  %v7694_v29 = vpop.eup %7693 }
 0x18a   :  { %v709_v3 = vpop.permute.xlu1 %708 }
 0x18b   :  { %v752_v52 = vmul.f32 %v7682_v2, %v709_v3  ;;  %v7696_v2 = vpop.eup %7695 }
 0x18c   :  { %v8975_v7 = vld [vmem:[#allocation2 + $0x11] sm:$0xff] }
 0x18d   :  { %1178 = vst.msk [vmem:[#allocation2 + $0x30] sm:$0xff] %vm1016_vm2, %v752_v52  ;;  %v1605_v45 = vmul.f32 %v8664_v8, %v8975_v7  ;;  %v264_v52 = vrot.slane %v8713_v31, %v8716_v32 }
 0x18f   :  { %v1620_v61 = vpack.c.bf16 %v1605_v45, %v1604_v34  ;;  %v409_v34 = vrot.slane %v8713_v31, %v8994_v0 }
 0x191   :  { %2071 = vrot.lane.b32.xlu0 %v1620_v61, %s8169_s21  ;;  %v9000_v45 = vadd.f32 %v409_v34, %v264_v52 }
 0x192   :  { %v727_v41 = vpop.permute.xlu0 %726 }
 0x193   :  { %v761_v44 = vmul.f32 %v7684_v43, %v727_v41 }
 0x194   :  { %v721_v54 = vpop.permute.xlu1 %720 }
 0x195   :  { %1187 = vst.msk [vmem:[#allocation2 + $0x78] sm:$0xff] %vm1016_vm2, %v761_v44  ;;  %v758_v6 = vmul.f32 %v7686_v48, %v721_v54 }
 0x196   :  { %v715_v8 = vpop.permute.xlu0 %714 }
 0x197   :  { %v755_v51 = vmul.f32 %v7688_v57, %v715_v8  ;;  %1184 = vst.msk [vmem:[#allocation2 + $0x60] sm:$0xff] %vm1016_vm2, %v758_v6 }
 0x198   :  { %v717_v40 = vpop.permute.xlu1 %716 }
 0x199   :  { %1181 = vst.msk [vmem:[#allocation2 + $0x48] sm:$0xff] %vm1016_vm2, %v755_v51  ;;  %v756_v49 = vmul.f32 %v7690_v55, %v717_v40 }
 0x19a   :  { %v711_v62 = vpop.permute.xlu0 %710 }
 0x19b   :  { %v753_v39 = vmul.f32 %v7692_v60, %v711_v62  ;;  %1182 = vst.msk [vmem:[#allocation2 + $0x50] sm:$0xff] %vm1016_vm2, %v756_v49 }
 0x19d   :  { %1179 = vst.msk [vmem:[#allocation2 + $0x38] sm:$0xff] %vm1016_vm2, %v753_v39 }
 0x19e   :  { %v723_v50 = vpop.permute.xlu0 %722 }
 0x19f   :  { %v759_v59 = vmul.f32 %v7694_v29, %v723_v50 }
 0x1a1   :  { %1185 = vst.msk [vmem:[#allocation2 + $0x68] sm:$0xff] %vm1016_vm2, %v759_v59 }
 0x1a2   :  { %v719_v3 = vpop.permute.xlu0 %718 }
 0x1a3   :  { %v757_v1 = vmul.f32 %v7696_v2, %v719_v3 }
 0x1a5   :  { %1183 = vst.msk [vmem:[#allocation2 + $0x58] sm:$0xff] %vm1016_vm2, %v757_v1 }
 0x1c0   :  { %v7199_v61 = vpop.f32.mrb[4].mxu1 }
 0x1c1   :  { %v7394_v43 = vadd.f32 %v9000_v45, %v7199_v61  ;;  %v493_v41 = vpop.f32.mrb[5].mxu1 }
 0x1c2   :  { %v7396_v44 = vadd.f32 %v9000_v45, %v493_v41  ;;  %v7200_v48 = vpop.f32.mrb[6].mxu1 }
 0x1c3   :  { %v9005_v54 = vadd.f32 %v7394_v43, %v8728_v36  ;;  %v7398_v6 = vadd.f32 %v9000_v45, %v7200_v48  ;;  %v496_v57 = vpop.f32.mrb[7].mxu1 }
 0x1c4   :  { %v9009_v8 = vadd.f32 %v7396_v44, %v8728_v36  ;;  %v7400_v31 = vadd.f32 %v9000_v45, %v496_v57 }
 0x1c5   :  { %v6576_v51 = vmul.f32 -1.442695, %v9005_v54  ;;  %v9014_v55 = vadd.f32 %v7398_v6, %v8728_v36 }
 0x1c6   :  { %v6574_v40 = vmul.f32 -1.442695, %v9009_v8  ;;  %v9018_v49 = vadd.f32 %v7400_v31, %v8728_v36 }
 0x1c7   :  { %7697 = vpow2.f32 %v6576_v51  ;;  %v6577_v60 = vmul.f32 -1.442695, %v9014_v55 }
 0x1c8   :  { %7699 = vpow2.f32 %v6574_v40  ;;  %v6575_v62 = vmul.f32 -1.442695, %v9018_v49  ;;  %v7203_v39 = vpop.f32.mrb[8].mxu1 }
 0x1c9   :  { %v7402_v29 = vadd.f32 %v9000_v45, %v7203_v39  ;;  %v509_v50 = vpop.f32.mrb[9].mxu1  ;;  %7701 = vpow2.f32 %v6577_v60 }
 0x1ca   :  { %v7404_v59 = vadd.f32 %v9000_v45, %v509_v50  ;;  %v7204_v2 = vpop.f32.mrb[10].mxu1  ;;  %7703 = vpow2.f32 %v6575_v62  ;;  %v7553_v62 = vld [vmem:[%s11611_s10] sm:$0xff]  }
 0x1cb   :  { %v9025_v3 = vadd.f32 %v7402_v29, %v8728_v36  ;;  %v7406_v1 = vadd.f32 %v9000_v45, %v7204_v2  ;;  %v512_v52 = vpop.f32.mrb[11].mxu1  ;;  %7213 = vmatprep.subr.bf16.mxu0 %v7553_v62 }
 0x1cc   :  { %v9029_v34 = vadd.f32 %v7404_v59, %v8728_v36  ;;  %v7408_v61 = vadd.f32 %v9000_v45, %v512_v52  ;;  %v7554_v52 = vld [vmem:[%s11612_s7] sm:$0xff]   ;;  %7214 = vmatpush3.bf16.msra.mxu0 %v7553_v62 }
 0x1cd   :  { %v6580_v43 = vmul.f32 -1.442695, %v9025_v3  ;;  %v9034_v41 = vadd.f32 %v7406_v1, %v8728_v36  ;;  %2341 = vmatpush1.bf16.msra.mxu1 %v7554_v52 }
 0x1ce   :  { %v6578_v44 = vmul.f32 -1.442695, %v9029_v34  ;;  %v9038_v48 = vadd.f32 %v7408_v61, %v8728_v36 }
 0x1cf   :  { %7705 = vpow2.f32 %v6580_v43  ;;  %v6581_v6 = vmul.f32 -1.442695, %v9034_v41 }
 0x1d0   :  { %v6579_v57 = vmul.f32 -1.442695, %v9038_v48  ;;  %v7207_v31 = vpop.f32.mrb[12].mxu1  ;;  %7707 = vpow2.f32 %v6578_v44 }
 0x1d1   :  { %v7698_v51 = vpop.eup %7697  ;;  %v7410_v40 = vadd.f32 %v9000_v45, %v7207_v31  ;;  %v525_v60 = vpop.f32.mrb[13].mxu1  ;;  %7709 = vpow2.f32 %v6581_v6  ;;  %v7555_v31 = vld [vmem:[%s11612_s7 + $0x8] sm:$0xff]  }
 0x1d2   :  { %v7700_v39 = vpop.eup %7699  ;;  %v862_v29 = vadd.f32 1.0, %v7698_v51  ;;  %v7412_v36 = vadd.f32 %v9000_v45, %v525_v60  ;;  %v7208_v50 = vpop.f32.mrb[14].mxu1 }
 0x1d3   :  { %v860_v59 = vadd.f32 1.0, %v7700_v39  ;;  %v9048_v2 = vadd.f32 %v7410_v40, %v8731_v37  ;;  %v528_v1 = vpop.f32.mrb[15].mxu1  ;;  %v7702_v61 = vpop.eup %7701  ;;  %v7414_v6 = vadd.f32 %v9000_v45, %v7208_v50  ;;  %v11696_v39 = vmov 0  }
 0x1d4   :  { %7711 = vrcp.f32 %v862_v29  ;;  %v9054_v43 = vadd.f32 %v7412_v36, %v8731_v37  ;;  %v863_v44 = vadd.f32 1.0, %v7702_v61  ;;  %v7704_v51 = vpop.eup %7703  ;;  %v7416_v60 = vadd.f32 %v9000_v45, %v528_v1  ;;  %2342 = vmatprep.subr.bf16.mxu1 %v11696_v39 }
 0x1d5   :  { %7713 = vrcp.f32 %v860_v59  ;;  %v6584_v40 = vmul.f32 -1.442695, %v9048_v2  ;;  %v861_v29 = vadd.f32 1.0, %v7704_v51  ;;  %v9065_v50 = vadd.f32 %v7414_v6, %v8731_v37  ;;  %2343 = vmatpush1.bf16.msra.mxu1 %v7555_v31 }
 0x1d6   :  { %7715 = vpow2.f32 %v6579_v57  ;;  %v6582_v62 = vmul.f32 -1.442695, %v9054_v43  ;;  %v7556_v57 = vld [vmem:[%s11612_s7 + $0x10] sm:$0xff]   ;;  %v9072_v51 = vadd.f32 %v7416_v60, %v8731_v37  ;;  %2344 = vmatprep.subr.bf16.mxu1 %v11696_v39 }
 0x1d7   :  { %7717 = vrcp.f32 %v863_v44 }
 0x1d8   :  { %v7211_v36 = vpop.f32.mrb[16].mxu1  ;;  %7719 = vpow2.f32 %v6584_v40  ;;  %v7557_v40 = vld [vmem:[%s11611_s10 + $0x8] sm:$0xff]  }
 0x1d9   :  { %v7706_v59 = vpop.eup %7705  ;;  %v7418_v52 = vadd.f32 %v9000_v45, %v7211_v36  ;;  %v541_v61 = vpop.f32.mrb[17].mxu1  ;;  %7721 = vrcp.f32 %v861_v29  ;;  %2345 = vmatpush1.bf16.msra.mxu1 %v7556_v57  ;;  %v7558_v29 = vld [vmem:[%s11612_s7 + $0x18] sm:$0xff]   ;;  %7215 = vmatprep.subr.bf16.mxu0 %v7557_v40 }
 0x1da   :  { %v866_v1 = vadd.f32 1.0, %v7706_v59  ;;  %v7212_v0 = vpop.f32.mrb[18].mxu1  ;;  %v7708_v44 = vpop.eup %7707  ;;  %v7420_v31 = vadd.f32 %v9000_v45, %v541_v61  ;;  %v6585_v59 = vmul.f32 -1.442695, %v9065_v50  ;;  %2346 = vmatprep.subr.bf16.mxu1 %v11696_v39  ;;  %7216 = vmatpush3.bf16.msra.mxu0 %v7557_v40 }
 0x1db   :  { %v544_v32 = vpop.f32.mrb[19].mxu1  ;;  %v7710_v6 = vpop.eup %7709  ;;  %v9076_v36 = vadd.f32 %v7418_v52, %v8731_v37  ;;  %v7422_v27 = vadd.f32 %v9000_v45, %v7212_v0  ;;  %v6583_v52 = vmul.f32 -1.442695, %v9072_v51  ;;  %v864_v61 = vadd.f32 1.0, %v7708_v44 }
 0x1dc   :  { %7723 = vrcp.f32 %v866_v1  ;;  %v867_v60 = vadd.f32 1.0, %v7710_v6  ;;  %v9092_v6 = vadd.f32 %v7420_v31, %v8731_v37 }
 0x1dd   :  { %7725 = vpow2.f32 %v6582_v62  ;;  %v6588_v57 = vmul.f32 -1.442695, %v9076_v36  ;;  %v9095_v63 = vadd.f32 %v7422_v27, %v8731_v37  ;;  %v7424_v62 = vadd.f32 %v9000_v45, %v544_v32  ;;  %2347 = vmatpush1.bf16.msra.mxu1 %v7558_v29 }
 0x1de   :  { %v7712_v4 = vpop.eup %7711  ;;  %7727 = vrcp.f32 %v867_v60  ;;  %2348 = vmatprep.subr.bf16.mxu1 %v11696_v39  ;;  %v6586_v27 = vmul.f32 -1.442695, %v9092_v6  ;;  %v7560_v60 = vld [vmem:[%s11612_s7 + $0x28] sm:$0xff]  }
 0x1df   :  { %v7714_v0 = vpop.eup %7713  ;;  %928 = vrot.lane.b32.xlu1 %v7712_v4, %s8167_s19  ;;  %7729 = vpow2.f32 %v6585_v59  ;;  %v7559_v4 = vld [vmem:[%s11612_s7 + $0x20] sm:$0xff]   ;;  %v6589_v40 = vmul.f32 -1.442695, %v9095_v63  ;;  %v9106_v32 = vadd.f32 %v7424_v62, %v8731_v37  ;;  %v7562_v62 = vld [vmem:[%s11612_s7 + $0x38] sm:$0xff]  }
 0x1e0   :  { %v7716_v1 = vpop.eup %7715  ;;  %924 = vrot.lane.b32.xlu0 %v7714_v0, %s8167_s19 }
 0x1e1   :  { %v865_v42 = vadd.f32 1.0, %v7716_v1  ;;  %v7718_v44 = vpop.eup %7717  ;;  %2349 = vmatpush1.bf16.msra.mxu1 %v7559_v4 }
 0x1e2   :  { %v7720_v31 = vpop.eup %7719  ;;  %2350 = vmatprep.subr.bf16.mxu1 %v11696_v39 }
 0x1e3   :  { %7731 = vrcp.f32 %v865_v42  ;;  %v870_v45 = vadd.f32 1.0, %v7720_v31  ;;  %v7722_v59 = vpop.eup %7721 }
 0x1e4   :  { %7733 = vpow2.f32 %v6583_v52  ;;  %930 = vrot.lane.b32.xlu0 %v7718_v44, %s8167_s19  ;;  %v6587_v52 = vmul.f32 -1.442695, %v9106_v32 }
 0x1e5   :  { %7735 = vrcp.f32 %v864_v61  ;;  %2351 = vmatpush1.bf16.msra.mxu1 %v7560_v60  ;;  %v7561_v61 = vld [vmem:[%s11612_s7 + $0x30] sm:$0xff]   ;;  %v7563_v60 = vld [vmem:[%s11612_s7 + $0x40] sm:$0xff]  }
 0x1e6   :  { %7737 = vpow2.f32 %v6588_v57  ;;  %v7724_v42 = vpop.eup %7723  ;;  %2352 = vmatprep.subr.bf16.mxu1 %v11696_v39 }
 0x1e7   :  { %v7726_v29 = vpop.eup %7725  ;;  %7739 = vrcp.f32 %v870_v45 }
 0x1e8   :  { %926 = vrot.lane.b32.xlu0 %v7722_v59, %s8167_s19  ;;  %v7728_v37 = vpop.eup %7727  ;;  %v868_v0 = vadd.f32 1.0, %v7726_v29  ;;  %7741 = vpow2.f32 %v6586_v27 }
 0x1e9   :  { %938 = vrot.lane.b32.xlu1 %v7728_v37, %s8167_s19  ;;  %v7730_v1 = vpop.eup %7729  ;;  %7743 = vpow2.f32 %v6589_v40  ;;  %2353 = vmatpush1.bf16.msra.mxu1 %v7561_v61  ;;  %v7564_v61 = vld [vmem:[%s11612_s7 + $0x48] sm:$0xff]  }
 0x1ea   :  { %v871_v57 = vadd.f32 1.0, %v7730_v1  ;;  %7745 = vrcp.f32 %v868_v0  ;;  %2354 = vmatprep.subr.bf16.mxu1 %v11696_v39 }
 0x1ec   :  { %936 = vrot.lane.b32.xlu0 %v7724_v42, %s8167_s19  ;;  %7747 = vrcp.f32 %v871_v57 }
 0x1ed   :  { %v7732_v4 = vpop.eup %7731  ;;  %7749 = vpow2.f32 %v6587_v52  ;;  %2355 = vmatpush1.bf16.msra.mxu1 %v7562_v62 }
 0x1ee   :  { %v7734_v44 = vpop.eup %7733  ;;  %934 = vrot.lane.b32.xlu1 %v7732_v4, %s8167_s19  ;;  %2356 = vmatprep.subr.bf16.mxu1 %v11696_v39  ;;  %v7565_v4 = vld [vmem:[%s11612_s7 + $0x50] sm:$0xff]  }
 0x1ef   :  { %v7736_v31 = vpop.eup %7735  ;;  %v869_v27 = vadd.f32 1.0, %v7734_v44 }
 0x1f0   :  { %v7738_v45 = vpop.eup %7737  ;;  %932 = vrot.lane.b32.xlu0 %v7736_v31, %s8167_s19 }
 0x1f1   :  { %v874_v40 = vadd.f32 1.0, %v7738_v45  ;;  %v7740_v59 = vpop.eup %7739  ;;  %7751 = vrcp.f32 %v869_v27  ;;  %2357 = vmatpush1.bf16.msra.mxu1 %v7563_v60  ;;  %v9143_v27 = vld [vmem:[#allocation2 + $0x17] sm:$0xff]  ;;  %v9147_v45 = vld [vmem:[#allocation2 + $0xf] sm:$0xff] }
 0x1f2   :  { %v7742_v42 = vpop.eup %7741  ;;  %2358 = vmatprep.subr.bf16.mxu1 %v11696_v39  ;;  %v1742_v60 = vmul.f32 %v8672_v12, %v9143_v27 }
 0x1f3   :  { %7753 = vrcp.f32 %v874_v40  ;;  %v872_v29 = vadd.f32 1.0, %v7742_v42  ;;  %v7744_v52 = vpop.eup %7743  ;;  %v7566_v40 = vld [vmem:[%s11612_s7 + $0x58] sm:$0xff]   ;;  %v1741_v42 = vmul.f32 %v8670_v11, %v9147_v45 }
 0x1f4   :  { %944 = vrot.lane.b32.xlu0 %v7740_v59, %s8167_s19  ;;  %v7746_v37 = vpop.eup %7745  ;;  %v875_v0 = vadd.f32 1.0, %v7744_v52  ;;  %v1903_v52 = vld [vmem:[#allocation2 + $0x19] sm:$0xff] }
 0x1f5   :  { %7755 = vrcp.f32 %v872_v29  ;;  %2359 = vmatpush1.bf16.msra.mxu1 %v7564_v61  ;;  %v2016_v61 = vmul.f32 %v8668_v10, %v1903_v52  ;;  %v1238_v10 = vld [vmem:[%s11651_s26 + $0x20] sm:$0xff] }
 0x1f6   :  { %v7748_v1 = vpop.eup %7747  ;;  %7757 = vrcp.f32 %v875_v0  ;;  %2360 = vmatprep.subr.bf16.mxu1 %v11696_v39  ;;  %v2015_v0 = vmul.f32 %v8666_v9, %v8975_v7  ;;  %v1606_v9 = vmul.f32 %v1903_v52, %v8678_v15  ;;  %v9175_v7 = vld [vmem:[#allocation2 + $0x1f] sm:$0xff] }
 0x1f7   :  { %v7750_v57 = vpop.eup %7749  ;;  %946 = vrot.lane.b32.xlu1 %v7748_v1, %s8167_s19  ;;  %v1239_v1 = vld [vmem:[%s11651_s26 + $0x28] sm:$0xff]  ;;  %v6654_v15 = vld [vmem:[%s11651_s26 + $0x220] sm:$0xff] }
 0x1f8   :  { %940 = vrot.lane.b32.xlu0 %v7746_v37, %s8167_s19  ;;  %v873_v62 = vadd.f32 1.0, %v7750_v57  ;;  %v1757_v37 = vpack.c.bf16 %v1742_v60, %v1741_v42  ;;  %v2031_v11 = vpack.c.bf16 %v2016_v61, %v2015_v0  ;;  %v6655_v57 = vld [vmem:[%s11651_s26 + $0x228] sm:$0xff]  ;;  %v1743_v60 = vmul.f32 %v8686_v19, %v9175_v7 }
 0x1f9   :  { %2361 = vmatpush1.bf16.msra.mxu1 %v7565_v4 }
 0x1fa   :  { %7759 = vrcp.f32 %v873_v62  ;;  %2362 = vmatprep.subr.bf16.mxu1 %v11696_v39  ;;  %v1494_v62 = vld [vmem:[#allocation2 + $0x21] sm:$0xff] }
 0x1fb   :  { %v7752_v44 = vpop.eup %7751  ;;  %v1607_v4 = vmul.f32 %v8680_v16, %v1494_v62  ;;  %v2017_v61 = vmul.f32 %v8682_v17, %v1494_v62  ;;  %v9214_v17 = vld [vmem:[#allocation2 + $0x37] sm:$0xff]  ;;  %7761 = vtanh.f32 %v9005_v54 }
 0x1fc   :  { %942 = vrot.lane.b32.xlu1 %v7752_v44, %s8167_s19  ;;  %v9178_v44 = vld [vmem:[#allocation2 + $0x18] sm:$0xff]  ;;  %v9216_v62 = vld [vmem:[#allocation2 + $0x30] sm:$0xff]  ;;  %7763 = vtanh.f32 %v9014_v55  ;;  %v9329_v55 = vld [vmem:[#allocation2 + $0x67] sm:$0xff] }
 0x1fd   :  { %v7754_v31 = vpop.eup %7753  ;;  %2363 = vmatpush1.bf16.msra.mxu1 %v7566_v40  ;;  %v1621_v40 = vpack.c.bf16 %v1607_v4, %v1606_v9  ;;  %v1469_v42 = vmul.f32 %v8674_v13, %v9178_v44  ;;  %v1241_v13 = vld [vmem:[%s11651_s26 + $0x38] sm:$0xff]  ;;  %v9225_v4 = vld [vmem:[#allocation2 + $0x28] sm:$0xff]  ;;  %7765 = vtanh.f32 %v9009_v8 }
 0x1fe   :  { %952 = vrot.lane.b32.xlu0 %v7754_v31, %s8167_s19  ;;  %4848 = vmatprep.subr.bf16.mxu1 %v11696_v39  ;;  %v9180_v31 = vld [vmem:[#allocation2 + $0x27] sm:$0xff]  ;;  %7767 = vtanh.f32 %v9018_v49  ;;  %v11709_v8 = vld [vmem:[#allocation19_spill] sm:$0xff]  ;;  %v1752_v49 = vmul.f32 %v8900_v58, %v9329_v55 }
 0x1ff   :  { %v7756_v59 = vpop.eup %7755  ;;  %v1744_v16 = vmul.f32 %v8688_v20, %v9180_v31  ;;  %v1496_v20 = vld [vmem:[#allocation2 + $0x31] sm:$0xff]  ;;  %7769 = vtanh.f32 %v9025_v3 }
 0x200   :  { %v7758_v29 = vpop.eup %7757  ;;  %7771 = vtanh.f32 %v9034_v41 }
 0x201   :  { %954 = vrot.lane.b32.xlu1 %v7758_v29, %s8167_s19  ;;  %v1905_v29 = vld [vmem:[#allocation2 + $0x29] sm:$0xff]  ;;  %v1758_v19 = vpack.c.bf16 %v1744_v16, %v1743_v60  ;;  %v1907_v60 = vld [vmem:[#allocation2 + $0x39] sm:$0xff]  ;;  %7773 = vtanh.f32 %v9029_v34 }
 0x202   :  { %948 = vrot.lane.b32.xlu0 %v7756_v59, %s8167_s19  ;;  %v9187_v59 = vld [vmem:[#allocation2 + $0x20] sm:$0xff]  ;;  %v2018_v0 = vmul.f32 %v8684_v18, %v1905_v29  ;;  %v1608_v18 = vmul.f32 %v1905_v29, %v8694_v23  ;;  %v1746_v23 = vmul.f32 %v8725_v35, %v9214_v17  ;;  %v2019_v35 = vmul.f32 %v8698_v26, %v1496_v20  ;;  %v1243_v29 = vld [vmem:[%s11651_s26 + $0x48] sm:$0xff]  ;;  %v6665_v34 = vld [vmem:[%s11651_s26 + $0x278] sm:$0xff] }
 0x203   :  { %v1470_v52 = vmul.f32 %v8676_v14, %v9187_v59  ;;  %v6657_v14 = vld [vmem:[%s11651_s26 + $0x238] sm:$0xff]  ;;  %v2020_v16 = vmul.f32 %v8703_v28, %v1907_v60  ;;  %v1610_v26 = vmul.f32 %v1907_v60, %v8774_v5  ;;  %v1242_v28 = vld [vmem:[%s11651_s26 + $0x40] sm:$0xff]  ;;  %7775 = vtanh.f32 %v9038_v48 }
 0x204   :  { %v7760_v12 = vpop.eup %7759  ;;  %v6658_v5 = vld [vmem:[%s11651_s26 + $0x240] sm:$0xff]  ;;  %7777 = vtanh.f32 %v9048_v2  ;;  %v6664_v2 = vld [vmem:[%s11651_s26 + $0x270] sm:$0xff] }
 0x205   :  { %950 = vrot.lane.b32.xlu1 %v7760_v12, %s8167_s19  ;;  %v2032_v12 = vpack.c.bf16 %v2018_v0, %v2017_v61  ;;  %v9252_v61 = vld [vmem:[#allocation2 + $0x47] sm:$0xff]  ;;  %7779 = vtanh.f32 %v9065_v50 }
 0x206   :  { %2095 = vrot.lane.b32.xlu0 %v1757_v37, %s8167_s19  ;;  %v1484_v37 = vpack.c.bf16 %v1470_v52, %v1469_v42  ;;  %v1498_v52 = vld [vmem:[#allocation2 + $0x41] sm:$0xff]  ;;  %7781 = vtanh.f32 %v9054_v43 }
 0x207   :  { %7783 = vtanh.f32 %v9072_v51  ;;  %v11722_v51 = vld [vmem:[#allocation39_spill] sm:$0xff] }
 0x208   :  { %7785 = vtanh.f32 %v9076_v36 }
 0x209   :  { %2119 = vrot.lane.b32.xlu1 %v2031_v11, %s8168_s0  ;;  %v1240_v11 = vld [vmem:[%s11651_s26 + $0x30] sm:$0xff]  ;;  %7787 = vtanh.f32 %v9095_v63 }
 0x20a   :  { %1277 = vperm.xlu0 %7546, %v1239_v1   ;;  %v1609_v1 = vmul.f32 %v8696_v25, %v1496_v20  ;;  %v6656_v25 = vld [vmem:[%s11651_s26 + $0x230] sm:$0xff]  ;;  %7789 = vtanh.f32 %v9092_v6  ;;  %v6705_v6 = vld [vmem:[%s11613_s13 + $0x98] sm:$0xff] }
 0x20b   :  { %7791 = vtanh.f32 %v9106_v32  ;;  %v6702_v32 = vld [vmem:[%s11613_s13 + $0x80] sm:$0xff] }
 0x20c   :  { %v1622_v9 = vpack.c.bf16 %v1609_v1, %v1608_v18  ;;  %v11698_v18 = vld [vmem:[#allocation7_spill] sm:$0xff] }
 0x20d   :  { %1272 = vperm.xlu1 %7545, %v1238_v10  }
 0x20e   :  { %1825 = vperm.xlu0 %7546, %v6655_v57   ;;  %v9212_v57 = vld [vmem:[#allocation2 + $0x2f] sm:$0xff] }
 0x20f   :  { %v1745_v10 = vmul.f32 %v8708_v30, %v9212_v57 }
 0x211   :  { %1820 = vperm.xlu1 %7545, %v6654_v15   ;;  %v1471_v15 = vmul.f32 %v8690_v21, %v9225_v4  ;;  %v1759_v30 = vpack.c.bf16 %v1746_v23, %v1745_v10  ;;  %v6659_v21 = vld [vmem:[%s11651_s26 + $0x248] sm:$0xff]  ;;  %v11699_v10 = vld [vmem:[#allocation8_spill] sm:$0xff] }
 0x212   :  { %2073 = vrot.lane.b32.xlu0 %v1621_v40, %s8169_s21  ;;  %v1472_v40 = vmul.f32 %v8692_v22, %v9216_v62  ;;  %v2033_v22 = vpack.c.bf16 %v2020_v16, %v2019_v35  ;;  %v6661_v16 = vld [vmem:[%s11651_s26 + $0x258] sm:$0xff] }
 0x214   :  { %v1485_v42 = vpack.c.bf16 %v1472_v40, %v1471_v15  ;;  %v11700_v40 = vld [vmem:[#allocation11_spill] sm:$0xff] }
 0x215   :  { %2049 = vrot.lane.b32.xlu1 %v1484_v37, %s8168_s0  ;;  %v11697_v37 = vld [vmem:[#allocation9_spill] sm:$0xff]  ;;  %v1245_v15 = vld [vmem:[%s11651_s26 + $0x58] sm:$0xff] }
 0x216   :  { %2097 = vrot.lane.b32.xlu0 %v1758_v19, %s8167_s19  ;;  %v9247_v19 = vld [vmem:[#allocation2 + $0x3f] sm:$0xff]  ;;  %v1611_v0 = vmul.f32 %v11697_v37, %v1498_v52  ;;  %v9288_v37 = vld [vmem:[#allocation2 + $0x50] sm:$0xff] }
 0x218   :  { %v1623_v20 = vpack.c.bf16 %v1611_v0, %v1610_v26  ;;  %v1244_v26 = vld [vmem:[%s11651_s26 + $0x50] sm:$0xff] }
 0x219   :  { %2121 = vrot.lane.b32.xlu1 %v2032_v12, %s8168_s0  ;;  %v1747_v12 = vmul.f32 %v8814_v53, %v9247_v19 }
 0x21a   :  { %1287 = vperm.xlu0 %7546, %v1241_v13   ;;  %v9250_v13 = vld [vmem:[#allocation2 + $0x38] sm:$0xff] }
 0x21b   :  { %v1473_v1 = vmul.f32 %v11698_v18, %v9250_v13 }
 0x21d   :  { %1282 = vperm.xlu1 %7545, %v1240_v11   ;;  %v1748_v11 = vmul.f32 %v8817_v46, %v9252_v61  ;;  %v1500_v46 = vld [vmem:[#allocation2 + $0x51] sm:$0xff] }
 0x21e   :  { %1835 = vperm.xlu0 %7546, %v6657_v14   ;;  %v9259_v14 = vld [vmem:[#allocation2 + $0x40] sm:$0xff] }
 0x21f   :  { %v1474_v23 = vmul.f32 %v11699_v10, %v9259_v14  ;;  %v1760_v53 = vpack.c.bf16 %v1748_v11, %v1747_v12  ;;  %v11705_v11 = vld [vmem:[#allocation13_spill] sm:$0xff]  ;;  %v1911_v10 = vld [vmem:[#allocation2 + $0x59] sm:$0xff] }
 0x221   :  { %1830 = vperm.xlu1 %7545, %v6656_v25   ;;  %v1486_v25 = vpack.c.bf16 %v1474_v23, %v1473_v1  ;;  %v9297_v1 = vld [vmem:[#allocation2 + $0x48] sm:$0xff]  ;;  %v11706_v23 = vld [vmem:[#allocation12_spill] sm:$0xff] }
 0x222   :  { %2075 = vrot.lane.b32.xlu0 %v1622_v9, %s8169_s21  ;;  %v1909_v9 = vld [vmem:[#allocation2 + $0x49] sm:$0xff] }
 0x223   :  { %v2022_v60 = vmul.f32 %v11700_v40, %v1909_v9 }
 0x225   :  { %2051 = vrot.lane.b32.xlu1 %v1485_v42, %s8168_s0 }
 0x226   :  { %2099 = vrot.lane.b32.xlu0 %v1759_v30, %s8167_s19  ;;  %v11701_v30 = vld [vmem:[#allocation10_spill] sm:$0xff] }
 0x227   :  { %v2021_v42 = vmul.f32 %v11701_v30, %v1498_v52  ;;  %v9286_v52 = vld [vmem:[#allocation2 + $0x57] sm:$0xff]  ;;  %v11708_v30 = vld [vmem:[#allocation16_spill] sm:$0xff] }
 0x229   :  { %2123 = vrot.lane.b32.xlu1 %v2033_v22, %s8168_s0  ;;  %v2034_v35 = vpack.c.bf16 %v2022_v60, %v2021_v42  ;;  %v11707_v60 = vld [vmem:[#allocation15_spill] sm:$0xff]  ;;  %v2024_v42 = vmul.f32 %v11708_v30, %v1911_v10 }
 0x22a   :  { %1297 = vperm.xlu0 %7546, %v1243_v29   ;;  %v11702_v29 = vld [vmem:[#allocation14_spill] sm:$0xff] }
 0x22b   :  { %v1612_v22 = vmul.f32 %v1909_v9, %v11702_v29  ;;  %v1476_v9 = vmul.f32 %v11705_v11, %v9288_v37  ;;  %v6663_v29 = vld [vmem:[%s11651_s26 + $0x268] sm:$0xff] }
 0x22d   :  { %1292 = vperm.xlu1 %7545, %v1242_v28   ;;  %v9284_v28 = vld [vmem:[#allocation2 + $0x4f] sm:$0xff] }
 0x22e   :  { %1845 = vperm.xlu0 %7546, %v6659_v21   ;;  %v1613_v21 = vmul.f32 %v8853_v38, %v1500_v46  ;;  %v6660_v38 = vld [vmem:[%s11651_s26 + $0x250] sm:$0xff] }
 0x230   :  { %v1624_v0 = vpack.c.bf16 %v1613_v21, %v1612_v22  ;;  %v1502_v22 = vld [vmem:[#allocation2 + $0x61] sm:$0xff] }
 0x231   :  { %1840 = vperm.xlu1 %7545, %v6658_v5   ;;  %v11704_v5 = vld [vmem:[#allocation18_spill] sm:$0xff]  ;;  %v1246_v21 = vld [vmem:[%s11651_s26 + $0x60] sm:$0xff]  ;;  %v1615_v54 = vmul.f32 %v8887_v47, %v1502_v22 }
 0x232   :  { %2077 = vrot.lane.b32.xlu0 %v1623_v20, %s8169_s21  ;;  %v11703_v20 = vld [vmem:[#allocation17_spill] sm:$0xff]  ;;  %v1750_v18 = vmul.f32 %v11704_v5, %v9286_v52  ;;  %v9339_v47 = vld [vmem:[#allocation2 + $0x60] sm:$0xff] }
 0x233   :  { %v1749_v12 = vmul.f32 %v11703_v20, %v9284_v28  ;;  %v9327_v20 = vld [vmem:[#allocation2 + $0x58] sm:$0xff] }
 0x235   :  { %2053 = vrot.lane.b32.xlu1 %v1486_v25, %s8168_s0  ;;  %v1761_v25 = vpack.c.bf16 %v1750_v18, %v1749_v12  ;;  %v6662_v18 = vld [vmem:[%s11651_s26 + $0x260] sm:$0xff] }
 0x236   :  { %2101 = vrot.lane.b32.xlu0 %v1760_v53, %s8167_s19  ;;  %v1475_v53 = vmul.f32 %v11706_v23, %v9297_v1 }
 0x238   :  { %v1487_v40 = vpack.c.bf16 %v1476_v9, %v1475_v53  ;;  %v1913_v9 = vld [vmem:[#allocation2 + $0x69] sm:$0xff] }
 0x239   :  { %2125 = vrot.lane.b32.xlu1 %v2034_v35, %s8168_s0  ;;  %v1247_v35 = vld [vmem:[%s11651_s26 + $0x68] sm:$0xff] }
 0x23a   :  { %1307 = vperm.xlu0 %7546, %v1245_v15   ;;  %v2023_v15 = vmul.f32 %v11707_v60, %v1500_v46  ;;  %v1614_v46 = vmul.f32 %v1911_v10, %v8885_v33  ;;  %v9332_v33 = vpop.permute.xlu1 %2047 }
 0x23c   :  { %v1625_v12 = vpack.c.bf16 %v1615_v54, %v1614_v46 }
 0x23d   :  { %1302 = vperm.xlu1 %7545, %v1244_v26   ;;  %v9321_v26 = vld [vmem:[#allocation2 + $0x5f] sm:$0xff] }
 0x23e   :  { %1855 = vperm.xlu0 %7546, %v6661_v16   ;;  %v2035_v16 = vpack.c.bf16 %v2024_v42, %v2023_v15  ;;  %v1751_v5 = vmul.f32 %v8897_v56, %v9321_v26  ;;  %v11710_v56 = vld [vmem:[#allocation20_spill] sm:$0xff]  ;;  %v11711_v15 = vld [vmem:[#allocation21_spill] sm:$0xff]  ;;  %v11712_v42 = vld [vmem:[#allocation22_spill] sm:$0xff] }
 0x23f   :  { %v1478_v10 = vmul.f32 %v11710_v56, %v9339_v47  ;;  %v2025_v30 = vmul.f32 %v11711_v15, %v1502_v22  ;;  %v1248_v56 = vld [vmem:[%s11651_s26 + $0x70] sm:$0xff]  ;;  %v9371_v15 = vld [vmem:[#allocation2 + $0x68] sm:$0xff] }
 0x240   :  { %v1762_v53 = vpack.c.bf16 %v1752_v49, %v1751_v5 }
 0x241   :  { %1850 = vperm.xlu1 %7545, %v6660_v38   ;;  %v1477_v38 = vmul.f32 %v11709_v8, %v9327_v20 }
 0x242   :  { %2079 = vrot.lane.b32.xlu0 %v1624_v0, %s8169_s21  ;;  %v9323_v0 = vpop.permute.xlu0 %2071 }
 0x243   :  { %v1488_v60 = vpack.c.bf16 %v1478_v10, %v1477_v38  ;;  %v11713_v38 = vld [vmem:[#allocation25_spill] sm:$0xff] }
 0x244   :  { %v1616_v48 = vmul.f32 %v1913_v9, %v11713_v38  ;;  %v1506_v38 = vld [vmem:[#allocation2 + $0x81] sm:$0xff] }
 0x245   :  { %2055 = vrot.lane.b32.xlu1 %v1487_v40, %s8168_s0 }
 0x246   :  { %2103 = vrot.lane.b32.xlu0 %v1761_v25, %s8167_s19  ;;  %v7762_v25 = vpop.eup %7761 }
 0x247   :  { %v7764_v40 = vpop.eup %7763 }
 0x249   :  { %2127 = vrot.lane.b32.xlu1 %v2035_v16, %s8168_s0  ;;  %v1249_v16 = vld [vmem:[%s11651_s26 + $0x78] sm:$0xff] }
 0x24a   :  { %1317 = vperm.xlu0 %7546, %v1247_v35   ;;  %v2026_v35 = vmul.f32 %v11712_v42, %v1913_v9  ;;  %v9374_v9 = vld [vmem:[#allocation2 + $0x77] sm:$0xff] }
 0x24d   :  { %1312 = vperm.xlu1 %7545, %v1246_v21   ;;  %v2036_v21 = vpack.c.bf16 %v2026_v35, %v2025_v30 }
 0x24e   :  { %1865 = vperm.xlu0 %7546, %v6663_v29   ;;  %v7766_v29 = vpop.eup %7765 }
 0x24f   :  { %v7768_v22 = vpop.eup %7767 }
 0x250   :  { %v7770_v49 = vpop.eup %7769 }
 0x251   :  { %1860 = vperm.xlu1 %7545, %v6662_v18   ;;  %v929_v23 = vpop.permute.xlu1 %928  ;;  %v1504_v18 = vld [vmem:[#allocation2 + $0x71] sm:$0xff] }
 0x252   :  { %2081 = vrot.lane.b32.xlu0 %v1625_v12, %s8169_s21  ;;  %v925_v11 = vpop.permute.xlu0 %924  ;;  %v974_v3 = vmul.f32 %v7762_v25, %v929_v23  ;;  %v9367_v23 = vld [vmem:[#allocation2 + $0x6f] sm:$0xff] }
 0x253   :  { %v972_v12 = vmul.f32 %v7766_v29, %v925_v11  ;;  %v7772_v11 = vpop.eup %7771  ;;  %v11714_v25 = vld [vmem:[#allocation26_spill] sm:$0xff] }
 0x255   :  { %2057 = vrot.lane.b32.xlu1 %v1488_v60, %s8168_s0 }
 0x256   :  { %2105 = vrot.lane.b32.xlu0 %v1762_v53, %s8167_s19  ;;  %v931_v58 = vpop.permute.xlu0 %930 }
 0x257   :  { %v975_v41 = vmul.f32 %v7764_v40, %v931_v58  ;;  %v1617_v40 = vmul.f32 %v11714_v25, %v1504_v18  ;;  %v11715_v58 = vld [vmem:[#allocation29_spill] sm:$0xff] }
 0x259   :  { %v993_v46 = vpack.c.bf16 %v975_v41, %v974_v3  ;;  %2129 = vrot.lane.b32.xlu1 %v2036_v21, %s8168_s0  ;;  %v1626_v35 = vpack.c.bf16 %v1617_v40, %v1616_v48  ;;  %v1753_v3 = vmul.f32 %v11715_v58, %v9367_v23  ;;  %v7774_v41 = vpop.eup %7773  ;;  %v11718_v48 = vld [vmem:[#allocation24_spill] sm:$0xff]  ;;  %v11719_v40 = vld [vmem:[#allocation27_spill] sm:$0xff] }
 0x25a   :  { %1327 = vperm.xlu0 %7546, %v1249_v16   ;;  %v927_v54 = vpop.permute.xlu0 %926  ;;  %v9383_v16 = vld [vmem:[#allocation2 + $0x70] sm:$0xff]  ;;  %v7776_v21 = vpop.eup %7775 }
 0x25b   :  { %v973_v5 = vmul.f32 %v7768_v22, %v927_v54  ;;  %v939_v8 = vpop.permute.xlu1 %938  ;;  %v1915_v22 = vld [vmem:[#allocation2 + $0x79] sm:$0xff] }
 0x25c   :  { %v979_v60 = vmul.f32 %v7772_v11, %v939_v8  ;;  %v11716_v54 = vld [vmem:[#allocation23_spill] sm:$0xff] }
 0x25d   :  { %v992_v10 = vpack.c.bf16 %v973_v5, %v972_v12  ;;  %1322 = vperm.xlu1 %7545, %v1248_v56   ;;  %v1479_v12 = vmul.f32 %v11716_v54, %v9371_v15  ;;  %v11717_v5 = vld [vmem:[#allocation30_spill] sm:$0xff] }
 0x25e   :  { %1875 = vperm.xlu0 %7546, %v6665_v34   ;;  %v937_v53 = vpop.permute.xlu0 %936  ;;  %v1754_v34 = vmul.f32 %v11717_v5, %v9374_v9 }
 0x25f   :  { %v978_v30 = vmul.f32 %v7770_v49, %v937_v53  ;;  %7217 = vmatprep.mubr.msk.bf16.mxu0 %vm1016_vm2, %v992_v10  ;;  %v1480_v49 = vmul.f32 %v11718_v48, %v9383_v16  ;;  %v1618_v10 = vmul.f32 %v1915_v22, %v8926_v24  ;;  %v9395_v53 = vld [vmem:[#allocation2 + $0x7f] sm:$0xff] }
 0x260   :  { %v935_v42 = vpop.permute.xlu1 %934  ;;  %7218 = vmatmul.mubr.msk.bf16.vlgmr.msra.gmra.mrb[12].mxu0 %vm1016_vm2, %v993_v46  ;;  %v1763_v56 = vpack.c.bf16 %v1754_v34, %v1753_v3  ;;  %v7778_v3 = vpop.eup %7777 }
 0x261   :  { %v995_v29 = vpack.c.bf16 %v979_v60, %v978_v30  ;;  %v977_v50 = vmul.f32 %v7776_v21, %v935_v42  ;;  %1870 = vperm.xlu1 %7545, %v6664_v2   ;;  %v1489_v25 = vpack.c.bf16 %v1480_v49, %v1479_v12  ;;  %v2027_v60 = vmul.f32 %v11719_v40, %v1504_v18  ;;  %v11720_v30 = vld [vmem:[#allocation28_spill] sm:$0xff]  ;;  %v9401_v2 = vld [vmem:[#allocation2 + $0x78] sm:$0xff]  ;;  %v11723_v21 = vld [vmem:[#allocation38_spill] sm:$0xff] }
 0x262   :  { %2083 = vrot.lane.b32.xlu0 %v1626_v35, %s8169_s21  ;;  %v933_v46 = vpop.permute.xlu0 %932  ;;  %v2028_v43 = vmul.f32 %v11720_v30, %v1915_v22  ;;  %v11721_v35 = vld [vmem:[#allocation33_spill] sm:$0xff]  ;;  %v1755_v18 = vmul.f32 %v11722_v51, %v9395_v53  ;;  %v9408_v22 = vld [vmem:[#allocation2 + $0x80] sm:$0xff] }
 0x263   :  { %v976_v8 = vmul.f32 %v7774_v41, %v933_v46  ;;  %v1619_v58 = vmul.f32 %v11721_v35, %v1506_v38  ;;  %v1643_v41 = vld [vmem:[#allocation2 + $0x87] sm:$0xff] }
 0x264   :  { %v1756_v54 = vmul.f32 %v11723_v21, %v1643_v41  ;;  %v2037_v12 = vpack.c.bf16 %v2028_v43, %v2027_v60  ;;  %v11724_v46 = vld [vmem:[#allocation32_spill] sm:$0xff]  ;;  %v11727_v60 = vld [vmem:[#allocation34_spill] sm:$0xff]  ;;  %v6703_v41 = vld [vmem:[%s11613_s13 + $0x88] sm:$0xff] }
 0x265   :  { %v994_v11 = vpack.c.bf16 %v977_v50, %v976_v8  ;;  %2059 = vrot.lane.b32.xlu1 %v1489_v25, %s8168_s0  ;;  %v1627_v24 = vpack.c.bf16 %v1619_v58, %v1618_v10  ;;  %v1481_v5 = vmul.f32 %v11724_v46, %v9401_v2  ;;  %v1917_v50 = vld [vmem:[#allocation2 + $0x89] sm:$0xff]  ;;  %v7780_v8 = vpop.eup %7779  ;;  %v11726_v25 = vld [vmem:[#allocation35_spill] sm:$0xff] }
 0x266   :  { %2107 = vrot.lane.b32.xlu0 %v1763_v56, %s8167_s19  ;;  %v945_v42 = vpop.permute.xlu0 %944  ;;  %v11725_v56 = vld [vmem:[#allocation31_spill] sm:$0xff]  ;;  %v1764_v36 = vpack.c.bf16 %v1756_v54, %v1755_v18  ;;  %v2029_v40 = vmul.f32 %v11726_v25, %v1506_v38  ;;  %v2030_v30 = vmul.f32 %v11727_v60, %v1917_v50  ;;  %v1218_v21 = vld [vmem:[#allocation2 + $0x7] sm:$0xff] }
 0x267   :  { %7221 = vmatprep.mubr.msk.bf16.mxu0 %vm1016_vm2, %v994_v11  ;;  %v982_v34 = vmul.f32 %v7778_v3, %v945_v42  ;;  %v1482_v10 = vmul.f32 %v11725_v56, %v9408_v22  ;;  %v7782_v11 = vpop.eup %7781 }
 0x268   :  { %7222 = vmatmul.mubr.msk.bf16.gmra.mrb[16].mxu0 %vm1016_vm2, %v995_v29  ;;  %v7784_v63 = vpop.eup %7783  ;;  %v2038_v51 = vpack.c.bf16 %v2030_v30, %v2029_v40 }
 0x269   :  { %v947_v48 = vpop.permute.xlu1 %946  ;;  %2131 = vrot.lane.b32.xlu1 %v2037_v12, %s8168_s0  ;;  %v1490_v43 = vpack.c.bf16 %v1482_v10, %v1481_v5  ;;  %v7786_v3 = vpop.eup %7785  ;;  %v11728_v5 = vld [vmem:[#allocation36_spill] sm:$0xff]  ;;  %v1765_v10 = vld [vmem:[#allocation2 + $0x10] sm:$0xff] }
 0x26a   :  { %2085 = vrot.lane.b32.xlu0 %v1627_v24, %s8169_s21  ;;  %v941_v29 = vpop.permute.xlu0 %940  ;;  %v983_v49 = vmul.f32 %v7780_v8, %v947_v48  ;;  %v7788_v46 = vpop.eup %7787  ;;  %v6707_v8 = vld [vmem:[%s11613_s13 + $0xa8] sm:$0xff] }
 0x26b   :  { %v980_v35 = vmul.f32 %v7782_v11, %v941_v29  ;;  %v7790_v48 = vpop.eup %7789  ;;  %v6704_v11 = vld [vmem:[%s11613_s13 + $0x90] sm:$0xff] }
 0x26c   :  { %v997_v42 = vpack.c.bf16 %v983_v49, %v982_v34  ;;  %v1331_v34 = vmul.f32 %v11728_v5, %v9147_v45  ;;  %v11729_v49 = vld [vmem:[#allocation37_spill] sm:$0xff]  ;;  %v11730_v45 = vld [vmem:[#allocation40_spill] sm:$0xff]  ;;  %v7792_v60 = vpop.eup %7791 }
 0x26d   :  { %2061 = vrot.lane.b32.xlu1 %v1490_v43, %s8168_s0  ;;  %v1330_v56 = vmul.f32 %v11729_v49, %v1218_v21  ;;  %v1879_v40 = vmul.f32 %v11730_v45, %v9178_v44  ;;  %v6716_v49 = vld [vmem:[%s11613_s13 + $0xf0] sm:$0xff] }
 0x26e   :  { %2109 = vrot.lane.b32.xlu0 %v1764_v36, %s8167_s19  ;;  %v943_v58 = vpop.permute.xlu1 %942 }
 0x26f   :  { %v981_v38 = vmul.f32 %v7784_v63, %v943_v58  ;;  %v1346_v30 = vpack.c.bf16 %v1331_v34, %v1330_v56  ;;  %v6717_v34 = vld [vmem:[%s11613_s13 + $0xf8] sm:$0xff] }
 0x270   :  { %v953_v24 = vpop.permute.xlu0 %952 }
 0x271   :  { %v996_v18 = vpack.c.bf16 %v981_v38, %v980_v35  ;;  %2133 = vrot.lane.b32.xlu1 %v2038_v51, %s8168_s0  ;;  %v986_v54 = vmul.f32 %v7786_v3, %v953_v24  ;;  %v11731_v35 = vld [vmem:[#allocation41_spill] sm:$0xff]  ;;  %v2137_v38 = vsel %vm1016_vm2, %v1346_v30, %v9332_v33 }
 0x272   :  { %2613 = vperm.xlu0 %7546, %v6703_v41   ;;  %v1878_v63 = vmul.f32 %v11731_v35, %v1765_v10  ;;  %v6709_v41 = vld [vmem:[%s11613_s13 + $0xb8] sm:$0xff]  ;;  %v2160_v44 = vsel %vm434_vm4, %v2137_v38, %v9323_v0  ;;  %v6711_v33 = vld [vmem:[%s11613_s13 + $0xc8] sm:$0xff]  ;;  %v6708_v0 = vld [vmem:[%s11613_s13 + $0xb0] sm:$0xff] }
 0x273   :  { %7225 = vmatprep.mubr.msk.bf16.mxu0 %vm1016_vm2, %v996_v18  ;;  %v955_v50 = vpop.permute.xlu1 %954  ;;  %v6706_v18 = vld [vmem:[%s11613_s13 + $0xa0] sm:$0xff]  ;;  %v2455_v38 = vld [vmem:[%s11613_s13 + $0x10] sm:$0xff] }
 0x274   :  { %7226 = vmatmul.mubr.msk.bf16.gmra.mrb[20].mxu0 %vm1016_vm2, %v997_v42  ;;  %v949_v12 = vpop.permute.xlu0 %948  ;;  %v987_v29 = vmul.f32 %v7788_v46, %v955_v50  ;;  %v1894_v51 = vpack.c.bf16 %v1879_v40, %v1878_v63  ;;  %v6712_v46 = vld [vmem:[%s11613_s13 + $0xd0] sm:$0xff]  ;;  %v6714_v50 = vld [vmem:[%s11613_s13 + $0xe0] sm:$0xff]  ;;  %v2456_v40 = vld [vmem:[%s11613_s13 + $0x18] sm:$0xff] }
 0x275   :  { %2608 = vperm.xlu1 %7545, %v6702_v32   ;;  %v984_v25 = vmul.f32 %v7790_v48, %v949_v12  ;;  %v6713_v32 = vld [vmem:[%s11613_s13 + $0xd8] sm:$0xff]  ;;  %v6715_v12 = vld [vmem:[%s11613_s13 + $0xe8] sm:$0xff] }
 0x276   :  { %2623 = vperm.xlu0 %7546, %v6705_v6   ;;  %v999_v36 = vpack.c.bf16 %v987_v29, %v986_v54  ;;  %v6710_v54 = vld [vmem:[%s11613_s13 + $0xc0] sm:$0xff]  ;;  %v2454_v48 = vld [vmem:[%s11613_s13 + $0x8] sm:$0xff] }
 0x277   :  { %v951_v43 = vpop.permute.xlu1 %950 }
 0x278   :  { %v985_v42 = vmul.f32 %v7792_v60, %v951_v43  ;;  %v2096_v58 = vpop.permute.xlu0 %2095  ;;  %v2453_v60 = vld [vmem:[%s11613_s13] sm:$0xff] }
 0x279   :  { %2618 = vperm.xlu1 %7545, %v6704_v11   ;;  %v2177_v3 = vsel %vm2175_vm5, %v2160_v44, %v2096_v58  ;;  %v11734_v43 = vld [vmem:[#allocation44_spill] sm:$0xff] }
 0x27a   :  { %2633 = vperm.xlu0 %7546, %v6707_v8   ;;  %v998_v24 = vpack.c.bf16 %v985_v42, %v984_v25  ;;  %v11733_v25 = vld [vmem:[#allocation42_spill] sm:$0xff]  ;;  %v1881_v42 = vmul.f32 %v11734_v43, %v9225_v4 }
 0x27b   :  { %v2120_v6 = vpop.permute.xlu1 %2119  ;;  %v1333_v45 = vmul.f32 %v9175_v7, %v11733_v25  ;;  %v11735_v7 = vld [vmem:[#allocation45_spill] sm:$0xff]  ;;  %v2463_v25 = vld [vmem:[%s11613_s13 + $0x50] sm:$0xff] }
 0x27c   :  { %v2202_v21 = vsel %vm1016_vm2, %v1894_v51, %v2120_v6  ;;  %7229 = vmatprep.mubr.msk.bf16.mxu0 %vm1016_vm2, %v998_v24  ;;  %v1880_v58 = vmul.f32 %v11735_v7, %v9187_v59  ;;  %v2460_v6 = vld [vmem:[%s11613_s13 + $0x38] sm:$0xff] }
 0x27d   :  { %2628 = vperm.xlu1 %7545, %v6706_v18   ;;  %6694 = vmatprep.mubr.msk.bf16.mxu1 %vm434_vm4, %v2202_v21 }
 0x27e   :  { %2643 = vperm.xlu0 %7546, %v6709_v41   ;;  %7230 = vmatmul.mubr.msk.bf16.gmra.mrb[24].mxu0 %vm1016_vm2, %v999_v36  ;;  %v11732_v36 = vld [vmem:[#allocation43_spill] sm:$0xff]  ;;  %v1895_v24 = vpack.c.bf16 %v1881_v42, %v1880_v58 }
 0x27f   :  { %2373 = vmatmul.mubr.bf16.vlgmr.msra.gmra.mrb[20].mxu1 %v2177_v3  ;;  %v1332_v11 = vmul.f32 %v9143_v27, %v11732_v36  ;;  %v2458_v27 = vld [vmem:[%s11613_s13 + $0x28] sm:$0xff]  ;;  %v2457_v3 = vld [vmem:[%s11613_s13 + $0x20] sm:$0xff] }
 0x281   :  { %2638 = vperm.xlu1 %7545, %v6708_v0   ;;  %v1347_v35 = vpack.c.bf16 %v1333_v45, %v1332_v11  ;;  %v2462_v0 = vld [vmem:[%s11613_s13 + $0x48] sm:$0xff] }
 0x282   :  { %2653 = vperm.xlu0 %7546, %v6711_v33  }
 0x285   :  { %2648 = vperm.xlu1 %7545, %v6710_v54  }
 0x286   :  { %2663 = vperm.xlu0 %7546, %v6713_v32   ;;  %v2459_v32 = vld [vmem:[%s11613_s13 + $0x30] sm:$0xff] }
 0x289   :  { %v1278_v5 = vpop.permute.xlu0 %1277  ;;  %2658 = vperm.xlu1 %7545, %v6712_v46  }
 0x28a   :  { %2673 = vperm.xlu0 %7546, %v6715_v12   ;;  %v1335_v12 = vmul.f32 %v9212_v57, %v1278_v5 }
 0x28c   :  { %v1273_v8 = vpop.permute.xlu1 %1272 }
 0x28d   :  { %v1826_v29 = vpop.permute.xlu0 %1825  ;;  %2668 = vperm.xlu1 %7545, %v6714_v50   ;;  %v1334_v50 = vmul.f32 %v9180_v31, %v1273_v8 }
 0x28e   :  { %2683 = vperm.xlu0 %7546, %v6717_v34   ;;  %v2464_v34 = vld [vmem:[%s11613_s13 + $0x58] sm:$0xff] }
 0x28f   :  { %v1348_v36 = vpack.c.bf16 %v1335_v12, %v1334_v50 }
 0x290   :  { %v1821_v10 = vpop.permute.xlu1 %1820 }
 0x291   :  { %v2074_v56 = vpop.permute.xlu0 %2073  ;;  %2678 = vperm.xlu1 %7545, %v6716_v49   ;;  %v1882_v57 = vmul.f32 %v1821_v10, %v9216_v62 }
 0x292   :  { %2476 = vperm.xlu0 %7546, %v2454_v48   ;;  %v2461_v48 = vld [vmem:[%s11613_s13 + $0x40] sm:$0xff] }
 0x294   :  { %v2050_v63 = vpop.permute.xlu1 %2049 }
 0x295   :  { %v2098_v30 = vpop.permute.xlu0 %2097  ;;  %2471 = vperm.xlu1 %7545, %v2453_v60   ;;  %v2140_v41 = vsel %vm1016_vm2, %v1347_v35, %v2050_v63 }
 0x296   :  { %2486 = vperm.xlu0 %7546, %v2456_v40   ;;  %v2162_v4 = vsel %vm434_vm4, %v2140_v41, %v2074_v56  ;;  %v1883_v56 = vmul.f32 %v1826_v29, %v9250_v13 }
 0x297   :  { %v2180_v18 = vsel %vm2175_vm5, %v2162_v4, %v2098_v30 }
 0x298   :  { %v2122_v51 = vpop.permute.xlu1 %2121  ;;  %v1896_v8 = vpack.c.bf16 %v1883_v56, %v1882_v57 }
 0x299   :  { %v1288_v44 = vpop.permute.xlu0 %1287  ;;  %v2205_v59 = vsel %vm1016_vm2, %v1895_v24, %v2122_v51  ;;  %2481 = vperm.xlu1 %7545, %v2455_v38  }
 0x29a   :  { %2496 = vperm.xlu0 %7546, %v2458_v27   ;;  %6695 = vmatprep.mubr.msk.bf16.mxu1 %vm434_vm4, %v2205_v59  ;;  %v1337_v30 = vmul.f32 %v9247_v19, %v1288_v44 }
 0x29b   :  { %2381 = vmatmul.mubr.bf16.gmra.mrb[24].mxu1 %v2180_v18 }
 0x29c   :  { %v1283_v33 = vpop.permute.xlu1 %1282 }
 0x29d   :  { %v1836_v21 = vpop.permute.xlu0 %1835  ;;  %2491 = vperm.xlu1 %7545, %v2457_v3   ;;  %v1336_v42 = vmul.f32 %v9214_v17, %v1283_v33 }
 0x29e   :  { %2506 = vperm.xlu0 %7546, %v2460_v6   ;;  %v1885_v63 = vmul.f32 %v1836_v21, %v9297_v1 }
 0x29f   :  { %v1349_v27 = vpack.c.bf16 %v1337_v30, %v1336_v42 }
 0x2a0   :  { %v1831_v46 = vpop.permute.xlu1 %1830 }
 0x2a1   :  { %v2076_v54 = vpop.permute.xlu0 %2075  ;;  %2501 = vperm.xlu1 %7545, %v2459_v32   ;;  %v1884_v58 = vmul.f32 %v1831_v46, %v9259_v14 }
 0x2a2   :  { %2516 = vperm.xlu0 %7546, %v2462_v0  }
 0x2a3   :  { %v1897_v4 = vpack.c.bf16 %v1885_v63, %v1884_v58 }
 0x2a4   :  { %v2052_v11 = vpop.permute.xlu1 %2051 }
 0x2a5   :  { %v2100_v49 = vpop.permute.xlu0 %2099  ;;  %2511 = vperm.xlu1 %7545, %v2461_v48   ;;  %v2143_v5 = vsel %vm1016_vm2, %v1348_v36, %v2052_v11 }
 0x2a6   :  { %2526 = vperm.xlu0 %7546, %v2464_v34   ;;  %v2164_v45 = vsel %vm434_vm4, %v2143_v5, %v2076_v54 }
 0x2a7   :  { %v2183_v60 = vsel %vm2175_vm5, %v2164_v45, %v2100_v49 }
 0x2a8   :  { %v2124_v40 = vpop.permute.xlu1 %2123 }
 0x2a9   :  { %v1298_v31 = vpop.permute.xlu0 %1297  ;;  %v2208_v13 = vsel %vm1016_vm2, %v1896_v8, %v2124_v40  ;;  %2521 = vperm.xlu1 %7545, %v2463_v25  }
 0x2aa   :  { %6696 = vmatprep.mubr.msk.bf16.mxu1 %vm434_vm4, %v2208_v13  ;;  %v1339_v6 = vmul.f32 %v9284_v28, %v1298_v31 }
 0x2ab   :  { %2389 = vmatmul.mubr.bf16.gmra.mrb[28].mxu1 %v2183_v60 }
 0x2ac   :  { %v1293_v29 = vpop.permute.xlu1 %1292 }
 0x2ad   :  { %v1846_v62 = vpop.permute.xlu0 %1845  ;;  %v1338_v59 = vmul.f32 %v9252_v61, %v1293_v29 }
 0x2ae   :  { %v1887_v21 = vmul.f32 %v1846_v62, %v9327_v20 }
 0x2af   :  { %v1350_v33 = vpack.c.bf16 %v1339_v6, %v1338_v59 }
 0x2b0   :  { %v1841_v43 = vpop.permute.xlu1 %1840 }
 0x2b1   :  { %v2078_v10 = vpop.permute.xlu0 %2077  ;;  %v1886_v32 = vmul.f32 %v1841_v43, %v9288_v37 }
 0x2b3   :  { %v1898_v46 = vpack.c.bf16 %v1887_v21, %v1886_v32 }
 0x2b4   :  { %v2054_v7 = vpop.permute.xlu1 %2053 }
 0x2b5   :  { %v2102_v35 = vpop.permute.xlu0 %2101  ;;  %v2146_v41 = vsel %vm1016_vm2, %v1349_v27, %v2054_v7 }
 0x2b6   :  { %v2166_v24 = vsel %vm434_vm4, %v2146_v41, %v2078_v10 }
 0x2b7   :  { %v2186_v18 = vsel %vm2175_vm5, %v2166_v24, %v2102_v35 }
 0x2b8   :  { %v2126_v51 = vpop.permute.xlu1 %2125 }
 0x2b9   :  { %v1308_v38 = vpop.permute.xlu0 %1307  ;;  %v2211_v19 = vsel %vm1016_vm2, %v1897_v4, %v2126_v51 }
 0x2ba   :  { %6697 = vmatprep.mubr.msk.bf16.mxu1 %vm434_vm4, %v2211_v19  ;;  %v1341_v56 = vmul.f32 %v9321_v26, %v1308_v38 }
 0x2bb   :  { %2397 = vmatmul.mubr.bf16.gmra.mrb[32].mxu1 %v2186_v18 }
 0x2bc   :  { %v1303_v1 = vpop.permute.xlu1 %1302 }
 0x2bd   :  { %v1856_v17 = vpop.permute.xlu0 %1855  ;;  %v1340_v36 = vmul.f32 %v9286_v52, %v1303_v1 }
 0x2be   :  { %v1889_v57 = vmul.f32 %v1856_v17, %v9371_v15 }
 0x2bf   :  { %v1351_v5 = vpack.c.bf16 %v1341_v56, %v1340_v36 }
 0x2c0   :  { %v1851_v14 = vpop.permute.xlu1 %1850 }
 0x2c1   :  { %v2080_v44 = vpop.permute.xlu0 %2079  ;;  %v1888_v31 = vmul.f32 %v1851_v14, %v9339_v47 }
 0x2c3   :  { %v1899_v40 = vpack.c.bf16 %v1889_v57, %v1888_v31 }
 0x2c4   :  { %v2056_v0 = vpop.permute.xlu1 %2055 }
 0x2c5   :  { %v2104_v3 = vpop.permute.xlu0 %2103  ;;  %v2149_v54 = vsel %vm1016_vm2, %v1350_v33, %v2056_v0 }
 0x2c6   :  { %v2168_v34 = vsel %vm434_vm4, %v2149_v54, %v2080_v44 }
 0x2c7   :  { %v2189_v48 = vsel %vm2175_vm5, %v2168_v34, %v2104_v3  ;;  %v11736_v3 = vld [vmem:[#allocation4_spill] sm:$0xff] }
 0x2c8   :  { %v2128_v50 = vpop.permute.xlu1 %2127  ;;  %v11636_v21 = vsub.s32 3, %v11736_v3 }
 0x2c9   :  { %v1318_v12 = vpop.permute.xlu0 %1317  ;;  %v2214_v28 = vsel %vm1016_vm2, %v1898_v46, %v2128_v50 }
 0x2ca   :  { %6698 = vmatprep.mubr.msk.bf16.mxu1 %vm434_vm4, %v2214_v28  ;;  %v1343_v10 = vmul.f32 %v9367_v23, %v1318_v12 }
 0x2cb   :  { %2405 = vmatmul.mubr.bf16.gmra.mrb[36].mxu1 %v2189_v48 }
 0x2cc   :  { %v1313_v20 = vpop.permute.xlu1 %1312 }
 0x2cd   :  { %v1866_v61 = vpop.permute.xlu0 %1865  ;;  %v1342_v30 = vmul.f32 %v9329_v55, %v1313_v20  ;;  %v7567_v20 = vld [vmem:[%s11614_s8] sm:$0xff]  }
 0x2ce   :  { %v1891_v42 = vmul.f32 %v1866_v61, %v9401_v2  ;;  %v1780_v2 = vld [vmem:[#allocation2 + $0x88] sm:$0xff]  ;;  %7233 = vmatprep.subr.bf16.mxu0 %v7567_v20 }
 0x2cf   :  { %v1352_v35 = vpack.c.bf16 %v1343_v10, %v1342_v30  ;;  %7234 = vmatpush3.bf16.msra.mxu0 %v7567_v20 }
 0x2d0   :  { %v1861_v37 = vpop.permute.xlu1 %1860 }
 0x2d1   :  { %v2082_v49 = vpop.permute.xlu0 %2081  ;;  %v1890_v27 = vmul.f32 %v1861_v37, %v9383_v16 }
 0x2d3   :  { %v1900_v58 = vpack.c.bf16 %v1891_v42, %v1890_v27  ;;  %v2465_v27 = vld [vmem:[%s11613_s13 + $0x60] sm:$0xff] }
 0x2d4   :  { %v2058_v25 = vpop.permute.xlu1 %2057 }
 0x2d5   :  { %v2106_v11 = vpop.permute.xlu0 %2105  ;;  %v2152_v8 = vsel %vm1016_vm2, %v1351_v5, %v2058_v25 }
 0x2d6   :  { %v2170_v60 = vsel %vm434_vm4, %v2152_v8, %v2082_v49 }
 0x2d7   :  { %v2192_v62 = vsel %vm2175_vm5, %v2170_v60, %v2106_v11 }
 0x2d8   :  { %v2130_v13 = vpop.permute.xlu1 %2129 }
 0x2d9   :  { %v1328_v45 = vpop.permute.xlu0 %1327  ;;  %v2217_v26 = vsel %vm1016_vm2, %v1899_v40, %v2130_v13  ;;  %v7568_v40 = vld [vmem:[%s11614_s8 + $0x8] sm:$0xff]  }
 0x2da   :  { %6699 = vmatprep.mubr.msk.bf16.mxu1 %vm434_vm4, %v2217_v26  ;;  %v1345_v4 = vmul.f32 %v9395_v53, %v1328_v45  ;;  %7235 = vmatprep.subr.bf16.mxu0 %v7568_v40 }
 0x2db   :  { %2413 = vmatmul.mubr.bf16.gmra.mrb[40].mxu1 %v2192_v62  ;;  %7236 = vmatpush3.bf16.msra.mxu0 %v7568_v40 }
 0x2dc   :  { %v1323_v15 = vpop.permute.xlu1 %1322 }
 0x2dd   :  { %v1876_v52 = vpop.permute.xlu0 %1875  ;;  %v1344_v51 = vmul.f32 %v9374_v9, %v1323_v15 }
 0x2de   :  { %v1893_v18 = vmul.f32 %v1876_v52, %v1780_v2 }
 0x2df   :  { %v1353_v16 = vpack.c.bf16 %v1345_v4, %v1344_v51 }
 0x2e0   :  { %v1871_v47 = vpop.permute.xlu1 %1870 }
 0x2e1   :  { %v2084_v29 = vpop.permute.xlu0 %2083  ;;  %v1892_v17 = vmul.f32 %v1871_v47, %v9408_v22  ;;  %v8145_v22 = vld [vmem:[%s11609_s11] sm:$0xf] }
 0x2e2   :  { %v9599_v33 = vrot.slane %v8145_v22, %v11636_v21 }
 0x2e3   :  { %v1901_v53 = vpack.c.bf16 %v1893_v18, %v1892_v17 }
 0x2e4   :  { %v2060_v63 = vpop.permute.xlu1 %2059 }
 0x2e5   :  { %v2108_v43 = vpop.permute.xlu0 %2107  ;;  %v2155_v7 = vsel %vm1016_vm2, %v1352_v35, %v2060_v63  ;;  %v2466_v35 = vld [vmem:[%s11613_s13 + $0x68] sm:$0xff] }
 0x2e6   :  { %v2172_v41 = vsel %vm434_vm4, %v2155_v7, %v2084_v29 }
 0x2e7   :  { %v2195_v23 = vsel %vm2175_vm5, %v2172_v41, %v2108_v43  ;;  %v7569_v43 = vld [vmem:[%s11614_s8 + $0x10] sm:$0xff]  }
 0x2e8   :  { %v2132_v24 = vpop.permute.xlu1 %2131  ;;  %7237 = vmatprep.subr.bf16.mxu0 %v7569_v43 }
 0x2e9   :  { %v2086_v38 = vpop.permute.xlu0 %2085  ;;  %v2220_v55 = vsel %vm1016_vm2, %v1900_v58, %v2132_v24  ;;  %7238 = vmatpush3.bf16.msra.mxu0 %v7569_v43  ;;  %v7570_v58 = vld [vmem:[%s11614_s8 + $0x18] sm:$0xff]  }
 0x2ea   :  { %6700 = vmatprep.mubr.msk.bf16.mxu1 %vm434_vm4, %v2220_v55  ;;  %7239 = vmatprep.subr.bf16.mxu0 %v7570_v58 }
 0x2eb   :  { %2421 = vmatmul.mubr.bf16.gmra.mrb[44].mxu1 %v2195_v23 }
 0x2ec   :  { %v2062_v19 = vpop.permute.xlu1 %2061 }
 0x2ed   :  { %v2110_v1 = vpop.permute.xlu0 %2109  ;;  %v2158_v44 = vsel %vm1016_vm2, %v1353_v16, %v2062_v19  ;;  %7240 = vmatpush3.bf16.msra.mxu0 %v7570_v58 }
 0x2ee   :  { %v2174_v6 = vsel %vm434_vm4, %v2158_v44, %v2086_v38 }
 0x2ef   :  { %v2198_v59 = vsel %vm2175_vm5, %v2174_v6, %v2110_v1 }
 0x2f0   :  { %v2134_v14 = vpop.permute.xlu1 %2133 }
 0x2f1   :  { %v2223_v9 = vsel %vm1016_vm2, %v1901_v53, %v2134_v14  ;;  %v2614_v32 = vpop.permute.xlu0 %2613 }
 0x2f2   :  { %6701 = vmatprep.mubr.msk.bf16.mxu1 %vm434_vm4, %v2223_v9 }
 0x2f3   :  { %2429 = vmatmul.mubr.bf16.gmra.mrb[48].mxu1 %v2198_v59 }
 0x2f4   :  { %v2609_v46 = vpop.permute.xlu1 %2608 }
 0x2f5   :  { %v2624_v49 = vpop.permute.xlu0 %2623 }
 0x2f8   :  { %v2619_v56 = vpop.permute.xlu1 %2618 }
 0x2f9   :  { %v2634_v29 = vpop.permute.xlu0 %2633 }
 0x2fc   :  { %v2629_v15 = vpop.permute.xlu1 %2628 }
 0x2fd   :  { %v2644_v38 = vpop.permute.xlu0 %2643 }
 0x300   :  { %v2639_v41 = vpop.permute.xlu1 %2638 }
 0x301   :  { %v2654_v22 = vpop.permute.xlu0 %2653 }
 0x304   :  { %v2649_v9 = vpop.permute.xlu1 %2648 }
 0x333   :  { %v7219_v0 = vpop.f32.mrb[12].mxu0 }
 0x334   :  { %v1084_v54 = vadd.f32 %v7219_v0, %v9599_v33  ;;  %v1075_v12 = vpop.f32.mrb[13].mxu0  ;;  %v2468_v0 = vld [vmem:[%s11613_s13 + $0x78] sm:$0xff] }
 0x335   :  { %v1076_v34 = vadd.f32 %v1075_v12, %v9599_v33  ;;  %v7220_v50 = vpop.f32.mrb[14].mxu0  ;;  %v9659_v12 = vld [vmem:[%s11610_s2 + $0x2] sm:$0x3] }
 0x336   :  { %1192 = vst.msk [vmem:[#allocation3 + $0x18] sm:$0xff] %vm1016_vm2, %v1084_v54  ;;  %v1087_v48 = vadd.f32 %v7220_v50, %v9599_v33  ;;  %v1078_v28 = vpop.f32.mrb[15].mxu0  ;;  %v2467_v54 = vld [vmem:[%s11613_s13 + $0x70] sm:$0xff] }
 0x337   :  { %1190 = vst.msk [vmem:[#allocation3 + $0x8] sm:$0xff] %vm1016_vm2, %v1076_v34  ;;  %v1079_v61 = vadd.f32 %v1078_v28, %v9599_v33  ;;  %v2664_v28 = vpop.permute.xlu0 %2663 }
 0x338   :  { %1193 = vst.msk [vmem:[#allocation3 + $0x20] sm:$0xff] %vm1016_vm2, %v1087_v48  ;;  %v2659_v48 = vpop.permute.xlu1 %2658 }
 0x339   :  { %1191 = vst.msk [vmem:[#allocation3 + $0x10] sm:$0xff] %vm1016_vm2, %v1079_v61 }
 0x33b   :  { %v7223_v37 = vpop.f32.mrb[16].mxu0 }
 0x33c   :  { %v1100_v36 = vadd.f32 %v7223_v37, %v9599_v33  ;;  %v1091_v11 = vpop.f32.mrb[17].mxu0 }
 0x33d   :  { %v1092_v57 = vadd.f32 %v1091_v11, %v9599_v33  ;;  %v7224_v5 = vpop.f32.mrb[18].mxu0  ;;  %v2575_v25 = vld [vmem:[#allocation3 + $0x18] sm:$0xff] }
 0x33e   :  { %1196 = vst.msk [vmem:[#allocation3 + $0x38] sm:$0xff] %vm1016_vm2, %v1100_v36  ;;  %v1103_v31 = vadd.f32 %v7224_v5, %v9599_v33  ;;  %v1094_v8 = vpop.f32.mrb[19].mxu0  ;;  %v2573_v45 = vld [vmem:[#allocation3 + $0x8] sm:$0xff]  ;;  %v2688_v62 = vmul.f32 %v2619_v56, %v2575_v25 }
 0x33f   :  { %1194 = vst.msk [vmem:[#allocation3 + $0x28] sm:$0xff] %vm1016_vm2, %v1092_v57  ;;  %v1095_v60 = vadd.f32 %v1094_v8, %v9599_v33  ;;  %v2576_v13 = vld [vmem:[#allocation3 + $0x20] sm:$0xff]  ;;  %v2686_v10 = vmul.f32 %v2609_v46, %v2573_v45  ;;  %v11737_v46 = vld [vmem:[#allocation5_spill] sm:$0xff] }
 0x340   :  { %1197 = vst.msk [vmem:[#allocation3 + $0x40] sm:$0xff] %vm1016_vm2, %v1103_v31  ;;  %v2689_v26 = vmul.f32 %v2624_v49, %v2576_v13  ;;  %v2574_v52 = vld [vmem:[#allocation3 + $0x10] sm:$0xff]  ;;  %v9666_v61 = vrot.slane %v9659_v12, %v11737_v46 }
 0x341   :  { %1195 = vst.msk [vmem:[#allocation3 + $0x30] sm:$0xff] %vm1016_vm2, %v1095_v60  ;;  %v2687_v47 = vmul.f32 %v2614_v32, %v2574_v52  ;;  %v6600_v32 = vld [vmem:[%s11609_s11 + $0x4] sm:$0xf] }
 0x342   :  { %v2703_v30 = vpack.c.bf16 %v2689_v26, %v2688_v62  ;;  %v9662_v34 = vrot.slane %v6600_v32, %v11737_v46  ;;  %v11754_v46 = vld [vmem:[#allocation46_spill] sm:$0xff] }
 0x343   :  { %v2702_v42 = vpack.c.bf16 %v2687_v47, %v2686_v10 }
 0x344   :  { %2720 = vrot.lane.b32.xlu0 %v2703_v30, %s8168_s0 }
 0x345   :  { %2718 = vrot.lane.b32.xlu1 %v2702_v42, %s8168_s0  ;;  %v2579_v63 = vld [vmem:[#allocation3 + $0x38] sm:$0xff] }
 0x346   :  { %v2577_v7 = vld [vmem:[#allocation3 + $0x28] sm:$0xff]  ;;  %v2692_v23 = vmul.f32 %v2639_v41, %v2579_v63 }
 0x347   :  { %v2580_v4 = vld [vmem:[#allocation3 + $0x40] sm:$0xff]  ;;  %v7227_v24 = vpop.f32.mrb[20].mxu0  ;;  %v2690_v16 = vmul.f32 %v2629_v15, %v2577_v7  ;;  %v2674_v7 = vpop.permute.xlu0 %2673 }
 0x348   :  { %2536 = vperm.xlu0 %7546, %v2466_v35   ;;  %v2693_v55 = vmul.f32 %v2644_v38, %v2580_v4  ;;  %v2578_v51 = vld [vmem:[#allocation3 + $0x30] sm:$0xff]  ;;  %v1116_v2 = vadd.f32 %v7227_v24, %v9599_v33  ;;  %v1107_v18 = vpop.f32.mrb[21].mxu0  ;;  %v9699_v38 = vld [vmem:[%s11608_s9 + $0x20] sm:$0xff]  }
 0x349   :  { %2531 = vperm.xlu1 %7545, %v2465_v27   ;;  %v2691_v19 = vmul.f32 %v2634_v29, %v2578_v51  ;;  %v1108_v17 = vadd.f32 %v1107_v18, %v9599_v33  ;;  %v7228_v1 = vpop.f32.mrb[22].mxu0  ;;  %v2669_v27 = vpop.permute.xlu1 %2668  ;;  %7257 = vmatprep.subr.bf16.mxu0 %v9699_v38 }
 0x34a   :  { %v2705_v44 = vpack.c.bf16 %v2693_v55, %v2692_v23  ;;  %1200 = vst.msk [vmem:[#allocation3 + $0x58] sm:$0xff] %vm1016_vm2, %v1116_v2  ;;  %v1119_v53 = vadd.f32 %v7228_v1, %v9599_v33  ;;  %v1110_v6 = vpop.f32.mrb[23].mxu0 }
 0x34b   :  { %v2704_v14 = vpack.c.bf16 %v2691_v19, %v2690_v16  ;;  %1198 = vst.msk [vmem:[#allocation3 + $0x48] sm:$0xff] %vm1016_vm2, %v1108_v17  ;;  %v1111_v59 = vadd.f32 %v1110_v6, %v9599_v33  ;;  %v2684_v24 = vpop.permute.xlu0 %2683 }
 0x34c   :  { %2724 = vrot.lane.b32.xlu0 %v2705_v44, %s8168_s0  ;;  %1201 = vst.msk [vmem:[#allocation3 + $0x60] sm:$0xff] %vm1016_vm2, %v1119_v53 }
 0x34d   :  { %2722 = vrot.lane.b32.xlu1 %v2704_v14, %s8168_s0  ;;  %1199 = vst.msk [vmem:[#allocation3 + $0x50] sm:$0xff] %vm1016_vm2, %v1111_v59  ;;  %v2679_v4 = vpop.permute.xlu1 %2678 }
 0x350   :  { %2546 = vperm.xlu0 %7546, %v2468_v0  }
 0x351   :  { %2541 = vperm.xlu1 %7545, %v2467_v54   ;;  %v2583_v50 = vld [vmem:[#allocation3 + $0x58] sm:$0xff]  ;;  %v7231_v49 = vpop.f32.mrb[24].mxu0 }
 0x352   :  { %v2581_v20 = vld [vmem:[#allocation3 + $0x48] sm:$0xff]  ;;  %v2374_v56 = vpop.f32.mrb[20].mxu1  ;;  %v1132_v36 = vadd.f32 %v7231_v49, %v9599_v33  ;;  %v1123_v5 = vpop.f32.mrb[25].mxu0  ;;  %v2696_v25 = vmul.f32 %v2659_v48, %v2583_v50 }
 0x353   :  { %v2584_v37 = vld [vmem:[#allocation3 + $0x60] sm:$0xff]  ;;  %v9670_v11 = vadd.f32 %v2374_v56, %v9662_v34  ;;  %v2376_v57 = vpop.f32.mrb[21].mxu1  ;;  %v1124_v45 = vadd.f32 %v1123_v5, %v9599_v33  ;;  %v7232_v60 = vpop.f32.mrb[26].mxu0  ;;  %v2694_v13 = vmul.f32 %v2649_v9, %v2581_v20  ;;  %v6798_v56 = vld [vmem:[%s11651_s26 + $0x80] sm:$0xff] }
 0x354   :  { %v2697_v31 = vmul.f32 %v2664_v28, %v2584_v37  ;;  %v2582_v8 = vld [vmem:[#allocation3 + $0x50] sm:$0xff]  ;;  %v2377_v40 = vpop.f32.mrb[22].mxu1  ;;  %1204 = vst.msk [vmem:[#allocation3 + $0x78] sm:$0xff] %vm1016_vm2, %v1132_v36  ;;  %v1135_v15 = vadd.f32 %v7232_v60, %v9599_v33  ;;  %v1126_v29 = vpop.f32.mrb[27].mxu0  ;;  %v6814_v36 = vld [vmem:[%s11651_s26 + $0x100] sm:$0xff] }
 0x355   :  { %v2695_v62 = vmul.f32 %v2654_v22, %v2582_v8  ;;  %v9676_v26 = vadd.f32 %v9670_v11, %v9666_v61  ;;  %v9679_v52 = vadd.f32 %v2377_v40, %v9662_v34  ;;  %v2379_v10 = vpop.f32.mrb[23].mxu1  ;;  %1202 = vst.msk [vmem:[#allocation3 + $0x68] sm:$0xff] %vm1016_vm2, %v1124_v45  ;;  %v1127_v30 = vadd.f32 %v1126_v29, %v9599_v33  ;;  %v6862_v57 = vld [vmem:[%s11651_s26 + $0x280] sm:$0xff] }
 0x356   :  { %v2707_v47 = vpack.c.bf16 %v2697_v31, %v2696_v25  ;;  %1205 = vst.msk [vmem:[#allocation3 + $0x80] sm:$0xff] %vm1016_vm2, %v1135_v15  ;;  %v6830_v45 = vld [vmem:[%s11651_s26 + $0x180] sm:$0xff] }
 0x357   :  { %v2706_v43 = vpack.c.bf16 %v2695_v62, %v2694_v13  ;;  %v6766_v42 = vmul.f32 -1.442695, %v9676_v26  ;;  %v2916_v35 = vpack.c.bf16 %v9679_v52, %v9670_v11  ;;  %v9689_v63 = vadd.f32 %v9679_v52, %v9666_v61  ;;  %1203 = vst.msk [vmem:[#allocation3 + $0x70] sm:$0xff] %vm1016_vm2, %v1127_v30 }
 0x358   :  { %2728 = vrot.lane.b32.xlu0 %v2707_v47, %s8168_s0 }
 0x359   :  { %2726 = vrot.lane.b32.xlu1 %v2706_v43, %s8168_s0  ;;  %7793 = vpow2.f32 %v6766_v42  ;;  %v6767_v33 = vmul.f32 -1.442695, %v9689_v63 }
 0x35b   :  { %7795 = vpow2.f32 %v6767_v33  ;;  %v2587_v58 = vld [vmem:[#allocation3 + $0x78] sm:$0xff] }
 0x35c   :  { %v2585_v41 = vld [vmem:[#allocation3 + $0x68] sm:$0xff]  ;;  %v2700_v55 = vmul.f32 %v2679_v4, %v2587_v58  ;;  %v6799_v58 = vld [vmem:[%s11651_s26 + $0x88] sm:$0xff] }
 0x35d   :  { %v2588_v23 = vld [vmem:[#allocation3 + $0x80] sm:$0xff]  ;;  %v2698_v18 = vmul.f32 %v2669_v27, %v2585_v41 }
 0x35e   :  { %v2701_v51 = vmul.f32 %v2684_v24, %v2588_v23  ;;  %v2586_v2 = vld [vmem:[#allocation3 + $0x70] sm:$0xff] }
 0x35f   :  { %v2699_v16 = vmul.f32 %v2674_v7, %v2586_v2  ;;  %v9765_v2 = vpop.permute.xlu0 %2476 }
 0x360   :  { %v2709_v19 = vpack.c.bf16 %v2701_v51, %v2700_v55  ;;  %v6800_v55 = vld [vmem:[%s11651_s26 + $0x90] sm:$0xff] }
 0x361   :  { %v2708_v17 = vpack.c.bf16 %v2699_v16, %v2698_v18 }
 0x362   :  { %2732 = vrot.lane.b32.xlu0 %v2709_v19, %s8168_s0 }
 0x363   :  { %v7794_v1 = vpop.eup %7793  ;;  %2730 = vrot.lane.b32.xlu1 %v2708_v17, %s8168_s0  ;;  %v9774_v17 = vpop.permute.xlu1 %2471 }
 0x364   :  { %v3393_v44 = vadd.f32 1.0, %v7794_v1 }
 0x365   :  { %v7796_v53 = vpop.eup %7795 }
 0x366   :  { %7797 = vrcp.f32 %v3393_v44  ;;  %v3394_v6 = vadd.f32 1.0, %v7796_v53  ;;  %v6815_v44 = vld [vmem:[%s11651_s26 + $0x108] sm:$0xff] }
 0x368   :  { %7799 = vrcp.f32 %v3394_v6 }
 0x36e   :  { %v2382_v14 = vpop.f32.mrb[24].mxu1 }
 0x36f   :  { %v9705_v9 = vadd.f32 %v2382_v14, %v9662_v34  ;;  %v2384_v22 = vpop.f32.mrb[25].mxu1 }
 0x370   :  { %v7798_v59 = vpop.eup %7797  ;;  %v2385_v0 = vpop.f32.mrb[26].mxu1 }
 0x371   :  { %3457 = vrot.lane.b32.xlu1 %v7798_v59, %s8167_s19  ;;  %v9710_v54 = vadd.f32 %v9705_v9, %v9666_v61  ;;  %v9713_v50 = vadd.f32 %v2385_v0, %v9662_v34  ;;  %v2387_v48 = vpop.f32.mrb[27].mxu1  ;;  %v6816_v59 = vld [vmem:[%s11651_s26 + $0x110] sm:$0xff]  ;;  %v6863_v0 = vld [vmem:[%s11651_s26 + $0x288] sm:$0xff] }
 0x372   :  { %v7800_v32 = vpop.eup %7799 }
 0x373   :  { %3459 = vrot.lane.b32.xlu0 %v7800_v32, %s8167_s19  ;;  %v6768_v28 = vmul.f32 -1.442695, %v9710_v54  ;;  %v2917_v20 = vpack.c.bf16 %v9713_v50, %v9705_v9  ;;  %v9721_v49 = vadd.f32 %v9713_v50, %v9666_v61  ;;  %v9792_v32 = vpop.permute.xlu0 %2486  ;;  %v6872_v50 = vld [vmem:[%s11651_s26 + $0x2d0] sm:$0xff] }
 0x375   :  { %7801 = vpow2.f32 %v6768_v28  ;;  %v6769_v37 = vmul.f32 -1.442695, %v9721_v49  ;;  %v9795_v28 = vpop.permute.xlu1 %2481 }
 0x377   :  { %3901 = vperm.xlu0 %7546, %v6798_v56   ;;  %7803 = vpow2.f32 %v6769_v37  ;;  %v6864_v56 = vld [vmem:[%s11651_s26 + $0x290] sm:$0xff]  ;;  %v6831_v37 = vld [vmem:[%s11651_s26 + $0x188] sm:$0xff] }
 0x37b   :  { %4037 = vperm.xlu0 %7546, %v6814_v36   ;;  %v6832_v36 = vld [vmem:[%s11651_s26 + $0x190] sm:$0xff] }
 0x37e   :  { %v2390_v5 = vpop.f32.mrb[28].mxu1 }
 0x37f   :  { %4445 = vperm.xlu0 %7546, %v6862_v57   ;;  %v7802_v25 = vpop.eup %7801  ;;  %v9734_v31 = vadd.f32 %v2390_v5, %v9662_v34  ;;  %v2392_v8 = vpop.f32.mrb[29].mxu1 }
 0x380   :  { %v3395_v40 = vadd.f32 1.0, %v7802_v25  ;;  %v2393_v60 = vpop.f32.mrb[30].mxu1  ;;  %v9806_v57 = vpop.permute.xlu0 %2496 }
 0x381   :  { %v7804_v13 = vpop.eup %7803  ;;  %v9741_v62 = vadd.f32 %v9734_v31, %v9666_v61  ;;  %v9744_v15 = vadd.f32 %v2393_v60, %v9662_v34  ;;  %v2395_v29 = vpop.f32.mrb[31].mxu1  ;;  %v11738_v60 = vld [vmem:[#allocation6_spill] sm:$0xff] }
 0x382   :  { %7805 = vrcp.f32 %v3395_v40  ;;  %v3396_v10 = vadd.f32 1.0, %v7804_v13  ;;  %v9808_v5 = vpop.permute.xlu1 %2491  ;;  %v9812_v13 = vrot.slane %v9659_v12, %v11738_v60 }
 0x383   :  { %4173 = vperm.xlu0 %7546, %v6830_v45   ;;  %v6770_v47 = vmul.f32 -1.442695, %v9741_v62  ;;  %v2918_v30 = vpack.c.bf16 %v9744_v15, %v9734_v31  ;;  %v9751_v43 = vadd.f32 %v9744_v15, %v9666_v61  ;;  %v6840_v31 = vld [vmem:[%s11651_s26 + $0x1d0] sm:$0xff] }
 0x384   :  { %7807 = vrcp.f32 %v3396_v10 }
 0x385   :  { %7809 = vpow2.f32 %v6770_v47  ;;  %v6771_v42 = vmul.f32 -1.442695, %v9751_v43 }
 0x387   :  { %7811 = vpow2.f32 %v6771_v42 }
 0x38c   :  { %v7806_v27 = vpop.eup %7805 }
 0x38d   :  { %3461 = vrot.lane.b32.xlu1 %v7806_v27, %s8167_s19  ;;  %v6801_v27 = vld [vmem:[%s11651_s26 + $0x98] sm:$0xff] }
 0x38e   :  { %v7808_v7 = vpop.eup %7807  ;;  %v2398_v33 = vpop.f32.mrb[32].mxu1 }
 0x38f   :  { %v7810_v41 = vpop.eup %7809  ;;  %v9759_v4 = vadd.f32 %v2398_v33, %v9662_v34  ;;  %v2400_v24 = vpop.f32.mrb[33].mxu1  ;;  %3463 = vrot.lane.b32.xlu0 %v7808_v7, %s8167_s19 }
 0x390   :  { %v2401_v23 = vpop.f32.mrb[34].mxu1  ;;  %v3397_v1 = vadd.f32 1.0, %v7810_v41  ;;  %v9824_v33 = vpop.permute.xlu0 %2506  ;;  %v6802_v41 = vld [vmem:[%s11651_s26 + $0xa0] sm:$0xff] }
 0x391   :  { %v7812_v51 = vpop.eup %7811  ;;  %v9769_v18 = vadd.f32 %v9759_v4, %v9666_v61  ;;  %v9772_v16 = vadd.f32 %v2401_v23, %v9662_v34  ;;  %v2403_v19 = vpop.f32.mrb[35].mxu1  ;;  %3906 = vperm.xlu1 %7545, %v6799_v58  }
 0x392   :  { %v3398_v14 = vadd.f32 1.0, %v7812_v51  ;;  %7813 = vrcp.f32 %v3397_v1  ;;  %v9829_v58 = vpop.permute.xlu1 %2501  ;;  %v6817_v51 = vld [vmem:[%s11651_s26 + $0x118] sm:$0xff] }
 0x393   :  { %v9783_v6 = vadd.f32 %v9772_v16, %v9666_v61  ;;  %3911 = vperm.xlu0 %7546, %v6800_v55   ;;  %v6772_v22 = vmul.f32 -1.442695, %v9769_v18  ;;  %v11739_v15 = vpack.c.bf16 %v9772_v16, %v9759_v4  ;;  %v6810_v4 = vld [vmem:[%s11651_s26 + $0xe0] sm:$0xff] }
 0x394   :  { %7815 = vrcp.f32 %v3398_v14  ;;  %v9848_v14 = vpop.permute.xlu0 %2516 }
 0x395   :  { %4042 = vperm.xlu1 %7545, %v6815_v44   ;;  %v6773_v48 = vmul.f32 -1.442695, %v9783_v6  ;;  %7817 = vpow2.f32 %v6772_v22  ;;  %v6818_v44 = vld [vmem:[%s11651_s26 + $0x120] sm:$0xff] }
 0x396   :  { %v9851_v22 = vpop.permute.xlu1 %2511 }
 0x397   :  { %4047 = vperm.xlu0 %7546, %v6816_v59   ;;  %7819 = vpow2.f32 %v6773_v48 }
 0x399   :  { %4450 = vperm.xlu1 %7545, %v6863_v0   ;;  %v6865_v0 = vld [vmem:[%s11651_s26 + $0x298] sm:$0xff] }
 0x39b   :  { %4455 = vperm.xlu0 %7546, %v6864_v56   ;;  %v6866_v56 = vld [vmem:[%s11651_s26 + $0x2a0] sm:$0xff] }
 0x39c   :  { %v7814_v45 = vpop.eup %7813 }
 0x39d   :  { %4178 = vperm.xlu1 %7545, %v6831_v37   ;;  %v2438_v37 = vld [vmem:[#allocation3 + $0xf] sm:$0xff] }
 0x39e   :  { %v2406_v25 = vpop.f32.mrb[36].mxu1  ;;  %v7816_v42 = vpop.eup %7815 }
 0x39f   :  { %v2408_v8 = vpop.f32.mrb[37].mxu1  ;;  %4183 = vperm.xlu0 %7546, %v6832_v36   ;;  %v9815_v29 = vadd.f32 %v2406_v25, %v9662_v34  ;;  %v7818_v7 = vpop.eup %7817  ;;  %v2439_v36 = vld [vmem:[#allocation3 + $0x17] sm:$0xff]  ;;  %v2440_v25 = vld [vmem:[#allocation3 + $0x1f] sm:$0xff] }
 0x3a0   :  { %v2409_v40 = vpop.f32.mrb[38].mxu1  ;;  %v3399_v55 = vadd.f32 1.0, %v7818_v7  ;;  %v9866_v7 = vpop.permute.xlu1 %2521 }
 0x3a1   :  { %v9818_v10 = vadd.f32 %v2409_v40, %v9662_v34  ;;  %v2411_v47 = vpop.f32.mrb[39].mxu1  ;;  %3465 = vrot.lane.b32.xlu1 %v7814_v45, %s8167_s19  ;;  %v7820_v24 = vpop.eup %7819  ;;  %v9836_v23 = vadd.f32 %v9815_v29, %v9812_v13  ;;  %v6833_v45 = vld [vmem:[%s11651_s26 + $0x198] sm:$0xff] }
 0x3a2   :  { %v3400_v1 = vadd.f32 1.0, %v7820_v24  ;;  %7821 = vrcp.f32 %v3399_v55  ;;  %v2437_v40 = vld [vmem:[#allocation3 + $0x7] sm:$0xff]  ;;  %v9863_v47 = vpop.permute.xlu0 %2526  ;;  %v2552_v55 = vmul.f32 %v9792_v32, %v2440_v25 }
 0x3a3   :  { %3467 = vrot.lane.b32.xlu0 %v7816_v42, %s8167_s19  ;;  %v9843_v19 = vadd.f32 %v9818_v10, %v9812_v13  ;;  %v6774_v59 = vmul.f32 -1.442695, %v9836_v23  ;;  %v6834_v24 = vld [vmem:[%s11651_s26 + $0x1a0] sm:$0xff] }
 0x3a4   :  { %7823 = vrcp.f32 %v3400_v1 }
 0x3a5   :  { %3916 = vperm.xlu1 %7545, %v6801_v27   ;;  %v6775_v48 = vmul.f32 -1.442695, %v9843_v19  ;;  %7825 = vpow2.f32 %v6774_v59  ;;  %v2550_v27 = vmul.f32 %v9765_v2, %v2438_v37  ;;  %v2549_v2 = vmul.f32 %v9774_v17, %v2437_v40  ;;  %v6803_v17 = vld [vmem:[%s11651_s26 + $0xa8] sm:$0xff] }
 0x3a7   :  { %3921 = vperm.xlu0 %7546, %v6802_v41   ;;  %7827 = vpow2.f32 %v6775_v48 }
 0x3a9   :  { %4052 = vperm.xlu1 %7545, %v6817_v51   ;;  %v2551_v51 = vmul.f32 %v9795_v28, %v2439_v36  ;;  %v7572_v36 = vld [vmem:[%s11608_s9 + $0x28] sm:$0xff]  }
 0x3ab   :  { %4057 = vperm.xlu0 %7546, %v6818_v44   ;;  %v2566_v32 = vpack.c.bf16 %v2552_v55, %v2551_v51  ;;  %v6819_v51 = vld [vmem:[%s11651_s26 + $0x128] sm:$0xff] }
 0x3ac   :  { %v7822_v37 = vpop.eup %7821 }
 0x3ad   :  { %4460 = vperm.xlu1 %7545, %v6865_v0  }
 0x3ae   :  { %v2414_v8 = vpop.f32.mrb[40].mxu1 }
 0x3af   :  { %v2416_v42 = vpop.f32.mrb[41].mxu1  ;;  %4465 = vperm.xlu0 %7546, %v6866_v56   ;;  %v9874_v1 = vadd.f32 %v2414_v8, %v9662_v34  ;;  %v2565_v56 = vpack.c.bf16 %v2550_v27, %v2549_v2  ;;  %v7824_v8 = vpop.eup %7823  ;;  %v6820_v2 = vld [vmem:[%s11651_s26 + $0x130] sm:$0xff] }
 0x3b0   :  { %v2417_v41 = vpop.f32.mrb[42].mxu1  ;;  %v7826_v40 = vpop.eup %7825  ;;  %v6804_v42 = vld [vmem:[%s11651_s26 + $0xb0] sm:$0xff] }
 0x3b1   :  { %v9877_v44 = vadd.f32 %v2417_v41, %v9662_v34  ;;  %v2419_v59 = vpop.f32.mrb[43].mxu1  ;;  %4188 = vperm.xlu1 %7545, %v6833_v45   ;;  %v7828_v27 = vpop.eup %7827  ;;  %v9900_v41 = vadd.f32 %v9874_v1, %v9812_v13  ;;  %v3401_v55 = vadd.f32 1.0, %v7826_v40 }
 0x3b3   :  { %4193 = vperm.xlu0 %7546, %v6834_v24   ;;  %v7573_v24 = vld [vmem:[%s11608_s9 + $0x30] sm:$0xff]   ;;  %v9910_v59 = vadd.f32 %v9877_v44, %v9812_v13  ;;  %7829 = vrcp.f32 %v3401_v55  ;;  %v11741_v16 = vpack.c.bf16 %v9877_v44, %v9874_v1  ;;  %v6826_v44 = vld [vmem:[%s11651_s26 + $0x160] sm:$0xff] }
 0x3b4   :  { %v2443_v55 = vld [vmem:[#allocation3 + $0x37] sm:$0xff] }
 0x3b5   :  { %3469 = vrot.lane.b32.xlu1 %v7822_v37, %s8167_s19 }
 0x3b6   :  { %v2721_v48 = vpop.permute.xlu0 %2720 }
 0x3b7   :  { %v2719_v25 = vpop.permute.xlu1 %2718  ;;  %v2739_v45 = vsel %vm1016_vm2, %v2566_v32, %v2721_v48  ;;  %3471 = vrot.lane.b32.xlu0 %v7824_v8, %s8167_s19  ;;  %v6776_v48 = vmul.f32 -1.442695, %v9900_v41  ;;  %v6867_v32 = vld [vmem:[%s11651_s26 + $0x2a8] sm:$0xff]  ;;  %v6868_v8 = vld [vmem:[%s11651_s26 + $0x2b0] sm:$0xff] }
 0x3b8   :  { %v2736_v28 = vsel %vm1016_vm2, %v2565_v56, %v2719_v25  ;;  %v7574_v56 = vld [vmem:[%s11608_s9 + $0x38] sm:$0xff]   ;;  %v6777_v25 = vmul.f32 -1.442695, %v9910_v59 }
 0x3b9   :  { %7241 = vmatprep.mubr.msk.bf16.mxu0 %vm434_vm4, %v2736_v28  ;;  %3926 = vperm.xlu1 %7545, %v6803_v17  }
 0x3ba   :  { %7242 = vmatmul.mubr.msk.bf16.vlgmr.msra.gmra.mrb[28].mxu0 %vm434_vm4, %v2739_v45 }
 0x3bb   :  { %7258 = vmatpush3.bf16.msra.mxu0 %v9699_v38  ;;  %3931 = vperm.xlu0 %7546, %v6804_v42   ;;  %v3402_v38 = vadd.f32 1.0, %v7828_v27  ;;  %v2442_v42 = vld [vmem:[#allocation3 + $0x2f] sm:$0xff] }
 0x3bc   :  { %7259 = vmatprep.subr.bf16.mxu0 %v7572_v36  ;;  %v6835_v27 = vld [vmem:[%s11651_s26 + $0x1a8] sm:$0xff] }
 0x3bd   :  { %4062 = vperm.xlu1 %7545, %v6819_v51   ;;  %7831 = vrcp.f32 %v3402_v38  ;;  %v2444_v51 = vld [vmem:[#allocation3 + $0x3f] sm:$0xff]  ;;  %v2441_v38 = vld [vmem:[#allocation3 + $0x27] sm:$0xff] }
 0x3be   :  { %v2422_v37 = vpop.f32.mrb[44].mxu1  ;;  %7833 = vpow2.f32 %v6776_v48 }
 0x3bf   :  { %7260 = vmatpush3.bf16.msra.mxu0 %v7572_v36  ;;  %v2424_v28 = vpop.f32.mrb[45].mxu1  ;;  %4067 = vperm.xlu0 %7546, %v6820_v2   ;;  %v9927_v17 = vadd.f32 %v2422_v37, %v9662_v34  ;;  %7835 = vpow2.f32 %v6777_v25  ;;  %v6836_v2 = vld [vmem:[%s11651_s26 + $0x1b0] sm:$0xff]  ;;  %v2554_v37 = vmul.f32 %v9806_v57, %v2442_v42  ;;  %v2446_v42 = vld [vmem:[#allocation3 + $0x4f] sm:$0xff] }
 0x3c0   :  { %7261 = vmatprep.subr.bf16.mxu0 %v7573_v24  ;;  %v2425_v36 = vpop.f32.mrb[46].mxu1  ;;  %v2556_v28 = vmul.f32 %v9824_v33, %v2444_v51  ;;  %v2448_v51 = vld [vmem:[#allocation3 + $0x5f] sm:$0xff] }
 0x3c1   :  { %v9930_v45 = vadd.f32 %v2425_v36, %v9662_v34  ;;  %v2427_v40 = vpop.f32.mrb[47].mxu1  ;;  %4470 = vperm.xlu1 %7545, %v6867_v32   ;;  %v2555_v36 = vmul.f32 %v9829_v58, %v2443_v55  ;;  %v2447_v55 = vld [vmem:[#allocation3 + $0x57] sm:$0xff] }
 0x3c2   :  { %v2553_v40 = vmul.f32 %v9808_v5, %v2441_v38 }
 0x3c3   :  { %7262 = vmatpush3.bf16.msra.mxu0 %v7573_v24  ;;  %4475 = vperm.xlu0 %7546, %v6868_v8   ;;  %v7830_v8 = vpop.eup %7829  ;;  %v2568_v33 = vpack.c.bf16 %v2556_v28, %v2555_v36 }
 0x3c4   :  { %7263 = vmatprep.subr.bf16.mxu0 %v7574_v56  ;;  %v2567_v12 = vpack.c.bf16 %v2554_v37, %v2553_v40  ;;  %v6806_v37 = vld [vmem:[%s11651_s26 + $0xc0] sm:$0xff] }
 0x3c5   :  { %4198 = vperm.xlu1 %7545, %v6835_v27  }
 0x3c6   :  { %v2430_v25 = vpop.f32.mrb[48].mxu1 }
 0x3c7   :  { %v2537_v48 = vpop.permute.xlu0 %2536  ;;  %7264 = vmatpush3.bf16.msra.mxu0 %v7574_v56  ;;  %v2432_v21 = vpop.f32.mrb[49].mxu1  ;;  %4203 = vperm.xlu0 %7546, %v6836_v2   ;;  %v9945_v53 = vadd.f32 %v2430_v25, %v9662_v34  ;;  %v2445_v2 = vld [vmem:[#allocation3 + $0x47] sm:$0xff]  ;;  %v9967_v25 = vadd.f32 %v9927_v17, %v9812_v13 }
 0x3c8   :  { %v2532_v32 = vpop.permute.xlu1 %2531  ;;  %v2433_v24 = vpop.f32.mrb[50].mxu1  ;;  %v6805_v21 = vld [vmem:[%s11651_s26 + $0xb8] sm:$0xff] }
 0x3c9   :  { %v9948_v57 = vadd.f32 %v2433_v24, %v9662_v34  ;;  %v2435_v56 = vpop.f32.mrb[51].mxu1  ;;  %3473 = vrot.lane.b32.xlu1 %v7830_v8, %s8167_s19  ;;  %v7832_v27 = vpop.eup %7831  ;;  %v2559_v8 = vmul.f32 %v9866_v7, %v2447_v55 }
 0x3ca   :  { %v7834_v38 = vpop.eup %7833 }
 0x3cb   :  { %v2725_v0 = vpop.permute.xlu0 %2724  ;;  %v2923_v34 = vpack.c.bf16 %v9948_v57, %v9945_v53  ;;  %3475 = vrot.lane.b32.xlu0 %v7832_v27, %s8167_s19  ;;  %v7836_v36 = vpop.eup %7835  ;;  %v3403_v56 = vadd.f32 1.0, %v7834_v38  ;;  %v2449_v27 = vld [vmem:[#allocation3 + $0x67] sm:$0xff] }
 0x3cc   :  { %v2723_v58 = vpop.permute.xlu1 %2722  ;;  %v2745_v24 = vsel %vm1016_vm2, %v2568_v33, %v2725_v0  ;;  %v2560_v0 = vmul.f32 %v9863_v47, %v2448_v51  ;;  %v6821_v33 = vld [vmem:[%s11651_s26 + $0x138] sm:$0xff]  ;;  %v6822_v47 = vld [vmem:[%s11651_s26 + $0x140] sm:$0xff]  ;;  %v6778_v51 = vmul.f32 -1.442695, %v9967_v25 }
 0x3cd   :  { %v2742_v5 = vsel %vm1016_vm2, %v2567_v12, %v2723_v58  ;;  %v2558_v12 = vmul.f32 %v9848_v14, %v2446_v42  ;;  %3936 = vperm.xlu1 %7545, %v6805_v21   ;;  %v2557_v58 = vmul.f32 %v9851_v22, %v2445_v2  ;;  %v9977_v14 = vadd.f32 %v9930_v45, %v9812_v13  ;;  %v2450_v42 = vld [vmem:[#allocation3 + $0x6f] sm:$0xff]  ;;  %v6869_v2 = vld [vmem:[%s11651_s26 + $0x2b8] sm:$0xff] }
 0x3ce   :  { %7245 = vmatprep.mubr.msk.bf16.mxu0 %vm434_vm4, %v2742_v5  ;;  %v3404_v21 = vadd.f32 1.0, %v7836_v36  ;;  %v2562_v5 = vmul.f32 %v2537_v48, %v2450_v42  ;;  %v2570_v22 = vpack.c.bf16 %v2560_v0, %v2559_v8  ;;  %7837 = vrcp.f32 %v3403_v56  ;;  %v2452_v36 = vld [vmem:[#allocation3 + $0x7f] sm:$0xff]  ;;  %v6870_v0 = vld [vmem:[%s11651_s26 + $0x2c0] sm:$0xff] }
 0x3cf   :  { %v2547_v28 = vpop.permute.xlu0 %2546  ;;  %7246 = vmatmul.mubr.msk.bf16.gmra.mrb[32].mxu0 %vm434_vm4, %v2745_v24  ;;  %3941 = vperm.xlu0 %7546, %v6806_v37   ;;  %v2561_v24 = vmul.f32 %v2532_v32, %v2449_v27  ;;  %v2569_v55 = vpack.c.bf16 %v2558_v12, %v2557_v58  ;;  %v6779_v48 = vmul.f32 -1.442695, %v9977_v14  ;;  %v6837_v42 = vld [vmem:[%s11651_s26 + $0x1b8] sm:$0xff] }
 0x3d0   :  { %v2542_v40 = vpop.permute.xlu1 %2541  ;;  %7839 = vrcp.f32 %v3404_v21  ;;  %v2564_v8 = vmul.f32 %v2547_v28, %v2452_v36  ;;  %v6838_v21 = vld [vmem:[%s11651_s26 + $0x1c0] sm:$0xff] }
 0x3d1   :  { %4072 = vperm.xlu1 %7545, %v6821_v33   ;;  %v2571_v12 = vpack.c.bf16 %v2562_v5, %v2561_v24  ;;  %v2451_v33 = vld [vmem:[#allocation3 + $0x77] sm:$0xff]  ;;  %7841 = vpow2.f32 %v6778_v51  ;;  %v10020_v51 = vadd.f32 %v9945_v53, %v9812_v13 }
 0x3d2   :  { %v2563_v56 = vmul.f32 %v2542_v40, %v2451_v33  ;;  %7843 = vpow2.f32 %v6779_v48 }
 0x3d3   :  { %v2729_v7 = vpop.permute.xlu0 %2728  ;;  %4077 = vperm.xlu0 %7546, %v6822_v47   ;;  %7845 = vtanh.f32 %v9676_v26  ;;  %v6807_v47 = vld [vmem:[%s11651_s26 + $0xc8] sm:$0xff]  ;;  %v6780_v36 = vmul.f32 -1.442695, %v10020_v51 }
 0x3d4   :  { %v2727_v38 = vpop.permute.xlu1 %2726  ;;  %v2751_v32 = vsel %vm1016_vm2, %v2570_v22, %v2729_v7  ;;  %v2572_v5 = vpack.c.bf16 %v2564_v8, %v2563_v56  ;;  %7847 = vtanh.f32 %v9689_v63  ;;  %v6808_v63 = vld [vmem:[%s11651_s26 + $0xd0] sm:$0xff]  ;;  %v6823_v22 = vld [vmem:[%s11651_s26 + $0x148] sm:$0xff] }
 0x3d5   :  { %v2748_v37 = vsel %vm1016_vm2, %v2569_v55, %v2727_v38  ;;  %4480 = vperm.xlu1 %7545, %v6869_v2   ;;  %v10027_v38 = vadd.f32 %v9948_v57, %v9812_v13 }
 0x3d6   :  { %7249 = vmatprep.mubr.msk.bf16.mxu0 %vm434_vm4, %v2748_v37 }
 0x3d7   :  { %7250 = vmatmul.mubr.msk.bf16.gmra.mrb[36].mxu0 %vm434_vm4, %v2751_v32  ;;  %4485 = vperm.xlu0 %7546, %v6870_v0   ;;  %v2733_v28 = vpop.permute.xlu0 %2732  ;;  %v6871_v0 = vld [vmem:[%s11651_s26 + $0x2c8] sm:$0xff]  ;;  %v6781_v9 = vmul.f32 -1.442695, %v10027_v38 }
 0x3d8   :  { %v2731_v58 = vpop.permute.xlu1 %2730  ;;  %v2757_v40 = vsel %vm1016_vm2, %v2572_v5, %v2733_v28  ;;  %v7838_v24 = vpop.eup %7837  ;;  %v6825_v28 = vld [vmem:[%s11651_s26 + $0x158] sm:$0xff] }
 0x3d9   :  { %v2754_v27 = vsel %vm1016_vm2, %v2571_v12, %v2731_v58  ;;  %4208 = vperm.xlu1 %7545, %v6837_v42   ;;  %v6824_v12 = vld [vmem:[%s11651_s26 + $0x150] sm:$0xff]  ;;  %v6809_v58 = vld [vmem:[%s11651_s26 + $0xd8] sm:$0xff] }
 0x3da   :  { %7253 = vmatprep.mubr.msk.bf16.mxu0 %vm434_vm4, %v2754_v27  ;;  %v7840_v26 = vpop.eup %7839  ;;  %v11742_v27 = vpack.c.bf16 %v9930_v45, %v9927_v17  ;;  %v6873_v17 = vld [vmem:[%s11651_s26 + $0x2d8] sm:$0xff]  ;;  %v6874_v45 = vld [vmem:[%s11651_s26 + $0x2e0] sm:$0xff] }
 0x3db   :  { %4213 = vperm.xlu0 %7546, %v6838_v21   ;;  %v7842_v7 = vpop.eup %7841 }
 0x3dc   :  { %v7844_v55 = vpop.eup %7843  ;;  %v3405_v52 = vadd.f32 1.0, %v7842_v7 }
 0x3dd   :  { %3477 = vrot.lane.b32.xlu1 %v7838_v24, %s8167_s19  ;;  %v7846_v11 = vpop.eup %7845  ;;  %v3406_v48 = vadd.f32 1.0, %v7844_v55 }
 0x3de   :  { %v7848_v37 = vpop.eup %7847  ;;  %7849 = vrcp.f32 %v3405_v52  ;;  %v6813_v52 = vld [vmem:[%s11651_s26 + $0xf8] sm:$0xff] }
 0x3df   :  { %7254 = vmatmul.mubr.msk.bf16.gmra.mrb[40].mxu0 %vm434_vm4, %v2757_v40  ;;  %3479 = vrot.lane.b32.xlu0 %v7840_v26, %s8167_s19  ;;  %7851 = vrcp.f32 %v3406_v48  ;;  %v6841_v40 = vld [vmem:[%s11651_s26 + $0x1d8] sm:$0xff] }
 0x3e0   :  { %7265 = vmatprep.mubr.msk.bf16.mxu0 %vm434_vm4, %v2916_v35  ;;  %7853 = vpow2.f32 %v6780_v36  ;;  %v6877_v48 = vld [vmem:[%s11651_s26 + $0x2f8] sm:$0xff] }
 0x3e1   :  { %3946 = vperm.xlu1 %7545, %v6807_v47   ;;  %7855 = vpow2.f32 %v6781_v9  ;;  %v6842_v47 = vld [vmem:[%s11651_s26 + $0x1e0] sm:$0xff]  ;;  %v6812_v9 = vld [vmem:[%s11651_s26 + $0xf0] sm:$0xff] }
 0x3e2   :  { %7857 = vtanh.f32 %v9710_v54 }
 0x3e3   :  { %v3458_v35 = vpop.permute.xlu1 %3457  ;;  %3951 = vperm.xlu0 %7546, %v6808_v63  }
 0x3e4   :  { %v3505_v2 = vmul.f32 %v7846_v11, %v3458_v35  ;;  %v6811_v11 = vld [vmem:[%s11651_s26 + $0xe8] sm:$0xff] }
 0x3e5   :  { %v3460_v32 = vpop.permute.xlu0 %3459  ;;  %4082 = vperm.xlu1 %7545, %v6823_v22   ;;  %v6827_v35 = vld [vmem:[%s11651_s26 + $0x168] sm:$0xff]  ;;  %v6829_v22 = vld [vmem:[%s11651_s26 + $0x178] sm:$0xff] }
 0x3e6   :  { %3687 = vst.msk [vmem:[#allocation2 + $0x10] sm:$0xff] %vm1016_vm2, %v3505_v2  ;;  %v3506_v33 = vmul.f32 %v7848_v37, %v3460_v32  ;;  %v6875_v2 = vld [vmem:[%s11651_s26 + $0x2e8] sm:$0xff] }
 0x3e7   :  { %7266 = vmatmul.mubr.msk.bf16.vlgmr.msra.gmra.mrb[28].mxu0 %vm434_vm4, %v2917_v20  ;;  %4087 = vperm.xlu0 %7546, %v6824_v12   ;;  %v6839_v20 = vld [vmem:[%s11651_s26 + $0x1c8] sm:$0xff] }
 0x3e8   :  { %7269 = vmatprep.mubr.msk.bf16.mxu0 %vm434_vm4, %v2918_v30  ;;  %3688 = vst.msk [vmem:[#allocation2 + $0x18] sm:$0xff] %vm1016_vm2, %v3506_v33  ;;  %v11740_v30 = vpack.c.bf16 %v9818_v10, %v9815_v29  ;;  %v7850_v8 = vpop.eup %7849  ;;  %v6843_v12 = vld [vmem:[%s11651_s26 + $0x1e8] sm:$0xff] }
 0x3e9   :  { %4490 = vperm.xlu1 %7545, %v6871_v0   ;;  %v7852_v56 = vpop.eup %7851  ;;  %v3748_v33 = vld [vmem:[%s11651_s26 + $0x8] sm:$0xff] }
 0x3ea   :  { %v7854_v42 = vpop.eup %7853 }
 0x3eb   :  { %4495 = vperm.xlu0 %7546, %v6872_v50   ;;  %v7856_v29 = vpop.eup %7855  ;;  %v3407_v21 = vadd.f32 1.0, %v7854_v42  ;;  %v3750_v42 = vld [vmem:[%s11651_s26 + $0x18] sm:$0xff] }
 0x3ec   :  { %v3408_v1 = vadd.f32 1.0, %v7856_v29  ;;  %v7858_v24 = vpop.eup %7857 }
 0x3ed   :  { %4218 = vperm.xlu1 %7545, %v6839_v20   ;;  %7859 = vrcp.f32 %v3407_v21  ;;  %v6845_v20 = vld [vmem:[%s11651_s26 + $0x1f8] sm:$0xff] }
 0x3ee   :  { %7861 = vtanh.f32 %v9721_v49 }
 0x3ef   :  { %7270 = vmatmul.mubr.msk.bf16.gmra.mrb[32].mxu0 %vm434_vm4, %v11739_v15  ;;  %4223 = vperm.xlu0 %7546, %v6840_v31   ;;  %7863 = vrcp.f32 %v3408_v1  ;;  %v6849_v1 = vld [vmem:[%s11651_s26 + $0x218] sm:$0xff] }
 0x3f0   :  { %7273 = vmatprep.mubr.msk.bf16.mxu0 %vm434_vm4, %v11740_v30  ;;  %7865 = vtanh.f32 %v9741_v62  ;;  %v6828_v62 = vld [vmem:[%s11651_s26 + $0x170] sm:$0xff] }
 0x3f1   :  { %3481 = vrot.lane.b32.xlu1 %v7850_v8, %s8167_s19  ;;  %7867 = vtanh.f32 %v9751_v43  ;;  %v6847_v43 = vld [vmem:[%s11651_s26 + $0x208] sm:$0xff]  ;;  %v6876_v8 = vld [vmem:[%s11651_s26 + $0x2f0] sm:$0xff] }
 0x3f2   :  { %7869 = vtanh.f32 %v9769_v18  ;;  %v3867_v18 = vld [vmem:[#allocation2 + $0x8] sm:$0xff] }
 0x3f3   :  { %3483 = vrot.lane.b32.xlu0 %v7852_v56, %s8167_s19  ;;  %7871 = vtanh.f32 %v9783_v6  ;;  %v6848_v6 = vld [vmem:[%s11651_s26 + $0x210] sm:$0xff] }
 0x3f4   :  { %7873 = vtanh.f32 %v9836_v23 }
 0x3f5   :  { %3956 = vperm.xlu1 %7545, %v6809_v58   ;;  %7875 = vtanh.f32 %v9843_v19 }
 0x3f6   :  { %v10077_v10 = vpop.permute.xlu0 %3901  ;;  %7877 = vtanh.f32 %v9900_v41 }
 0x3f7   :  { %7274 = vmatmul.mubr.msk.bf16.gmra.mrb[36].mxu0 %vm434_vm4, %v11741_v16  ;;  %3961 = vperm.xlu0 %7546, %v6810_v4   ;;  %v7860_v53 = vpop.eup %7859  ;;  %7879 = vtanh.f32 %v9910_v59 }
 0x3f8   :  { %7277 = vmatprep.mubr.msk.bf16.mxu0 %vm434_vm4, %v11742_v27  ;;  %v7862_v57 = vpop.eup %7861  ;;  %v3747_v27 = vld [vmem:[%s11651_s26] sm:$0xff]  ;;  %7881 = vtanh.f32 %v9967_v25 }
 0x3f9   :  { %4092 = vperm.xlu1 %7545, %v6825_v28   ;;  %v7864_v63 = vpop.eup %7863  ;;  %7883 = vtanh.f32 %v9977_v14 }
 0x3fa   :  { %v10089_v54 = vpop.permute.xlu0 %4037  ;;  %v7866_v56 = vpop.eup %7865  ;;  %7885 = vtanh.f32 %v10020_v51 }
 0x3fb   :  { %4097 = vperm.xlu0 %7546, %v6826_v44   ;;  %v7868_v16 = vpop.eup %7867  ;;  %7887 = vtanh.f32 %v10027_v38  ;;  %v8146_v38 = vld [vmem:[%s11609_s11 + $0x4] sm:$0xf] }
 0x3fc   :  { %v2927_v3 = vrot.slane %v8146_v38, %v11754_v46 }
 0x3fd   :  { %4500 = vperm.xlu1 %7545, %v6873_v17   ;;  %v6844_v17 = vld [vmem:[%s11651_s26 + $0x1f0] sm:$0xff] }
 0x3fe   :  { %v10102_v5 = vpop.permute.xlu0 %4445 }
 0x3ff   :  { %7278 = vmatmul.mubr.msk.bf16.gmra.mrb[40].mxu0 %vm434_vm4, %v2923_v34  ;;  %4505 = vperm.xlu0 %7546, %v6874_v45   ;;  %v3462_v49 = vpop.permute.xlu1 %3461 }
 0x400   :  { %v3507_v26 = vmul.f32 %v7858_v24, %v3462_v49  ;;  %v6846_v24 = vld [vmem:[%s11651_s26 + $0x200] sm:$0xff] }
 0x401   :  { %4228 = vperm.xlu1 %7545, %v6841_v40  }
 0x402   :  { %v10110_v7 = vpop.permute.xlu0 %4173  ;;  %3689 = vst.msk [vmem:[#allocation2 + $0x20] sm:$0xff] %vm1016_vm2, %v3507_v26 }
 0x403   :  { %4233 = vperm.xlu0 %7546, %v6842_v47   ;;  %v3749_v47 = vld [vmem:[%s11651_s26 + $0x10] sm:$0xff] }
 0x405   :  { %3485 = vrot.lane.b32.xlu1 %v7860_v53, %s8167_s19 }
 0x406   :  { %v3464_v34 = vpop.permute.xlu0 %3463 }
 0x407   :  { %v3508_v55 = vmul.f32 %v7862_v57, %v3464_v34  ;;  %3487 = vrot.lane.b32.xlu0 %v7864_v63, %s8167_s19  ;;  %v3868_v57 = vld [vmem:[#allocation2 + $0x10] sm:$0xff] }
 0x409   :  { %3690 = vst.msk [vmem:[#allocation2 + $0x28] sm:$0xff] %vm1016_vm2, %v3508_v55  ;;  %3966 = vperm.xlu1 %7545, %v6811_v11   ;;  %v7870_v55 = vpop.eup %7869 }
 0x40b   :  { %3976 = vperm.xlu0 %7546, %v6813_v52   ;;  %v3979_v52 = vmul.f32 %v10077_v10, %v3867_v18 }
 0x40d   :  { %4102 = vperm.xlu1 %7545, %v6827_v35  }
 0x40f   :  { %4112 = vperm.xlu0 %7546, %v6829_v22   ;;  %v7872_v22 = vpop.eup %7871 }
 0x410   :  { %v3907_v37 = vpop.permute.xlu1 %3906 }
 0x411   :  { %4510 = vperm.xlu1 %7545, %v6875_v2   ;;  %v3980_v63 = vmul.f32 %v3907_v37, %v3868_v57 }
 0x412   :  { %v10134_v32 = vpop.permute.xlu0 %3911 }
 0x413   :  { %4520 = vperm.xlu0 %7546, %v6877_v48   ;;  %v3995_v48 = vpack.c.bf16 %v3980_v63, %v3979_v52 }
 0x414   :  { %v10139_v36 = vpop.permute.xlu1 %4042 }
 0x415   :  { %4238 = vperm.xlu1 %7545, %v6843_v12  }
 0x416   :  { %v10145_v0 = vpop.permute.xlu0 %4047 }
 0x417   :  { %3770 = vperm.xlu0 %7546, %v3748_v33  }
 0x418   :  { %v10151_v50 = vpop.permute.xlu1 %4450 }
 0x419   :  { %3971 = vperm.xlu1 %7545, %v6812_v9  }
 0x41a   :  { %v10156_v31 = vpop.permute.xlu0 %4455 }
 0x41b   :  { %4248 = vperm.xlu0 %7546, %v6845_v20  }
 0x41c   :  { %v10161_v15 = vpop.permute.xlu1 %4178 }
 0x41d   :  { %4107 = vperm.xlu1 %7545, %v6828_v62  }
 0x41e   :  { %v10166_v30 = vpop.permute.xlu0 %4183 }
 0x41f   :  { %4314 = vperm.xlu0 %7546, %v6847_v43  }
 0x420   :  { %v3466_v58 = vpop.permute.xlu1 %3465 }
 0x421   :  { %v3509_v4 = vmul.f32 %v7866_v56, %v3466_v58  ;;  %4515 = vperm.xlu1 %7545, %v6876_v8   ;;  %v7874_v56 = vpop.eup %7873 }
 0x422   :  { %v3468_v29 = vpop.permute.xlu0 %3467 }
 0x423   :  { %3691 = vst.msk [vmem:[#allocation2 + $0x30] sm:$0xff] %vm1016_vm2, %v3509_v4  ;;  %v3510_v21 = vmul.f32 %v7868_v16, %v3468_v29  ;;  %3780 = vperm.xlu0 %7546, %v3750_v42   ;;  %v7876_v4 = vpop.eup %7875 }
 0x424   :  { %v10178_v28 = vpop.permute.xlu1 %3916  ;;  %v7878_v18 = vpop.eup %7877 }
 0x425   :  { %3692 = vst.msk [vmem:[#allocation2 + $0x38] sm:$0xff] %vm1016_vm2, %v3510_v21  ;;  %3765 = vperm.xlu1 %7545, %v3747_v27   ;;  %v7880_v63 = vpop.eup %7879 }
 0x426   :  { %v10184_v44 = vpop.permute.xlu0 %3921 }
 0x427   :  { %4324 = vperm.xlu0 %7546, %v6849_v1  }
 0x428   :  { %v10189_v45 = vpop.permute.xlu1 %4052 }
 0x429   :  { %4243 = vperm.xlu1 %7545, %v6844_v17  }
 0x42a   :  { %v10192_v40 = vpop.permute.xlu0 %4057 }
 0x42c   :  { %v10198_v49 = vpop.permute.xlu1 %4460 }
 0x42d   :  { %4309 = vperm.xlu1 %7545, %v6846_v24  }
 0x42e   :  { %v10200_v26 = vpop.permute.xlu0 %4465 }
 0x430   :  { %v10205_v53 = vpop.permute.xlu1 %4188 }
 0x431   :  { %3775 = vperm.xlu1 %7545, %v3749_v47  }
 0x432   :  { %v10207_v34 = vpop.permute.xlu0 %4193 }
 0x434   :  { %v3470_v11 = vpop.permute.xlu1 %3469 }
 0x435   :  { %v3511_v35 = vmul.f32 %v7870_v55, %v3470_v11  ;;  %4319 = vperm.xlu1 %7545, %v6848_v6  }
 0x436   :  { %v3472_v2 = vpop.permute.xlu0 %3471 }
 0x437   :  { %3693 = vst.msk [vmem:[#allocation2 + $0x40] sm:$0xff] %vm1016_vm2, %v3511_v35  ;;  %v3512_v12 = vmul.f32 %v7872_v22, %v3472_v2 }
 0x438   :  { %v10214_v33 = vpop.permute.xlu1 %3926 }
 0x439   :  { %3694 = vst.msk [vmem:[#allocation2 + $0x48] sm:$0xff] %vm1016_vm2, %v3512_v12  ;;  %4555 = vrot.lane.b32.xlu1 %v3995_v48, %s8168_s0 }
 0x43a   :  { %v10218_v9 = vpop.permute.xlu0 %3931 }
 0x43c   :  { %v10220_v37 = vpop.permute.xlu1 %4062 }
 0x43e   :  { %v10223_v10 = vpop.permute.xlu0 %4067 }
 0x440   :  { %v10226_v20 = vpop.permute.xlu1 %4470 }
 0x442   :  { %v10228_v62 = vpop.permute.xlu0 %4475 }
 0x444   :  { %v10230_v43 = vpop.permute.xlu1 %4198 }
 0x446   :  { %v10232_v8 = vpop.permute.xlu0 %4203 }
 0x448   :  { %v3474_v58 = vpop.permute.xlu1 %3473 }
 0x449   :  { %v3513_v42 = vmul.f32 %v7874_v56, %v3474_v58  ;;  %v7882_v56 = vpop.eup %7881 }
 0x44a   :  { %v3476_v16 = vpop.permute.xlu0 %3475 }
 0x44b   :  { %3695 = vst.msk [vmem:[#allocation2 + $0x50] sm:$0xff] %vm1016_vm2, %v3513_v42  ;;  %v3514_v23 = vmul.f32 %v7876_v4, %v3476_v16  ;;  %v7884_v4 = vpop.eup %7883 }
 0x44c   :  { %v10235_v29 = vpop.permute.xlu1 %3936 }
 0x44d   :  { %3696 = vst.msk [vmem:[#allocation2 + $0x58] sm:$0xff] %vm1016_vm2, %v3514_v23 }
 0x44e   :  { %v10238_v19 = vpop.permute.xlu0 %3941 }
 0x450   :  { %v10240_v27 = vpop.permute.xlu1 %4072 }
 0x452   :  { %v10243_v21 = vpop.permute.xlu0 %4077 }
 0x454   :  { %v10246_v1 = vpop.permute.xlu1 %4480 }
 0x456   :  { %v10248_v17 = vpop.permute.xlu0 %4485 }
 0x458   :  { %v10250_v24 = vpop.permute.xlu1 %4208 }
 0x45a   :  { %v10252_v47 = vpop.permute.xlu0 %4213 }
 0x45c   :  { %v3478_v57 = vpop.permute.xlu1 %3477 }
 0x45d   :  { %v3515_v6 = vmul.f32 %v7878_v18, %v3478_v57 }
 0x45e   :  { %v3480_v55 = vpop.permute.xlu0 %3479 }
 0x45f   :  { %3697 = vst.msk [vmem:[#allocation2 + $0x60] sm:$0xff] %vm1016_vm2, %v3515_v6  ;;  %v3516_v41 = vmul.f32 %v7880_v63, %v3480_v55 }
 0x460   :  { %v10255_v11 = vpop.permute.xlu1 %3946 }
 0x461   :  { %3698 = vst.msk [vmem:[#allocation2 + $0x68] sm:$0xff] %vm1016_vm2, %v3516_v41 }
 0x462   :  { %v10258_v59 = vpop.permute.xlu0 %3951 }
 0x463   :  { %11743 = vst [vmem:[#allocation9_spill] sm:$0xff] %v10258_v59 }
 0x464   :  { %v10260_v52 = vpop.permute.xlu1 %4082 }
 0x466   :  { %v10263_v35 = vpop.permute.xlu0 %4087 }
 0x467   :  { %11744 = vst [vmem:[#allocation7_spill] sm:$0xff] %v10263_v35 }
 0x468   :  { %v10266_v22 = vpop.permute.xlu1 %4490 }
 0x46a   :  { %v10268_v2 = vpop.permute.xlu0 %4495 }
 0x46b   :  { %11745 = vst [vmem:[#allocation8_spill] sm:$0xff] %v10268_v2 }
 0x46c   :  { %v10270_v48 = vpop.permute.xlu1 %4218 }
 0x46e   :  { %v10272_v12 = vpop.permute.xlu0 %4223 }
 0x46f   :  { %11746 = vst [vmem:[#allocation11_spill] sm:$0xff] %v10272_v12 }
 0x470   :  { %v3482_v58 = vpop.permute.xlu1 %3481 }
 0x471   :  { %v3517_v42 = vmul.f32 %v7882_v56, %v3482_v58  ;;  %v7886_v56 = vpop.eup %7885 }
 0x472   :  { %v3484_v16 = vpop.permute.xlu0 %3483 }
 0x473   :  { %3699 = vst.msk [vmem:[#allocation2 + $0x70] sm:$0xff] %vm1016_vm2, %v3517_v42  ;;  %v3518_v25 = vmul.f32 %v7884_v4, %v3484_v16  ;;  %v7888_v4 = vpop.eup %7887 }
 0x474   :  { %v10275_v23 = vpop.permute.xlu1 %3956 }
 0x475   :  { %11747 = vst [vmem:[#allocation10_spill] sm:$0xff] %v10275_v23  ;;  %3700 = vst.msk [vmem:[#allocation2 + $0x78] sm:$0xff] %vm1016_vm2, %v3518_v25  ;;  %v2769_v25 = vrot.slane %v8146_v38, %v11738_v60 }
 0x476   :  { %v10278_v14 = vpop.permute.xlu0 %3961 }
 0x477   :  { %11748 = vst [vmem:[#allocation14_spill] sm:$0xff] %v10278_v14 }
 0x478   :  { %v10280_v18 = vpop.permute.xlu1 %4092 }
 0x47a   :  { %v10283_v57 = vpop.permute.xlu0 %4097 }
 0x47b   :  { %11749 = vst [vmem:[#allocation17_spill] sm:$0xff] %v10283_v57 }
 0x47c   :  { %v10286_v6 = vpop.permute.xlu1 %4500 }
 0x47d   :  { %11750 = vst [vmem:[#allocation18_spill] sm:$0xff] %v10286_v6 }
 0x47e   :  { %v10288_v63 = vpop.permute.xlu0 %4505 }
 0x47f   :  { %11751 = vst [vmem:[#allocation13_spill] sm:$0xff] %v10288_v63  ;;  %v10301_v63 = vadd.f32 %v2927_v3, %v2769_v25  ;;  %v7575_v3 = vld [vmem:[%s11611_s10 + $0x10] sm:$0xff]  }
 0x480   :  { %v10290_v55 = vpop.permute.xlu1 %4228  ;;  %7281 = vmatprep.subr.bf16.mxu0 %v7575_v3 }
 0x481   :  { %11752 = vst [vmem:[#allocation12_spill] sm:$0xff] %v10290_v55  ;;  %7282 = vmatpush3.bf16.msra.mxu0 %v7575_v3 }
 0x482   :  { %v10292_v41 = vpop.permute.xlu0 %4233 }
 0x483   :  { %11753 = vst [vmem:[#allocation15_spill] sm:$0xff] %v10292_v41 }
 0x484   :  { %v3486_v58 = vpop.permute.xlu1 %3485 }
 0x485   :  { %v3519_v42 = vmul.f32 %v7886_v56, %v3486_v58 }
 0x486   :  { %v3488_v16 = vpop.permute.xlu0 %3487 }
 0x487   :  { %3701 = vst.msk [vmem:[#allocation2 + $0x80] sm:$0xff] %vm1016_vm2, %v3519_v42  ;;  %v3520_v51 = vmul.f32 %v7888_v4, %v3488_v16 }
 0x489   :  { %3702 = vst.msk [vmem:[#allocation2 + $0x88] sm:$0xff] %vm1016_vm2, %v3520_v51 }
 0x4ba   :  { %v7267_v41 = vpop.f32.mrb[28].mxu0 }
 0x4bb   :  { %v7426_v56 = vadd.f32 %v10301_v63, %v7267_v41  ;;  %v3010_v58 = vpop.f32.mrb[29].mxu0 }
 0x4bc   :  { %v7428_v14 = vadd.f32 %v10301_v63, %v3010_v58  ;;  %v7268_v42 = vpop.f32.mrb[30].mxu0 }
 0x4bd   :  { %v10306_v4 = vadd.f32 %v7426_v56, %v9666_v61  ;;  %v7430_v16 = vadd.f32 %v10301_v63, %v7268_v42  ;;  %v3013_v51 = vpop.f32.mrb[31].mxu0 }
 0x4be   :  { %v10310_v57 = vadd.f32 %v7428_v14, %v9666_v61  ;;  %v7432_v38 = vadd.f32 %v10301_v63, %v3013_v51 }
 0x4bf   :  { %v6752_v41 = vmul.f32 -1.442695, %v10306_v4  ;;  %v10318_v25 = vadd.f32 %v7430_v16, %v9666_v61 }
 0x4c0   :  { %v6750_v56 = vmul.f32 -1.442695, %v10310_v57  ;;  %v10322_v58 = vadd.f32 %v7432_v38, %v9666_v61 }
 0x4c1   :  { %7889 = vpow2.f32 %v6752_v41  ;;  %v6753_v14 = vmul.f32 -1.442695, %v10318_v25 }
 0x4c2   :  { %7891 = vpow2.f32 %v6750_v56  ;;  %v6751_v42 = vmul.f32 -1.442695, %v10322_v58  ;;  %v7271_v51 = vpop.f32.mrb[32].mxu0 }
 0x4c3   :  { %v7434_v46 = vadd.f32 %v10301_v63, %v7271_v51  ;;  %v3026_v60 = vpop.f32.mrb[33].mxu0  ;;  %7893 = vpow2.f32 %v6753_v14 }
 0x4c4   :  { %v7436_v16 = vadd.f32 %v10301_v63, %v3026_v60  ;;  %v7272_v2 = vpop.f32.mrb[34].mxu0  ;;  %7895 = vpow2.f32 %v6751_v42 }
 0x4c5   :  { %v10329_v6 = vadd.f32 %v7434_v46, %v9666_v61  ;;  %v7438_v38 = vadd.f32 %v10301_v63, %v7272_v2  ;;  %v3029_v41 = vpop.f32.mrb[35].mxu0 }
 0x4c6   :  { %v10333_v3 = vadd.f32 %v7436_v16, %v9666_v61  ;;  %v7440_v56 = vadd.f32 %v10301_v63, %v3029_v41 }
 0x4c7   :  { %11755 = vst [vmem:[#allocation16_spill] sm:$0xff] %v10329_v6  ;;  %v6756_v12 = vmul.f32 -1.442695, %v10329_v6  ;;  %v10338_v51 = vadd.f32 %v7438_v38, %v9666_v61 }
 0x4c8   :  { %11756 = vst [vmem:[#allocation19_spill] sm:$0xff] %v10333_v3  ;;  %v6754_v60 = vmul.f32 -1.442695, %v10333_v3  ;;  %v10342_v14 = vadd.f32 %v7440_v56, %v9666_v61 }
 0x4c9   :  { %11757 = vst [vmem:[#allocation20_spill] sm:$0xff] %v10338_v51  ;;  %7897 = vpow2.f32 %v6756_v12  ;;  %v6757_v46 = vmul.f32 -1.442695, %v10338_v51 }
 0x4ca   :  { %11758 = vst [vmem:[#allocation21_spill] sm:$0xff] %v10342_v14  ;;  %v7275_v2 = vpop.f32.mrb[36].mxu0  ;;  %7899 = vpow2.f32 %v6754_v60  ;;  %v6755_v38 = vmul.f32 -1.442695, %v10342_v14  ;;  %v7576_v60 = vld [vmem:[%s11612_s7 + $0x60] sm:$0xff]  }
 0x4cb   :  { %v7890_v42 = vpop.eup %7889  ;;  %v7442_v16 = vadd.f32 %v10301_v63, %v7275_v2  ;;  %v3042_v55 = vpop.f32.mrb[37].mxu0  ;;  %7901 = vpow2.f32 %v6757_v46  ;;  %v7577_v46 = vld [vmem:[%s11611_s10 + $0x18] sm:$0xff]   ;;  %4849 = vmatpush1.bf16.msra.mxu1 %v7576_v60 }
 0x4cc   :  { %v7892_v41 = vpop.eup %7891  ;;  %v3171_v59 = vadd.f32 1.0, %v7890_v42  ;;  %v7444_v6 = vadd.f32 %v10301_v63, %v3042_v55  ;;  %v7276_v3 = vpop.f32.mrb[38].mxu0  ;;  %7283 = vmatprep.subr.bf16.mxu0 %v7577_v46  ;;  %4850 = vmatprep.subr.bf16.mxu1 %v11696_v39 }
 0x4cd   :  { %v10349_v61 = vadd.f32 %v7442_v16, %v9812_v13  ;;  %v3045_v12 = vpop.f32.mrb[39].mxu0  ;;  %v7894_v56 = vpop.eup %7893  ;;  %v3169_v51 = vadd.f32 1.0, %v7892_v41  ;;  %v7446_v42 = vadd.f32 %v10301_v63, %v7276_v3  ;;  %7284 = vmatpush3.bf16.msra.mxu0 %v7577_v46  ;;  %v7578_v3 = vld [vmem:[%s11612_s7 + $0x68] sm:$0xff]  }
 0x4ce   :  { %7903 = vrcp.f32 %v3171_v59  ;;  %v3172_v2 = vadd.f32 1.0, %v7894_v56  ;;  %v7896_v55 = vpop.eup %7895  ;;  %v10360_v14 = vadd.f32 %v7444_v6, %v9812_v13  ;;  %v7448_v41 = vadd.f32 %v10301_v63, %v3045_v12 }
 0x4cf   :  { %11759 = vst [vmem:[#allocation22_spill] sm:$0xff] %v10349_v61  ;;  %7905 = vpow2.f32 %v6755_v38  ;;  %v6760_v16 = vmul.f32 -1.442695, %v10349_v61  ;;  %v3170_v59 = vadd.f32 1.0, %v7896_v55  ;;  %v10368_v61 = vadd.f32 %v7446_v42, %v9812_v13  ;;  %4851 = vmatpush1.bf16.msra.mxu1 %v7578_v3  ;;  %v7579_v42 = vld [vmem:[%s11612_s7 + $0x70] sm:$0xff]  }
 0x4d0   :  { %11760 = vst [vmem:[#allocation25_spill] sm:$0xff] %v10360_v14  ;;  %7907 = vrcp.f32 %v3172_v2  ;;  %v6758_v2 = vmul.f32 -1.442695, %v10360_v14  ;;  %4852 = vmatprep.subr.bf16.mxu1 %v11696_v39  ;;  %v10374_v35 = vadd.f32 %v7448_v41, %v9812_v13 }
 0x4d1   :  { %7909 = vrcp.f32 %v3169_v51 }
 0x4d2   :  { %v7279_v56 = vpop.f32.mrb[40].mxu0  ;;  %7911 = vpow2.f32 %v6760_v16 }
 0x4d3   :  { %v7898_v38 = vpop.eup %7897  ;;  %v3058_v6 = vpop.f32.mrb[41].mxu0  ;;  %v7450_v46 = vadd.f32 %v10301_v63, %v7279_v56  ;;  %7913 = vrcp.f32 %v3170_v59  ;;  %4853 = vmatpush1.bf16.msra.mxu1 %v7579_v42 }
 0x4d4   :  { %v3175_v60 = vadd.f32 1.0, %v7898_v38  ;;  %v7280_v55 = vpop.f32.mrb[42].mxu0  ;;  %v7900_v51 = vpop.eup %7899  ;;  %v6761_v38 = vmul.f32 -1.442695, %v10368_v61  ;;  %v7452_v56 = vadd.f32 %v10301_v63, %v3058_v6  ;;  %4854 = vmatprep.subr.bf16.mxu1 %v11696_v39  ;;  %v7580_v6 = vld [vmem:[%s11612_s7 + $0x78] sm:$0xff]  }
 0x4d5   :  { %v3061_v12 = vpop.f32.mrb[43].mxu0  ;;  %v7902_v23 = vpop.eup %7901  ;;  %v3173_v14 = vadd.f32 1.0, %v7900_v51  ;;  %v10382_v59 = vadd.f32 %v7450_v46, %v9812_v13 }
 0x4d6   :  { %7915 = vrcp.f32 %v3175_v60  ;;  %v3176_v16 = vadd.f32 1.0, %v7902_v23  ;;  %v6759_v60 = vmul.f32 -1.442695, %v10374_v35  ;;  %v7454_v23 = vadd.f32 %v10301_v63, %v7280_v55 }
 0x4d7   :  { %7917 = vpow2.f32 %v6758_v2  ;;  %v10392_v46 = vadd.f32 %v7452_v56, %v9812_v13  ;;  %4855 = vmatpush1.bf16.msra.mxu1 %v7580_v6  ;;  %v7456_v55 = vadd.f32 %v10301_v63, %v3061_v12 }
 0x4d8   :  { %v7904_v3 = vpop.eup %7903  ;;  %7919 = vrcp.f32 %v3176_v16  ;;  %v6764_v16 = vmul.f32 -1.442695, %v10382_v59  ;;  %4856 = vmatprep.subr.bf16.mxu1 %v11696_v39 }
 0x4d9   :  { %3237 = vrot.lane.b32.xlu1 %v7904_v3, %s8167_s19  ;;  %v7906_v41 = vpop.eup %7905  ;;  %7921 = vpow2.f32 %v6761_v38  ;;  %v10400_v38 = vadd.f32 %v7454_v23, %v9812_v13  ;;  %v6762_v6 = vmul.f32 -1.442695, %v10392_v46  ;;  %v10408_v12 = vadd.f32 %v7456_v55, %v9812_v13 }
 0x4da   :  { %v7908_v51 = vpop.eup %7907  ;;  %v3174_v2 = vadd.f32 1.0, %v7906_v41  ;;  %7923 = vrcp.f32 %v3173_v14  ;;  %v7581_v14 = vld [vmem:[%s11612_s7 + $0x80] sm:$0xff]  }
 0x4db   :  { %v7910_v42 = vpop.eup %7909  ;;  %3239 = vrot.lane.b32.xlu0 %v7908_v51, %s8167_s19  ;;  %4857 = vmatpush1.bf16.msra.mxu1 %v7581_v14  ;;  %v6765_v23 = vmul.f32 -1.442695, %v10400_v38  ;;  %v7582_v51 = vld [vmem:[%s11612_s7 + $0x88] sm:$0xff]   ;;  %v6763_v13 = vmul.f32 -1.442695, %v10408_v12  ;;  %v7583_v14 = vld [vmem:[%s11612_s7 + $0x90] sm:$0xff]  }
 0x4dc   :  { %7925 = vrcp.f32 %v3174_v2  ;;  %v7912_v3 = vpop.eup %7911  ;;  %4858 = vmatprep.subr.bf16.mxu1 %v11696_v39 }
 0x4dd   :  { %3233 = vrot.lane.b32.xlu1 %v7910_v42, %s8167_s19  ;;  %7927 = vpow2.f32 %v6759_v60  ;;  %v7914_v56 = vpop.eup %7913  ;;  %v3179_v41 = vadd.f32 1.0, %v7912_v3 }
 0x4de   :  { %7929 = vpow2.f32 %v6764_v16 }
 0x4df   :  { %3235 = vrot.lane.b32.xlu0 %v7914_v56, %s8167_s19  ;;  %7931 = vrcp.f32 %v3179_v41  ;;  %4859 = vmatpush1.bf16.msra.mxu1 %v7582_v51 }
 0x4e0   :  { %v7916_v63 = vpop.eup %7915  ;;  %7933 = vpow2.f32 %v6762_v6  ;;  %4860 = vmatprep.subr.bf16.mxu1 %v11696_v39 }
 0x4e1   :  { %v7918_v60 = vpop.eup %7917 }
 0x4e2   :  { %v7920_v2 = vpop.eup %7919  ;;  %v3177_v42 = vadd.f32 1.0, %v7918_v60  ;;  %v7584_v60 = vld [vmem:[%s11612_s7 + $0x98] sm:$0xff]  }
 0x4e3   :  { %3245 = vrot.lane.b32.xlu0 %v7916_v63, %s8167_s19  ;;  %3247 = vrot.lane.b32.xlu1 %v7920_v2, %s8167_s19  ;;  %v7922_v16 = vpop.eup %7921 }
 0x4e4   :  { %7935 = vrcp.f32 %v3177_v42  ;;  %v7924_v55 = vpop.eup %7923  ;;  %v3180_v3 = vadd.f32 1.0, %v7922_v16  ;;  %4861 = vmatpush1.bf16.msra.mxu1 %v7583_v14  ;;  %v7585_v16 = vld [vmem:[%s11612_s7 + $0xa0] sm:$0xff]  }
 0x4e5   :  { %7937 = vpow2.f32 %v6765_v23  ;;  %4862 = vmatprep.subr.bf16.mxu1 %v11696_v39 }
 0x4e6   :  { %v7926_v56 = vpop.eup %7925  ;;  %7939 = vrcp.f32 %v3180_v3 }
 0x4e7   :  { %v7928_v41 = vpop.eup %7927  ;;  %3241 = vrot.lane.b32.xlu0 %v7924_v55, %s8167_s19  ;;  %3243 = vrot.lane.b32.xlu1 %v7926_v56, %s8167_s19  ;;  %7941 = vpow2.f32 %v6763_v13 }
 0x4e8   :  { %v3178_v6 = vadd.f32 1.0, %v7928_v41  ;;  %v7930_v63 = vpop.eup %7929  ;;  %4863 = vmatpush1.bf16.msra.mxu1 %v7584_v60  ;;  %v7586_v41 = vld [vmem:[%s11612_s7 + $0xa8] sm:$0xff]  }
 0x4e9   :  { %v7932_v23 = vpop.eup %7931  ;;  %v3183_v51 = vadd.f32 1.0, %v7930_v63  ;;  %4864 = vmatprep.subr.bf16.mxu1 %v11696_v39 }
 0x4ea   :  { %7943 = vrcp.f32 %v3178_v6  ;;  %v7934_v2 = vpop.eup %7933 }
 0x4eb   :  { %3253 = vrot.lane.b32.xlu0 %v7932_v23, %s8167_s19  ;;  %7945 = vrcp.f32 %v3183_v51  ;;  %v3181_v42 = vadd.f32 1.0, %v7934_v2  ;;  %v7587_v23 = vld [vmem:[%s11612_s7 + $0xb0] sm:$0xff]  }
 0x4ec   :  { %4865 = vmatpush1.bf16.msra.mxu1 %v7585_v16  ;;  %v4411_v51 = vld [vmem:[#allocation2 + $0x11] sm:$0xff]  ;;  %v4003_v16 = vld [vmem:[#allocation2 + $0x9] sm:$0xff] }
 0x4ed   :  { %7947 = vrcp.f32 %v3181_v42  ;;  %4866 = vmatprep.subr.bf16.mxu1 %v11696_v39  ;;  %v4116_v2 = vmul.f32 %v4411_v51, %v10139_v36 }
 0x4ee   :  { %v7936_v13 = vpop.eup %7935 }
 0x4ef   :  { %v7938_v55 = vpop.eup %7937  ;;  %3249 = vrot.lane.b32.xlu0 %v7936_v13, %s8167_s19  ;;  %v7588_v13 = vld [vmem:[%s11612_s7 + $0xb8] sm:$0xff]  }
 0x4f0   :  { %v3184_v3 = vadd.f32 1.0, %v7938_v55  ;;  %v7940_v14 = vpop.eup %7939  ;;  %4867 = vmatpush1.bf16.msra.mxu1 %v7586_v41  ;;  %v4115_v55 = vmul.f32 %v10089_v54, %v4003_v16  ;;  %v4005_v41 = vld [vmem:[#allocation2 + $0x19] sm:$0xff]  ;;  %v3752_v16 = vld [vmem:[%s11651_s26 + $0x28] sm:$0xff] }
 0x4f1   :  { %v7942_v56 = vpop.eup %7941  ;;  %3255 = vrot.lane.b32.xlu1 %v7940_v14, %s8167_s19  ;;  %4868 = vmatprep.subr.bf16.mxu1 %v11696_v39  ;;  %v10452_v14 = vld [vmem:[#allocation2 + $0x17] sm:$0xff] }
 0x4f2   :  { %7949 = vrcp.f32 %v3184_v3  ;;  %v3182_v6 = vadd.f32 1.0, %v7942_v56  ;;  %v4131_v56 = vpack.c.bf16 %v4116_v2, %v4115_v55  ;;  %v4252_v36 = vmul.f32 %v10161_v15, %v10452_v14 }
 0x4f4   :  { %v7944_v63 = vpop.eup %7943  ;;  %7951 = vrcp.f32 %v3182_v6  ;;  %4869 = vmatpush1.bf16.msra.mxu1 %v7587_v23  ;;  %v10459_v6 = vpop.permute.xlu1 %3966  ;;  %v4523_v23 = vmul.f32 %v10102_v5, %v4411_v51  ;;  %v4413_v5 = vld [vmem:[#allocation2 + $0x21] sm:$0xff] }
 0x4f5   :  { %v7946_v60 = vpop.eup %7945  ;;  %3251 = vrot.lane.b32.xlu1 %v7944_v63, %s8167_s19  ;;  %4870 = vmatprep.subr.bf16.mxu1 %v11696_v39  ;;  %v10457_v39 = vld [vmem:[#allocation2 + $0xf] sm:$0xff]  ;;  %v4524_v63 = vmul.f32 %v10151_v50, %v4005_v41  ;;  %v4118_v51 = vmul.f32 %v4413_v5, %v10189_v45  ;;  %7953 = vtanh.f32 %v10310_v57 }
 0x4f6   :  { %3261 = vrot.lane.b32.xlu0 %v7946_v60, %s8167_s19  ;;  %v4251_v54 = vmul.f32 %v10110_v7, %v10457_v39  ;;  %v3751_v7 = vld [vmem:[%s11651_s26 + $0x20] sm:$0xff]  ;;  %v6851_v50 = vld [vmem:[%s11651_s26 + $0x228] sm:$0xff]  ;;  %7955 = vtanh.f32 %v10318_v25 }
 0x4f7   :  { %v7948_v42 = vpop.eup %7947  ;;  %v4539_v15 = vpack.c.bf16 %v4524_v63, %v4523_v23  ;;  %v4142_v63 = vld [vmem:[#allocation2 + $0x27] sm:$0xff]  ;;  %7957 = vtanh.f32 %v10322_v58  ;;  %v11761_v58 = vld [vmem:[#allocation7_spill] sm:$0xff] }
 0x4f8   :  { %4871 = vmatpush1.bf16.msra.mxu1 %v7588_v13  ;;  %v4267_v2 = vpack.c.bf16 %v4252_v36, %v4251_v54  ;;  %v10481_v13 = vld [vmem:[#allocation2 + $0x20] sm:$0xff]  ;;  %v10491_v54 = vld [vmem:[#allocation2 + $0x18] sm:$0xff]  ;;  %v4254_v23 = vmul.f32 %v10205_v53, %v4142_v63  ;;  %7959 = vtanh.f32 %v10306_v4  ;;  %v6859_v57 = vld [vmem:[%s11651_s26 + $0x268] sm:$0xff] }
 0x4f9   :  { %v3982_v36 = vmul.f32 %v10178_v28, %v10481_v13  ;;  %v3981_v45 = vmul.f32 %v10134_v32, %v10491_v54  ;;  %v3878_v25 = vld [vmem:[#allocation2 + $0x60] sm:$0xff]  ;;  %v3877_v4 = vld [vmem:[#allocation2 + $0x58] sm:$0xff] }
 0x4fa   :  { %3257 = vrot.lane.b32.xlu0 %v7948_v42, %s8167_s19  ;;  %v10468_v42 = vpop.permute.xlu1 %4102 }
 0x4fc   :  { %v7950_v3 = vpop.eup %7949 }
 0x4fd   :  { %3263 = vrot.lane.b32.xlu1 %v7950_v3, %s8167_s19  ;;  %v6850_v3 = vld [vmem:[%s11651_s26 + $0x220] sm:$0xff] }
 0x4fe   :  { %4579 = vrot.lane.b32.xlu0 %v4131_v56, %s8169_s21  ;;  %v7952_v60 = vpop.eup %7951  ;;  %v10483_v55 = vpop.permute.xlu1 %4510  ;;  %v4117_v56 = vmul.f32 %v10145_v0, %v4005_v41  ;;  %v3996_v41 = vpack.c.bf16 %v3982_v36, %v3981_v45  ;;  %v10525_v45 = vld [vmem:[#allocation2 + $0x28] sm:$0xff] }
 0x501   :  { %3259 = vrot.lane.b32.xlu1 %v7952_v60, %s8167_s19  ;;  %v4132_v60 = vpack.c.bf16 %v4118_v51, %v4117_v56  ;;  %v6852_v56 = vld [vmem:[%s11651_s26 + $0x230] sm:$0xff] }
 0x502   :  { %4603 = vrot.lane.b32.xlu0 %v4267_v2, %s8167_s19  ;;  %v10496_v2 = vld [vmem:[#allocation2 + $0x1f] sm:$0xff] }
 0x503   :  { %v4253_v0 = vmul.f32 %v10166_v30, %v10496_v2 }
 0x505   :  { %4627 = vrot.lane.b32.xlu1 %v4539_v15, %s8168_s0  ;;  %v4007_v15 = vld [vmem:[#allocation2 + $0x29] sm:$0xff]  ;;  %v4268_v32 = vpack.c.bf16 %v4254_v23, %v4253_v0  ;;  %v3983_v0 = vmul.f32 %v10184_v44, %v10525_v45 }
 0x506   :  { %3790 = vperm.xlu0 %7546, %v3752_v16   ;;  %v4526_v28 = vmul.f32 %v10198_v49, %v4007_v15  ;;  %v10502_v16 = vpop.permute.xlu1 %4238  ;;  %v3753_v49 = vld [vmem:[%s11651_s26 + $0x30] sm:$0xff]  ;;  %v4119_v36 = vmul.f32 %v10192_v40, %v4007_v15  ;;  %v10534_v15 = vpop.permute.xlu0 %3976 }
 0x509   :  { %3785 = vperm.xlu1 %7545, %v3751_v7   ;;  %v4525_v7 = vmul.f32 %v10156_v31, %v4413_v5  ;;  %v4415_v31 = vld [vmem:[#allocation2 + $0x31] sm:$0xff] }
 0x50a   :  { %4334 = vperm.xlu0 %7546, %v6851_v50   ;;  %v3754_v50 = vld [vmem:[%s11651_s26 + $0x38] sm:$0xff]  ;;  %v10511_v30 = vpop.permute.xlu1 %3971  ;;  %v4120_v51 = vmul.f32 %v4415_v31, %v10220_v37 }
 0x50b   :  { %v4540_v53 = vpack.c.bf16 %v4526_v28, %v4525_v7  ;;  %v6853_v5 = vld [vmem:[%s11651_s26 + $0x238] sm:$0xff]  ;;  %v4143_v28 = vld [vmem:[#allocation2 + $0x2f] sm:$0xff] }
 0x50c   :  { %v4133_v37 = vpack.c.bf16 %v4120_v51, %v4119_v36  ;;  %v4009_v7 = vld [vmem:[#allocation2 + $0x39] sm:$0xff] }
 0x50d   :  { %4329 = vperm.xlu1 %7545, %v6850_v3   ;;  %v3872_v3 = vld [vmem:[#allocation2 + $0x30] sm:$0xff]  ;;  %v4121_v36 = vmul.f32 %v10223_v10, %v4009_v7 }
 0x50e   :  { %4581 = vrot.lane.b32.xlu0 %v4132_v60, %s8169_s21  ;;  %v3984_v63 = vmul.f32 %v10214_v33, %v3872_v3  ;;  %v4144_v60 = vld [vmem:[#allocation2 + $0x37] sm:$0xff]  ;;  %v10527_v23 = vpop.permute.xlu1 %4107  ;;  %v4528_v33 = vmul.f32 %v10226_v20, %v4009_v7  ;;  %v4417_v20 = vld [vmem:[#allocation2 + $0x41] sm:$0xff] }
 0x50f   :  { %v4122_v51 = vmul.f32 %v4417_v20, %v10240_v27  ;;  %v3874_v3 = vld [vmem:[#allocation2 + $0x40] sm:$0xff]  ;;  %v4529_v7 = vmul.f32 %v10228_v62, %v4417_v20  ;;  %v3757_v62 = vld [vmem:[%s11651_s26 + $0x50] sm:$0xff] }
 0x510   :  { %v3997_v40 = vpack.c.bf16 %v3984_v63, %v3983_v0  ;;  %v3986_v63 = vmul.f32 %v10235_v29, %v3874_v3  ;;  %v3873_v0 = vld [vmem:[#allocation2 + $0x38] sm:$0xff]  ;;  %v6856_v3 = vld [vmem:[%s11651_s26 + $0x250] sm:$0xff] }
 0x511   :  { %4557 = vrot.lane.b32.xlu1 %v3996_v41, %s8168_s0  ;;  %v4256_v41 = vmul.f32 %v10230_v43, %v4144_v60 }
 0x512   :  { %4605 = vrot.lane.b32.xlu0 %v4268_v32, %s8167_s19  ;;  %v4255_v32 = vmul.f32 %v10207_v34, %v4143_v28  ;;  %v10539_v44 = vpop.permute.xlu1 %4515  ;;  %v3756_v34 = vld [vmem:[%s11651_s26 + $0x48] sm:$0xff]  ;;  %v4134_v28 = vpack.c.bf16 %v4122_v51, %v4121_v36 }
 0x515   :  { %4629 = vrot.lane.b32.xlu1 %v4540_v53, %s8168_s0  ;;  %v4527_v53 = vmul.f32 %v10200_v26, %v4415_v31  ;;  %v3755_v26 = vld [vmem:[%s11651_s26 + $0x40] sm:$0xff] }
 0x516   :  { %3800 = vperm.xlu0 %7546, %v3754_v50   ;;  %v4269_v50 = vpack.c.bf16 %v4256_v41, %v4255_v32  ;;  %v10551_v31 = vpop.permute.xlu1 %3765  ;;  %v3985_v41 = vmul.f32 %v10218_v9, %v3873_v0  ;;  %v4145_v32 = vld [vmem:[#allocation2 + $0x3f] sm:$0xff]  ;;  %v4148_v0 = vld [vmem:[#allocation2 + $0x57] sm:$0xff] }
 0x517   :  { %v4541_v43 = vpack.c.bf16 %v4528_v33, %v4527_v53  ;;  %v4257_v53 = vmul.f32 %v10232_v8, %v4145_v32  ;;  %v3758_v8 = vld [vmem:[%s11651_s26 + $0x58] sm:$0xff] }
 0x518   :  { %v3998_v10 = vpack.c.bf16 %v3986_v63, %v3985_v41  ;;  %v3875_v63 = vld [vmem:[#allocation2 + $0x48] sm:$0xff]  ;;  %v4013_v32 = vld [vmem:[#allocation2 + $0x59] sm:$0xff] }
 0x519   :  { %3795 = vperm.xlu1 %7545, %v3753_v49   ;;  %v10545_v49 = vpop.permute.xlu0 %4112 }
 0x51a   :  { %4344 = vperm.xlu0 %7546, %v6853_v5   ;;  %v6855_v5 = vld [vmem:[%s11651_s26 + $0x248] sm:$0xff]  ;;  %v10566_v33 = vpop.permute.xlu1 %4243 }
 0x51d   :  { %4339 = vperm.xlu1 %7545, %v6852_v56   ;;  %v6854_v56 = vld [vmem:[%s11651_s26 + $0x240] sm:$0xff]  ;;  %v10562_v60 = vpop.permute.xlu0 %4520 }
 0x51e   :  { %4583 = vrot.lane.b32.xlu0 %v4133_v37, %s8169_s21  ;;  %v4146_v37 = vld [vmem:[#allocation2 + $0x47] sm:$0xff] }
 0x51f   :  { %v4258_v27 = vmul.f32 %v10250_v24, %v4146_v37  ;;  %v10576_v24 = vpop.permute.xlu1 %4309  ;;  %v3987_v37 = vmul.f32 %v10238_v19, %v3875_v63  ;;  %v11765_v63 = vld [vmem:[#allocation12_spill] sm:$0xff] }
 0x521   :  { %4559 = vrot.lane.b32.xlu1 %v3997_v40, %s8168_s0  ;;  %v4011_v40 = vld [vmem:[#allocation2 + $0x49] sm:$0xff] }
 0x522   :  { %4607 = vrot.lane.b32.xlu0 %v4269_v50, %s8167_s19  ;;  %v4530_v29 = vmul.f32 %v10246_v1, %v4011_v40  ;;  %v4270_v50 = vpack.c.bf16 %v4258_v27, %v4257_v53  ;;  %v4147_v27 = vld [vmem:[#allocation2 + $0x4f] sm:$0xff] }
 0x523   :  { %v10591_v51 = vpop.permute.xlu1 %3775  ;;  %v4259_v53 = vmul.f32 %v10252_v47, %v4147_v27  ;;  %v3760_v47 = vld [vmem:[%s11651_s26 + $0x68] sm:$0xff] }
 0x524   :  { %v4542_v9 = vpack.c.bf16 %v4530_v29, %v4529_v7  ;;  %v4421_v7 = vld [vmem:[#allocation2 + $0x61] sm:$0xff]  ;;  %v4015_v27 = vld [vmem:[#allocation2 + $0x69] sm:$0xff] }
 0x525   :  { %4631 = vrot.lane.b32.xlu1 %v4541_v43, %s8168_s0  ;;  %v10572_v43 = vpop.permute.xlu0 %3770 }
 0x526   :  { %3810 = vperm.xlu0 %7546, %v3756_v34   ;;  %v4419_v34 = vld [vmem:[#allocation2 + $0x51] sm:$0xff] }
 0x527   :  { %v4124_v20 = vmul.f32 %v4419_v34, %v10260_v52  ;;  %v4260_v52 = vmul.f32 %v10270_v48, %v4148_v0 }
 0x529   :  { %3805 = vperm.xlu1 %7545, %v3755_v26   ;;  %v10585_v1 = vpop.permute.xlu0 %4248  ;;  %v6857_v26 = vld [vmem:[%s11651_s26 + $0x258] sm:$0xff]  ;;  %v4271_v19 = vpack.c.bf16 %v4260_v52, %v4259_v53  ;;  %v11767_v53 = vld [vmem:[#allocation20_spill] sm:$0xff] }
 0x52a   :  { %4354 = vperm.xlu0 %7546, %v6855_v5   ;;  %v3876_v5 = vld [vmem:[#allocation2 + $0x50] sm:$0xff]  ;;  %v4149_v52 = vld [vmem:[#allocation2 + $0x5f] sm:$0xff] }
 0x52b   :  { %v3988_v36 = vmul.f32 %v10255_v11, %v3876_v5  ;;  %v10605_v11 = vpop.permute.xlu1 %4319  ;;  %v4150_v5 = vld [vmem:[#allocation2 + $0x67] sm:$0xff] }
 0x52c   :  { %v4262_v0 = vmul.f32 %v11765_v63, %v4150_v5 }
 0x52d   :  { %4349 = vperm.xlu1 %7545, %v6854_v56   ;;  %v4123_v56 = vmul.f32 %v10243_v21, %v4011_v40  ;;  %v4532_v21 = vmul.f32 %v10266_v22, %v4013_v32  ;;  %v4531_v40 = vmul.f32 %v10248_v17, %v4419_v34  ;;  %v3759_v17 = vld [vmem:[%s11651_s26 + $0x60] sm:$0xff]  ;;  %v4125_v34 = vmul.f32 %v11761_v58, %v4013_v32  ;;  %v7954_v32 = vpop.eup %7953 }
 0x52e   :  { %4585 = vrot.lane.b32.xlu0 %v4134_v28, %s8169_s21  ;;  %v10600_v28 = vpop.permute.xlu0 %4314 }
 0x52f   :  { %v4135_v41 = vpack.c.bf16 %v4124_v20, %v4123_v56  ;;  %v4543_v48 = vpack.c.bf16 %v4532_v21, %v4531_v40  ;;  %v10617_v22 = vpop.permute.xlu1 %4555  ;;  %v11764_v56 = vld [vmem:[#allocation9_spill] sm:$0xff] }
 0x531   :  { %4561 = vrot.lane.b32.xlu1 %v3998_v10, %s8168_s0  ;;  %v3999_v10 = vpack.c.bf16 %v3988_v36, %v3987_v37  ;;  %v11766_v37 = vld [vmem:[#allocation19_spill] sm:$0xff] }
 0x532   :  { %4609 = vrot.lane.b32.xlu0 %v4270_v50, %s8167_s19  ;;  %v10609_v29 = vpop.permute.xlu0 %3780  ;;  %v4126_v50 = vmul.f32 %v4421_v7, %v10280_v18  ;;  %v3989_v18 = vmul.f32 %v11764_v56, %v3877_v4 }
 0x534   :  { %v4136_v36 = vpack.c.bf16 %v4126_v50, %v4125_v34 }
 0x535   :  { %4633 = vrot.lane.b32.xlu1 %v4542_v9, %s8168_s0 }
 0x536   :  { %3820 = vperm.xlu0 %7546, %v3758_v8   ;;  %v10629_v9 = vpop.permute.xlu0 %4324  ;;  %v6858_v8 = vld [vmem:[%s11651_s26 + $0x260] sm:$0xff] }
 0x539   :  { %3815 = vperm.xlu1 %7545, %v3757_v62  }
 0x53a   :  { %4364 = vperm.xlu0 %7546, %v6857_v26   ;;  %v11762_v26 = vld [vmem:[#allocation10_spill] sm:$0xff] }
 0x53b   :  { %v3990_v20 = vmul.f32 %v11762_v26, %v3878_v25  ;;  %v11771_v25 = vld [vmem:[#allocation8_spill] sm:$0xff] }
 0x53d   :  { %4359 = vperm.xlu1 %7545, %v6856_v3   ;;  %v11763_v3 = vld [vmem:[#allocation16_spill] sm:$0xff]  ;;  %v4000_v40 = vpack.c.bf16 %v3990_v20, %v3989_v18 }
 0x53e   :  { %4587 = vrot.lane.b32.xlu0 %v4135_v41, %s8169_s21  ;;  %7961 = vtanh.f32 %v11763_v3 }
 0x53f   :  { %7963 = vtanh.f32 %v11766_v37 }
 0x540   :  { %7965 = vtanh.f32 %v11767_v53  ;;  %v4423_v53 = vld [vmem:[#allocation2 + $0x71] sm:$0xff] }
 0x541   :  { %4563 = vrot.lane.b32.xlu1 %v3999_v10, %s8168_s0  ;;  %v11768_v10 = vld [vmem:[#allocation11_spill] sm:$0xff] }
 0x542   :  { %4611 = vrot.lane.b32.xlu0 %v4271_v19, %s8167_s19  ;;  %v4261_v21 = vmul.f32 %v11768_v10, %v4149_v52  ;;  %v11769_v19 = vld [vmem:[#allocation18_spill] sm:$0xff] }
 0x544   :  { %v4272_v58 = vpack.c.bf16 %v4262_v0, %v4261_v21  ;;  %v4128_v21 = vmul.f32 %v4423_v53, %v10468_v42 }
 0x545   :  { %4635 = vrot.lane.b32.xlu1 %v4543_v48, %s8168_s0  ;;  %v4534_v48 = vmul.f32 %v11769_v19, %v4015_v27 }
 0x546   :  { %3830 = vperm.xlu0 %7546, %v3760_v47   ;;  %v11770_v47 = vld [vmem:[#allocation21_spill] sm:$0xff] }
 0x547   :  { %7967 = vtanh.f32 %v11770_v47 }
 0x549   :  { %3825 = vperm.xlu1 %7545, %v3759_v17  }
 0x54a   :  { %4374 = vperm.xlu0 %7546, %v6859_v57   ;;  %v7956_v57 = vpop.eup %7955 }
 0x54b   :  { %v3238_v62 = vpop.permute.xlu1 %3237  ;;  %v7958_v50 = vpop.eup %7957 }
 0x54c   :  { %v7960_v4 = vpop.eup %7959 }
 0x54d   :  { %4369 = vperm.xlu1 %7545, %v6858_v8   ;;  %v3240_v41 = vpop.permute.xlu0 %3239  ;;  %v4533_v8 = vmul.f32 %v11771_v25, %v4421_v7  ;;  %v10653_v56 = vmul.f32 %v7960_v4, %v3238_v62  ;;  %v3762_v7 = vld [vmem:[%s11651_s26 + $0x78] sm:$0xff]  ;;  %v7962_v37 = vpop.eup %7961  ;;  %v3761_v62 = vld [vmem:[%s11651_s26 + $0x70] sm:$0xff] }
 0x54e   :  { %4589 = vrot.lane.b32.xlu0 %v4136_v36, %s8169_s21  ;;  %v10647_v34 = vmul.f32 %v7956_v57, %v3240_v41  ;;  %v7964_v41 = vpop.eup %7963  ;;  %v6860_v57 = vld [vmem:[%s11651_s26 + $0x270] sm:$0xff] }
 0x54f   :  { %v3234_v17 = vpop.permute.xlu1 %3233  ;;  %v4544_v3 = vpack.c.bf16 %v4534_v48, %v4533_v8  ;;  %v7966_v52 = vpop.eup %7965  ;;  %v3879_v8 = vld [vmem:[#allocation2 + $0x68] sm:$0xff]  ;;  %v11773_v4 = vld [vmem:[#allocation22_spill] sm:$0xff] }
 0x550   :  { %v10649_v5 = vmul.f32 %v7954_v32, %v3234_v17  ;;  %v3527_v36 = vpack.c.bf16 %v10647_v34, %v10653_v56  ;;  %v6861_v32 = vld [vmem:[%s11651_s26 + $0x278] sm:$0xff]  ;;  %v3880_v17 = vld [vmem:[#allocation2 + $0x70] sm:$0xff]  ;;  %7969 = vtanh.f32 %v11773_v4 }
 0x551   :  { %4565 = vrot.lane.b32.xlu1 %v4000_v40, %s8168_s0  ;;  %v3236_v26 = vpop.permute.xlu0 %3235  ;;  %v7968_v10 = vpop.eup %7967  ;;  %v3992_v42 = vmul.f32 %v10459_v6, %v3880_v17  ;;  %v4153_v4 = vld [vmem:[#allocation2 + $0x7f] sm:$0xff] }
 0x552   :  { %v10651_v20 = vmul.f32 %v7958_v50, %v3236_v26  ;;  %4613 = vrot.lane.b32.xlu0 %v4272_v58, %s8167_s19  ;;  %v11772_v58 = vld [vmem:[#allocation17_spill] sm:$0xff] }
 0x553   :  { %v4127_v26 = vmul.f32 %v11772_v58, %v4015_v27 }
 0x554   :  { %v3526_v18 = vpack.c.bf16 %v10651_v20, %v10649_v5 }
 0x555   :  { %4637 = vrot.lane.b32.xlu1 %v4544_v3, %s8168_s0  ;;  %v3246_v63 = vpop.permute.xlu0 %3245  ;;  %v3248_v0 = vpop.permute.xlu1 %3247  ;;  %v11774_v3 = vld [vmem:[#allocation14_spill] sm:$0xff] }
 0x556   :  { %7285 = vmatprep.mubr.msk.bf16.mxu0 %vm1016_vm2, %v3526_v18  ;;  %3840 = vperm.xlu0 %7546, %v3762_v7   ;;  %v10673_v40 = vmul.f32 %v7962_v37, %v3246_v63  ;;  %v10675_v19 = vmul.f32 %v7966_v52, %v3248_v0  ;;  %v3991_v18 = vmul.f32 %v11774_v3, %v3879_v8  ;;  %v4152_v7 = vld [vmem:[#allocation2 + $0x77] sm:$0xff] }
 0x557   :  { %7286 = vmatmul.mubr.msk.bf16.vlgmr.msra.gmra.mrb[44].mxu0 %vm1016_vm2, %v3527_v36  ;;  %v11775_v36 = vld [vmem:[#allocation25_spill] sm:$0xff]  ;;  %v4137_v0 = vpack.c.bf16 %v4128_v21, %v4127_v26  ;;  %v4264_v37 = vmul.f32 %v10502_v16, %v4152_v7  ;;  %v11776_v52 = vld [vmem:[#allocation15_spill] sm:$0xff]  ;;  %v4265_v7 = vmul.f32 %v10566_v33, %v4153_v4 }
 0x558   :  { %7971 = vtanh.f32 %v11775_v36  ;;  %v3529_v6 = vpack.c.bf16 %v10675_v19, %v10673_v40  ;;  %v11777_v16 = vld [vmem:[#allocation13_spill] sm:$0xff] }
 0x559   :  { %3835 = vperm.xlu1 %7545, %v3761_v62   ;;  %v3242_v48 = vpop.permute.xlu0 %3241  ;;  %v3244_v47 = vpop.permute.xlu1 %3243  ;;  %7973 = vtanh.f32 %v10368_v61  ;;  %v4151_v62 = vld [vmem:[#allocation2 + $0x6f] sm:$0xff]  ;;  %v4018_v61 = vld [vmem:[#allocation2 + $0x81] sm:$0xff] }
 0x55a   :  { %v10680_v50 = vmul.f32 %v7964_v41, %v3242_v48  ;;  %v10682_v25 = vmul.f32 %v7968_v10, %v3244_v47  ;;  %4384 = vperm.xlu0 %7546, %v6861_v32   ;;  %v4424_v41 = vld [vmem:[#allocation2 + $0x79] sm:$0xff]  ;;  %7975 = vtanh.f32 %v10374_v35  ;;  %v4263_v32 = vmul.f32 %v11776_v52, %v4151_v62  ;;  %v4426_v33 = vld [vmem:[#allocation2 + $0x89] sm:$0xff] }
 0x55b   :  { %v4001_v10 = vpack.c.bf16 %v3992_v42, %v3991_v18  ;;  %v4536_v21 = vmul.f32 %v10483_v55, %v4424_v41  ;;  %v4535_v48 = vmul.f32 %v11777_v16, %v4423_v53  ;;  %v3882_v47 = vld [vmem:[#allocation2 + $0x80] sm:$0xff]  ;;  %v4129_v8 = vmul.f32 %v4424_v41, %v10527_v23  ;;  %v7970_v53 = vpop.eup %7969 }
 0x55c   :  { %v3528_v63 = vpack.c.bf16 %v10682_v25, %v10680_v50  ;;  %v4273_v17 = vpack.c.bf16 %v4264_v37, %v4263_v32  ;;  %v4130_v58 = vmul.f32 %v10545_v49, %v4018_v61  ;;  %v3994_v42 = vmul.f32 %v10534_v15, %v3882_v47 }
 0x55d   :  { %4379 = vperm.xlu1 %7545, %v6860_v57   ;;  %v3254_v27 = vpop.permute.xlu0 %3253  ;;  %v3881_v57 = vld [vmem:[#allocation2 + $0x78] sm:$0xff]  ;;  %v4545_v26 = vpack.c.bf16 %v4536_v21, %v4535_v48  ;;  %7977 = vtanh.f32 %v10382_v59  ;;  %v4538_v41 = vmul.f32 %v10562_v60, %v4426_v33  ;;  %v6923_v60 = vld [vmem:[%s11613_s13 + $0x88] sm:$0xff] }
 0x55e   :  { %7289 = vmatprep.mubr.msk.bf16.mxu0 %vm1016_vm2, %v3528_v63  ;;  %4591 = vrot.lane.b32.xlu0 %v4137_v0, %s8169_s21  ;;  %v3993_v35 = vmul.f32 %v10511_v30, %v3881_v57  ;;  %v4138_v18 = vpack.c.bf16 %v4130_v58, %v4129_v8  ;;  %v4154_v63 = vld [vmem:[#allocation2 + $0x87] sm:$0xff]  ;;  %v4537_v0 = vmul.f32 %v10539_v44, %v4018_v61  ;;  %7979 = vtanh.f32 %v10392_v46  ;;  %v6925_v48 = vld [vmem:[%s11613_s13 + $0x98] sm:$0xff] }
 0x55f   :  { %7290 = vmatmul.mubr.msk.bf16.gmra.mrb[48].mxu0 %vm1016_vm2, %v3529_v6  ;;  %v4266_v49 = vmul.f32 %v10585_v1, %v4154_v63  ;;  %7981 = vtanh.f32 %v10400_v38  ;;  %v10718_v6 = vmul.f32 %v7970_v53, %v3254_v27  ;;  %v3731_v27 = vld [vmem:[#allocation2 + $0x7] sm:$0xff]  ;;  %v3844_v8 = vmul.f32 %v10457_v39, %v10572_v43 }
 0x560   :  { %v4002_v36 = vpack.c.bf16 %v3994_v42, %v3993_v35  ;;  %7983 = vtanh.f32 %v10408_v12  ;;  %v4546_v52 = vpack.c.bf16 %v4538_v41, %v4537_v0  ;;  %v3843_v16 = vmul.f32 %v10551_v31, %v3731_v27  ;;  %v8147_v35 = vld [vmem:[#allocation2 + $0x10] sm:$0xff]  ;;  %v6929_v0 = vld [vmem:[%s11613_s13 + $0xb8] sm:$0xff]  ;;  %v6931_v33 = vld [vmem:[%s11613_s13 + $0xc8] sm:$0xff] }
 0x561   :  { %4567 = vrot.lane.b32.xlu1 %v4001_v10, %s8168_s0  ;;  %v3250_v55 = vpop.permute.xlu0 %3249  ;;  %v4274_v1 = vpack.c.bf16 %v4266_v49, %v4265_v7  ;;  %v6922_v10 = vld [vmem:[%s11613_s13 + $0x80] sm:$0xff]  ;;  %v4387_v58 = vmul.f32 %v8147_v35, %v10576_v24  ;;  %v6924_v31 = vld [vmem:[%s11613_s13 + $0x90] sm:$0xff]  ;;  %v4388_v53 = vmul.f32 %v10600_v28, %v10491_v54  ;;  %v6927_v24 = vld [vmem:[%s11613_s13 + $0xa8] sm:$0xff] }
 0x562   :  { %4615 = vrot.lane.b32.xlu0 %v4273_v17, %s8167_s19  ;;  %v7972_v23 = vpop.eup %7971  ;;  %v3859_v39 = vpack.c.bf16 %v3844_v8, %v3843_v16  ;;  %v6926_v54 = vld [vmem:[%s11613_s13 + $0xa0] sm:$0xff]  ;;  %v6933_v41 = vld [vmem:[%s11613_s13 + $0xd8] sm:$0xff]  ;;  %v6936_v27 = vld [vmem:[%s11613_s13 + $0xf0] sm:$0xff]  ;;  %v3846_v16 = vmul.f32 %v10496_v2, %v10609_v29  ;;  %v4390_v8 = vmul.f32 %v10629_v9, %v10525_v45 }
 0x563   :  { %v3256_v3 = vpop.permute.xlu1 %3255  ;;  %v7974_v30 = vpop.eup %7973  ;;  %v10714_v15 = vmul.f32 %v7972_v23, %v3250_v55  ;;  %v4403_v7 = vpack.c.bf16 %v4388_v53, %v4387_v58  ;;  %v4963_v29 = vld [vmem:[%s11613_s13 + $0x10] sm:$0xff]  ;;  %v4965_v9 = vld [vmem:[%s11613_s13 + $0x20] sm:$0xff] }
 0x564   :  { %v7976_v37 = vpop.eup %7975  ;;  %v10720_v62 = vmul.f32 %v7974_v30, %v3256_v3  ;;  %v4645_v23 = vsel %vm1016_vm2, %v3859_v39, %v10617_v22  ;;  %v4968_v39 = vld [vmem:[%s11613_s13 + $0x38] sm:$0xff] }
 0x565   :  { %4639 = vrot.lane.b32.xlu1 %v4545_v26, %s8168_s0 }
 0x566   :  { %4593 = vrot.lane.b32.xlu0 %v4138_v18, %s8169_s21  ;;  %v3531_v38 = vpack.c.bf16 %v10720_v62, %v10718_v6 }
 0x567   :  { %v3252_v59 = vpop.permute.xlu1 %3251  ;;  %v7978_v61 = vpop.eup %7977 }
 0x568   :  { %v10725_v46 = vmul.f32 %v7976_v37, %v3252_v59  ;;  %v3262_v44 = vpop.permute.xlu0 %3261  ;;  %v7980_v47 = vpop.eup %7979  ;;  %v6928_v37 = vld [vmem:[%s11613_s13 + $0xb0] sm:$0xff]  ;;  %v6930_v59 = vld [vmem:[%s11613_s13 + $0xc0] sm:$0xff] }
 0x569   :  { %4569 = vrot.lane.b32.xlu1 %v4002_v36, %s8168_s0  ;;  %v7982_v57 = vpop.eup %7981  ;;  %v10753_v42 = vmul.f32 %v7978_v61, %v3262_v44  ;;  %v6935_v44 = vld [vmem:[%s11613_s13 + $0xe8] sm:$0xff] }
 0x56a   :  { %v3530_v32 = vpack.c.bf16 %v10725_v46, %v10714_v15  ;;  %4617 = vrot.lane.b32.xlu0 %v4274_v1, %s8167_s19  ;;  %v7984_v55 = vpop.eup %7983  ;;  %v6932_v1 = vld [vmem:[%s11613_s13 + $0xd0] sm:$0xff]  ;;  %v4962_v61 = vld [vmem:[%s11613_s13 + $0x8] sm:$0xff] }
 0x56c   :  { %7293 = vmatprep.mubr.msk.bf16.mxu0 %vm1016_vm2, %v3530_v32  ;;  %v3258_v12 = vpop.permute.xlu0 %3257 }
 0x56d   :  { %4641 = vrot.lane.b32.xlu1 %v4546_v52, %s8168_s0  ;;  %7294 = vmatmul.mubr.msk.bf16.gmra.mrb[52].mxu0 %vm1016_vm2, %v3531_v38  ;;  %v10748_v26 = vmul.f32 %v7980_v47, %v3258_v12  ;;  %v6934_v52 = vld [vmem:[%s11613_s13 + $0xe0] sm:$0xff] }
 0x56e   :  { %5120 = vperm.xlu0 %7546, %v6923_v60   ;;  %v6937_v60 = vld [vmem:[%s11613_s13 + $0xf8] sm:$0xff] }
 0x56f   :  { %v3264_v21 = vpop.permute.xlu1 %3263 }
 0x570   :  { %v4580_v17 = vpop.permute.xlu0 %4579  ;;  %v10755_v4 = vmul.f32 %v7982_v57, %v3264_v21 }
 0x571   :  { %5115 = vperm.xlu1 %7545, %v6922_v10   ;;  %v4668_v63 = vsel %vm434_vm4, %v4645_v23, %v4580_v17  ;;  %v3845_v10 = vmul.f32 %v10452_v14, %v10591_v51  ;;  %v4389_v17 = vmul.f32 %v10605_v11, %v10481_v13  ;;  %v4964_v51 = vld [vmem:[%s11613_s13 + $0x18] sm:$0xff] }
 0x572   :  { %5130 = vperm.xlu0 %7546, %v6925_v48   ;;  %v3533_v28 = vpack.c.bf16 %v10755_v4, %v10753_v42  ;;  %v4961_v48 = vld [vmem:[%s11613_s13] sm:$0xff] }
 0x573   :  { %v3260_v3 = vpop.permute.xlu1 %3259  ;;  %v3860_v57 = vpack.c.bf16 %v3846_v16, %v3845_v10  ;;  %v4404_v58 = vpack.c.bf16 %v4390_v8, %v4389_v17 }
 0x574   :  { %v10759_v43 = vmul.f32 %v7984_v55, %v3260_v3  ;;  %v4604_v18 = vpop.permute.xlu0 %4603  ;;  %v4966_v55 = vld [vmem:[%s11613_s13 + $0x28] sm:$0xff] }
 0x575   :  { %5125 = vperm.xlu1 %7545, %v6924_v31   ;;  %v4684_v22 = vsel %vm2175_vm5, %v4668_v63, %v4604_v18 }
 0x576   :  { %v3532_v36 = vpack.c.bf16 %v10759_v43, %v10748_v26  ;;  %5140 = vperm.xlu0 %7546, %v6927_v24   ;;  %v4967_v24 = vld [vmem:[%s11613_s13 + $0x30] sm:$0xff] }
 0x577   :  { %v4628_v30 = vpop.permute.xlu1 %4627 }
 0x578   :  { %v4709_v49 = vsel %vm1016_vm2, %v4403_v7, %v4628_v30  ;;  %7297 = vmatprep.mubr.msk.bf16.mxu0 %vm1016_vm2, %v3532_v36  ;;  %v3736_v7 = vld [vmem:[#allocation2 + $0x2f] sm:$0xff]  ;;  %v4280_v30 = vld [vmem:[#allocation2 + $0x38] sm:$0xff] }
 0x579   :  { %5135 = vperm.xlu1 %7545, %v6926_v54   ;;  %7298 = vmatmul.mubr.msk.bf16.gmra.mrb[56].mxu0 %vm1016_vm2, %v3533_v28  ;;  %v4970_v54 = vld [vmem:[%s11613_s13 + $0x48] sm:$0xff] }
 0x57a   :  { %6914 = vmatprep.mubr.msk.bf16.mxu1 %vm434_vm4, %v4709_v49  ;;  %5150 = vperm.xlu0 %7546, %v6929_v0   ;;  %v3735_v28 = vld [vmem:[#allocation2 + $0x27] sm:$0xff] }
 0x57b   :  { %4881 = vmatmul.mubr.bf16.vlgmr.msra.gmra.mrb[52].mxu1 %v4684_v22  ;;  %v4969_v49 = vld [vmem:[%s11613_s13 + $0x40] sm:$0xff] }
 0x57d   :  { %5145 = vperm.xlu1 %7545, %v6928_v37  }
 0x57e   :  { %5160 = vperm.xlu0 %7546, %v6931_v33   ;;  %v4279_v33 = vld [vmem:[#allocation2 + $0x30] sm:$0xff] }
 0x581   :  { %5155 = vperm.xlu1 %7545, %v6930_v59  }
 0x582   :  { %5170 = vperm.xlu0 %7546, %v6933_v41   ;;  %v4972_v41 = vld [vmem:[%s11613_s13 + $0x58] sm:$0xff] }
 0x585   :  { %5165 = vperm.xlu1 %7545, %v6932_v1   ;;  %v3791_v32 = vpop.permute.xlu0 %3790 }
 0x586   :  { %5180 = vperm.xlu0 %7546, %v6935_v44   ;;  %v3848_v23 = vmul.f32 %v3791_v32, %v3736_v7  ;;  %v3740_v7 = vld [vmem:[#allocation2 + $0x4f] sm:$0xff] }
 0x588   :  { %v3786_v38 = vpop.permute.xlu1 %3785 }
 0x589   :  { %5175 = vperm.xlu1 %7545, %v6934_v52   ;;  %v4335_v12 = vpop.permute.xlu0 %4334  ;;  %v3847_v63 = vmul.f32 %v3786_v38, %v3735_v28  ;;  %v4971_v52 = vld [vmem:[%s11613_s13 + $0x50] sm:$0xff] }
 0x58a   :  { %5190 = vperm.xlu0 %7546, %v6937_v60   ;;  %v4392_v0 = vmul.f32 %v4335_v12, %v4280_v30 }
 0x58b   :  { %v3861_v37 = vpack.c.bf16 %v3848_v23, %v3847_v63  ;;  %v4284_v63 = vld [vmem:[#allocation2 + $0x58] sm:$0xff] }
 0x58c   :  { %v4330_v21 = vpop.permute.xlu1 %4329 }
 0x58d   :  { %5185 = vperm.xlu1 %7545, %v6936_v27   ;;  %v4582_v47 = vpop.permute.xlu0 %4581  ;;  %v4391_v1 = vmul.f32 %v4330_v21, %v4279_v33 }
 0x58e   :  { %4984 = vperm.xlu0 %7546, %v4962_v61  }
 0x58f   :  { %v4405_v38 = vpack.c.bf16 %v4392_v0, %v4391_v1  ;;  %v4283_v0 = vld [vmem:[#allocation2 + $0x50] sm:$0xff] }
 0x590   :  { %v4558_v14 = vpop.permute.xlu1 %4557 }
 0x591   :  { %4979 = vperm.xlu1 %7545, %v4961_v48   ;;  %v4648_v2 = vsel %vm1016_vm2, %v3860_v57, %v4558_v14  ;;  %v4606_v35 = vpop.permute.xlu0 %4605  ;;  %v3738_v48 = vld [vmem:[#allocation2 + $0x3f] sm:$0xff]  ;;  %v3737_v57 = vld [vmem:[#allocation2 + $0x37] sm:$0xff] }
 0x592   :  { %v4670_v13 = vsel %vm434_vm4, %v4648_v2, %v4582_v47  ;;  %4994 = vperm.xlu0 %7546, %v4964_v51   ;;  %v4282_v51 = vld [vmem:[#allocation2 + $0x48] sm:$0xff] }
 0x593   :  { %v4687_v31 = vsel %vm2175_vm5, %v4670_v13, %v4606_v35  ;;  %v4281_v35 = vld [vmem:[#allocation2 + $0x40] sm:$0xff] }
 0x594   :  { %v4630_v11 = vpop.permute.xlu1 %4629 }
 0x595   :  { %v4712_v45 = vsel %vm1016_vm2, %v4404_v58, %v4630_v11  ;;  %4989 = vperm.xlu1 %7545, %v4963_v29   ;;  %v3801_v3 = vpop.permute.xlu0 %3800 }
 0x596   :  { %6915 = vmatprep.mubr.msk.bf16.mxu1 %vm434_vm4, %v4712_v45  ;;  %5004 = vperm.xlu0 %7546, %v4966_v55   ;;  %v3850_v47 = vmul.f32 %v3801_v3, %v3738_v48 }
 0x597   :  { %4889 = vmatmul.mubr.bf16.gmra.mrb[56].mxu1 %v4687_v31 }
 0x598   :  { %v3796_v53 = vpop.permute.xlu1 %3795 }
 0x599   :  { %4999 = vperm.xlu1 %7545, %v4965_v9   ;;  %v4345_v18 = vpop.permute.xlu0 %4344  ;;  %v3849_v14 = vmul.f32 %v3796_v53, %v3737_v57 }
 0x59a   :  { %5014 = vperm.xlu0 %7546, %v4968_v39   ;;  %v4394_v2 = vmul.f32 %v4345_v18, %v4282_v51  ;;  %v4285_v51 = vld [vmem:[#allocation2 + $0x60] sm:$0xff] }
 0x59b   :  { %v3862_v29 = vpack.c.bf16 %v3850_v47, %v3849_v14  ;;  %v4286_v47 = vld [vmem:[#allocation2 + $0x68] sm:$0xff] }
 0x59c   :  { %v4340_v36 = vpop.permute.xlu1 %4339 }
 0x59d   :  { %5009 = vperm.xlu1 %7545, %v4967_v24   ;;  %v4584_v22 = vpop.permute.xlu0 %4583  ;;  %v4393_v13 = vmul.f32 %v4340_v36, %v4281_v35 }
 0x59e   :  { %5024 = vperm.xlu0 %7546, %v4970_v54   ;;  %v3739_v54 = vld [vmem:[#allocation2 + $0x47] sm:$0xff] }
 0x59f   :  { %v4406_v55 = vpack.c.bf16 %v4394_v2, %v4393_v13 }
 0x5a0   :  { %v4560_v59 = vpop.permute.xlu1 %4559 }
 0x5a1   :  { %5019 = vperm.xlu1 %7545, %v4969_v49   ;;  %v4651_v44 = vsel %vm1016_vm2, %v3861_v37, %v4560_v59  ;;  %v4608_v32 = vpop.permute.xlu0 %4607 }
 0x5a2   :  { %v4672_v60 = vsel %vm434_vm4, %v4651_v44, %v4584_v22  ;;  %5034 = vperm.xlu0 %7546, %v4972_v41  }
 0x5a3   :  { %v4690_v12 = vsel %vm2175_vm5, %v4672_v60, %v4608_v32 }
 0x5a4   :  { %v4632_v27 = vpop.permute.xlu1 %4631 }
 0x5a5   :  { %v4715_v10 = vsel %vm1016_vm2, %v4405_v38, %v4632_v27  ;;  %5029 = vperm.xlu1 %7545, %v4971_v52   ;;  %v3811_v21 = vpop.permute.xlu0 %3810 }
 0x5a6   :  { %6916 = vmatprep.mubr.msk.bf16.mxu1 %vm434_vm4, %v4715_v10  ;;  %v3852_v23 = vmul.f32 %v3811_v21, %v3740_v7  ;;  %v3742_v10 = vld [vmem:[#allocation2 + $0x5f] sm:$0xff] }
 0x5a7   :  { %4897 = vmatmul.mubr.bf16.gmra.mrb[60].mxu1 %v4690_v12 }
 0x5a8   :  { %v3806_v61 = vpop.permute.xlu1 %3805 }
 0x5a9   :  { %v4355_v16 = vpop.permute.xlu0 %4354  ;;  %v3851_v28 = vmul.f32 %v3806_v61, %v3739_v54 }
 0x5aa   :  { %v4396_v49 = vmul.f32 %v4355_v16, %v4284_v63  ;;  %v3741_v16 = vld [vmem:[#allocation2 + $0x57] sm:$0xff] }
 0x5ab   :  { %v3863_v22 = vpack.c.bf16 %v3852_v23, %v3851_v28  ;;  %v4288_v23 = vld [vmem:[#allocation2 + $0x78] sm:$0xff]  ;;  %v4287_v63 = vld [vmem:[#allocation2 + $0x70] sm:$0xff] }
 0x5ac   :  { %v4350_v17 = vpop.permute.xlu1 %4349 }
 0x5ad   :  { %v4586_v8 = vpop.permute.xlu0 %4585  ;;  %v4395_v33 = vmul.f32 %v4350_v17, %v4283_v0 }
 0x5af   :  { %v4407_v1 = vpack.c.bf16 %v4396_v49, %v4395_v33  ;;  %v3746_v33 = vld [vmem:[#allocation2 + $0x7f] sm:$0xff] }
 0x5b0   :  { %v4562_v58 = vpop.permute.xlu1 %4561 }
 0x5b1   :  { %v4654_v11 = vsel %vm1016_vm2, %v3862_v29, %v4562_v58  ;;  %v4610_v31 = vpop.permute.xlu0 %4609 }
 0x5b2   :  { %v4674_v45 = vsel %vm434_vm4, %v4654_v11, %v4586_v8 }
 0x5b3   :  { %v4693_v39 = vsel %vm2175_vm5, %v4674_v45, %v4610_v31 }
 0x5b4   :  { %v4634_v9 = vpop.permute.xlu1 %4633 }
 0x5b5   :  { %v4718_v3 = vsel %vm1016_vm2, %v4406_v55, %v4634_v9  ;;  %v3821_v53 = vpop.permute.xlu0 %3820 }
 0x5b6   :  { %6917 = vmatprep.mubr.msk.bf16.mxu1 %vm434_vm4, %v4718_v3  ;;  %v3854_v21 = vmul.f32 %v3821_v53, %v3742_v10  ;;  %v3744_v3 = vld [vmem:[#allocation2 + $0x6f] sm:$0xff] }
 0x5b7   :  { %4905 = vmatmul.mubr.bf16.gmra.mrb[64].mxu1 %v4693_v39 }
 0x5b8   :  { %v3816_v24 = vpop.permute.xlu1 %3815 }
 0x5b9   :  { %v4365_v18 = vpop.permute.xlu0 %4364  ;;  %v3853_v48 = vmul.f32 %v3816_v24, %v3741_v16 }
 0x5ba   :  { %v4398_v57 = vmul.f32 %v4365_v18, %v4286_v47  ;;  %v3743_v18 = vld [vmem:[#allocation2 + $0x67] sm:$0xff] }
 0x5bb   :  { %v3864_v14 = vpack.c.bf16 %v3854_v21, %v3853_v48  ;;  %v4289_v21 = vld [vmem:[#allocation2 + $0x80] sm:$0xff] }
 0x5bc   :  { %v4360_v36 = vpop.permute.xlu1 %4359 }
 0x5bd   :  { %v4588_v30 = vpop.permute.xlu0 %4587  ;;  %v4397_v2 = vmul.f32 %v4360_v36, %v4285_v51 }
 0x5bf   :  { %v4408_v58 = vpack.c.bf16 %v4398_v57, %v4397_v2  ;;  %v7589_v2 = vld [vmem:[%s11614_s8 + $0x20] sm:$0xff]  }
 0x5c0   :  { %v4564_v37 = vpop.permute.xlu1 %4563  ;;  %7301 = vmatprep.subr.bf16.mxu0 %v7589_v2 }
 0x5c1   :  { %v4657_v59 = vsel %vm1016_vm2, %v3863_v22, %v4564_v37  ;;  %v4612_v41 = vpop.permute.xlu0 %4611  ;;  %7302 = vmatpush3.bf16.msra.mxu0 %v7589_v2 }
 0x5c2   :  { %v4676_v44 = vsel %vm434_vm4, %v4657_v59, %v4588_v30 }
 0x5c3   :  { %v4696_v32 = vsel %vm2175_vm5, %v4676_v44, %v4612_v41 }
 0x5c4   :  { %v4636_v52 = vpop.permute.xlu1 %4635 }
 0x5c5   :  { %v4721_v38 = vsel %vm1016_vm2, %v4407_v1, %v4636_v52  ;;  %v3831_v60 = vpop.permute.xlu0 %3830  ;;  %v3745_v52 = vld [vmem:[#allocation2 + $0x77] sm:$0xff] }
 0x5c6   :  { %6918 = vmatprep.mubr.msk.bf16.mxu1 %vm434_vm4, %v4721_v38  ;;  %v3856_v53 = vmul.f32 %v3831_v60, %v3744_v3  ;;  %v4290_v60 = vld [vmem:[#allocation2 + $0x88] sm:$0xff]  ;;  %v8149_v3 = vld [vmem:[#allocation3 + $0x18] sm:$0xff] }
 0x5c7   :  { %4913 = vmatmul.mubr.bf16.gmra.mrb[68].mxu1 %v4696_v32 }
 0x5c8   :  { %v3826_v27 = vpop.permute.xlu1 %3825 }
 0x5c9   :  { %v4375_v12 = vpop.permute.xlu0 %4374  ;;  %v3855_v7 = vmul.f32 %v3826_v27, %v3743_v18 }
 0x5ca   :  { %v4400_v54 = vmul.f32 %v4375_v12, %v4288_v23  ;;  %v8150_v23 = vld [vmem:[#allocation3 + $0x8] sm:$0xff] }
 0x5cb   :  { %v3865_v28 = vpack.c.bf16 %v3856_v53, %v3855_v7 }
 0x5cc   :  { %v4370_v61 = vpop.permute.xlu1 %4369 }
 0x5cd   :  { %v4590_v17 = vpop.permute.xlu0 %4589  ;;  %v4399_v49 = vmul.f32 %v4370_v61, %v4287_v63 }
 0x5cf   :  { %v4409_v37 = vpack.c.bf16 %v4400_v54, %v4399_v49  ;;  %v7591_v49 = vld [vmem:[%s11614_s8 + $0x30] sm:$0xff]  }
 0x5d0   :  { %v4566_v8 = vpop.permute.xlu1 %4565 }
 0x5d1   :  { %v4660_v29 = vsel %vm1016_vm2, %v3864_v14, %v4566_v8  ;;  %v4614_v35 = vpop.permute.xlu0 %4613 }
 0x5d2   :  { %v4678_v13 = vsel %vm434_vm4, %v4660_v29, %v4590_v17  ;;  %v8148_v29 = vld [vmem:[%s11609_s11 + $0x4] sm:$0xf] }
 0x5d3   :  { %v4699_v31 = vsel %vm2175_vm5, %v4678_v13, %v4614_v35  ;;  %v11778_v35 = vld [vmem:[#allocation4_spill] sm:$0xff] }
 0x5d4   :  { %v4638_v11 = vpop.permute.xlu1 %4637 }
 0x5d5   :  { %v4724_v55 = vsel %vm1016_vm2, %v4408_v58, %v4638_v11  ;;  %v3841_v45 = vpop.permute.xlu0 %3840  ;;  %v11779_v58 = vsub.s32 3, %v11778_v35 }
 0x5d6   :  { %6919 = vmatprep.mubr.msk.bf16.mxu1 %vm434_vm4, %v4724_v55  ;;  %v3858_v41 = vmul.f32 %v3841_v45, %v3746_v33 }
 0x5d7   :  { %4921 = vmatmul.mubr.bf16.gmra.mrb[72].mxu1 %v4699_v31  ;;  %v10896_v13 = vrot.slane %v8148_v29, %v11779_v58 }
 0x5d8   :  { %v3836_v9 = vpop.permute.xlu1 %3835 }
 0x5d9   :  { %v4385_v39 = vpop.permute.xlu0 %4384  ;;  %v3857_v38 = vmul.f32 %v3836_v9, %v3745_v52 }
 0x5da   :  { %v4402_v12 = vmul.f32 %v4385_v39, %v4290_v60 }
 0x5db   :  { %v3866_v10 = vpack.c.bf16 %v3858_v41, %v3857_v38  ;;  %v8153_v38 = vld [vmem:[#allocation3 + $0x38] sm:$0xff] }
 0x5dc   :  { %v4380_v24 = vpop.permute.xlu1 %4379 }
 0x5dd   :  { %v4592_v36 = vpop.permute.xlu0 %4591  ;;  %v4401_v16 = vmul.f32 %v4380_v24, %v4289_v21 }
 0x5df   :  { %v4410_v17 = vpack.c.bf16 %v4402_v12, %v4401_v16 }
 0x5e0   :  { %v4568_v30 = vpop.permute.xlu1 %4567 }
 0x5e1   :  { %v4663_v22 = vsel %vm1016_vm2, %v3865_v28, %v4568_v30  ;;  %v4616_v0 = vpop.permute.xlu0 %4615  ;;  %v8151_v28 = vld [vmem:[#allocation3 + $0x20] sm:$0xff]  ;;  %v7590_v30 = vld [vmem:[%s11614_s8 + $0x28] sm:$0xff]  }
 0x5e2   :  { %v4680_v59 = vsel %vm434_vm4, %v4663_v22, %v4592_v36  ;;  %v8152_v22 = vld [vmem:[#allocation3 + $0x10] sm:$0xff]  ;;  %7303 = vmatprep.subr.bf16.mxu0 %v7590_v30 }
 0x5e3   :  { %v4702_v44 = vsel %vm2175_vm5, %v4680_v59, %v4616_v0  ;;  %7304 = vmatpush3.bf16.msra.mxu0 %v7590_v30 }
 0x5e4   :  { %v4640_v1 = vpop.permute.xlu1 %4639  ;;  %7305 = vmatprep.subr.bf16.mxu0 %v7591_v49 }
 0x5e5   :  { %v4727_v32 = vsel %vm1016_vm2, %v4409_v37, %v4640_v1  ;;  %v4594_v27 = vpop.permute.xlu0 %4593  ;;  %v7592_v1 = vld [vmem:[%s11614_s8 + $0x38] sm:$0xff]  }
 0x5e6   :  { %6920 = vmatprep.mubr.msk.bf16.mxu1 %vm434_vm4, %v4727_v32 }
 0x5e7   :  { %4929 = vmatmul.mubr.bf16.gmra.mrb[76].mxu1 %v4702_v44  ;;  %7306 = vmatpush3.bf16.msra.mxu0 %v7591_v49 }
 0x5e8   :  { %v4570_v61 = vpop.permute.xlu1 %4569  ;;  %7307 = vmatprep.subr.bf16.mxu0 %v7592_v1 }
 0x5e9   :  { %v4666_v48 = vsel %vm1016_vm2, %v3866_v10, %v4570_v61  ;;  %v4618_v47 = vpop.permute.xlu0 %4617  ;;  %v8154_v10 = vld [vmem:[#allocation3 + $0x28] sm:$0xff] }
 0x5ea   :  { %v4682_v57 = vsel %vm434_vm4, %v4666_v48, %v4594_v27  ;;  %v8155_v48 = vld [vmem:[#allocation3 + $0x40] sm:$0xff] }
 0x5eb   :  { %v4705_v51 = vsel %vm2175_vm5, %v4682_v57, %v4618_v47  ;;  %v8156_v57 = vld [vmem:[#allocation3 + $0x30] sm:$0xff]  ;;  %7308 = vmatpush3.bf16.msra.mxu0 %v7592_v1 }
 0x5ec   :  { %v4642_v14 = vpop.permute.xlu1 %4641 }
 0x5ed   :  { %v4730_v8 = vsel %vm1016_vm2, %v4410_v17, %v4642_v14  ;;  %v5121_v39 = vpop.permute.xlu0 %5120 }
 0x5ee   :  { %6921 = vmatprep.mubr.msk.bf16.mxu1 %vm434_vm4, %v4730_v8 }
 0x5ef   :  { %4937 = vmatmul.mubr.bf16.gmra.mrb[80].mxu1 %v4705_v51 }
 0x5f0   :  { %v5116_v7 = vpop.permute.xlu1 %5115 }
 0x5f1   :  { %v5131_v33 = vpop.permute.xlu0 %5130 }
 0x5f4   :  { %v5126_v44 = vpop.permute.xlu1 %5125 }
 0x5f5   :  { %v5141_v58 = vpop.permute.xlu0 %5140 }
 0x5f8   :  { %v5136_v35 = vpop.permute.xlu1 %5135 }
 0x62a   :  { %v7287_v11 = vpop.f32.mrb[44].mxu0 }
 0x62b   :  { %v3617_v31 = vadd.f32 %v7287_v11, %v10896_v13  ;;  %v3608_v55 = vpop.f32.mrb[45].mxu0 }
 0x62c   :  { %v3609_v45 = vadd.f32 %v3608_v55, %v10896_v13  ;;  %v7288_v9 = vpop.f32.mrb[46].mxu0 }
 0x62d   :  { %v3673_v53 = vadd.f32 %v8149_v3, %v3617_v31  ;;  %v3620_v24 = vadd.f32 %v7288_v9, %v10896_v13  ;;  %v3611_v18 = vpop.f32.mrb[47].mxu0  ;;  %v4974_v9 = vld [vmem:[%s11613_s13 + $0x68] sm:$0xff] }
 0x62e   :  { %v3671_v36 = vadd.f32 %v8150_v23, %v3609_v45  ;;  %v3612_v54 = vadd.f32 %v3611_v18, %v10896_v13  ;;  %v5146_v18 = vpop.permute.xlu1 %5145 }
 0x62f   :  { %3705 = vst.msk [vmem:[#allocation3 + $0x18] sm:$0xff] %vm1016_vm2, %v3673_v53  ;;  %v3674_v63 = vadd.f32 %v8151_v28, %v3620_v24  ;;  %v4973_v53 = vld [vmem:[%s11613_s13 + $0x60] sm:$0xff] }
 0x630   :  { %3703 = vst.msk [vmem:[#allocation3 + $0x8] sm:$0xff] %vm1016_vm2, %v3671_v36  ;;  %v3672_v0 = vadd.f32 %v8152_v22, %v3612_v54 }
 0x631   :  { %3706 = vst.msk [vmem:[#allocation3 + $0x20] sm:$0xff] %vm1016_vm2, %v3674_v63 }
 0x632   :  { %3704 = vst.msk [vmem:[#allocation3 + $0x10] sm:$0xff] %vm1016_vm2, %v3672_v0  ;;  %v7291_v37 = vpop.f32.mrb[48].mxu0 }
 0x633   :  { %v3633_v59 = vadd.f32 %v7291_v37, %v10896_v13  ;;  %v3624_v41 = vpop.f32.mrb[49].mxu0 }
 0x634   :  { %v3625_v52 = vadd.f32 %v3624_v41, %v10896_v13  ;;  %v7292_v32 = vpop.f32.mrb[50].mxu0 }
 0x635   :  { %v3677_v60 = vadd.f32 %v8153_v38, %v3633_v59  ;;  %v3636_v27 = vadd.f32 %v7292_v32, %v10896_v13  ;;  %v3627_v12 = vpop.f32.mrb[51].mxu0  ;;  %v8157_v59 = vld [vmem:[#allocation3 + $0x58] sm:$0xff]  ;;  %v8158_v32 = vld [vmem:[#allocation3 + $0x48] sm:$0xff] }
 0x636   :  { %v3675_v21 = vadd.f32 %v8154_v10, %v3625_v52  ;;  %v3628_v61 = vadd.f32 %v3627_v12, %v10896_v13  ;;  %v5083_v16 = vld [vmem:[#allocation3 + $0x18] sm:$0xff]  ;;  %v8159_v12 = vld [vmem:[#allocation3 + $0x60] sm:$0xff] }
 0x637   :  { %3709 = vst.msk [vmem:[#allocation3 + $0x38] sm:$0xff] %vm1016_vm2, %v3677_v60  ;;  %v3678_v47 = vadd.f32 %v8155_v48, %v3636_v27  ;;  %v5081_v17 = vld [vmem:[#allocation3 + $0x8] sm:$0xff]  ;;  %v5195_v8 = vmul.f32 %v5126_v44, %v5083_v16  ;;  %v8160_v16 = vld [vmem:[#allocation3 + $0x50] sm:$0xff] }
 0x638   :  { %3707 = vst.msk [vmem:[#allocation3 + $0x28] sm:$0xff] %vm1016_vm2, %v3675_v21  ;;  %v3676_v14 = vadd.f32 %v8156_v57, %v3628_v61  ;;  %v5084_v51 = vld [vmem:[#allocation3 + $0x20] sm:$0xff]  ;;  %v5193_v11 = vmul.f32 %v5116_v7, %v5081_v17  ;;  %v5151_v7 = vpop.permute.xlu0 %5150  ;;  %v5156_v61 = vpop.permute.xlu1 %5155  ;;  %v10948_v17 = vld [vmem:[%s11608_s9 + $0x40] sm:$0xff]   ;;  %v10955_v57 = vld [vmem:[%s11609_s11 + $0x8] sm:$0xf] }
 0x639   :  { %3710 = vst.msk [vmem:[#allocation3 + $0x40] sm:$0xff] %vm1016_vm2, %v3678_v47  ;;  %v5196_v2 = vmul.f32 %v5131_v33, %v5084_v51  ;;  %v5082_v29 = vld [vmem:[#allocation3 + $0x10] sm:$0xff]  ;;  %v4976_v21 = vld [vmem:[%s11613_s13 + $0x78] sm:$0xff]  ;;  %v4975_v47 = vld [vmem:[%s11613_s13 + $0x70] sm:$0xff]  ;;  %7325 = vmatprep.subr.bf16.mxu0 %v10948_v17 }
 0x63a   :  { %3708 = vst.msk [vmem:[#allocation3 + $0x30] sm:$0xff] %vm1016_vm2, %v3676_v14  ;;  %v5194_v31 = vmul.f32 %v5121_v39, %v5082_v29 }
 0x63b   :  { %v5210_v55 = vpack.c.bf16 %v5196_v2, %v5195_v8  ;;  %v11780_v8 = vld [vmem:[#allocation5_spill] sm:$0xff] }
 0x63c   :  { %v5209_v45 = vpack.c.bf16 %v5194_v31, %v5193_v11  ;;  %v5161_v27 = vpop.permute.xlu0 %5160  ;;  %v10960_v2 = vrot.slane %v10955_v57, %v11780_v8  ;;  %v5166_v29 = vpop.permute.xlu1 %5165 }
 0x63d   :  { %5227 = vrot.lane.b32.xlu0 %v5210_v55, %s8168_s0 }
 0x63e   :  { %5225 = vrot.lane.b32.xlu1 %v5209_v45, %s8168_s0  ;;  %v5087_v3 = vld [vmem:[#allocation3 + $0x38] sm:$0xff] }
 0x63f   :  { %v5085_v24 = vld [vmem:[#allocation3 + $0x28] sm:$0xff]  ;;  %v5199_v36 = vmul.f32 %v5146_v18, %v5087_v3  ;;  %v8161_v3 = vld [vmem:[#allocation3 + $0x78] sm:$0xff] }
 0x640   :  { %v5088_v39 = vld [vmem:[#allocation3 + $0x40] sm:$0xff]  ;;  %v7295_v23 = vpop.f32.mrb[52].mxu0  ;;  %v5197_v49 = vmul.f32 %v5136_v35, %v5085_v24  ;;  %v5171_v14 = vpop.permute.xlu0 %5170 }
 0x641   :  { %5044 = vperm.xlu0 %7546, %v4974_v9   ;;  %v5200_v54 = vmul.f32 %v5151_v7, %v5088_v39  ;;  %v5086_v28 = vld [vmem:[#allocation3 + $0x30] sm:$0xff]  ;;  %v3649_v63 = vadd.f32 %v7295_v23, %v10896_v13  ;;  %v3640_v30 = vpop.f32.mrb[53].mxu0 }
 0x642   :  { %5039 = vperm.xlu1 %7545, %v4973_v53   ;;  %v5198_v22 = vmul.f32 %v5141_v58, %v5086_v28  ;;  %v3641_v0 = vadd.f32 %v3640_v30, %v10896_v13  ;;  %v7296_v37 = vpop.f32.mrb[54].mxu0 }
 0x643   :  { %v5212_v33 = vpack.c.bf16 %v5200_v54, %v5199_v36  ;;  %v3681_v41 = vadd.f32 %v8157_v59, %v3649_v63  ;;  %v3652_v1 = vadd.f32 %v7296_v37, %v10896_v13  ;;  %v3643_v44 = vpop.f32.mrb[55].mxu0  ;;  %v8162_v36 = vld [vmem:[#allocation3 + $0x68] sm:$0xff] }
 0x644   :  { %v5211_v52 = vpack.c.bf16 %v5198_v22, %v5197_v49  ;;  %v3679_v38 = vadd.f32 %v8158_v32, %v3641_v0  ;;  %v3644_v60 = vadd.f32 %v3643_v44, %v10896_v13  ;;  %v8163_v0 = vld [vmem:[#allocation3 + $0x80] sm:$0xff]  ;;  %v8164_v44 = vld [vmem:[#allocation3 + $0x70] sm:$0xff] }
 0x645   :  { %5231 = vrot.lane.b32.xlu0 %v5212_v33, %s8168_s0  ;;  %3713 = vst.msk [vmem:[#allocation3 + $0x58] sm:$0xff] %vm1016_vm2, %v3681_v41  ;;  %v3682_v10 = vadd.f32 %v8159_v12, %v3652_v1  ;;  %v5181_v12 = vpop.permute.xlu0 %5180 }
 0x646   :  { %5229 = vrot.lane.b32.xlu1 %v5211_v52, %s8168_s0  ;;  %3711 = vst.msk [vmem:[#allocation3 + $0x48] sm:$0xff] %vm1016_vm2, %v3679_v38  ;;  %v3680_v48 = vadd.f32 %v8160_v16, %v3644_v60  ;;  %v5176_v60 = vpop.permute.xlu1 %5175 }
 0x647   :  { %3714 = vst.msk [vmem:[#allocation3 + $0x60] sm:$0xff] %vm1016_vm2, %v3682_v10 }
 0x648   :  { %3712 = vst.msk [vmem:[#allocation3 + $0x50] sm:$0xff] %vm1016_vm2, %v3680_v48 }
 0x649   :  { %5054 = vperm.xlu0 %7546, %v4976_v21  }
 0x64a   :  { %5049 = vperm.xlu1 %7545, %v4975_v47   ;;  %v5186_v21 = vpop.permute.xlu1 %5185 }
 0x64c   :  { %v7299_v51 = vpop.f32.mrb[56].mxu0  ;;  %v5091_v11 = vld [vmem:[#allocation3 + $0x58] sm:$0xff] }
 0x64d   :  { %v3665_v35 = vadd.f32 %v7299_v51, %v10896_v13  ;;  %v3656_v58 = vpop.f32.mrb[57].mxu0  ;;  %v5089_v9 = vld [vmem:[#allocation3 + $0x48] sm:$0xff]  ;;  %v5203_v23 = vmul.f32 %v5166_v29, %v5091_v11 }
 0x64e   :  { %v3657_v31 = vadd.f32 %v3656_v58, %v10896_v13  ;;  %v7300_v55 = vpop.f32.mrb[58].mxu0  ;;  %v4882_v45 = vpop.f32.mrb[52].mxu1  ;;  %v5092_v39 = vld [vmem:[#allocation3 + $0x60] sm:$0xff]  ;;  %v5201_v41 = vmul.f32 %v5156_v61, %v5089_v9 }
 0x64f   :  { %v3685_v53 = vadd.f32 %v8161_v3, %v3665_v35  ;;  %v3668_v24 = vadd.f32 %v7300_v55, %v10896_v13  ;;  %v3659_v18 = vpop.f32.mrb[59].mxu0  ;;  %v4884_v7 = vpop.f32.mrb[53].mxu1  ;;  %v10967_v63 = vadd.f32 %v4882_v45, %v10960_v2  ;;  %v5204_v49 = vmul.f32 %v5171_v14, %v5092_v39  ;;  %v5090_v22 = vld [vmem:[#allocation3 + $0x50] sm:$0xff] }
 0x650   :  { %v3683_v54 = vadd.f32 %v8162_v36, %v3657_v31  ;;  %v3660_v28 = vadd.f32 %v3659_v18, %v10896_v13  ;;  %v4885_v30 = vpop.f32.mrb[54].mxu1  ;;  %v5202_v1 = vmul.f32 %v5161_v27, %v5090_v22  ;;  %v5191_v61 = vpop.permute.xlu0 %5190 }
 0x651   :  { %3717 = vst.msk [vmem:[#allocation3 + $0x78] sm:$0xff] %vm1016_vm2, %v3685_v53  ;;  %v3686_v37 = vadd.f32 %v8163_v0, %v3668_v24  ;;  %v10971_v33 = vadd.f32 %v4885_v30, %v10960_v2  ;;  %v4887_v59 = vpop.f32.mrb[55].mxu1  ;;  %v5214_v52 = vpack.c.bf16 %v5204_v49, %v5203_v23  ;;  %v4954_v53 = vld [vmem:[#allocation3 + $0x4f] sm:$0xff] }
 0x652   :  { %3715 = vst.msk [vmem:[#allocation3 + $0x68] sm:$0xff] %vm1016_vm2, %v3683_v54  ;;  %v3684_v13 = vadd.f32 %v8164_v44, %v3660_v28  ;;  %v5213_v38 = vpack.c.bf16 %v5202_v1, %v5201_v41  ;;  %v4980_v41 = vpop.permute.xlu1 %4979 }
 0x653   :  { %3718 = vst.msk [vmem:[#allocation3 + $0x80] sm:$0xff] %vm1016_vm2, %v3686_v37  ;;  %v5424_v32 = vpack.c.bf16 %v10971_v33, %v10967_v63  ;;  %5235 = vrot.lane.b32.xlu0 %v5214_v52, %s8168_s0 }
 0x654   :  { %3716 = vst.msk [vmem:[#allocation3 + $0x70] sm:$0xff] %vm1016_vm2, %v3684_v13  ;;  %5233 = vrot.lane.b32.xlu1 %v5213_v38, %s8168_s0  ;;  %v4985_v22 = vpop.permute.xlu0 %4984 }
 0x656   :  { %v4990_v13 = vpop.permute.xlu1 %4989 }
 0x658   :  { %v5095_v27 = vld [vmem:[#allocation3 + $0x78] sm:$0xff]  ;;  %v4995_v44 = vpop.permute.xlu0 %4994 }
 0x659   :  { %v5093_v10 = vld [vmem:[#allocation3 + $0x68] sm:$0xff]  ;;  %v5207_v48 = vmul.f32 %v5186_v21, %v5095_v27 }
 0x65a   :  { %v5096_v16 = vld [vmem:[#allocation3 + $0x80] sm:$0xff]  ;;  %v5205_v51 = vmul.f32 %v5176_v60, %v5093_v10  ;;  %v11006_v38 = vpop.permute.xlu1 %4999 }
 0x65b   :  { %v5208_v47 = vmul.f32 %v5191_v61, %v5096_v16  ;;  %v5094_v14 = vld [vmem:[#allocation3 + $0x70] sm:$0xff] }
 0x65c   :  { %v5206_v29 = vmul.f32 %v5181_v12, %v5094_v14  ;;  %v5005_v52 = vpop.permute.xlu0 %5004 }
 0x65d   :  { %v5216_v35 = vpack.c.bf16 %v5208_v47, %v5207_v48 }
 0x65e   :  { %v5215_v58 = vpack.c.bf16 %v5206_v29, %v5205_v51  ;;  %v5010_v47 = vpop.permute.xlu1 %5009  ;;  %v4946_v29 = vld [vmem:[#allocation3 + $0xf] sm:$0xff] }
 0x65f   :  { %5239 = vrot.lane.b32.xlu0 %v5216_v35, %s8168_s0  ;;  %v4947_v35 = vld [vmem:[#allocation3 + $0x17] sm:$0xff] }
 0x660   :  { %5237 = vrot.lane.b32.xlu1 %v5215_v58, %s8168_s0  ;;  %v5015_v16 = vpop.permute.xlu0 %5014  ;;  %v4948_v58 = vld [vmem:[#allocation3 + $0x1f] sm:$0xff] }
 0x662   :  { %v11018_v51 = vpop.permute.xlu1 %5019 }
 0x664   :  { %v11016_v14 = vpop.permute.xlu0 %5024 }
 0x66a   :  { %v4890_v11 = vpop.f32.mrb[56].mxu1 }
 0x66b   :  { %v4892_v31 = vpop.f32.mrb[57].mxu1  ;;  %v10983_v45 = vadd.f32 %v4890_v11, %v10960_v2 }
 0x66c   :  { %v4893_v55 = vpop.f32.mrb[58].mxu1  ;;  %v4945_v31 = vld [vmem:[#allocation3 + $0x7] sm:$0xff] }
 0x66d   :  { %v10986_v9 = vadd.f32 %v4893_v55, %v10960_v2  ;;  %v4895_v3 = vpop.f32.mrb[59].mxu1  ;;  %v11020_v55 = vpop.permute.xlu0 %5034 }
 0x67a   :  { %v4898_v24 = vpop.f32.mrb[60].mxu1 }
 0x67b   :  { %v4900_v18 = vpop.f32.mrb[61].mxu1  ;;  %v10991_v39 = vadd.f32 %v4898_v24, %v10960_v2  ;;  %v5058_v24 = vmul.f32 %v4985_v22, %v4946_v29 }
 0x67c   :  { %v4901_v7 = vpop.f32.mrb[62].mxu1  ;;  %v11022_v18 = vpop.permute.xlu1 %5029 }
 0x67d   :  { %v10994_v23 = vadd.f32 %v4901_v7, %v10960_v2  ;;  %v4903_v36 = vpop.f32.mrb[63].mxu1 }
 0x67e   :  { %v5060_v36 = vmul.f32 %v4995_v44, %v4948_v58  ;;  %v7594_v44 = vld [vmem:[%s11608_s9 + $0x48] sm:$0xff]  }
 0x68a   :  { %v4906_v28 = vpop.f32.mrb[64].mxu1 }
 0x68b   :  { %v4908_v30 = vpop.f32.mrb[65].mxu1  ;;  %v10999_v0 = vadd.f32 %v4906_v28, %v10960_v2  ;;  %v5059_v28 = vmul.f32 %v4990_v13, %v4947_v35  ;;  %v7596_v35 = vld [vmem:[%s11608_s9 + $0x58] sm:$0xff]  }
 0x68c   :  { %v4909_v49 = vpop.f32.mrb[66].mxu1 }
 0x68d   :  { %v11002_v37 = vadd.f32 %v4909_v49, %v10960_v2  ;;  %v4911_v59 = vpop.f32.mrb[67].mxu1 }
 0x69a   :  { %v4914_v60 = vpop.f32.mrb[68].mxu1 }
 0x69b   :  { %v4916_v12 = vpop.f32.mrb[69].mxu1  ;;  %v11009_v10 = vadd.f32 %v4914_v60, %v10960_v2  ;;  %v5057_v60 = vmul.f32 %v4980_v41, %v4945_v31  ;;  %v7595_v41 = vld [vmem:[%s11608_s9 + $0x50] sm:$0xff]  }
 0x69c   :  { %v4917_v27 = vpop.f32.mrb[70].mxu1 }
 0x69d   :  { %v11012_v21 = vadd.f32 %v4917_v27, %v10960_v2  ;;  %v4919_v61 = vpop.f32.mrb[71].mxu1 }
 0x69e   :  { %v5073_v61 = vpack.c.bf16 %v5058_v24, %v5057_v60 }
 0x69f   :  { %v11784_v63 = vpack.c.bf16 %v11012_v21, %v11009_v10  ;;  %v6797_v10 = vld [vmem:[%s11610_s2 + $0x4] sm:$0x3] }
 0x6aa   :  { %v4922_v11 = vpop.f32.mrb[72].mxu1 }
 0x6ab   :  { %v4924_v3 = vpop.f32.mrb[73].mxu1  ;;  %v11025_v30 = vadd.f32 %v4922_v11, %v10960_v2 }
 0x6ac   :  { %v4925_v7 = vpop.f32.mrb[74].mxu1  ;;  %v5074_v3 = vpack.c.bf16 %v5060_v36, %v5059_v28  ;;  %v4950_v36 = vld [vmem:[#allocation3 + $0x2f] sm:$0xff]  ;;  %v4951_v28 = vld [vmem:[#allocation3 + $0x37] sm:$0xff] }
 0x6ad   :  { %v11028_v49 = vadd.f32 %v4925_v7, %v10960_v2  ;;  %v4927_v59 = vpop.f32.mrb[75].mxu1 }
 0x6ae   :  { %v4952_v59 = vld [vmem:[#allocation3 + $0x3f] sm:$0xff] }
 0x6af   :  { %v5228_v27 = vpop.permute.xlu0 %5227  ;;  %v11785_v33 = vpack.c.bf16 %v11028_v49, %v11025_v30  ;;  %v3726_v30 = vrot.slane %v6797_v10, %v11780_v8 }
 0x6b0   :  { %v5226_v22 = vpop.permute.xlu1 %5225  ;;  %v5246_v13 = vsel %vm1016_vm2, %v5074_v3, %v5228_v27  ;;  %v4949_v27 = vld [vmem:[#allocation3 + $0x27] sm:$0xff]  ;;  %v5062_v3 = vmul.f32 %v5005_v52, %v4950_v36 }
 0x6b1   :  { %v5243_v29 = vsel %vm1016_vm2, %v5073_v61, %v5226_v22 }
 0x6b2   :  { %7309 = vmatprep.mubr.msk.bf16.mxu0 %vm434_vm4, %v5243_v29  ;;  %v5064_v29 = vmul.f32 %v5015_v16, %v4952_v59  ;;  %v4956_v16 = vld [vmem:[#allocation3 + $0x5f] sm:$0xff]  ;;  %v5066_v59 = vmul.f32 %v11016_v14, %v4954_v53  ;;  %v4959_v14 = vld [vmem:[#allocation3 + $0x77] sm:$0xff] }
 0x6b3   :  { %7310 = vmatmul.mubr.msk.bf16.vlgmr.msra.gmra.mrb[60].mxu0 %vm434_vm4, %v5246_v13  ;;  %v4960_v53 = vld [vmem:[#allocation3 + $0x7f] sm:$0xff] }
 0x6b4   :  { %7326 = vmatpush3.bf16.msra.mxu0 %v10948_v17 }
 0x6b5   :  { %7327 = vmatprep.subr.bf16.mxu0 %v7594_v44 }
 0x6b8   :  { %7328 = vmatpush3.bf16.msra.mxu0 %v7594_v44  ;;  %v5063_v44 = vmul.f32 %v5010_v47, %v4951_v28 }
 0x6b9   :  { %7329 = vmatprep.subr.bf16.mxu0 %v7595_v41 }
 0x6ba   :  { %v4930_v58 = vpop.f32.mrb[76].mxu1  ;;  %v5076_v60 = vpack.c.bf16 %v5064_v29, %v5063_v44  ;;  %v4957_v29 = vld [vmem:[#allocation3 + $0x67] sm:$0xff] }
 0x6bb   :  { %v4932_v11 = vpop.f32.mrb[77].mxu1  ;;  %v11047_v24 = vadd.f32 %v4930_v58, %v10960_v2 }
 0x6bc   :  { %v4933_v31 = vpop.f32.mrb[78].mxu1  ;;  %7330 = vmatpush3.bf16.msra.mxu0 %v7595_v41  ;;  %v5061_v41 = vmul.f32 %v11006_v38, %v4949_v27  ;;  %v4953_v38 = vld [vmem:[#allocation3 + $0x47] sm:$0xff] }
 0x6bd   :  { %v11050_v17 = vadd.f32 %v4933_v31, %v10960_v2  ;;  %v4935_v7 = vpop.f32.mrb[79].mxu1  ;;  %7331 = vmatprep.subr.bf16.mxu0 %v7596_v35 }
 0x6be   :  { %v5075_v7 = vpack.c.bf16 %v5062_v3, %v5061_v41  ;;  %v4958_v3 = vld [vmem:[#allocation3 + $0x6f] sm:$0xff] }
 0x6c0   :  { %v5045_v61 = vpop.permute.xlu0 %5044  ;;  %7332 = vmatpush3.bf16.msra.mxu0 %v7596_v35  ;;  %v4955_v35 = vld [vmem:[#allocation3 + $0x57] sm:$0xff] }
 0x6c1   :  { %v5040_v22 = vpop.permute.xlu1 %5039  ;;  %v5067_v27 = vmul.f32 %v11022_v18, %v4955_v35  ;;  %v11781_v35 = vpack.c.bf16 %v10986_v9, %v10983_v45  ;;  %v7597_v45 = vld [vmem:[%s11615_s14] sm:$0xff]   ;;  %v7598_v9 = vld [vmem:[%s11615_s14 + $0x8] sm:$0xff]  }
 0x6c2   :  { %v4938_v13 = vpop.f32.mrb[80].mxu1  ;;  %v5069_v44 = vmul.f32 %v5040_v22, %v4957_v29  ;;  %7349 = vmatprep.subr.bf16.mxu1 %v7597_v45 }
 0x6c3   :  { %v4940_v58 = vpop.f32.mrb[81].mxu1  ;;  %v4939_v12 = vadd.f32 %v4938_v13, %v10960_v2  ;;  %7350 = vmatpush3.bf16.msra.mxu1 %v7597_v45 }
 0x6c4   :  { %v4941_v11 = vpop.f32.mrb[82].mxu1  ;;  %v5232_v31 = vpop.permute.xlu0 %5231  ;;  %7351 = vmatprep.subr.bf16.mxu1 %v7598_v9 }
 0x6c5   :  { %v4942_v48 = vadd.f32 %v4941_v11, %v10960_v2  ;;  %v4943_v1 = vpop.f32.mrb[83].mxu1  ;;  %v5230_v54 = vpop.permute.xlu1 %5229  ;;  %v5252_v36 = vsel %vm1016_vm2, %v5076_v60, %v5232_v31  ;;  %v5070_v60 = vmul.f32 %v5045_v61, %v4958_v3 }
 0x6c6   :  { %v5249_v52 = vsel %vm1016_vm2, %v5075_v7, %v5230_v54  ;;  %v5068_v1 = vmul.f32 %v11020_v55, %v4956_v16  ;;  %v5065_v54 = vmul.f32 %v11018_v51, %v4953_v38  ;;  %v11782_v16 = vpack.c.bf16 %v10994_v23, %v10991_v39  ;;  %v11787_v39 = vld [vmem:[#allocation6_spill] sm:$0xff] }
 0x6c7   :  { %v5431_v47 = vpack.c.bf16 %v4942_v48, %v4939_v12  ;;  %7313 = vmatprep.mubr.msk.bf16.mxu0 %vm434_vm4, %v5249_v52  ;;  %v5079_v55 = vpack.c.bf16 %v5070_v60, %v5069_v44  ;;  %7352 = vmatpush3.bf16.msra.mxu1 %v7598_v9  ;;  %v5277_v23 = vrot.slane %v10955_v57, %v11787_v39 }
 0x6c8   :  { %v5055_v28 = vpop.permute.xlu0 %5054  ;;  %7314 = vmatmul.mubr.msk.bf16.gmra.mrb[64].mxu0 %vm434_vm4, %v5252_v36  ;;  %v5077_v12 = vpack.c.bf16 %v5066_v59, %v5065_v54  ;;  %v5078_v13 = vpack.c.bf16 %v5068_v1, %v5067_v27  ;;  %v11783_v36 = vpack.c.bf16 %v11002_v37, %v10999_v0  ;;  %v11788_v0 = vld [vmem:[#allocation46_spill] sm:$0xff] }
 0x6c9   :  { %v5050_v2 = vpop.permute.xlu1 %5049  ;;  %v5072_v51 = vmul.f32 %v5055_v28, %v4960_v53  ;;  %v5435_v37 = vrot.slane %v10955_v57, %v11788_v0 }
 0x6ca   :  { %v5071_v18 = vmul.f32 %v5050_v2, %v4959_v14 }
 0x6cb   :  { %v11115_v21 = vadd.f32 %v5435_v37, %v5277_v23 }
 0x6cc   :  { %v5236_v48 = vpop.permute.xlu0 %5235  ;;  %v5080_v22 = vpack.c.bf16 %v5072_v51, %v5071_v18 }
 0x6cd   :  { %v5234_v41 = vpop.permute.xlu1 %5233  ;;  %v5258_v11 = vsel %vm1016_vm2, %v5078_v13, %v5236_v48 }
 0x6ce   :  { %v5255_v58 = vsel %vm1016_vm2, %v5077_v12, %v5234_v41 }
 0x6cf   :  { %7317 = vmatprep.mubr.msk.bf16.mxu0 %vm434_vm4, %v5255_v58 }
 0x6d0   :  { %7318 = vmatmul.mubr.msk.bf16.gmra.mrb[68].mxu0 %vm434_vm4, %v5258_v11 }
 0x6d1   :  { %v5240_v61 = vpop.permute.xlu0 %5239 }
 0x6d2   :  { %v5238_v31 = vpop.permute.xlu1 %5237  ;;  %v5264_v52 = vsel %vm1016_vm2, %v5080_v22, %v5240_v61 }
 0x6d3   :  { %v5261_v7 = vsel %vm1016_vm2, %v5079_v55, %v5238_v31 }
 0x6d4   :  { %7321 = vmatprep.mubr.msk.bf16.mxu0 %vm434_vm4, %v5261_v7 }
 0x6d8   :  { %7322 = vmatmul.mubr.msk.bf16.gmra.mrb[72].mxu0 %vm434_vm4, %v5264_v52  ;;  %v11150_v52 = vrot.slane %v6797_v10, %v11787_v39 }
 0x6d9   :  { %7333 = vmatprep.mubr.msk.bf16.mxu0 %vm434_vm4, %v5424_v32  ;;  %v11786_v32 = vpack.c.bf16 %v11050_v17, %v11047_v24 }
 0x6e0   :  { %7334 = vmatmul.mubr.msk.bf16.vlgmr.msra.gmra.mrb[60].mxu0 %vm434_vm4, %v11781_v35 }
 0x6e1   :  { %7337 = vmatprep.mubr.msk.bf16.mxu0 %vm434_vm4, %v11782_v16 }
 0x6e8   :  { %7338 = vmatmul.mubr.msk.bf16.gmra.mrb[64].mxu0 %vm434_vm4, %v11783_v36 }
 0x6e9   :  { %7341 = vmatprep.mubr.msk.bf16.mxu0 %vm434_vm4, %v11784_v63 }
 0x6f0   :  { %7342 = vmatmul.mubr.msk.bf16.gmra.mrb[68].mxu0 %vm434_vm4, %v11785_v33 }
 0x6f1   :  { %7345 = vmatprep.mubr.msk.bf16.mxu0 %vm434_vm4, %v11786_v32 }
 0x6f8   :  { %7346 = vmatmul.mubr.msk.bf16.gmra.mrb[72].mxu0 %vm434_vm4, %v5431_v47 }
 0x7b3   :  { %v7335_v49 = vpop.f32.mrb[60].mxu0 }
 0x7b4   :  { %v7458_v24 = vadd.f32 %v11115_v21, %v7335_v49  ;;  %v5518_v17 = vpop.f32.mrb[61].mxu0 }
 0x7b5   :  { %v7460_v47 = vadd.f32 %v11115_v21, %v5518_v17  ;;  %v7336_v38 = vpop.f32.mrb[62].mxu0 }
 0x7b6   :  { %v11120_v28 = vadd.f32 %v7458_v24, %v3726_v30  ;;  %v7462_v59 = vadd.f32 %v11115_v21, %v7336_v38  ;;  %v5521_v57 = vpop.f32.mrb[63].mxu0 }
 0x7b7   :  { %v11123_v2 = vadd.f32 %v7460_v47, %v3726_v30  ;;  %v7464_v1 = vadd.f32 %v11115_v21, %v5521_v57 }
 0x7b8   :  { %v6980_v27 = vmul.f32 -1.442695, %v11120_v28  ;;  %v11127_v54 = vadd.f32 %v7462_v59, %v3726_v30 }
 0x7b9   :  { %v6978_v3 = vmul.f32 -1.442695, %v11123_v2  ;;  %v11130_v29 = vadd.f32 %v7464_v1, %v3726_v30 }
 0x7ba   :  { %7985 = vpow2.f32 %v6980_v27  ;;  %v6981_v48 = vmul.f32 -1.442695, %v11127_v54 }
 0x7bb   :  { %7987 = vpow2.f32 %v6978_v3  ;;  %v6979_v12 = vmul.f32 -1.442695, %v11130_v29  ;;  %v7339_v60 = vpop.f32.mrb[64].mxu0 }
 0x7bc   :  { %v7466_v44 = vadd.f32 %v11115_v21, %v7339_v60  ;;  %v5534_v13 = vpop.f32.mrb[65].mxu0  ;;  %7989 = vpow2.f32 %v6981_v48 }
 0x7bd   :  { %v7468_v41 = vadd.f32 %v11115_v21, %v5534_v13  ;;  %v7340_v58 = vpop.f32.mrb[66].mxu0  ;;  %7991 = vpow2.f32 %v6979_v12 }
 0x7be   :  { %v11136_v11 = vadd.f32 %v7466_v44, %v3726_v30  ;;  %v7470_v53 = vadd.f32 %v11115_v21, %v7340_v58  ;;  %v5537_v14 = vpop.f32.mrb[67].mxu0 }
 0x7bf   :  { %v11139_v55 = vadd.f32 %v7468_v41, %v3726_v30  ;;  %v7472_v51 = vadd.f32 %v11115_v21, %v5537_v14 }
 0x7c0   :  { %v6984_v18 = vmul.f32 -1.442695, %v11136_v11  ;;  %v11143_v31 = vadd.f32 %v7470_v53, %v3726_v30 }
 0x7c1   :  { %v6982_v7 = vmul.f32 -1.442695, %v11139_v55  ;;  %v11146_v61 = vadd.f32 %v7472_v51, %v3726_v30 }
 0x7c2   :  { %7993 = vpow2.f32 %v6984_v18  ;;  %v6985_v22 = vmul.f32 -1.442695, %v11143_v31 }
 0x7c3   :  { %7995 = vpow2.f32 %v6982_v7  ;;  %v7343_v35 = vpop.f32.mrb[68].mxu0  ;;  %v6983_v32 = vmul.f32 -1.442695, %v11146_v61 }
 0x7c4   :  { %v7986_v16 = vpop.eup %7985  ;;  %v7474_v36 = vadd.f32 %v11115_v21, %v7343_v35  ;;  %v5550_v63 = vpop.f32.mrb[69].mxu0  ;;  %7997 = vpow2.f32 %v6985_v22 }
 0x7c5   :  { %v7988_v33 = vpop.eup %7987  ;;  %v7476_v45 = vadd.f32 %v11115_v21, %v5550_v63  ;;  %v7344_v9 = vpop.f32.mrb[70].mxu0  ;;  %v5679_v30 = vadd.f32 1.0, %v7986_v16 }
 0x7c6   :  { %v5677_v23 = vadd.f32 1.0, %v7988_v33  ;;  %v5553_v0 = vpop.f32.mrb[71].mxu0  ;;  %v7990_v37 = vpop.eup %7989  ;;  %v11156_v49 = vadd.f32 %v7474_v36, %v11150_v52  ;;  %v7478_v17 = vadd.f32 %v11115_v21, %v7344_v9 }
 0x7c7   :  { %v7992_v10 = vpop.eup %7991  ;;  %v11159_v24 = vadd.f32 %v7476_v45, %v11150_v52  ;;  %v5680_v47 = vadd.f32 1.0, %v7990_v37  ;;  %v7480_v57 = vadd.f32 %v11115_v21, %v5553_v0 }
 0x7c8   :  { %7999 = vrcp.f32 %v5677_v23  ;;  %v5678_v38 = vadd.f32 1.0, %v7992_v10  ;;  %v6988_v59 = vmul.f32 -1.442695, %v11156_v49  ;;  %v11166_v60 = vadd.f32 %v7478_v17, %v11150_v52 }
 0x7c9   :  { %8001 = vpow2.f32 %v6983_v32  ;;  %v6986_v12 = vmul.f32 -1.442695, %v11159_v24  ;;  %v11169_v58 = vadd.f32 %v7480_v57, %v11150_v52 }
 0x7ca   :  { %8003 = vrcp.f32 %v5679_v30  ;;  %v6989_v7 = vmul.f32 -1.442695, %v11166_v60 }
 0x7cb   :  { %v7347_v1 = vpop.f32.mrb[72].mxu0  ;;  %8005 = vrcp.f32 %v5678_v38  ;;  %v6987_v16 = vmul.f32 -1.442695, %v11169_v58 }
 0x7cc   :  { %v7994_v27 = vpop.eup %7993  ;;  %v5566_v3 = vpop.f32.mrb[73].mxu0  ;;  %8007 = vrcp.f32 %v5680_v47  ;;  %v7482_v53 = vadd.f32 %v11115_v21, %v7347_v1 }
 0x7cd   :  { %v7996_v48 = vpop.eup %7995  ;;  %v7348_v44 = vpop.f32.mrb[74].mxu0  ;;  %8009 = vpow2.f32 %v6988_v59  ;;  %v5683_v14 = vadd.f32 1.0, %v7994_v27  ;;  %v7484_v51 = vadd.f32 %v11115_v21, %v5566_v3 }
 0x7ce   :  { %v5681_v13 = vadd.f32 1.0, %v7996_v48  ;;  %v5569_v41 = vpop.f32.mrb[75].mxu0  ;;  %v7998_v18 = vpop.eup %7997  ;;  %v11176_v36 = vadd.f32 %v7482_v53, %v11150_v52  ;;  %v7486_v45 = vadd.f32 %v11115_v21, %v7348_v44 }
 0x7cf   :  { %v11180_v33 = vadd.f32 %v7484_v51, %v11150_v52  ;;  %v5684_v23 = vadd.f32 1.0, %v7998_v18  ;;  %v7488_v0 = vadd.f32 %v11115_v21, %v5569_v41 }
 0x7d0   :  { %8011 = vrcp.f32 %v5681_v13  ;;  %v6992_v37 = vmul.f32 -1.442695, %v11176_v36  ;;  %v11189_v47 = vadd.f32 %v7486_v45, %v11150_v52 }
 0x7d1   :  { %8013 = vpow2.f32 %v6986_v12  ;;  %v6990_v10 = vmul.f32 -1.442695, %v11180_v33  ;;  %v11192_v59 = vadd.f32 %v7488_v0, %v11150_v52 }
 0x7d2   :  { %v8000_v22 = vpop.eup %7999  ;;  %8015 = vrcp.f32 %v5683_v14  ;;  %v6993_v27 = vmul.f32 -1.442695, %v11189_v47 }
 0x7d3   :  { %v8002_v35 = vpop.eup %8001  ;;  %5741 = vrot.lane.b32.xlu1 %v8000_v22, %s8167_s19  ;;  %8017 = vpow2.f32 %v6989_v7  ;;  %v6991_v48 = vmul.f32 -1.442695, %v11192_v59 }
 0x7d4   :  { %v5682_v63 = vadd.f32 1.0, %v8002_v35  ;;  %v8004_v32 = vpop.eup %8003 }
 0x7d5   :  { %v8006_v9 = vpop.eup %8005 }
 0x7d6   :  { %8019 = vrcp.f32 %v5682_v63  ;;  %5743 = vrot.lane.b32.xlu0 %v8006_v9, %s8167_s19  ;;  %v8008_v30 = vpop.eup %8007 }
 0x7d7   :  { %8021 = vpow2.f32 %v6987_v16  ;;  %5745 = vrot.lane.b32.xlu1 %v8004_v32, %s8167_s19  ;;  %v8010_v17 = vpop.eup %8009 }
 0x7d8   :  { %8023 = vrcp.f32 %v5684_v23  ;;  %v5687_v57 = vadd.f32 1.0, %v8010_v17 }
 0x7d9   :  { %8025 = vpow2.f32 %v6992_v37 }
 0x7da   :  { %v8012_v38 = vpop.eup %8011  ;;  %5747 = vrot.lane.b32.xlu0 %v8008_v30, %s8167_s19  ;;  %8027 = vpow2.f32 %v6990_v10  ;;  %v7599_v10 = vld [vmem:[%s11616_s16] sm:$0xff]  }
 0x7db   :  { %v8014_v21 = vpop.eup %8013  ;;  %5749 = vrot.lane.b32.xlu1 %v8012_v38, %s8167_s19  ;;  %v7600_v38 = vld [vmem:[%s11616_s16 + $0x8] sm:$0xff]   ;;  %7369 = vmatprep.subr.bf16.mxu0 %v7599_v10 }
 0x7dc   :  { %v5685_v1 = vadd.f32 1.0, %v8014_v21  ;;  %v8016_v3 = vpop.eup %8015  ;;  %7370 = vmatpush3.bf16.msra.mxu0 %v7599_v10 }
 0x7dd   :  { %v8018_v12 = vpop.eup %8017  ;;  %7371 = vmatprep.subr.bf16.mxu0 %v7600_v38 }
 0x7de   :  { %8029 = vrcp.f32 %v5685_v1  ;;  %v5688_v53 = vadd.f32 1.0, %v8018_v12 }
 0x7df   :  { %5753 = vrot.lane.b32.xlu1 %v8016_v3, %s8167_s19  ;;  %8031 = vrcp.f32 %v5687_v57  ;;  %v11223_v57 = vld [vmem:[%s11617_s3] sm:$0x3] }
 0x7e0   :  { %v8020_v52 = vpop.eup %8019  ;;  %8033 = vpow2.f32 %v6993_v27  ;;  %7372 = vmatpush3.bf16.msra.mxu0 %v7600_v38 }
 0x7e1   :  { %v8022_v44 = vpop.eup %8021  ;;  %5751 = vrot.lane.b32.xlu0 %v8020_v52, %s8167_s19  ;;  %8035 = vpow2.f32 %v6991_v48 }
 0x7e2   :  { %v5686_v13 = vadd.f32 1.0, %v8022_v44  ;;  %v8024_v41 = vpop.eup %8023 }
 0x7e3   :  { %v8026_v14 = vpop.eup %8025 }
 0x7e4   :  { %8037 = vrcp.f32 %v5686_v13  ;;  %v8028_v51 = vpop.eup %8027  ;;  %v5691_v22 = vadd.f32 1.0, %v8026_v14 }
 0x7e5   :  { %5755 = vrot.lane.b32.xlu0 %v8024_v41, %s8167_s19  ;;  %v5689_v18 = vadd.f32 1.0, %v8028_v51  ;;  %8039 = vrcp.f32 %v5688_v53 }
 0x7e7   :  { %8041 = vrcp.f32 %v5689_v18 }
 0x7e8   :  { %v8030_v7 = vpop.eup %8029  ;;  %8043 = vrcp.f32 %v5691_v22 }
 0x7e9   :  { %5757 = vrot.lane.b32.xlu1 %v8030_v7, %s8167_s19  ;;  %v8032_v35 = vpop.eup %8031 }
 0x7ea   :  { %v8034_v16 = vpop.eup %8033 }
 0x7eb   :  { %v8036_v63 = vpop.eup %8035  ;;  %v5692_v9 = vadd.f32 1.0, %v8034_v16 }
 0x7ec   :  { %v5690_v32 = vadd.f32 1.0, %v8036_v63 }
 0x7ed   :  { %5761 = vrot.lane.b32.xlu1 %v8032_v35, %s8167_s19 }
 0x7ee   :  { %v8038_v45 = vpop.eup %8037  ;;  %8045 = vrcp.f32 %v5690_v32 }
 0x7ef   :  { %5759 = vrot.lane.b32.xlu0 %v8038_v45, %s8167_s19  ;;  %v8040_v23 = vpop.eup %8039  ;;  %8047 = vrcp.f32 %v5692_v9 }
 0x7f0   :  { %8049 = vtanh.f32 %v11123_v2 }
 0x7f1   :  { %v8042_v0 = vpop.eup %8041  ;;  %8051 = vtanh.f32 %v11120_v28  ;;  %v5825_v28 = vrot.slane %v11223_v57, %v11780_v8 }
 0x7f2   :  { %5765 = vrot.lane.b32.xlu1 %v8042_v0, %s8167_s19  ;;  %v8044_v37 = vpop.eup %8043  ;;  %8053 = vtanh.f32 %v11130_v29 }
 0x7f3   :  { %5763 = vrot.lane.b32.xlu0 %v8040_v23, %s8167_s19  ;;  %8055 = vtanh.f32 %v11127_v54 }
 0x7f4   :  { %8057 = vtanh.f32 %v11139_v55 }
 0x7f5   :  { %8059 = vtanh.f32 %v11136_v11 }
 0x7f6   :  { %5769 = vrot.lane.b32.xlu1 %v8044_v37, %s8167_s19  ;;  %8061 = vtanh.f32 %v11146_v61 }
 0x7f7   :  { %8063 = vtanh.f32 %v11143_v31 }
 0x7f8   :  { %v8046_v30 = vpop.eup %8045  ;;  %8065 = vtanh.f32 %v11159_v24 }
 0x7f9   :  { %5767 = vrot.lane.b32.xlu0 %v8046_v30, %s8167_s19  ;;  %v8048_v17 = vpop.eup %8047  ;;  %8067 = vtanh.f32 %v11156_v49 }
 0x7fa   :  { %v8050_v21 = vpop.eup %8049  ;;  %8069 = vtanh.f32 %v11169_v58 }
 0x7fb   :  { %v8052_v3 = vpop.eup %8051  ;;  %8071 = vtanh.f32 %v11166_v60 }
 0x7fc   :  { %v8054_v29 = vpop.eup %8053  ;;  %8073 = vtanh.f32 %v11180_v33 }
 0x7fd   :  { %5771 = vrot.lane.b32.xlu0 %v8048_v17, %s8167_s19  ;;  %v8056_v52 = vpop.eup %8055  ;;  %8075 = vtanh.f32 %v11176_v36 }
 0x7fe   :  { %v8058_v11 = vpop.eup %8057  ;;  %8077 = vtanh.f32 %v11192_v59 }
 0x7ff   :  { %v8060_v35 = vpop.eup %8059  ;;  %8079 = vtanh.f32 %v11189_v47 }
 0x800   :  { %v8062_v31 = vpop.eup %8061 }
 0x801   :  { %v8064_v10 = vpop.eup %8063 }
 0x802   :  { %v8066_v49 = vpop.eup %8065 }
 0x845   :  { %v5742_v1 = vpop.permute.xlu1 %5741 }
 0x846   :  { %v5789_v27 = vmul.f32 %v8050_v21, %v5742_v1 }
 0x848   :  { %v5805_v2 = vadd.f32 %v5789_v27, %v10649_v5  ;;  %v5744_v54 = vpop.permute.xlu0 %5743 }
 0x849   :  { %v5746_v55 = vpop.permute.xlu1 %5745  ;;  %v5790_v48 = vmul.f32 %v8054_v29, %v5744_v54 }
 0x84a   :  { %v5791_v12 = vmul.f32 %v8052_v3, %v5746_v55  ;;  %v5830_v44 = vadd.f32 %v5825_v28, %v5805_v2  ;;  %v8068_v55 = vpop.eup %8067 }
 0x84b   :  { %v5806_v13 = vadd.f32 %v5790_v48, %v10651_v20 }
 0x84c   :  { %v5807_v41 = vadd.f32 %v5791_v12, %v10653_v56  ;;  %v5748_v53 = vpop.permute.xlu0 %5747  ;;  %v5846_v18 = vmax.f32 %v5830_v44, 0.0  ;;  %v8070_v44 = vpop.eup %8069 }
 0x84d   :  { %v5750_v8 = vpop.permute.xlu1 %5749  ;;  %v5831_v14 = vadd.f32 %v5825_v28, %v5806_v13  ;;  %v5792_v5 = vmul.f32 %v8056_v52, %v5748_v53 }
 0x84e   :  { %v5793_v51 = vmul.f32 %v8058_v11, %v5750_v8  ;;  %v5832_v7 = vadd.f32 %v5825_v28, %v5807_v41  ;;  %v8072_v11 = vpop.eup %8071 }
 0x84f   :  { %v5847_v61 = vmax.f32 %v5831_v14, 0.0  ;;  %v5808_v22 = vadd.f32 %v5792_v5, %v10647_v34  ;;  %v8074_v8 = vpop.eup %8073 }
 0x850   :  { %v5809_v56 = vadd.f32 %v5793_v51, %v10680_v50  ;;  %v5848_v9 = vmax.f32 %v5832_v7, 0.0 }
 0x851   :  { %v5754_v16 = vpop.permute.xlu1 %5753  ;;  %v5866_v20 = vpack.c.bf16 %v5847_v61, %v5846_v18  ;;  %v5833_v63 = vadd.f32 %v5825_v28, %v5808_v22  ;;  %v8076_v61 = vpop.eup %8075 }
 0x852   :  { %v5795_v32 = vmul.f32 %v8060_v35, %v5754_v16  ;;  %v5834_v34 = vadd.f32 %v5825_v28, %v5809_v56  ;;  %v8078_v16 = vpop.eup %8077 }
 0x853   :  { %v5752_v45 = vpop.permute.xlu0 %5751  ;;  %v5849_v23 = vmax.f32 %v5833_v63, 0.0  ;;  %7353 = vmatprep.mubr.msk.bf16.mxu1 %vm1016_vm2, %v5866_v20 }
 0x854   :  { %v5794_v0 = vmul.f32 %v8062_v31, %v5752_v45  ;;  %v5811_v24 = vadd.f32 %v5795_v32, %v10673_v40  ;;  %v5850_v21 = vmax.f32 %v5834_v34, 0.0 }
 0x855   :  { %v5867_v37 = vpack.c.bf16 %v5849_v23, %v5848_v9  ;;  %v8080_v9 = vpop.eup %8079 }
 0x856   :  { %v5810_v30 = vadd.f32 %v5794_v0, %v10682_v25  ;;  %v5836_v27 = vadd.f32 %v5825_v28, %v5811_v24 }
 0x857   :  { %v5756_v50 = vpop.permute.xlu0 %5755  ;;  %7354 = vmatmul.mubr.msk.bf16.vlgmr.msra.gmra.mrb[84].mxu1 %vm1016_vm2, %v5867_v37 }
 0x858   :  { %v5835_v17 = vadd.f32 %v5825_v28, %v5810_v30  ;;  %v5796_v38 = vmul.f32 %v8064_v10, %v5756_v50  ;;  %v5852_v58 = vmax.f32 %v5836_v27, 0.0 }
 0x85a   :  { %v5851_v1 = vmax.f32 %v5835_v17, 0.0  ;;  %v5812_v3 = vadd.f32 %v5796_v38, %v10675_v19  ;;  %v5829_v19 = vrot.slane %v11223_v57, %v11787_v39 }
 0x85b   :  { %v5758_v2 = vpop.permute.xlu1 %5757 }
 0x85c   :  { %v5868_v40 = vpack.c.bf16 %v5851_v1, %v5850_v21  ;;  %v5837_v25 = vadd.f32 %v5825_v28, %v5812_v3  ;;  %v5797_v29 = vmul.f32 %v8066_v49, %v5758_v2 }
 0x85e   :  { %v5853_v54 = vmax.f32 %v5837_v25, 0.0  ;;  %7357 = vmatprep.mubr.msk.bf16.mxu1 %vm1016_vm2, %v5868_v40  ;;  %v5813_v60 = vadd.f32 %v5797_v29, %v10714_v15 }
 0x85f   :  { %v5762_v48 = vpop.permute.xlu1 %5761 }
 0x860   :  { %v5869_v12 = vpack.c.bf16 %v5853_v54, %v5852_v58  ;;  %v5799_v52 = vmul.f32 %v8068_v55, %v5762_v48  ;;  %v5838_v13 = vadd.f32 %v5829_v19, %v5813_v60 }
 0x861   :  { %v5760_v33 = vpop.permute.xlu0 %5759 }
 0x862   :  { %v5798_v28 = vmul.f32 %v8070_v44, %v5760_v33  ;;  %7358 = vmatmul.mubr.msk.bf16.gmra.mrb[88].mxu1 %vm1016_vm2, %v5869_v12  ;;  %v5815_v36 = vadd.f32 %v5799_v52, %v10718_v6  ;;  %v5854_v5 = vmax.f32 %v5838_v13, 0.0 }
 0x864   :  { %v5814_v41 = vadd.f32 %v5798_v28, %v10725_v46  ;;  %v5766_v57 = vpop.permute.xlu1 %5765  ;;  %v5840_v59 = vadd.f32 %v5829_v19, %v5815_v36 }
 0x865   :  { %v5764_v53 = vpop.permute.xlu0 %5763  ;;  %v5801_v14 = vmul.f32 %v8074_v8, %v5766_v57 }
 0x866   :  { %v5839_v39 = vadd.f32 %v5829_v19, %v5814_v41  ;;  %v5800_v15 = vmul.f32 %v8072_v11, %v5764_v53  ;;  %v5856_v20 = vmax.f32 %v5840_v59, 0.0 }
 0x867   :  { %v5817_v6 = vadd.f32 %v5801_v14, %v10748_v26 }
 0x868   :  { %v5855_v51 = vmax.f32 %v5839_v39, 0.0  ;;  %v5816_v18 = vadd.f32 %v5800_v15, %v10720_v62  ;;  %v5770_v46 = vpop.permute.xlu1 %5769 }
 0x869   :  { %v5803_v35 = vmul.f32 %v8076_v61, %v5770_v46  ;;  %v5842_v31 = vadd.f32 %v5829_v19, %v5817_v6 }
 0x86a   :  { %v5870_v7 = vpack.c.bf16 %v5855_v51, %v5854_v5  ;;  %v5841_v22 = vadd.f32 %v5829_v19, %v5816_v18 }
 0x86b   :  { %v5768_v47 = vpop.permute.xlu0 %5767  ;;  %v5819_v62 = vadd.f32 %v5803_v35, %v10753_v42  ;;  %v5858_v37 = vmax.f32 %v5842_v31, 0.0  ;;  %v6994_v42 = vld [vmem:[%s11618_s15] ss:$0 sm:$0xff] }
 0x86c   :  { %v5857_v63 = vmax.f32 %v5841_v22, 0.0  ;;  %7361 = vmatprep.mubr.msk.bf16.mxu1 %vm1016_vm2, %v5870_v7  ;;  %v5802_v56 = vmul.f32 %v8078_v16, %v5768_v47 }
 0x86d   :  { %v5844_v30 = vadd.f32 %v5829_v19, %v5819_v62 }
 0x86e   :  { %v5871_v32 = vpack.c.bf16 %v5857_v63, %v5856_v20  ;;  %v5818_v45 = vadd.f32 %v5802_v56, %v10759_v43 }
 0x86f   :  { %v5772_v23 = vpop.permute.xlu0 %5771  ;;  %v5860_v17 = vmax.f32 %v5844_v30, 0.0  ;;  %v11278_v30 = vld [vmem:[%s11619_s17] ss:$0 sm:$0xff] }
 0x870   :  { %7362 = vmatmul.mubr.msk.bf16.gmra.mrb[92].mxu1 %vm1016_vm2, %v5871_v32  ;;  %v5843_v0 = vadd.f32 %v5829_v19, %v5818_v45  ;;  %v5804_v26 = vmul.f32 %v8080_v9, %v5772_v23 }
 0x872   :  { %v5859_v34 = vmax.f32 %v5843_v0, 0.0  ;;  %v5820_v24 = vadd.f32 %v5804_v26, %v10755_v4 }
 0x874   :  { %v5872_v10 = vpack.c.bf16 %v5859_v34, %v5858_v37  ;;  %v5845_v50 = vadd.f32 %v5829_v19, %v5820_v24 }
 0x876   :  { %v5861_v38 = vmax.f32 %v5845_v50, 0.0  ;;  %7365 = vmatprep.mubr.msk.bf16.mxu1 %vm1016_vm2, %v5872_v10  ;;  %v6184_v10 = vld [vmem:[%s11620_s4 + $0x10] sm:$0xff] }
 0x878   :  { %v5873_v43 = vpack.c.bf16 %v5861_v38, %v5860_v17  ;;  %v6182_v38 = vld [vmem:[%s11620_s4] sm:$0xff] }
 0x87a   :  { %7366 = vmatmul.mubr.msk.bf16.gmra.mrb[96].mxu1 %vm1016_vm2, %v5873_v43 }
 0x92a   :  { %v7355_v21 = vpop.f32.mrb[84].mxu1 }
 0x92b   :  { %v5960_v1 = vadd.f32 %v7355_v21, %v6994_v42  ;;  %v5951_v27 = vpop.f32.mrb[85].mxu1 }
 0x92c   :  { %v5952_v3 = vadd.f32 %v6994_v42, %v5951_v27  ;;  %v7356_v49 = vpop.f32.mrb[86].mxu1  ;;  %v6185_v27 = vld [vmem:[%s11620_s4 + $0x18] sm:$0xff] }
 0x92d   :  { %v5963_v2 = vadd.f32 %v7356_v49, %v6994_v42  ;;  %v5954_v4 = vpop.f32.mrb[87].mxu1  ;;  %v6016_v25 = vmax.f32 %v5960_v1, 0.0  ;;  %v6183_v49 = vld [vmem:[%s11620_s4 + $0x8] sm:$0xff] }
 0x92e   :  { %v5955_v40 = vadd.f32 %v6994_v42, %v5954_v4  ;;  %v6014_v58 = vmax.f32 %v5952_v3, 0.0 }
 0x92f   :  { %v6017_v29 = vmax.f32 %v5963_v2, 0.0 }
 0x930   :  { %v6015_v54 = vmax.f32 %v5955_v40, 0.0 }
 0x931   :  { %v6035_v55 = vpack.c.bf16 %v6017_v29, %v6016_v25 }
 0x932   :  { %v6034_v48 = vpack.c.bf16 %v6015_v54, %v6014_v58 }
 0x934   :  { %7373 = vmatprep.mubr.msk.bf16.mxu0 %vm1016_vm2, %v6034_v48  ;;  %v6188_v48 = vld [vmem:[%s11620_s4 + $0x30] sm:$0xff] }
 0x935   :  { %v7359_v12 = vpop.f32.mrb[88].mxu1  ;;  %7374 = vmatmul.mubr.msk.bf16.vlgmr.msra.gmra.mrb[76].mxu0 %vm1016_vm2, %v6035_v55 }
 0x936   :  { %v5976_v19 = vadd.f32 %v7359_v12, %v6994_v42  ;;  %v5967_v60 = vpop.f32.mrb[89].mxu1 }
 0x937   :  { %v5968_v52 = vadd.f32 %v6994_v42, %v5967_v60  ;;  %v7360_v44 = vpop.f32.mrb[90].mxu1 }
 0x938   :  { %v5979_v33 = vadd.f32 %v7360_v44, %v6994_v42  ;;  %v5970_v28 = vpop.f32.mrb[91].mxu1  ;;  %v6020_v41 = vmax.f32 %v5976_v19, 0.0  ;;  %v6186_v44 = vld [vmem:[%s11620_s4 + $0x20] sm:$0xff] }
 0x939   :  { %v5971_v13 = vadd.f32 %v6994_v42, %v5970_v28  ;;  %v6018_v11 = vmax.f32 %v5968_v52, 0.0  ;;  %v6189_v28 = vld [vmem:[%s11620_s4 + $0x38] sm:$0xff] }
 0x93a   :  { %v6021_v36 = vmax.f32 %v5979_v33, 0.0 }
 0x93b   :  { %v6019_v53 = vmax.f32 %v5971_v13, 0.0 }
 0x93c   :  { %v6037_v8 = vpack.c.bf16 %v6021_v36, %v6020_v41 }
 0x93d   :  { %v6036_v39 = vpack.c.bf16 %v6019_v53, %v6018_v11  ;;  %v6187_v53 = vld [vmem:[%s11620_s4 + $0x28] sm:$0xff] }
 0x93f   :  { %7377 = vmatprep.mubr.msk.bf16.mxu0 %vm1016_vm2, %v6036_v39 }
 0x940   :  { %7378 = vmatmul.mubr.msk.bf16.gmra.mrb[80].mxu0 %vm1016_vm2, %v6037_v8 }
 0x943   :  { %v7363_v15 = vpop.f32.mrb[92].mxu1 }
 0x944   :  { %v5992_v57 = vadd.f32 %v7363_v15, %v6994_v42  ;;  %v5983_v14 = vpop.f32.mrb[93].mxu1 }
 0x945   :  { %v5984_v5 = vadd.f32 %v6994_v42, %v5983_v14  ;;  %v7364_v51 = vpop.f32.mrb[94].mxu1 }
 0x946   :  { %v5995_v59 = vadd.f32 %v7364_v51, %v6994_v42  ;;  %v5986_v18 = vpop.f32.mrb[95].mxu1  ;;  %v6024_v7 = vmax.f32 %v5992_v57, 0.0 }
 0x947   :  { %v5987_v61 = vadd.f32 %v6994_v42, %v5986_v18  ;;  %v6022_v46 = vmax.f32 %v5984_v5, 0.0  ;;  %v6192_v18 = vld [vmem:[%s11620_s4 + $0x50] sm:$0xff] }
 0x948   :  { %v6025_v22 = vmax.f32 %v5995_v59, 0.0 }
 0x949   :  { %v6023_v6 = vmax.f32 %v5987_v61, 0.0 }
 0x94a   :  { %v6039_v35 = vpack.c.bf16 %v6025_v22, %v6024_v7 }
 0x94b   :  { %v6038_v16 = vpack.c.bf16 %v6023_v6, %v6022_v46  ;;  %v6190_v46 = vld [vmem:[%s11620_s4 + $0x40] sm:$0xff] }
 0x94d   :  { %7381 = vmatprep.mubr.msk.bf16.mxu0 %vm1016_vm2, %v6038_v16  ;;  %v7367_v20 = vpop.f32.mrb[96].mxu1 }
 0x94e   :  { %7382 = vmatmul.mubr.msk.bf16.gmra.mrb[84].mxu0 %vm1016_vm2, %v6039_v35  ;;  %v6008_v63 = vadd.f32 %v7367_v20, %v6994_v42  ;;  %v5999_v47 = vpop.f32.mrb[97].mxu1  ;;  %v6193_v35 = vld [vmem:[%s11620_s4 + $0x58] sm:$0xff] }
 0x94f   :  { %v6000_v56 = vadd.f32 %v6994_v42, %v5999_v47  ;;  %v7368_v32 = vpop.f32.mrb[98].mxu1 }
 0x950   :  { %v6011_v31 = vadd.f32 %v7368_v32, %v6994_v42  ;;  %v6002_v45 = vpop.f32.mrb[99].mxu1  ;;  %v6028_v9 = vmax.f32 %v6008_v63, 0.0 }
 0x951   :  { %v6003_v62 = vadd.f32 %v6994_v42, %v6002_v45  ;;  %v6026_v0 = vmax.f32 %v6000_v56, 0.0  ;;  %v6191_v56 = vld [vmem:[%s11620_s4 + $0x48] sm:$0xff] }
 0x952   :  { %v6029_v23 = vmax.f32 %v6011_v31, 0.0 }
 0x953   :  { %v6027_v26 = vmax.f32 %v6003_v62, 0.0 }
 0x954   :  { %v6041_v37 = vpack.c.bf16 %v6029_v23, %v6028_v9 }
 0x955   :  { %v6040_v34 = vpack.c.bf16 %v6027_v26, %v6026_v0 }
 0x957   :  { %7385 = vmatprep.mubr.msk.bf16.mxu0 %vm1016_vm2, %v6040_v34  ;;  %v6194_v34 = vld [vmem:[%s11620_s4 + $0x60] sm:$0xff] }
 0x958   :  { %7386 = vmatmul.mubr.msk.bf16.gmra.mrb[88].mxu0 %vm1016_vm2, %v6041_v37 }
 0xa08   :  { %v7375_v24 = vpop.f32.mrb[76].mxu0 }
 0xa09   :  { %v6128_v50 = vadd.f32 %v7375_v24, %v11278_v30  ;;  %v6119_v17 = vpop.f32.mrb[77].mxu0 }
 0xa0a   :  { %v6120_v43 = vadd.f32 %v11278_v30, %v6119_v17  ;;  %v7376_v42 = vpop.f32.mrb[78].mxu0  ;;  %v6196_v17 = vld [vmem:[%s11620_s4 + $0x70] sm:$0xff] }
 0xa0b   :  { %v11288_v21 = vadd.f32 %v6184_v10, %v6128_v50  ;;  %v6131_v1 = vadd.f32 %v7376_v42, %v11278_v30  ;;  %v6122_v3 = vpop.f32.mrb[79].mxu0 }
 0xa0c   :  { %v11297_v2 = vadd.f32 %v6182_v38, %v6120_v43  ;;  %v6123_v4 = vadd.f32 %v11278_v30, %v6122_v3  ;;  %v6195_v43 = vld [vmem:[%s11620_s4 + $0x68] sm:$0xff]  ;;  %v6197_v3 = vld [vmem:[%s11620_s4 + $0x78] sm:$0xff] }
 0xa0d   :  { %v6221_v40 = vsel %vm6214_vm6, %v11288_v21, -inf  ;;  %v11302_v25 = vadd.f32 %v6185_v27, %v6131_v1 }
 0xa0e   :  { %v11304_v29 = vadd.f32 %v6183_v49, %v6123_v4  ;;  %6222 = vmax.xlane.f32.xlu0 %v6221_v40  ;;  %v6215_v58 = vsel %vm6214_vm6, %v11297_v2, -inf }
 0xa0f   :  { %6216 = vmax.xlane.f32.xlu1 %v6215_v58  ;;  %v6224_v12 = vsel %vm6214_vm6, %v11302_v25, -inf }
 0xa10   :  { %v6218_v54 = vsel %vm6214_vm6, %v11304_v29, -inf }
 0xa12   :  { %6219 = vmax.xlane.f32.xlu0 %v6218_v54 }
 0xa13   :  { %v7379_v55 = vpop.f32.mrb[80].mxu0  ;;  %6225 = vmax.xlane.f32.xlu1 %v6224_v12 }
 0xa14   :  { %v6144_v19 = vadd.f32 %v7379_v55, %v11278_v30  ;;  %v6135_v60 = vpop.f32.mrb[81].mxu0 }
 0xa15   :  { %v6136_v52 = vadd.f32 %v11278_v30, %v6135_v60  ;;  %v7380_v33 = vpop.f32.mrb[82].mxu0 }
 0xa16   :  { %v11323_v13 = vadd.f32 %v6188_v48, %v6144_v19  ;;  %v6147_v41 = vadd.f32 %v7380_v33, %v11278_v30  ;;  %v6138_v36 = vpop.f32.mrb[83].mxu0 }
 0xa17   :  { %v6139_v11 = vadd.f32 %v11278_v30, %v6138_v36  ;;  %v11330_v8 = vadd.f32 %v6186_v44, %v6136_v52 }
 0xa18   :  { %v11332_v39 = vadd.f32 %v6189_v28, %v6147_v41  ;;  %v6233_v15 = vsel %vm6214_vm6, %v11323_v13, -inf }
 0xa19   :  { %6234 = vmax.xlane.f32.xlu0 %v6233_v15  ;;  %v11336_v57 = vadd.f32 %v6187_v53, %v6139_v11  ;;  %v6227_v5 = vsel %vm6214_vm6, %v11330_v8, -inf }
 0xa1a   :  { %v6236_v14 = vsel %vm6214_vm6, %v11332_v39, -inf }
 0xa1b   :  { %6237 = vmax.xlane.f32.xlu1 %v6236_v14  ;;  %v6230_v51 = vsel %vm6214_vm6, %v11336_v57, -inf }
 0xa1d   :  { %6228 = vmax.xlane.f32.xlu0 %v6227_v5 }
 0xa1f   :  { %6231 = vmax.xlane.f32.xlu1 %v6230_v51 }
 0xa21   :  { %v7383_v59 = vpop.f32.mrb[84].mxu0 }
 0xa22   :  { %v6160_v61 = vadd.f32 %v7383_v59, %v11278_v30  ;;  %v6151_v7 = vpop.f32.mrb[85].mxu0 }
 0xa23   :  { %v6152_v22 = vadd.f32 %v11278_v30, %v6151_v7  ;;  %v7384_v6 = vpop.f32.mrb[86].mxu0 }
 0xa24   :  { %v11355_v16 = vadd.f32 %v6192_v18, %v6160_v61  ;;  %v6163_v20 = vadd.f32 %v7384_v6, %v11278_v30  ;;  %v6154_v63 = vpop.f32.mrb[87].mxu0 }
 0xa25   :  { %v6155_v47 = vadd.f32 %v11278_v30, %v6154_v63  ;;  %v11362_v32 = vadd.f32 %v6190_v46, %v6152_v22 }
 0xa26   :  { %v11364_v31 = vadd.f32 %v6193_v35, %v6163_v20  ;;  %v6245_v45 = vsel %vm6214_vm6, %v11355_v16, -inf }
 0xa27   :  { %6246 = vmax.xlane.f32.xlu0 %v6245_v45  ;;  %v11368_v62 = vadd.f32 %v6191_v56, %v6155_v47  ;;  %v6239_v23 = vsel %vm6214_vm6, %v11362_v32, -inf }
 0xa28   :  { %v6248_v9 = vsel %vm6214_vm6, %v11364_v31, -inf }
 0xa29   :  { %6249 = vmax.xlane.f32.xlu1 %v6248_v9  ;;  %v6242_v26 = vsel %vm6214_vm6, %v11368_v62, -inf }
 0xa2b   :  { %6240 = vmax.xlane.f32.xlu0 %v6239_v23  ;;  %v7387_v0 = vpop.f32.mrb[88].mxu0 }
 0xa2c   :  { %v6167_v37 = vpop.f32.mrb[89].mxu0  ;;  %v6176_v24 = vadd.f32 %v7387_v0, %v11278_v30 }
 0xa2d   :  { %6243 = vmax.xlane.f32.xlu1 %v6242_v26  ;;  %v6168_v10 = vadd.f32 %v11278_v30, %v6167_v37  ;;  %v7388_v50 = vpop.f32.mrb[90].mxu0 }
 0xa2e   :  { %v6170_v38 = vpop.f32.mrb[91].mxu0  ;;  %v6179_v1 = vadd.f32 %v7388_v50, %v11278_v30  ;;  %v11394_v49 = vadd.f32 %v6196_v17, %v6176_v24 }
 0xa2f   :  { %v11387_v42 = vadd.f32 %v6194_v34, %v6168_v10  ;;  %v6171_v27 = vadd.f32 %v11278_v30, %v6170_v38 }
 0xa30   :  { %v11400_v58 = vadd.f32 %v6197_v3, %v6179_v1  ;;  %v6257_v30 = vsel %vm6214_vm6, %v11394_v49, -inf }
 0xa31   :  { %v11396_v4 = vadd.f32 %v6195_v43, %v6171_v27  ;;  %v6251_v40 = vsel %vm6214_vm6, %v11387_v42, -inf }
 0xa32   :  { %6252 = vmax.xlane.f32.xlu0 %v6251_v40  ;;  %v6260_v55 = vsel %vm6214_vm6, %v11400_v58, -inf }
 0xa33   :  { %v6254_v54 = vsel %vm6214_vm6, %v11396_v4, -inf }
 0xa34   :  { %6255 = vmax.xlane.f32.xlu1 %v6254_v54 }
 0xa36   :  { %6258 = vmax.xlane.f32.xlu0 %v6257_v30 }
 0xa38   :  { %6261 = vmax.xlane.f32.xlu1 %v6260_v55 }
 0xa9b   :  { %v6223_v48 = vpop.xlane.xlu0 %6222 }
 0xa9c   :  { %v6265_v12 = vsub.f32 %v11288_v21, %v6223_v48  ;;  %v6217_v19 = vpop.xlane.xlu1 %6216 }
 0xa9d   :  { %v6263_v60 = vsub.f32 %v11297_v2, %v6217_v19 }
 0xa9e   :  { %v6283_v52 = vmul.f32 1.442695, %v6265_v12 }
 0xa9f   :  { %v6279_v44 = vmul.f32 1.442695, %v6263_v60  ;;  %v6220_v33 = vpop.xlane.xlu0 %6219 }
 0xaa0   :  { %8081 = vpow2.f32 %v6283_v52  ;;  %v6264_v28 = vsub.f32 %v11304_v29, %v6220_v33  ;;  %v6226_v41 = vpop.xlane.xlu1 %6225 }
 0xaa1   :  { %v6266_v36 = vsub.f32 %v11302_v25, %v6226_v41  ;;  %8083 = vpow2.f32 %v6279_v44 }
 0xaa2   :  { %v6281_v11 = vmul.f32 1.442695, %v6264_v28 }
 0xaa3   :  { %v6285_v53 = vmul.f32 1.442695, %v6266_v36 }
 0xaa5   :  { %8085 = vpow2.f32 %v6285_v53 }
 0xaa6   :  { %v6235_v15 = vpop.xlane.xlu0 %6234  ;;  %8087 = vpow2.f32 %v6281_v11 }
 0xaa7   :  { %v6269_v14 = vsub.f32 %v11323_v13, %v6235_v15 }
 0xaa8   :  { %v6238_v21 = vpop.xlane.xlu1 %6237 }
 0xaa9   :  { %v6291_v5 = vmul.f32 1.442695, %v6269_v14  ;;  %v6270_v2 = vsub.f32 %v11332_v39, %v6238_v21 }
 0xaaa   :  { %v6229_v51 = vpop.xlane.xlu0 %6228  ;;  %v11414_v59 = vpop.eup %8081 }
 0xaab   :  { %8089 = vpow2.f32 %v6291_v5  ;;  %v6293_v29 = vmul.f32 1.442695, %v6270_v2  ;;  %v6267_v18 = vsub.f32 %v11330_v8, %v6229_v51  ;;  %v6317_v61 = vsel %vm6214_vm6, %v11414_v59, 0.0  ;;  %v11419_v7 = vpop.eup %8083 }
 0xaac   :  { %v6232_v25 = vpop.xlane.xlu1 %6231  ;;  %6318 = vadd.xlane.f32.xlu0 %v6317_v61  ;;  %v6311_v6 = vsel %vm6214_vm6, %v11419_v7, 0.0 }
 0xaad   :  { %8091 = vpow2.f32 %v6293_v29  ;;  %v6287_v13 = vmul.f32 1.442695, %v6267_v18  ;;  %v6268_v22 = vsub.f32 %v11336_v57, %v6232_v25  ;;  %v11789_v18 = vlaneseq }
 0xaaf   :  { %8093 = vpow2.f32 %v6287_v13  ;;  %v6289_v39 = vmul.f32 1.442695, %v6268_v22  ;;  %v11422_v46 = vpop.eup %8085  ;;  %v6392_v25 = vand.u32 127, %v11789_v18 }
 0xab0   :  { %6312 = vadd.xlane.f32.xlu0 %v6311_v6  ;;  %v6320_v8 = vsel %vm6214_vm6, %v11422_v46, 0.0  ;;  %v11428_v35 = vpop.eup %8087 }
 0xab1   :  { %8095 = vpow2.f32 %v6289_v39  ;;  %6321 = vadd.xlane.f32.xlu1 %v6320_v8  ;;  %v6314_v47 = vsel %vm6214_vm6, %v11428_v35, 0.0  ;;  %v11489_v22 = vcvt.s32.f32 %v6392_v25 }
 0xab4   :  { %v6247_v20 = vpop.xlane.xlu0 %6246 }
 0xab5   :  { %v11430_v63 = vpop.eup %8089  ;;  %v6273_v57 = vsub.f32 %v11355_v16, %v6247_v20  ;;  %6315 = vadd.xlane.f32.xlu1 %v6314_v47 }
 0xab6   :  { %v6250_v56 = vpop.xlane.xlu1 %6249  ;;  %v6329_v45 = vsel %vm6214_vm6, %v11430_v63, 0.0 }
 0xab7   :  { %v11437_v9 = vpop.eup %8091  ;;  %v6299_v23 = vmul.f32 1.442695, %v6273_v57  ;;  %v6274_v0 = vsub.f32 %v11364_v31, %v6250_v56  ;;  %6330 = vadd.xlane.f32.xlu0 %v6329_v45 }
 0xab8   :  { %v6241_v26 = vpop.xlane.xlu0 %6240  ;;  %v6332_v24 = vsel %vm6214_vm6, %v11437_v9, 0.0 }
 0xab9   :  { %v11440_v37 = vpop.eup %8093  ;;  %8097 = vpow2.f32 %v6299_v23  ;;  %v6301_v34 = vmul.f32 1.442695, %v6274_v0  ;;  %v6271_v16 = vsub.f32 %v11362_v32, %v6241_v26  ;;  %6333 = vadd.xlane.f32.xlu1 %v6332_v24 }
 0xaba   :  { %v6244_v10 = vpop.xlane.xlu1 %6243  ;;  %v6323_v50 = vsel %vm6214_vm6, %v11440_v37, 0.0 }
 0xabb   :  { %v11447_v17 = vpop.eup %8095  ;;  %8099 = vpow2.f32 %v6301_v34  ;;  %v6295_v31 = vmul.f32 1.442695, %v6271_v16  ;;  %v6272_v38 = vsub.f32 %v11368_v62, %v6244_v10  ;;  %6324 = vadd.xlane.f32.xlu0 %v6323_v50 }
 0xabc   :  { %v6326_v32 = vsel %vm6214_vm6, %v11447_v17, 0.0 }
 0xabd   :  { %8101 = vpow2.f32 %v6295_v31  ;;  %v6297_v43 = vmul.f32 1.442695, %v6272_v38  ;;  %6327 = vadd.xlane.f32.xlu1 %v6326_v32 }
 0xabf   :  { %8103 = vpow2.f32 %v6297_v43  ;;  %v6253_v1 = vpop.xlane.xlu0 %6252 }
 0xac0   :  { %v6275_v27 = vsub.f32 %v11387_v42, %v6253_v1 }
 0xac1   :  { %v6256_v3 = vpop.xlane.xlu1 %6255 }
 0xac2   :  { %v6303_v54 = vmul.f32 1.442695, %v6275_v27  ;;  %v6276_v30 = vsub.f32 %v11396_v4, %v6256_v3 }
 0xac3   :  { %v11453_v40 = vpop.eup %8097  ;;  %v6259_v55 = vpop.xlane.xlu0 %6258 }
 0xac4   :  { %v6341_v62 = vsel %vm6214_vm6, %v11453_v40, 0.0  ;;  %8105 = vpow2.f32 %v6303_v54  ;;  %v6305_v12 = vmul.f32 1.442695, %v6276_v30  ;;  %v6277_v19 = vsub.f32 %v11394_v49, %v6259_v55 }
 0xac5   :  { %v11458_v48 = vpop.eup %8099  ;;  %6342 = vadd.xlane.f32.xlu0 %v6341_v62  ;;  %v6262_v60 = vpop.xlane.xlu1 %6261 }
 0xac6   :  { %v6344_v42 = vsel %vm6214_vm6, %v11458_v48, 0.0  ;;  %8107 = vpow2.f32 %v6305_v12  ;;  %v6307_v44 = vmul.f32 1.442695, %v6277_v19  ;;  %v6278_v4 = vsub.f32 %v11400_v58, %v6262_v60 }
 0xac7   :  { %v11463_v52 = vpop.eup %8101  ;;  %6345 = vadd.xlane.f32.xlu1 %v6344_v42 }
 0xac8   :  { %v6335_v33 = vsel %vm6214_vm6, %v11463_v52, 0.0  ;;  %8109 = vpow2.f32 %v6307_v44  ;;  %v6309_v41 = vmul.f32 1.442695, %v6278_v4 }
 0xac9   :  { %v11468_v28 = vpop.eup %8103  ;;  %6336 = vadd.xlane.f32.xlu0 %v6335_v33 }
 0xaca   :  { %v6338_v49 = vsel %vm6214_vm6, %v11468_v28, 0.0  ;;  %8111 = vpow2.f32 %v6309_v41 }
 0xacb   :  { %6339 = vadd.xlane.f32.xlu1 %v6338_v49 }
 0xace   :  { %v11472_v36 = vpop.eup %8105 }
 0xacf   :  { %v6347_v11 = vsel %vm6214_vm6, %v11472_v36, 0.0 }
 0xad0   :  { %v11476_v58 = vpop.eup %8107  ;;  %6348 = vadd.xlane.f32.xlu0 %v6347_v11 }
 0xad1   :  { %v6350_v53 = vsel %vm6214_vm6, %v11476_v58, 0.0 }
 0xad2   :  { %v11480_v15 = vpop.eup %8109  ;;  %6351 = vadd.xlane.f32.xlu1 %v6350_v53 }
 0xad3   :  { %v6353_v14 = vsel %vm6214_vm6, %v11480_v15, 0.0 }
 0xad4   :  { %v11484_v21 = vpop.eup %8111  ;;  %6354 = vadd.xlane.f32.xlu0 %v6353_v14 }
 0xad5   :  { %v6356_v5 = vsel %vm6214_vm6, %v11484_v21, 0.0 }
 0xad6   :  { %6357 = vadd.xlane.f32.xlu1 %v6356_v5 }
 0xb39   :  { %v6319_v2 = vpop.xlane.xlu0 %6318 }
 0xb3a   :  { %8113 = vrcp.f32 %v6319_v2 }
 0xb3d   :  { %v6313_v51 = vpop.xlane.xlu0 %6312 }
 0xb3e   :  { %8115 = vrcp.f32 %v6313_v51  ;;  %v6322_v29 = vpop.xlane.xlu1 %6321 }
 0xb3f   :  { %8117 = vrcp.f32 %v6322_v29 }
 0xb42   :  { %v6316_v61 = vpop.xlane.xlu1 %6315 }
 0xb43   :  { %8119 = vrcp.f32 %v6316_v61 }
 0xb44   :  { %v6331_v13 = vpop.xlane.xlu0 %6330  ;;  %v8114_v39 = vpop.eup %8113 }
 0xb45   :  { %8121 = vrcp.f32 %v6331_v13  ;;  %v6364_v6 = vmul.f32 %v8114_v39, %v11414_v59 }
 0xb46   :  { %v6334_v8 = vpop.xlane.xlu1 %6333 }
 0xb47   :  { %8123 = vrcp.f32 %v6334_v8  ;;  %v6396_v57 = vmul.f32 %v11489_v22, %v6364_v6 }
 0xb48   :  { %v6325_v20 = vpop.xlane.xlu0 %6324  ;;  %v8116_v47 = vpop.eup %8115 }
 0xb49   :  { %8125 = vrcp.f32 %v6325_v20  ;;  %v8118_v56 = vpop.eup %8117  ;;  %v6416_v45 = vsel %vm6214_vm6, %v6396_v57, 0.0  ;;  %v6360_v23 = vmul.f32 %v8116_v47, %v11419_v7 }
 0xb4a   :  { %v6328_v0 = vpop.xlane.xlu1 %6327  ;;  %6417 = vadd.xlane.f32.xlu0 %v6416_v45  ;;  %v6366_v26 = vmul.f32 %v8118_v56, %v11422_v46 }
 0xb4b   :  { %8127 = vrcp.f32 %v6328_v0  ;;  %v6394_v34 = vmul.f32 %v11489_v22, %v6360_v23 }
 0xb4c   :  { %v6397_v59 = vmul.f32 %v11489_v22, %v6366_v26 }
 0xb4d   :  { %v8120_v16 = vpop.eup %8119  ;;  %v6410_v24 = vsel %vm6214_vm6, %v6394_v34, 0.0 }
 0xb4e   :  { %6411 = vadd.xlane.f32.xlu0 %v6410_v24  ;;  %v6419_v50 = vsel %vm6214_vm6, %v6397_v59, 0.0  ;;  %v6362_v31 = vmul.f32 %v8120_v16, %v11428_v35 }
 0xb4f   :  { %v8122_v10 = vpop.eup %8121  ;;  %6420 = vadd.xlane.f32.xlu1 %v6419_v50 }
 0xb50   :  { %v6372_v7 = vmul.f32 %v8122_v10, %v11430_v63  ;;  %v6395_v38 = vmul.f32 %v11489_v22, %v6362_v31 }
 0xb51   :  { %v8124_v46 = vpop.eup %8123 }
 0xb52   :  { %v6343_v43 = vpop.xlane.xlu0 %6342  ;;  %v6400_v32 = vmul.f32 %v11489_v22, %v6372_v7  ;;  %v6413_v27 = vsel %vm6214_vm6, %v6395_v38, 0.0  ;;  %v6374_v3 = vmul.f32 %v8124_v46, %v11437_v9 }
 0xb53   :  { %v8126_v1 = vpop.eup %8125  ;;  %8129 = vrcp.f32 %v6343_v43  ;;  %6414 = vadd.xlane.f32.xlu1 %v6413_v27 }
 0xb54   :  { %v6346_v54 = vpop.xlane.xlu1 %6345  ;;  %v6428_v30 = vsel %vm6214_vm6, %v6400_v32, 0.0  ;;  %v6368_v35 = vmul.f32 %v8126_v1, %v11440_v37  ;;  %v6401_v63 = vmul.f32 %v11489_v22, %v6374_v3 }
 0xb55   :  { %8131 = vrcp.f32 %v6346_v54  ;;  %6429 = vadd.xlane.f32.xlu0 %v6428_v30  ;;  %v8128_v55 = vpop.eup %8127 }
 0xb56   :  { %v6337_v62 = vpop.xlane.xlu0 %6336  ;;  %v6398_v12 = vmul.f32 %v11489_v22, %v6368_v35  ;;  %v6431_v19 = vsel %vm6214_vm6, %v6401_v63, 0.0  ;;  %v6370_v60 = vmul.f32 %v8128_v55, %v11447_v17 }
 0xb57   :  { %8133 = vrcp.f32 %v6337_v62  ;;  %6432 = vadd.xlane.f32.xlu1 %v6431_v19 }
 0xb58   :  { %v6340_v9 = vpop.xlane.xlu1 %6339  ;;  %v6422_v42 = vsel %vm6214_vm6, %v6398_v12, 0.0  ;;  %v6399_v37 = vmul.f32 %v11489_v22, %v6370_v60 }
 0xb59   :  { %8135 = vrcp.f32 %v6340_v9  ;;  %6423 = vadd.xlane.f32.xlu0 %v6422_v42 }
 0xb5a   :  { %v6425_v44 = vsel %vm6214_vm6, %v6399_v37, 0.0 }
 0xb5b   :  { %6426 = vadd.xlane.f32.xlu1 %v6425_v44 }
 0xb5d   :  { %v8130_v4 = vpop.eup %8129  ;;  %v6349_v33 = vpop.xlane.xlu0 %6348 }
 0xb5e   :  { %v6380_v41 = vmul.f32 %v8130_v4, %v11453_v40  ;;  %8137 = vrcp.f32 %v6349_v33 }
 0xb5f   :  { %v8132_v49 = vpop.eup %8131  ;;  %v6352_v11 = vpop.xlane.xlu1 %6351 }
 0xb60   :  { %v6404_v17 = vmul.f32 %v11489_v22, %v6380_v41  ;;  %v6382_v53 = vmul.f32 %v8132_v49, %v11458_v48  ;;  %8139 = vrcp.f32 %v6352_v11 }
 0xb61   :  { %v8134_v14 = vpop.eup %8133  ;;  %v6355_v5 = vpop.xlane.xlu0 %6354 }
 0xb62   :  { %v6440_v2 = vsel %vm6214_vm6, %v6404_v17, 0.0  ;;  %v6376_v51 = vmul.f32 %v8134_v14, %v11463_v52  ;;  %v6405_v29 = vmul.f32 %v11489_v22, %v6382_v53  ;;  %8141 = vrcp.f32 %v6355_v5 }
 0xb63   :  { %v8136_v18 = vpop.eup %8135  ;;  %6441 = vadd.xlane.f32.xlu0 %v6440_v2  ;;  %v6358_v40 = vpop.xlane.xlu1 %6357 }
 0xb64   :  { %v6402_v25 = vmul.f32 %v11489_v22, %v6376_v51  ;;  %v6443_v61 = vsel %vm6214_vm6, %v6405_v29, 0.0  ;;  %v6378_v13 = vmul.f32 %v8136_v18, %v11468_v28  ;;  %8143 = vrcp.f32 %v6358_v40 }
 0xb65   :  { %6444 = vadd.xlane.f32.xlu1 %v6443_v61 }
 0xb66   :  { %v6434_v48 = vsel %vm6214_vm6, %v6402_v25, 0.0  ;;  %v6403_v39 = vmul.f32 %v11489_v22, %v6378_v13 }
 0xb67   :  { %6435 = vadd.xlane.f32.xlu0 %v6434_v48 }
 0xb68   :  { %v6437_v52 = vsel %vm6214_vm6, %v6403_v39, 0.0  ;;  %v8138_v6 = vpop.eup %8137 }
 0xb69   :  { %6438 = vadd.xlane.f32.xlu1 %v6437_v52  ;;  %v6384_v8 = vmul.f32 %v8138_v6, %v11472_v36 }
 0xb6a   :  { %v8140_v20 = vpop.eup %8139 }
 0xb6b   :  { %v6406_v57 = vmul.f32 %v11489_v22, %v6384_v8  ;;  %v6386_v47 = vmul.f32 %v8140_v20, %v11476_v58 }
 0xb6c   :  { %v8142_v56 = vpop.eup %8141 }
 0xb6d   :  { %v6446_v28 = vsel %vm6214_vm6, %v6406_v57, 0.0  ;;  %v6407_v45 = vmul.f32 %v11489_v22, %v6386_v47  ;;  %v6388_v23 = vmul.f32 %v8142_v56, %v11480_v15 }
 0xb6e   :  { %v8144_v0 = vpop.eup %8143  ;;  %6447 = vadd.xlane.f32.xlu0 %v6446_v28 }
 0xb6f   :  { %v6449_v26 = vsel %vm6214_vm6, %v6407_v45, 0.0  ;;  %v6408_v34 = vmul.f32 %v11489_v22, %v6388_v23  ;;  %v6390_v36 = vmul.f32 %v8144_v0, %v11484_v21 }
 0xb70   :  { %6450 = vadd.xlane.f32.xlu1 %v6449_v26 }
 0xb71   :  { %v6452_v59 = vsel %vm6214_vm6, %v6408_v34, 0.0  ;;  %v6409_v58 = vmul.f32 %v11489_v22, %v6390_v36 }
 0xb72   :  { %6453 = vadd.xlane.f32.xlu0 %v6452_v59 }
 0xb73   :  { %v6455_v16 = vsel %vm6214_vm6, %v6409_v58, 0.0 }
 0xb74   :  { %6456 = vadd.xlane.f32.xlu1 %v6455_v16 }
 0xbd7   :  { %v6418_v24 = vpop.xlane.xlu0 %6417 }
 0xbd8   :  { %v6460_v10 = vmul.f32 2.0, %v6418_v24 }
 0xbda   :  { %v6477_v15 = vmul.f32 0.33333334, %v6460_v10 }
 0xbdb   :  { %v6412_v50 = vpop.xlane.xlu0 %6411 }
 0xbdc   :  { %v7018_v31 = vadd.f32 -1.0, %v6477_v15  ;;  %v6458_v7 = vmul.f32 2.0, %v6412_v50  ;;  %v6421_v38 = vpop.xlane.xlu1 %6420 }
 0xbdd   :  { %v6461_v46 = vmul.f32 2.0, %v6421_v38 }
 0xbde   :  { %6510 = vst.msk [vmem:[%s11621_s18 + $0x10] sm:$0xff] %vm6507_vm7, %v7018_v31  ;;  %v6475_v21 = vmul.f32 0.33333334, %v6458_v7 }
 0xbdf   :  { %v6478_v22 = vmul.f32 0.33333334, %v6461_v46 }
 0xbe0   :  { %v7016_v43 = vadd.f32 -1.0, %v6475_v21  ;;  %v6415_v32 = vpop.xlane.xlu1 %6414 }
 0xbe1   :  { %v7019_v1 = vadd.f32 -1.0, %v6478_v22  ;;  %v6459_v3 = vmul.f32 2.0, %v6415_v32 }
 0xbe2   :  { %v6430_v27 = vpop.xlane.xlu0 %6429  ;;  %6508 = vst.msk [vmem:[%s11621_s18] sm:$0xff] %vm6507_vm7, %v7016_v43 }
 0xbe3   :  { %v6464_v54 = vmul.f32 2.0, %v6430_v27  ;;  %6511 = vst.msk [vmem:[%s11621_s18 + $0x18] sm:$0xff] %vm6507_vm7, %v7019_v1  ;;  %v6476_v30 = vmul.f32 0.33333334, %v6459_v3 }
 0xbe4   :  { %v6433_v63 = vpop.xlane.xlu1 %6432 }
 0xbe5   :  { %v6481_v35 = vmul.f32 0.33333334, %v6464_v54  ;;  %v7017_v55 = vadd.f32 -1.0, %v6476_v30  ;;  %v6465_v12 = vmul.f32 2.0, %v6433_v63 }
 0xbe6   :  { %v6424_v62 = vpop.xlane.xlu0 %6423 }
 0xbe7   :  { %v7022_v19 = vadd.f32 -1.0, %v6481_v35  ;;  %v6462_v60 = vmul.f32 2.0, %v6424_v62  ;;  %6509 = vst.msk [vmem:[%s11621_s18 + $0x8] sm:$0xff] %vm6507_vm7, %v7017_v55  ;;  %v6482_v9 = vmul.f32 0.33333334, %v6465_v12 }
 0xbe8   :  { %v6427_v37 = vpop.xlane.xlu1 %6426 }
 0xbe9   :  { %6514 = vst.msk [vmem:[%s11621_s18 + $0x30] sm:$0xff] %vm6507_vm7, %v7022_v19  ;;  %v6479_v42 = vmul.f32 0.33333334, %v6462_v60  ;;  %v7023_v44 = vadd.f32 -1.0, %v6482_v9  ;;  %v6463_v4 = vmul.f32 2.0, %v6427_v37 }
 0xbeb   :  { %v7020_v33 = vadd.f32 -1.0, %v6479_v42  ;;  %6515 = vst.msk [vmem:[%s11621_s18 + $0x38] sm:$0xff] %vm6507_vm7, %v7023_v44  ;;  %v6480_v41 = vmul.f32 0.33333334, %v6463_v4 }
 0xbed   :  { %6512 = vst.msk [vmem:[%s11621_s18 + $0x20] sm:$0xff] %vm6507_vm7, %v7020_v33  ;;  %v7021_v49 = vadd.f32 -1.0, %v6480_v41 }
 0xbef   :  { %6513 = vst.msk [vmem:[%s11621_s18 + $0x28] sm:$0xff] %vm6507_vm7, %v7021_v49 }
 0xbf0   :  { %v6442_v11 = vpop.xlane.xlu0 %6441 }
 0xbf1   :  { %v6468_v17 = vmul.f32 2.0, %v6442_v11 }
 0xbf2   :  { %v6445_v53 = vpop.xlane.xlu1 %6444 }
 0xbf3   :  { %v6485_v14 = vmul.f32 0.33333334, %v6468_v17  ;;  %v6469_v5 = vmul.f32 2.0, %v6445_v53 }
 0xbf4   :  { %v6436_v2 = vpop.xlane.xlu0 %6435 }
 0xbf5   :  { %v7026_v51 = vadd.f32 -1.0, %v6485_v14  ;;  %v6466_v29 = vmul.f32 2.0, %v6436_v2  ;;  %v6486_v18 = vmul.f32 0.33333334, %v6469_v5 }
 0xbf6   :  { %v6439_v40 = vpop.xlane.xlu1 %6438 }
 0xbf7   :  { %6518 = vst.msk [vmem:[%s11621_s18 + $0x50] sm:$0xff] %vm6507_vm7, %v7026_v51  ;;  %v6483_v25 = vmul.f32 0.33333334, %v6466_v29  ;;  %v7027_v61 = vadd.f32 -1.0, %v6486_v18  ;;  %v6467_v13 = vmul.f32 2.0, %v6439_v40 }
 0xbf9   :  { %v7024_v48 = vadd.f32 -1.0, %v6483_v25  ;;  %6519 = vst.msk [vmem:[%s11621_s18 + $0x58] sm:$0xff] %vm6507_vm7, %v7027_v61  ;;  %v6484_v39 = vmul.f32 0.33333334, %v6467_v13 }
 0xbfb   :  { %6516 = vst.msk [vmem:[%s11621_s18 + $0x40] sm:$0xff] %vm6507_vm7, %v7024_v48  ;;  %v7025_v52 = vadd.f32 -1.0, %v6484_v39  ;;  %v6448_v6 = vpop.xlane.xlu0 %6447 }
 0xbfc   :  { %v6470_v8 = vmul.f32 2.0, %v6448_v6 }
 0xbfd   :  { %6517 = vst.msk [vmem:[%s11621_s18 + $0x48] sm:$0xff] %vm6507_vm7, %v7025_v52  ;;  %v6451_v20 = vpop.xlane.xlu1 %6450 }
 0xbfe   :  { %v6487_v57 = vmul.f32 0.33333334, %v6470_v8  ;;  %v6471_v47 = vmul.f32 2.0, %v6451_v20 }
 0xbff   :  { %v6454_v56 = vpop.xlane.xlu0 %6453 }
 0xc00   :  { %v7028_v28 = vadd.f32 -1.0, %v6487_v57  ;;  %v6488_v45 = vmul.f32 0.33333334, %v6471_v47  ;;  %v6472_v23 = vmul.f32 2.0, %v6454_v56 }
 0xc01   :  { %v6457_v0 = vpop.xlane.xlu1 %6456 }
 0xc02   :  { %6520 = vst.msk [vmem:[%s11621_s18 + $0x60] sm:$0xff] %vm6507_vm7, %v7028_v28  ;;  %v7029_v26 = vadd.f32 -1.0, %v6488_v45  ;;  %v6489_v34 = vmul.f32 0.33333334, %v6472_v23  ;;  %v6473_v36 = vmul.f32 2.0, %v6457_v0 }
 0xc04   :  { %6521 = vst.msk [vmem:[%s11621_s18 + $0x68] sm:$0xff] %vm6507_vm7, %v7029_v26  ;;  %v7030_v59 = vadd.f32 -1.0, %v6489_v34  ;;  %v6490_v58 = vmul.f32 0.33333334, %v6473_v36 }
 0xc06   :  { %6522 = vst.msk [vmem:[%s11621_s18 + $0x70] sm:$0xff] %vm6507_vm7, %v7030_v59  ;;  %v7031_v16 = vadd.f32 -1.0, %v6490_v58 }
 0xc08   :  { %6523 = vst.msk [vmem:[%s11621_s18 + $0x78] sm:$0xff] %vm6507_vm7, %v7031_v16 }

</bundles_post_ra>
